<compile_context>
chip_gen: v7x
topology: tpu7x:2x2x1
jax: 0.10.0
libtpu: 0.0.40
codegen_flags: <defaults>
</compile_context>

<pallas_src>
import functools

import jax
import jax.numpy as jnp
from jax.experimental import pallas as pl
from jax.experimental.pallas import tpu as pltpu


def _attention_kernel(x_ref, wqkv_ref, wprojh_ref, bproj_ref, o_ref, *, num_heads):
    """One grid step: full MHSA for `block_b` batch elements.

    x_ref:      (block_b, N, C)   activations (compute dtype)
    wqkv_ref:   (C, 3C)           fused qkv weight; softmax scale folded into q columns
    wprojh_ref: (G, hd, C)        proj weight, head-major, tiled block_b times (G = block_b*nh)
    bproj_ref:  (1, C)            proj bias (f32)
    o_ref:      (block_b, N, C)   output block
    """
    block_b, N, C = x_ref.shape
    nh = num_heads
    hd = C // nh
    mm_dtype = wqkv_ref.dtype               # matmul-operand dtype (f32 or bf16); accum is f32

    # ---- fused qkv projection: one big MXU matmul over M = block_b*N rows ----
    x2 = x_ref[...].reshape(block_b * N, C)                                    # (M, C)
    qkv = jnp.dot(x2, wqkv_ref[...], preferred_element_type=jnp.float32)       # (M, 3C) f32

    # ---- gather heads into a single leading batch dim: (G, N, hd), g = b*nh + h ----
    def split_heads(col_off):
        pieces = []
        for b in range(block_b):
            for h in range(nh):
                pieces.append(
                    qkv[b * N:(b + 1) * N, col_off + h * hd: col_off + (h + 1) * hd])
        return jnp.stack(pieces, axis=0)                                       # (G, N, hd)

    q = split_heads(0).astype(mm_dtype)       # scale already folded into these columns
    k = split_heads(C).astype(mm_dtype)
    v = split_heads(2 * C).astype(mm_dtype)

    # ---- batched scores + softmax (softmax math kept in f32) ----
    s = jnp.einsum('gqd,gkd->gqk', q, k, preferred_element_type=jnp.float32)   # (G, N, N)
    s = s - jnp.max(s, axis=-1, keepdims=True)
    p = jnp.exp(s)
    p = p * pl.reciprocal(jnp.sum(p, axis=-1, keepdims=True), approx=True)

    # ---- batched PV product ----
    o = jnp.einsum('gqk,gkd->gqd', p.astype(mm_dtype), v,
                   preferred_element_type=jnp.float32)                          # (G, N, hd)

    # ---- output projection with the head-concat folded in:
    #      out[b, n, c] = sum_h sum_d o[(b,h), n, d] * wproj[h*hd + d, c]
    part = jnp.einsum('gnd,gdc->gnc', o.astype(mm_dtype), wprojh_ref[...],
                      preferred_element_type=jnp.float32)                       # (G, N, C)
    for b in range(block_b):
        out_b = jnp.sum(part[b * nh:(b + 1) * nh], axis=0)                      # (N, C)
        o_ref[b] = (out_b + bproj_ref[...]).astype(o_ref.dtype)


def attention_forward(x_nhwc, wqkv, wproj, bproj, num_heads, *,
                      compute_dtype=jnp.float32, block_b=None):
    """x_nhwc: (B, H, W, C).  wqkv: (C, 3C)  wproj: (C, C)  bproj: (1, C).

    compute_dtype: dtype of the matmul operands (f32, or bf16 for the fast MXU path on
    v6e/v7x); accumulation and softmax are always f32. Output dtype matches x_nhwc.
    """
    B, H, W, C = x_nhwc.shape
    N = H * W
    nh = num_heads
    hd = C // nh
    scale = float(hd) ** (-0.5)

    if block_b is None:
        # Fill >= 128 MXU rows per grid step when N is small, while block_b divides B
        # (keeps the grid >= 2 whenever possible so both v7x TensorCores stay busy).
        target = (128 + N - 1) // N
        block_b = 1
        for cand in range(1, B + 1):
            if B % cand == 0 and cand <= target:
                block_b = cand
    assert B % block_b == 0, "block_b must divide B"
    G = block_b * nh

    x = x_nhwc.reshape(B, N, C).astype(compute_dtype)

    # Weight prep (free, wrapper-side):
    #  * fold the softmax scale into the q columns of the fused qkv weight
    #  * reshape proj weight to head-major (nh, hd, C) and tile block_b times -> (G, hd, C)
    wqkv_s = jnp.concatenate([wqkv[:, :C] * scale, wqkv[:, C:]], axis=1).astype(compute_dtype)
    wproj_g = jnp.tile(wproj.reshape(nh, hd, C), (block_b, 1, 1)).astype(compute_dtype)
    bproj_f32 = bproj.astype(jnp.float32)

    out = pl.pallas_call(
        functools.partial(_attention_kernel, num_heads=nh),
        out_shape=jax.ShapeDtypeStruct((B, N, C), x_nhwc.dtype),
        grid=(B // block_b,),
        in_specs=[
            pl.BlockSpec((block_b, N, C), lambda b: (b, 0, 0)),   # x: block_b batch elements
            pl.BlockSpec((C, 3 * C), lambda b: (0, 0)),           # fused qkv weight (scaled)
            pl.BlockSpec((G, hd, C), lambda b: (0, 0, 0)),        # head-major proj weight
            pl.BlockSpec((1, C), lambda b: (0, 0)),               # proj bias
        ],
        out_specs=pl.BlockSpec((block_b, N, C), lambda b: (b, 0, 0)),
        compiler_params=pltpu.CompilerParams(
            dimension_semantics=("parallel",)),
    )(x, wqkv_s, wproj_g, bproj_f32)

    return out.reshape(B, H, W, C)


def reference_attention(x_nhwc, wqkv, wproj, bproj, num_heads):
    """Pure-JAX mirror of the PyTorch forward, for correctness checking (f32)."""
    B, H, W, C = x_nhwc.shape
    N = H * W
    hd = C // num_heads
    scale = float(hd) ** (-0.5)

    x = x_nhwc.reshape(B, N, C)
    qkv = x @ wqkv                                                    # (B, N, 3C)
    qkv = qkv.reshape(B, N, 3, num_heads, hd).transpose(2, 0, 3, 1, 4)
    q, k, v = qkv[0], qkv[1], qkv[2]                                  # (B, nh, N, hd)
    attn = jnp.einsum('bhqd,bhkd->bhqk', q, k) * scale
    attn = jax.nn.softmax(attn, axis=-1)
    out = jnp.einsum('bhqk,bhkd->bhqd', attn, v)                      # (B, nh, N, hd)
    out = out.transpose(0, 2, 1, 3).reshape(B, N, C)
    out = out @ wproj + bproj[0]
    return out.reshape(B, H, W, C)


if __name__ == "__main__":
    # Shapes consistent with the module: dim=C=64, num_heads=8 (head_dim=8).
    # B=4 so block_b=2 gives 128 MXU rows per step AND a 2-step parallel grid.
    B, H, W, C = 4, 8, 8, 64
    num_heads = 8

    key = jax.random.PRNGKey(0)
    kx, kq, kp, kb = jax.random.split(key, 4)

    x = jax.random.normal(kx, (B, H, W, C), dtype=jnp.float32)
    # Deterministic synthetic parameters (nn.Linear equivalents, stored as (in, out)).
    wqkv = jax.random.normal(kq, (C, 3 * C), dtype=jnp.float32) * (1.0 / (C ** 0.5))
    wproj = jax.random.normal(kp, (C, C), dtype=jnp.float32) * (1.0 / (C ** 0.5))
    bproj = jax.random.normal(kb, (1, C), dtype=jnp.float32) * 0.02

    ref = reference_attention(x, wqkv, wproj, bproj, num_heads)

    # f32 matmul operands (tolerance headroom is for the approximate EUP reciprocal).
    out_f32 = jax.block_until_ready(attention_forward(x, wqkv, wproj, bproj, num_heads))
    assert out_f32.shape == (B, H, W, C)
    assert jnp.allclose(out_f32, ref, atol=2e-2, rtol=2e-2), "f32 kernel mismatch vs reference"

    # bf16 matmul operands (v6e/v7x fast MXU path), f32 accumulation: loose tolerance.
    out_bf16 = jax.block_until_ready(
        attention_forward(x, wqkv, wproj, bproj, num_heads, compute_dtype=jnp.bfloat16))
    assert out_bf16.shape == (B, H, W, C)
    assert jnp.allclose(out_bf16, ref, atol=2e-1, rtol=2e-1), "bf16 kernel mismatch vs reference"

    print("KERNEL_OK")
</pallas_src>

<mosaic_0001>
module attributes {stable_mosaic.version = 11 : i64} {
  func.func @_attention_kernel(%arg0: i32, %arg1: memref<2x64x64xf32, #tpu.memory_space<vmem>>, %arg2: memref<64x192xf32, #tpu.memory_space<vmem>>, %arg3: memref<16x8x64xf32, #tpu.memory_space<vmem>>, %arg4: memref<1x64xf32, #tpu.memory_space<vmem>>, %arg5: memref<2x64x64xf32, #tpu.memory_space<vmem>>) attributes {dimension_semantics = [#tpu.dimension_semantics<parallel>], iteration_bounds = array<i64: 2>, scalar_prefetch = 0 : i64, scratch_operands = 0 : i64, tpu.core_type = #tpu.core_type<tc>, window_params = [{transform_indices = @transform_0, window_bounds = array<i64: 2, 64, 64>}, {pipeline_mode = #tpu.pipeline_mode<synchronous>, transform_indices = @transform_1, window_bounds = array<i64: 64, 192>}, {pipeline_mode = #tpu.pipeline_mode<synchronous>, transform_indices = @transform_2, window_bounds = array<i64: 16, 8, 64>}, {pipeline_mode = #tpu.pipeline_mode<synchronous>, transform_indices = @transform_3, window_bounds = array<i64: 1, 64>}, {transform_indices = @transform_4, window_bounds = array<i64: 2, 64, 64>}]} {
    %c0 = arith.constant 0 : index
    %c0_0 = arith.constant 0 : index
    %c0_1 = arith.constant 0 : index
    %0 = vector.load %arg1[%c0, %c0_0, %c0_1] : memref<2x64x64xf32, #tpu.memory_space<vmem>>, vector<2x64x64xf32>
    %1 = vector.shape_cast %0 : vector<2x64x64xf32> to vector<128x64xf32>
    %c0_2 = arith.constant 0 : index
    %c0_3 = arith.constant 0 : index
    %2 = vector.load %arg2[%c0_2, %c0_3] : memref<64x192xf32, #tpu.memory_space<vmem>>, vector<64x192xf32>
    %cst = arith.constant dense<0.000000e+00> : vector<128x192xf32>
    %3 = tpu.matmul %1, %2, %cst {dimension_numbers = #tpu.dot_dimension_numbers<[1], [0], [0], [1], [0, 0, 1, 1], [], []>} : vector<128x64xf32>, vector<64x192xf32>, vector<128x192xf32> -> vector<128x192xf32>
    %4 = vector.extract_strided_slice %3 {offsets = [0, 0], sizes = [64, 8], strides = [1, 1]} : vector<128x192xf32> to vector<64x8xf32>
    %5 = vector.extract_strided_slice %3 {offsets = [0, 8], sizes = [64, 8], strides = [1, 1]} : vector<128x192xf32> to vector<64x8xf32>
    %6 = vector.extract_strided_slice %3 {offsets = [0, 16], sizes = [64, 8], strides = [1, 1]} : vector<128x192xf32> to vector<64x8xf32>
    %7 = vector.extract_strided_slice %3 {offsets = [0, 24], sizes = [64, 8], strides = [1, 1]} : vector<128x192xf32> to vector<64x8xf32>
    %8 = vector.extract_strided_slice %3 {offsets = [0, 32], sizes = [64, 8], strides = [1, 1]} : vector<128x192xf32> to vector<64x8xf32>
    %9 = vector.extract_strided_slice %3 {offsets = [0, 40], sizes = [64, 8], strides = [1, 1]} : vector<128x192xf32> to vector<64x8xf32>
    %10 = vector.extract_strided_slice %3 {offsets = [0, 48], sizes = [64, 8], strides = [1, 1]} : vector<128x192xf32> to vector<64x8xf32>
    %11 = vector.extract_strided_slice %3 {offsets = [0, 56], sizes = [64, 8], strides = [1, 1]} : vector<128x192xf32> to vector<64x8xf32>
    %12 = vector.extract_strided_slice %3 {offsets = [64, 0], sizes = [64, 8], strides = [1, 1]} : vector<128x192xf32> to vector<64x8xf32>
    %13 = vector.extract_strided_slice %3 {offsets = [64, 8], sizes = [64, 8], strides = [1, 1]} : vector<128x192xf32> to vector<64x8xf32>
    %14 = vector.extract_strided_slice %3 {offsets = [64, 16], sizes = [64, 8], strides = [1, 1]} : vector<128x192xf32> to vector<64x8xf32>
    %15 = vector.extract_strided_slice %3 {offsets = [64, 24], sizes = [64, 8], strides = [1, 1]} : vector<128x192xf32> to vector<64x8xf32>
    %16 = vector.extract_strided_slice %3 {offsets = [64, 32], sizes = [64, 8], strides = [1, 1]} : vector<128x192xf32> to vector<64x8xf32>
    %17 = vector.extract_strided_slice %3 {offsets = [64, 40], sizes = [64, 8], strides = [1, 1]} : vector<128x192xf32> to vector<64x8xf32>
    %18 = vector.extract_strided_slice %3 {offsets = [64, 48], sizes = [64, 8], strides = [1, 1]} : vector<128x192xf32> to vector<64x8xf32>
    %19 = vector.extract_strided_slice %3 {offsets = [64, 56], sizes = [64, 8], strides = [1, 1]} : vector<128x192xf32> to vector<64x8xf32>
    %20 = vector.shape_cast %4 : vector<64x8xf32> to vector<1x64x8xf32>
    %21 = vector.shape_cast %5 : vector<64x8xf32> to vector<1x64x8xf32>
    %22 = vector.shape_cast %6 : vector<64x8xf32> to vector<1x64x8xf32>
    %23 = vector.shape_cast %7 : vector<64x8xf32> to vector<1x64x8xf32>
    %24 = vector.shape_cast %8 : vector<64x8xf32> to vector<1x64x8xf32>
    %25 = vector.shape_cast %9 : vector<64x8xf32> to vector<1x64x8xf32>
    %26 = vector.shape_cast %10 : vector<64x8xf32> to vector<1x64x8xf32>
    %27 = vector.shape_cast %11 : vector<64x8xf32> to vector<1x64x8xf32>
    %28 = vector.shape_cast %12 : vector<64x8xf32> to vector<1x64x8xf32>
    %29 = vector.shape_cast %13 : vector<64x8xf32> to vector<1x64x8xf32>
    %30 = vector.shape_cast %14 : vector<64x8xf32> to vector<1x64x8xf32>
    %31 = vector.shape_cast %15 : vector<64x8xf32> to vector<1x64x8xf32>
    %32 = vector.shape_cast %16 : vector<64x8xf32> to vector<1x64x8xf32>
    %33 = vector.shape_cast %17 : vector<64x8xf32> to vector<1x64x8xf32>
    %34 = vector.shape_cast %18 : vector<64x8xf32> to vector<1x64x8xf32>
    %35 = vector.shape_cast %19 : vector<64x8xf32> to vector<1x64x8xf32>
    %36 = tpu.concatenate %20, %21, %22, %23, %24, %25, %26, %27, %28, %29, %30, %31, %32, %33, %34, %35 in 0 : vector<1x64x8xf32>, vector<1x64x8xf32>, vector<1x64x8xf32>, vector<1x64x8xf32>, vector<1x64x8xf32>, vector<1x64x8xf32>, vector<1x64x8xf32>, vector<1x64x8xf32>, vector<1x64x8xf32>, vector<1x64x8xf32>, vector<1x64x8xf32>, vector<1x64x8xf32>, vector<1x64x8xf32>, vector<1x64x8xf32>, vector<1x64x8xf32>, vector<1x64x8xf32> -> vector<16x64x8xf32>
    %37 = vector.extract_strided_slice %3 {offsets = [0, 64], sizes = [64, 8], strides = [1, 1]} : vector<128x192xf32> to vector<64x8xf32>
    %38 = vector.extract_strided_slice %3 {offsets = [0, 72], sizes = [64, 8], strides = [1, 1]} : vector<128x192xf32> to vector<64x8xf32>
    %39 = vector.extract_strided_slice %3 {offsets = [0, 80], sizes = [64, 8], strides = [1, 1]} : vector<128x192xf32> to vector<64x8xf32>
    %40 = vector.extract_strided_slice %3 {offsets = [0, 88], sizes = [64, 8], strides = [1, 1]} : vector<128x192xf32> to vector<64x8xf32>
    %41 = vector.extract_strided_slice %3 {offsets = [0, 96], sizes = [64, 8], strides = [1, 1]} : vector<128x192xf32> to vector<64x8xf32>
    %42 = vector.extract_strided_slice %3 {offsets = [0, 104], sizes = [64, 8], strides = [1, 1]} : vector<128x192xf32> to vector<64x8xf32>
    %43 = vector.extract_strided_slice %3 {offsets = [0, 112], sizes = [64, 8], strides = [1, 1]} : vector<128x192xf32> to vector<64x8xf32>
    %44 = vector.extract_strided_slice %3 {offsets = [0, 120], sizes = [64, 8], strides = [1, 1]} : vector<128x192xf32> to vector<64x8xf32>
    %45 = vector.extract_strided_slice %3 {offsets = [64, 64], sizes = [64, 8], strides = [1, 1]} : vector<128x192xf32> to vector<64x8xf32>
    %46 = vector.extract_strided_slice %3 {offsets = [64, 72], sizes = [64, 8], strides = [1, 1]} : vector<128x192xf32> to vector<64x8xf32>
    %47 = vector.extract_strided_slice %3 {offsets = [64, 80], sizes = [64, 8], strides = [1, 1]} : vector<128x192xf32> to vector<64x8xf32>
    %48 = vector.extract_strided_slice %3 {offsets = [64, 88], sizes = [64, 8], strides = [1, 1]} : vector<128x192xf32> to vector<64x8xf32>
    %49 = vector.extract_strided_slice %3 {offsets = [64, 96], sizes = [64, 8], strides = [1, 1]} : vector<128x192xf32> to vector<64x8xf32>
    %50 = vector.extract_strided_slice %3 {offsets = [64, 104], sizes = [64, 8], strides = [1, 1]} : vector<128x192xf32> to vector<64x8xf32>
    %51 = vector.extract_strided_slice %3 {offsets = [64, 112], sizes = [64, 8], strides = [1, 1]} : vector<128x192xf32> to vector<64x8xf32>
    %52 = vector.extract_strided_slice %3 {offsets = [64, 120], sizes = [64, 8], strides = [1, 1]} : vector<128x192xf32> to vector<64x8xf32>
    %53 = vector.shape_cast %37 : vector<64x8xf32> to vector<1x64x8xf32>
    %54 = vector.shape_cast %38 : vector<64x8xf32> to vector<1x64x8xf32>
    %55 = vector.shape_cast %39 : vector<64x8xf32> to vector<1x64x8xf32>
    %56 = vector.shape_cast %40 : vector<64x8xf32> to vector<1x64x8xf32>
    %57 = vector.shape_cast %41 : vector<64x8xf32> to vector<1x64x8xf32>
    %58 = vector.shape_cast %42 : vector<64x8xf32> to vector<1x64x8xf32>
    %59 = vector.shape_cast %43 : vector<64x8xf32> to vector<1x64x8xf32>
    %60 = vector.shape_cast %44 : vector<64x8xf32> to vector<1x64x8xf32>
    %61 = vector.shape_cast %45 : vector<64x8xf32> to vector<1x64x8xf32>
    %62 = vector.shape_cast %46 : vector<64x8xf32> to vector<1x64x8xf32>
    %63 = vector.shape_cast %47 : vector<64x8xf32> to vector<1x64x8xf32>
    %64 = vector.shape_cast %48 : vector<64x8xf32> to vector<1x64x8xf32>
    %65 = vector.shape_cast %49 : vector<64x8xf32> to vector<1x64x8xf32>
    %66 = vector.shape_cast %50 : vector<64x8xf32> to vector<1x64x8xf32>
    %67 = vector.shape_cast %51 : vector<64x8xf32> to vector<1x64x8xf32>
    %68 = vector.shape_cast %52 : vector<64x8xf32> to vector<1x64x8xf32>
    %69 = tpu.concatenate %53, %54, %55, %56, %57, %58, %59, %60, %61, %62, %63, %64, %65, %66, %67, %68 in 0 : vector<1x64x8xf32>, vector<1x64x8xf32>, vector<1x64x8xf32>, vector<1x64x8xf32>, vector<1x64x8xf32>, vector<1x64x8xf32>, vector<1x64x8xf32>, vector<1x64x8xf32>, vector<1x64x8xf32>, vector<1x64x8xf32>, vector<1x64x8xf32>, vector<1x64x8xf32>, vector<1x64x8xf32>, vector<1x64x8xf32>, vector<1x64x8xf32>, vector<1x64x8xf32> -> vector<16x64x8xf32>
    %70 = vector.extract_strided_slice %3 {offsets = [0, 128], sizes = [64, 8], strides = [1, 1]} : vector<128x192xf32> to vector<64x8xf32>
    %71 = vector.extract_strided_slice %3 {offsets = [0, 136], sizes = [64, 8], strides = [1, 1]} : vector<128x192xf32> to vector<64x8xf32>
    %72 = vector.extract_strided_slice %3 {offsets = [0, 144], sizes = [64, 8], strides = [1, 1]} : vector<128x192xf32> to vector<64x8xf32>
    %73 = vector.extract_strided_slice %3 {offsets = [0, 152], sizes = [64, 8], strides = [1, 1]} : vector<128x192xf32> to vector<64x8xf32>
    %74 = vector.extract_strided_slice %3 {offsets = [0, 160], sizes = [64, 8], strides = [1, 1]} : vector<128x192xf32> to vector<64x8xf32>
    %75 = vector.extract_strided_slice %3 {offsets = [0, 168], sizes = [64, 8], strides = [1, 1]} : vector<128x192xf32> to vector<64x8xf32>
    %76 = vector.extract_strided_slice %3 {offsets = [0, 176], sizes = [64, 8], strides = [1, 1]} : vector<128x192xf32> to vector<64x8xf32>
    %77 = vector.extract_strided_slice %3 {offsets = [0, 184], sizes = [64, 8], strides = [1, 1]} : vector<128x192xf32> to vector<64x8xf32>
    %78 = vector.extract_strided_slice %3 {offsets = [64, 128], sizes = [64, 8], strides = [1, 1]} : vector<128x192xf32> to vector<64x8xf32>
    %79 = vector.extract_strided_slice %3 {offsets = [64, 136], sizes = [64, 8], strides = [1, 1]} : vector<128x192xf32> to vector<64x8xf32>
    %80 = vector.extract_strided_slice %3 {offsets = [64, 144], sizes = [64, 8], strides = [1, 1]} : vector<128x192xf32> to vector<64x8xf32>
    %81 = vector.extract_strided_slice %3 {offsets = [64, 152], sizes = [64, 8], strides = [1, 1]} : vector<128x192xf32> to vector<64x8xf32>
    %82 = vector.extract_strided_slice %3 {offsets = [64, 160], sizes = [64, 8], strides = [1, 1]} : vector<128x192xf32> to vector<64x8xf32>
    %83 = vector.extract_strided_slice %3 {offsets = [64, 168], sizes = [64, 8], strides = [1, 1]} : vector<128x192xf32> to vector<64x8xf32>
    %84 = vector.extract_strided_slice %3 {offsets = [64, 176], sizes = [64, 8], strides = [1, 1]} : vector<128x192xf32> to vector<64x8xf32>
    %85 = vector.extract_strided_slice %3 {offsets = [64, 184], sizes = [64, 8], strides = [1, 1]} : vector<128x192xf32> to vector<64x8xf32>
    %86 = vector.shape_cast %70 : vector<64x8xf32> to vector<1x64x8xf32>
    %87 = vector.shape_cast %71 : vector<64x8xf32> to vector<1x64x8xf32>
    %88 = vector.shape_cast %72 : vector<64x8xf32> to vector<1x64x8xf32>
    %89 = vector.shape_cast %73 : vector<64x8xf32> to vector<1x64x8xf32>
    %90 = vector.shape_cast %74 : vector<64x8xf32> to vector<1x64x8xf32>
    %91 = vector.shape_cast %75 : vector<64x8xf32> to vector<1x64x8xf32>
    %92 = vector.shape_cast %76 : vector<64x8xf32> to vector<1x64x8xf32>
    %93 = vector.shape_cast %77 : vector<64x8xf32> to vector<1x64x8xf32>
    %94 = vector.shape_cast %78 : vector<64x8xf32> to vector<1x64x8xf32>
    %95 = vector.shape_cast %79 : vector<64x8xf32> to vector<1x64x8xf32>
    %96 = vector.shape_cast %80 : vector<64x8xf32> to vector<1x64x8xf32>
    %97 = vector.shape_cast %81 : vector<64x8xf32> to vector<1x64x8xf32>
    %98 = vector.shape_cast %82 : vector<64x8xf32> to vector<1x64x8xf32>
    %99 = vector.shape_cast %83 : vector<64x8xf32> to vector<1x64x8xf32>
    %100 = vector.shape_cast %84 : vector<64x8xf32> to vector<1x64x8xf32>
    %101 = vector.shape_cast %85 : vector<64x8xf32> to vector<1x64x8xf32>
    %102 = tpu.concatenate %86, %87, %88, %89, %90, %91, %92, %93, %94, %95, %96, %97, %98, %99, %100, %101 in 0 : vector<1x64x8xf32>, vector<1x64x8xf32>, vector<1x64x8xf32>, vector<1x64x8xf32>, vector<1x64x8xf32>, vector<1x64x8xf32>, vector<1x64x8xf32>, vector<1x64x8xf32>, vector<1x64x8xf32>, vector<1x64x8xf32>, vector<1x64x8xf32>, vector<1x64x8xf32>, vector<1x64x8xf32>, vector<1x64x8xf32>, vector<1x64x8xf32>, vector<1x64x8xf32> -> vector<16x64x8xf32>
    "tpu.trace_start"() <{level = 10 : i32, message = "gqd,gkd->gqk"}> : () -> ()
    %cst_4 = arith.constant dense<0.000000e+00> : vector<16x64x64xf32>
    %103 = tpu.matmul %36, %69, %cst_4 {dimension_numbers = #tpu.dot_dimension_numbers<[2], [2], [1], [1], [0, 0, 0, 1, 1, 1], [0], [0]>} : vector<16x64x8xf32>, vector<16x64x8xf32>, vector<16x64x64xf32> -> vector<16x64x64xf32>
    "tpu.trace_stop"() : () -> ()
    %cst_5 = arith.constant dense<0xFF800000> : vector<16x64xf32>
    %104 = vector.multi_reduction <maximumf>, %103, %cst_5 [2] : vector<16x64x64xf32> to vector<16x64xf32>
    %105 = vector.shape_cast %104 : vector<16x64xf32> to vector<16x64x1xf32>
    %106 = vector.broadcast %105 : vector<16x64x1xf32> to vector<16x64x64xf32>
    %107 = arith.subf %103, %106 : vector<16x64x64xf32>
    %108 = math.exp %107 : vector<16x64x64xf32>
    %cst_6 = arith.constant dense<0.000000e+00> : vector<16x64xf32>
    %109 = vector.multi_reduction <add>, %108, %cst_6 [2] : vector<16x64x64xf32> to vector<16x64xf32>
    %110 = vector.shape_cast %109 : vector<16x64xf32> to vector<16x64x1xf32>
    %111 = tpu.reciprocal %110 {approx = true} : vector<16x64x1xf32> -> vector<16x64x1xf32>
    %112 = vector.broadcast %111 : vector<16x64x1xf32> to vector<16x64x64xf32>
    %113 = arith.mulf %108, %112 : vector<16x64x64xf32>
    "tpu.trace_start"() <{level = 10 : i32, message = "gqk,gkd->gqd"}> : () -> ()
    %cst_7 = arith.constant dense<0.000000e+00> : vector<16x64x8xf32>
    %114 = tpu.matmul %113, %102, %cst_7 {dimension_numbers = #tpu.dot_dimension_numbers<[2], [1], [1], [2], [0, 0, 0, 1, 1, 2], [0], [0]>} : vector<16x64x64xf32>, vector<16x64x8xf32>, vector<16x64x8xf32> -> vector<16x64x8xf32>
    "tpu.trace_stop"() : () -> ()
    %c0_8 = arith.constant 0 : index
    %c0_9 = arith.constant 0 : index
    %c0_10 = arith.constant 0 : index
    %115 = vector.load %arg3[%c0_8, %c0_9, %c0_10] : memref<16x8x64xf32, #tpu.memory_space<vmem>>, vector<16x8x64xf32>
    "tpu.trace_start"() <{level = 10 : i32, message = "gnd,gdc->gnc"}> : () -> ()
    %cst_11 = arith.constant dense<0.000000e+00> : vector<16x64x64xf32>
    %116 = tpu.matmul %114, %115, %cst_11 {dimension_numbers = #tpu.dot_dimension_numbers<[2], [1], [1], [2], [0, 0, 0, 1, 1, 2], [0], [0]>} : vector<16x64x8xf32>, vector<16x8x64xf32>, vector<16x64x64xf32> -> vector<16x64x64xf32>
    "tpu.trace_stop"() : () -> ()
    %117 = vector.extract_strided_slice %116 {offsets = [0, 0, 0], sizes = [8, 64, 64], strides = [1, 1, 1]} : vector<16x64x64xf32> to vector<8x64x64xf32>
    %cst_12 = arith.constant dense<0.000000e+00> : vector<64x64xf32>
    %118 = vector.multi_reduction <add>, %117, %cst_12 [0] : vector<8x64x64xf32> to vector<64x64xf32>
    %c0_13 = arith.constant 0 : index
    %c0_14 = arith.constant 0 : index
    %119 = vector.load %arg4[%c0_13, %c0_14] : memref<1x64xf32, #tpu.memory_space<vmem>>, vector<1x64xf32>
    %120 = vector.broadcast %119 : vector<1x64xf32> to vector<64x64xf32>
    %121 = arith.addf %118, %120 : vector<64x64xf32>
    %c0_15 = arith.constant 0 : index
    %c0_16 = arith.constant 0 : index
    %c0_17 = arith.constant 0 : index
    %122 = vector.load %arg5[%c0_15, %c0_16, %c0_17] : memref<2x64x64xf32, #tpu.memory_space<vmem>>, vector<1x64x64xf32>
    %123 = vector.shape_cast %122 : vector<1x64x64xf32> to vector<64x64xf32>
    %124 = vector.shape_cast %121 : vector<64x64xf32> to vector<1x64x64xf32>
    tpu.vector_store %arg5[%c0_15, %c0_16, %c0_17], %124 {strides = array<i32>} : memref<2x64x64xf32, #tpu.memory_space<vmem>>, vector<1x64x64xf32>,
    %125 = vector.extract_strided_slice %116 {offsets = [8, 0, 0], sizes = [8, 64, 64], strides = [1, 1, 1]} : vector<16x64x64xf32> to vector<8x64x64xf32>
    %cst_18 = arith.constant dense<0.000000e+00> : vector<64x64xf32>
    %126 = vector.multi_reduction <add>, %125, %cst_18 [0] : vector<8x64x64xf32> to vector<64x64xf32>
    %c0_19 = arith.constant 0 : index
    %c0_20 = arith.constant 0 : index
    %127 = vector.load %arg4[%c0_19, %c0_20] : memref<1x64xf32, #tpu.memory_space<vmem>>, vector<1x64xf32>
    %128 = vector.broadcast %127 : vector<1x64xf32> to vector<64x64xf32>
    %129 = arith.addf %126, %128 : vector<64x64xf32>
    %c1 = arith.constant 1 : index
    %c0_21 = arith.constant 0 : index
    %c0_22 = arith.constant 0 : index
    %130 = vector.load %arg5[%c1, %c0_21, %c0_22] : memref<2x64x64xf32, #tpu.memory_space<vmem>>, vector<1x64x64xf32>
    %131 = vector.shape_cast %130 : vector<1x64x64xf32> to vector<64x64xf32>
    %132 = vector.shape_cast %129 : vector<64x64xf32> to vector<1x64x64xf32>
    tpu.vector_store %arg5[%c1, %c0_21, %c0_22], %132 {strides = array<i32>} : memref<2x64x64xf32, #tpu.memory_space<vmem>>, vector<1x64x64xf32>,
    return
  }
  func.func @transform_0(%arg0: i32) -> (i32, i32, i32) {
    %c0_i32 = arith.constant 0 : i32
    %c0_i32_0 = arith.constant 0 : i32
    %c0_i32_1 = arith.constant 0 : i32
    return %arg0, %c0_i32, %c0_i32_0 : i32, i32, i32
  }
  func.func @transform_1(%arg0: i32) -> (i32, i32) {
    %c0_i32 = arith.constant 0 : i32
    %c0_i32_0 = arith.constant 0 : i32
    %c0_i32_1 = arith.constant 0 : i32
    return %c0_i32, %c0_i32_0 : i32, i32
  }
  func.func @transform_2(%arg0: i32) -> (i32, i32, i32) {
    %c0_i32 = arith.constant 0 : i32
    %c0_i32_0 = arith.constant 0 : i32
    %c0_i32_1 = arith.constant 0 : i32
    %c0_i32_2 = arith.constant 0 : i32
    return %c0_i32, %c0_i32_0, %c0_i32_1 : i32, i32, i32
  }
  func.func @transform_3(%arg0: i32) -> (i32, i32) {
    %c0_i32 = arith.constant 0 : i32
    %c0_i32_0 = arith.constant 0 : i32
    %c0_i32_1 = arith.constant 0 : i32
    return %c0_i32, %c0_i32_0 : i32, i32
  }
  func.func @transform_4(%arg0: i32) -> (i32, i32, i32) {
    %c0_i32 = arith.constant 0 : i32
    %c0_i32_0 = arith.constant 0 : i32
    %c0_i32_1 = arith.constant 0 : i32
    return %arg0, %c0_i32, %c0_i32_0 : i32, i32, i32
  }
}

</mosaic_0001>

<bundles_post_ra>
// kernel: tpu_custom_call.1
= control target key start
LH: loop header
LB: loop body
LE: loop exit
PB: predicated region body
PF: predicated region fallthrough
CT: control target
= control target key end

     0   :  { %9 = vsyncpa [#allocation3], 0  ;;  %s18383_s0 = inlined_call_operand.hbm [shape: f32[4,64,64], index: 0, kind: input, shape index: {}]   ;;  %s18384_s1 = inlined_call_operand.hbm [shape: f32[64,192], index: 1, kind: input, shape index: {}]   ;;  %s18385_s2 = inlined_call_operand.hbm [shape: f32[16,8,64], index: 2, kind: input, shape index: {}]   ;;  %s18386_s3 = inlined_call_operand.vmem [shape: f32[1,64], index: 3, kind: input, shape index: {}]   ;;  %s18387_s4 = inlined_call_operand.hbm [shape: f32[4,64,64], index: 4, kind: output, shape index: {}]  }
   0x1   :  { %11 = vsyncpa [#allocation3 + $0x1], 0 }
   0x2   :  { %12 = vsyncpa [#allocation6], 0 }
   0x3   :  { %13 = vsyncpa [#allocation4], 0 }
   0x4   :  { %15 = vsyncpa [#allocation4 + $0x1], 0  ;;  %s13875_s15 = smov 0   ;;  %s13877_s16 = smov 0  }
   0x5   :  { %s13879_s17 = smov 0   ;;  %s13881_s18 = smov 0  }
   0x6 LB: > { %s13896_s19 = sadd.s32 4294967295, %s13829_s18   ;;  %s9477_s20 = sadd.s32 4294967294, %s13829_s18   ;;  %s13829_s18 = sphi %s13881_s18, %s19512_s18   ;;  %s13825_s17 = sphi %s13879_s17, %s19511_s17   ;;  %s13821_s16 = sphi %s13877_s16, %s19510_s16   ;;  %s13817_s15 = sphi %s13875_s15, %s19509_s15  }
   0x7   : > { %p41_p0 = scmp.ne.s32.totalorder %s13821_s16, %s13817_s15  ;;  %p18388_p1 = scmp.eq.s32.totalorder %s13896_s19, 0 }
   0x8   : > { %p134_p3 = scmp.eq.s32.totalorder %s9477_s20, 1  ;;  %p9478_p5 = scmp.ge.s32.totalorder %s13829_s18, 1 }
   0x9   : > { %p13905_p4 = por %p18388_p1, %p41_p0  ;;  %p141_p7 = scmp.lt.s32.totalorder %s13829_s18, 3 }
   0xa   : > { %p13910_p6 = por %p134_p3, %p41_p0  ;;  %s13831_s24 = smov [#allocation5]  }
   0xb   : > { %s18674_s21 = scalar_select %p13905_p4, 1, 0 }
   0xc   : > { %s18675_s22 = scalar_select %p13910_p6, 1, 0 }
   0xd   : > { %p13915_p8 = pnand %p9478_p5, %p141_p7  ;;  %s153_s25 = sshll.u32 %s13831_s24, 4  ;;  %s13919_s25 = int_to_ptr.vmem [resolvable:$true] %s153_s25 }
   0xe   : > { %s13832_s27 = smov [#allocation7]   ;;  %s13673_s5 = scalar_lea.hbm %s18384_s1, 2048 }
   0xf   : > { %p12491_p9 = pneg %p13915_p8  ;;  %s166_s28 = sshll.u32 %s13832_s27, 4  ;;  %s13930_s28 = int_to_ptr.vmem [resolvable:$true] %s166_s28 }
  0x10   : > { %p13674_p12 = scmp.ne.s32.totalorder %s18384_s1, %s13673_s5  ;;  %p13680_p5 = scmp.lt.u32.totalorder %s13673_s5, %s18384_s1 }
  0x11   : > { %p13926_p11 = pnand %p12491_p9, %p18388_p1 }
  0x13   : > { %p13675_p13 = pneg %p13926_p11 }
  0x15   : > { %p13676_p0 = pnand %p13675_p13, %p13674_p12 }
  0x17   : > { %p13677_p3 = pneg %p13676_p0 }
  0x19   : > { %p13682_p7 = pnand %p13680_p5, %p13677_p3 }
  0x1b   : > { %13685 = shalt.err (!%p13682_p7)
}
  0x1c   : > { %s13686_s10 = scalar_lea.vmem %s13919_s25, 2048  ;;  %p13694_p2 = scmp.lt.s32.totalorder %s13919_s25, %s13919_s25 }
  0x1d   : > { %p13687_p9 = scmp.ne.s32.totalorder %s13919_s25, %s13686_s10  ;;  %p13695_p12 = scmp.lt.s32.totalorder %s13686_s10, %s13686_s10 }
  0x1f   : > { %p13689_p10 = pnand %p13687_p9, %p13675_p13  ;;  %p13696_p0 = por %p13695_p12, %p13694_p2 }
  0x21   : > { %p13690_p1 = pneg %p13689_p10 }
  0x23   : > { %p13697_p6 = pnand %p13696_p0, %p13690_p1 }
  0x25   : > { %13700 = shalt.err (!%p13697_p6)
}
  0x26   : > { %s13833_s11 = smov 256   ;;  %s13834_s12 = smov 16  }
  0x27   : > { %12494 = dma.hbm_to_vmem [thread:$0]  (!%p13926_p11), %s18384_s1, 2048, %s13919_s25, [#allocation6], %s13833_s11, %s13833_s11, %s13834_s12  }
  0x28   : > { %s13701_s27 = scalar_lea.hbm %s18385_s2, 2048 }
  0x29   : > { %p13702_p2 = scmp.ne.s32.totalorder %s18385_s2, %s13701_s27  ;;  %p13708_p10 = scmp.lt.u32.totalorder %s13701_s27, %s18385_s2 }
  0x2b   : > { %p13704_p1 = pnand %p13702_p2, %p13675_p13 }
  0x2d   : > { %p13705_p6 = pneg %p13704_p1 }
  0x2f   : > { %p13710_p3 = pnand %p13708_p10, %p13705_p6 }
  0x31   : > { %13713 = shalt.err (!%p13710_p3)
}
  0x32   : > { %s13714_s25 = scalar_lea.vmem %s13930_s28, 2048  ;;  %p13722_p12 = scmp.lt.s32.totalorder %s13930_s28, %s13930_s28 }
  0x33   : > { %p13715_p5 = scmp.ne.s32.totalorder %s13930_s28, %s13714_s25  ;;  %p13723_p0 = scmp.lt.s32.totalorder %s13714_s25, %s13714_s25 }
  0x35   : > { %p13717_p7 = pnand %p13715_p5, %p13675_p13  ;;  %p13724_p2 = por %p13723_p0, %p13722_p12 }
  0x37   : > { %p13718_p9 = pneg %p13717_p7 }
  0x39   : > { %p13725_p1 = pnand %p13724_p2, %p13718_p9 }
  0x3b   : > { %13728 = shalt.err (!%p13725_p1)
}
  0x3c   : > { %s13835_s7 = smov 128   ;;  %s13836_s8 = smov 8  }
  0x3d   : > { %12497 = dma.hbm_to_vmem [thread:$0]  (!%p13926_p11), %s18385_s2, 2048, %s13930_s28, [#allocation6], %s13835_s7, %s13835_s7, %s13836_s8  }
  0x3e   : > { %s13988_s11 = sadd.s32 1, %s13829_s18   ;;  %s28_s13 = sadd.s32 1, %s13825_s17 }
  0x3f   : > { %s25_s12 = ssub.s32 %s13829_s18, %s13988_s11  ;;  %p35_p6 = scmp.ne.s32.totalorder %s13825_s17, %s13821_s16 }
  0x40   : > { %p26_p13 = scmp.eq.s32.totalorder %s25_s12, 0  ;;  %p36_p10 = scmp.eq.s32.totalorder %s13829_s18, 0 }
  0x41   : > { %p18678_p5 = scmp.eq.s32.totalorder %s13896_s19, 1  ;;  %p12508_p9 = scmp.lt.s32.totalorder %s13829_s18, 2 }
  0x42   : > { %s13997_s14 = scalar_select %p26_p13, %s13825_s17, %s28_s13  }
  0x43   : > { %p37_p3 = por %p36_p10, %p35_p6  ;;  %p14001_p7 = por %p18678_p5, %p35_p6 }
  0x44   : > { %s183_s20 = sand.u32 1, %s13825_s17   ;;  %s10036_s28 = sshll.u32 %s13829_s18, 11 }
  0x45   : > { %s18679_s26 = scalar_select %p14001_p7, 1, 0 }
  0x46   : > { %s9482_s24 = sshll.u32 %s183_s20, 7  ;;  %s14011_s30 = scalar_lea.hbm %s18383_s0, %s10036_s28 }
  0x47   : > { %s187_s5 = scalar_lea.vmem [#allocation2], %s9482_s24  ;;  %p14015_p11 = pnand %p12508_p9, %p37_p3 }
  0x48   : > { %s195_s6 = sshll.u32 %s187_s5, 4  ;;  %s14019_s9 = scalar_lea.sflag [#allocation3], %s183_s20  ;;  %s14013_s6 = int_to_ptr.vmem [resolvable:$true] %s195_s6 }
  0x49   : > { %s13729_s10 = scalar_lea.hbm %s14011_s30, 2048  ;;  %p13731_p0 = pneg %p14015_p11 }
  0x4a   : > { %p13730_p12 = scmp.ne.s32.totalorder %s14011_s30, %s13729_s10  ;;  %s13734_s24 = scalar_lea.hbm %s18383_s0, 4096 }
  0x4b   : > { %p13735_p13 = scmp.lt.u32.totalorder %s14011_s30, %s18383_s0  ;;  %p13736_p6 = scmp.lt.u32.totalorder %s13734_s24, %s13729_s10 }
  0x4c   : > { %p13732_p2 = pnand %p13731_p0, %p13730_p12  ;;  %p13738_p3 = scmp.lt.u32.totalorder %s13729_s10, %s14011_s30 }
  0x4d   : > { %p13737_p10 = por %p13736_p6, %p13735_p13 }
  0x4e   : > { %p13733_p1 = pneg %p13732_p2 }
  0x4f   : > { %p13739_p5 = por %p13738_p3, %p13737_p10 }
  0x51   : > { %p13740_p9 = pnand %p13739_p5, %p13733_p1 }
  0x53   : > { %13743 = shalt.err (!%p13740_p9)
}
  0x54   : > { %s13744_s20 = scalar_lea.vmem %s14013_s6, 2048  ;;  %s13837_s29 = smov [#allocation2]  }
  0x55   : > { %p13745_p12 = scmp.ne.s32.totalorder %s14013_s6, %s13744_s20  ;;  %s13749_s5 = sshll.u32 %s13837_s29, 4  ;;  %s13750_s5 = int_to_ptr.vmem [resolvable:$false] %s13749_s5 }
  0x56   : > { %s13751_s12 = scalar_lea.vmem %s13750_s5, 4096  ;;  %p13752_p4 = scmp.lt.s32.totalorder %s14013_s6, %s13750_s5 }
  0x57   : > { %p13747_p2 = pnand %p13745_p12, %p13731_p0  ;;  %p13753_p13 = scmp.lt.s32.totalorder %s13751_s12, %s13744_s20 }
  0x59   : > { %p13748_p7 = pneg %p13747_p2  ;;  %p13754_p6 = por %p13753_p13, %p13752_p4 }
  0x5b   : > { %p13755_p10 = pnand %p13754_p6, %p13748_p7 }
  0x5d   : > { %13758 = shalt.err (!%p13755_p10)
}
  0x5e   : > { %12501 = dma.hbm_to_vmem [thread:$0]  (!%p14015_p11), %s14011_s30, 2048, %s14013_s6, %s14019_s9, %s13835_s7, %s13835_s7, %s13836_s8  }
  0x5f   : > { %207 = sbr.rel (%p13915_p8) target bundleno = 2814 (0xafe), region = 36 }
  0x66   : > { %s14053_s10 = sand.u32 1, %s13821_s16   ;;  %p18681_p4 = scmp.ne.s32.totalorder %s18674_s21, 0 }
  0x67   : > { %s9487_s13 = sshll.u32 %s14053_s10, 7  ;;  %s210_s24 = scalar_lea.sflag [#allocation3], %s14053_s10 }
  0x68   : > { %s14059_s25 = scalar_lea.vmem [#allocation2], %s9487_s13 }
  0x69   : > { %13804 = dma.done.wait (%p18681_p4), %s210_s24, 2048  }
  0x6a   : > { %13806 = vsyncadd (%p18681_p4), %s210_s24, 4294965248  ;;  %p18682_p7 = scmp.eq.s32.totalorder %s13896_s19, 0 }
  0x6c   : > { %13808 = dma.done.wait (%p18682_p7), [#allocation6], 4096   ;;  %p18683_p8 = pmov %p18682_p7 }
  0x6d   : > { %v13838_v0 = vmov 0.0   ;;  %v265_v1 = vld [vmem:[#allocation5 + $0x8] sm:$0xff]  ;;  %v267_v2 = vld [vmem:[#allocation5 + $0x18] sm:$0xff]  ;;  %v264_v3 = vld [vmem:[#allocation5] sm:$0xff]  ;;  %vm280_vm0 = vcmask 523264   ;;  %vm1098_vm1 = vcmask 64512  }
  0x6e   : > { %13810 = vsyncadd (%p18683_p8), [#allocation6], 4294963200  ;;  %393 = vmatprep.mubr.f32.mxu0 %v13838_v0  ;;  %v11815_v4 = vpack.c.bf16 %v267_v2, %v265_v1  ;;  %v266_v5 = vld [vmem:[#allocation5 + $0x10] sm:$0xff]  ;;  %v269_v6 = vld [vmem:[#allocation5 + $0x28] sm:$0xff]  ;;  %s13839_s21 = smov 80   ;;  %s13840_s23 = smov 120  }
  0x6f   : > { %v271_v7 = vld [vmem:[#allocation5 + $0x38] sm:$0xff]  ;;  %v11817_v8 = vpack.c.bf16 %v266_v5, %v264_v3  ;;  %v268_v10 = vld [vmem:[#allocation5 + $0x20] sm:$0xff]  ;;  %v270_v11 = vld [vmem:[#allocation5 + $0x30] sm:$0xff]  ;;  %s13841_s7 = smov 72   ;;  %s13842_s8 = smov 112  }
  0x70   : > { %v11819_v9 = vpack.c.bf16 %v271_v7, %v269_v6  ;;  %v273_v12 = vld [vmem:[#allocation5 + $0x48] sm:$0xff]  ;;  %11816 = vmatprep.subr.bf16.mxu0 %v11815_v4  ;;  %v275_v13 = vld [vmem:[#allocation5 + $0x58] sm:$0xff]  ;;  %v11821_v14 = vpack.c.bf16 %v270_v11, %v268_v10  ;;  %v272_v16 = vld [vmem:[#allocation5 + $0x40] sm:$0xff]  ;;  %s13843_s30 = smov 104   ;;  %s13844_s6 = smov 96  }
  0x71   : > { %11818 = vmatpush1.bf16.msra.mxu0 %v11817_v8  ;;  %v11823_v15 = vpack.c.bf16 %v275_v13, %v273_v12  ;;  %v274_v17 = vld [vmem:[#allocation5 + $0x50] sm:$0xff]  ;;  %v277_v18 = vld [vmem:[#allocation5 + $0x68] sm:$0xff]  ;;  %v279_v19 = vld [vmem:[#allocation5 + $0x78] sm:$0xff]  ;;  %s13845_s9 = smov 88   ;;  %s13846_s28 = smov 64  }
  0x72   : > { %11820 = vmatprep.subr.bf16.mxu0 %v11819_v9  ;;  %v11825_v20 = vpack.c.bf16 %v274_v17, %v272_v16  ;;  %v11827_v21 = vpack.c.bf16 %v279_v19, %v277_v18  ;;  %v276_v22 = vld [vmem:[#allocation5 + $0x60] sm:$0xff]  ;;  %v278_v23 = vld [vmem:[#allocation5 + $0x70] sm:$0xff]  ;;  %v249_v26 = vld [vmem:[%s14059_s25 + $0x8] sm:$0xff]  ;;  %s18211_s29 = scalar_lea.vmem [#allocation8], %s9487_s13  ;;  %s10038_s5 = sshll.u32 %s13896_s19, 11 }
  0x73   : > { %v11829_v24 = vpack.c.bf16 %v278_v23, %v276_v22  ;;  %v248_v25 = vld [vmem:[%s14059_s25] sm:$0xff]  ;;  %v250_v27 = vld [vmem:[%s14059_s25 + $0x10] sm:$0xff]  ;;  %v251_v28 = vld [vmem:[%s14059_s25 + $0x18] sm:$0xff]  ;;  %s9385_s12 = sshll.u32 %s18211_s29, 4  ;;  %s9371_s19 = scalar_lea.sflag [#allocation4], %s14053_s10  ;;  %s18334_s12 = int_to_ptr.vmem [resolvable:$true] %s9385_s12 }
  0x74   : > { %v252_v29 = vld [vmem:[%s14059_s25 + $0x20] sm:$0xff]  ;;  %v253_v30 = vld [vmem:[%s14059_s25 + $0x28] sm:$0xff]  ;;  %v254_v31 = vld [vmem:[%s14059_s25 + $0x30] sm:$0xff]  ;;  %p19506_p0 = scmp.ne.s32.totalorder %s18679_s26, 0 }
  0x75   : > { %11822 = vmatpush1.bf16.msra.mxu0 %v11821_v14  ;;  %v255_v32 = vld [vmem:[%s14059_s25 + $0x38] sm:$0xff]  ;;  %v256_v33 = vld [vmem:[%s14059_s25 + $0x40] sm:$0xff]  ;;  %v257_v34 = vld [vmem:[%s14059_s25 + $0x48] sm:$0xff] }
  0x76   : > { %11824 = vmatprep.subr.bf16.mxu0 %v11823_v15  ;;  %v258_v35 = vld [vmem:[%s14059_s25 + $0x50] sm:$0xff]  ;;  %v259_v36 = vld [vmem:[%s14059_s25 + $0x58] sm:$0xff]  ;;  %v260_v37 = vld [vmem:[%s14059_s25 + $0x60] sm:$0xff] }
  0x77   : > { %v261_v38 = vld [vmem:[%s14059_s25 + $0x68] sm:$0xff]  ;;  %v262_v39 = vld [vmem:[%s14059_s25 + $0x70] sm:$0xff]  ;;  %v263_v40 = vld [vmem:[%s14059_s25 + $0x78] sm:$0xff]  ;;  %s18332_s25 = scalar_lea.hbm %s18387_s4, %s10038_s5 }
  0x78   : > { %vm14348_vm2 = vmpackc.low %vm1098_vm1, %vm1098_vm1 }
  0x79   : > { %11826 = vmatpush1.bf16.msra.mxu0 %v11825_v20 }
  0x7a   : > { %11828 = vmatprep.subr.bf16.mxu0 %v11827_v21 }
  0x7d   : > { %11830 = vmatpush1.bf16.msra.mxu0 %v11829_v24 }
  0x80   : > { %9491 = vmatmul.mubr.msk.f32.vlgmr.msra.gmra.mrb[0].mxu0 %vm280_vm0, %v248_v25 }
  0x81   : > { %399 = vmatprep.mubr.f32.mxu0 %v13838_v0 }
  0x84   : > { %9492 = vmatmul.mubr.msk.f32.gmra.mrb[2].mxu0 %vm280_vm0, %v249_v26 }
  0x85   : > { %405 = vmatprep.mubr.f32.mxu0 %v13838_v0 }
  0x88   : > { %9493 = vmatmul.mubr.msk.f32.gmra.mrb[4].mxu0 %vm280_vm0, %v250_v27 }
  0x89   : > { %411 = vmatprep.mubr.f32.mxu0 %v13838_v0 }
  0x8c   : > { %9494 = vmatmul.mubr.msk.f32.gmra.mrb[6].mxu0 %vm280_vm0, %v251_v28 }
  0x8d   : > { %417 = vmatprep.mubr.f32.mxu0 %v13838_v0 }
  0x90   : > { %9495 = vmatmul.mubr.msk.f32.gmra.mrb[8].mxu0 %vm280_vm0, %v252_v29 }
  0x91   : > { %423 = vmatprep.mubr.f32.mxu0 %v13838_v0 }
  0x94   : > { %9496 = vmatmul.mubr.msk.f32.gmra.mrb[10].mxu0 %vm280_vm0, %v253_v30 }
  0x95   : > { %429 = vmatprep.mubr.f32.mxu0 %v13838_v0 }
  0x98   : > { %9497 = vmatmul.mubr.msk.f32.gmra.mrb[12].mxu0 %vm280_vm0, %v254_v31 }
  0x99   : > { %435 = vmatprep.mubr.f32.mxu0 %v13838_v0 }
  0x9c   : > { %9498 = vmatmul.mubr.msk.f32.gmra.mrb[14].mxu0 %vm280_vm0, %v255_v32 }
  0x9d   : > { %441 = vmatprep.mubr.f32.mxu0 %v13838_v0 }
  0xa0   : > { %9499 = vmatmul.mubr.msk.f32.gmra.mrb[16].mxu0 %vm280_vm0, %v256_v33 }
  0xa1   : > { %447 = vmatprep.mubr.f32.mxu0 %v13838_v0 }
  0xa4   : > { %9500 = vmatmul.mubr.msk.f32.gmra.mrb[18].mxu0 %vm280_vm0, %v257_v34 }
  0xa5   : > { %453 = vmatprep.mubr.f32.mxu0 %v13838_v0 }
  0xa8   : > { %9501 = vmatmul.mubr.msk.f32.gmra.mrb[20].mxu0 %vm280_vm0, %v258_v35 }
  0xa9   : > { %459 = vmatprep.mubr.f32.mxu0 %v13838_v0 }
  0xac   : > { %9502 = vmatmul.mubr.msk.f32.gmra.mrb[22].mxu0 %vm280_vm0, %v259_v36 }
  0xad   : > { %465 = vmatprep.mubr.f32.mxu0 %v13838_v0 }
  0xb0   : > { %9503 = vmatmul.mubr.msk.f32.gmra.mrb[24].mxu0 %vm280_vm0, %v260_v37 }
  0xb1   : > { %471 = vmatprep.mubr.f32.mxu0 %v13838_v0 }
  0xb4   : > { %9504 = vmatmul.mubr.msk.f32.gmra.mrb[26].mxu0 %vm280_vm0, %v261_v38 }
  0xb5   : > { %477 = vmatprep.mubr.f32.mxu0 %v13838_v0 }
  0xb8   : > { %9505 = vmatmul.mubr.msk.f32.gmra.mrb[28].mxu0 %vm280_vm0, %v262_v39 }
  0xb9   : > { %483 = vmatprep.mubr.f32.mxu0 %v13838_v0 }
  0xbc   : > { %9506 = vmatmul.mubr.msk.f32.gmra.mrb[30].mxu0 %vm280_vm0, %v263_v40 }
 0x153   : > { %v395_v41 = vpop.f32.mrb[0].mxu0 }
 0x154   : > { %578 = vrot.lane.b32.xlu1 %v395_v41, %s13839_s21  ;;  %498 = vrot.lane.b32.xlu0 %v395_v41, %s13840_s23  ;;  %v397_v42 = vpop.f32.mrb[1].mxu0 }
 0x155   : > { %10711 = vmatprep.mubr.msk.f32.mxu1 %vm1098_vm1, %v395_v41 }
 0x157   : > { %v14120_v43 = vpop.f32.mrb[2].mxu0 }
 0x158   : > { %594 = vrot.lane.b32.xlu1 %v395_v41, %s13841_s7  ;;  %514 = vrot.lane.b32.xlu0 %v395_v41, %s13842_s8  ;;  %v403_v44 = vpop.f32.mrb[3].mxu0  ;;  %v12561_v45 = vpack.i.bf16 %v14120_v43, %v395_v41 }
 0x159   : > { %v14125_v46 = vpack.i.bf16 %v403_v44, %v397_v42  ;;  %v14127_v47 = vpack.c.bf16 %v403_v44, %v397_v42 }
 0x15b   : > { %18684 = vst [vmem:[#allocation12_spill] sm:$0xff] %v14125_v46  ;;  %18685 = vst [vmem:[#allocation13_spill] sm:$0xff] %v14127_v47  ;;  %v14129_v48 = vpop.f32.mrb[4].mxu0 }
 0x15c   : > { %530 = vrot.lane.b32.xlu0 %v395_v41, %s13843_s30  ;;  %516 = vrot.lane.b32.xlu1 %v14120_v43, %s13842_s8  ;;  %v409_v49 = vpop.f32.mrb[5].mxu0 }
 0x15f   : > { %v14134_v50 = vpop.f32.mrb[6].mxu0 }
 0x160   : > { %546 = vrot.lane.b32.xlu0 %v395_v41, %s13844_s6  ;;  %532 = vrot.lane.b32.xlu1 %v14120_v43, %s13843_s30  ;;  %v415_v51 = vpop.f32.mrb[7].mxu0  ;;  %v12576_v52 = vpack.i.bf16 %v14134_v50, %v14129_v48 }
 0x161   : > { %v14141_v53 = vpack.i.bf16 %v415_v51, %v409_v49  ;;  %v14143_v54 = vpack.c.bf16 %v415_v51, %v409_v49  ;;  %v18712_v49 = vmov 0 }
 0x162   : > { %v18713_v49 = vsel %vm14348_vm2, 4294967295, %v18712_v49 }
 0x163   : > { %18686 = vst [vmem:[#allocation14_spill] sm:$0xff] %v14141_v53  ;;  %18687 = vst [vmem:[#allocation15_spill] sm:$0xff] %v14143_v54  ;;  %v14145_v55 = vpop.f32.mrb[8].mxu0 }
 0x164   : > { %562 = vrot.lane.b32.xlu0 %v395_v41, %s13845_s9  ;;  %12562 = vrot.lane.b32.xlu1 %v12561_v45, %s13846_s28  ;;  %v421_v56 = vpop.f32.mrb[9].mxu0  ;;  %18714 = vst [vmem:[#allocation40_spill] sm:$0xff] %v18713_v49 }
 0x167   : > { %v14149_v57 = vpop.f32.mrb[10].mxu0 }
 0x168   : > { %500 = vrot.lane.b32.xlu0 %v14120_v43, %s13840_s23  ;;  %12572 = vrot.lane.b32.xlu1 %v14125_v46, %s13842_s8  ;;  %v427_v58 = vpop.f32.mrb[11].mxu0  ;;  %v12591_v59 = vpack.i.bf16 %v14149_v57, %v14145_v55 }
 0x169   : > { %v14157_v60 = vpack.i.bf16 %v427_v58, %v421_v56  ;;  %v14159_v61 = vpack.c.bf16 %v427_v58, %v421_v56 }
 0x16b   : > { %18688 = vst [vmem:[#allocation16_spill] sm:$0xff] %v14157_v60  ;;  %18689 = vst [vmem:[#allocation17_spill] sm:$0xff] %v14159_v61  ;;  %v14161_v62 = vpop.f32.mrb[12].mxu0 }
 0x16c   : > { %548 = vrot.lane.b32.xlu0 %v14120_v43, %s13844_s6  ;;  %502 = vrot.lane.b32.xlu1 %v14129_v48, %s13840_s23  ;;  %v433_v63 = vpop.f32.mrb[13].mxu0 }
 0x16f   : > { %v14167_v0 = vpop.f32.mrb[14].mxu0 }
 0x170   : > { %564 = vrot.lane.b32.xlu0 %v14120_v43, %s13845_s9  ;;  %550 = vrot.lane.b32.xlu1 %v14129_v48, %s13844_s6  ;;  %v439_v1 = vpop.f32.mrb[15].mxu0  ;;  %v12606_v2 = vpack.i.bf16 %v14167_v0, %v14161_v62 }
 0x171   : > { %v14175_v3 = vpack.i.bf16 %v439_v1, %v433_v63  ;;  %v14177_v4 = vpack.c.bf16 %v439_v1, %v433_v63 }
 0x173   : > { %18690 = vst [vmem:[#allocation18_spill] sm:$0xff] %v14175_v3  ;;  %18691 = vst [vmem:[#allocation19_spill] sm:$0xff] %v14177_v4  ;;  %v14179_v5 = vpop.f32.mrb[16].mxu0 }
 0x174   : > { %18692 = vst [vmem:[#allocation20_spill] sm:$0xff] %v14179_v5  ;;  %580 = vrot.lane.b32.xlu0 %v14120_v43, %s13839_s21  ;;  %566 = vrot.lane.b32.xlu1 %v14129_v48, %s13845_s9  ;;  %v445_v6 = vpop.f32.mrb[17].mxu0 }
 0x177   : > { %v14185_v7 = vpop.f32.mrb[18].mxu0 }
 0x178   : > { %18693 = vst [vmem:[#allocation21_spill] sm:$0xff] %v14185_v7  ;;  %596 = vrot.lane.b32.xlu0 %v14120_v43, %s13841_s7  ;;  %582 = vrot.lane.b32.xlu1 %v14129_v48, %s13839_s21  ;;  %v451_v8 = vpop.f32.mrb[19].mxu0  ;;  %v12616_v9 = vpack.i.bf16 %v14185_v7, %v14179_v5 }
 0x179   : > { %v14193_v10 = vpack.i.bf16 %v451_v8, %v445_v6  ;;  %v14195_v11 = vpack.c.bf16 %v451_v8, %v445_v6 }
 0x17b   : > { %18694 = vst [vmem:[#allocation22_spill] sm:$0xff] %v14193_v10  ;;  %18695 = vst [vmem:[#allocation23_spill] sm:$0xff] %v14195_v11  ;;  %v14197_v12 = vpop.f32.mrb[20].mxu0 }
 0x17c   : > { %18696 = vst [vmem:[#allocation24_spill] sm:$0xff] %v14197_v12  ;;  %12567 = vrot.lane.b32.xlu0 %v14125_v46, %s13840_s23  ;;  %598 = vrot.lane.b32.xlu1 %v14129_v48, %s13841_s7  ;;  %v457_v13 = vpop.f32.mrb[21].mxu0 }
 0x17f   : > { %v14203_v14 = vpop.f32.mrb[22].mxu0 }
 0x180   : > { %18697 = vst [vmem:[#allocation25_spill] sm:$0xff] %v14203_v14  ;;  %518 = vrot.lane.b32.xlu0 %v14129_v48, %s13842_s8  ;;  %504 = vrot.lane.b32.xlu1 %v14134_v50, %s13840_s23  ;;  %v463_v15 = vpop.f32.mrb[23].mxu0 }
 0x181   : > { %v14211_v17 = vpack.i.bf16 %v463_v15, %v457_v13  ;;  %v14213_v18 = vpack.c.bf16 %v463_v15, %v457_v13 }
 0x183   : > { %18698 = vst [vmem:[#allocation26_spill] sm:$0xff] %v14211_v17  ;;  %18699 = vst [vmem:[#allocation27_spill] sm:$0xff] %v14213_v18  ;;  %v14230_v19 = vpop.f32.mrb[24].mxu0  ;;  %v18730_v18 = vpack.i.bf16 %v14203_v14, %v14197_v12 }
 0x184   : > { %534 = vrot.lane.b32.xlu0 %v14129_v48, %s13843_s30  ;;  %520 = vrot.lane.b32.xlu1 %v14134_v50, %s13842_s8  ;;  %18700 = vst [vmem:[#allocation28_spill] sm:$0xff] %v14230_v19  ;;  %v469_v20 = vpop.f32.mrb[25].mxu0 }
 0x187   : > { %v14232_v21 = vpop.f32.mrb[26].mxu0 }
 0x188   : > { %12577 = vrot.lane.b32.xlu0 %v12576_v52, %s13846_s28  ;;  %536 = vrot.lane.b32.xlu1 %v14134_v50, %s13843_s30  ;;  %18701 = vst [vmem:[#allocation29_spill] sm:$0xff] %v14232_v21  ;;  %v475_v22 = vpop.f32.mrb[27].mxu0 }
 0x189   : > { %v14248_v24 = vpack.c.bf16 %v475_v22, %v469_v20  ;;  %v14250_v25 = vpack.i.bf16 %v475_v22, %v469_v20 }
 0x18b   : > { %18702 = vst [vmem:[#allocation30_spill] sm:$0xff] %v14248_v24  ;;  %18703 = vst [vmem:[#allocation31_spill] sm:$0xff] %v14250_v25  ;;  %v14270_v26 = vpop.f32.mrb[28].mxu0 }
 0x18c   : > { %584 = vrot.lane.b32.xlu0 %v14134_v50, %s13839_s21  ;;  %552 = vrot.lane.b32.xlu1 %v14134_v50, %s13844_s6  ;;  %18704 = vst [vmem:[#allocation32_spill] sm:$0xff] %v14270_v26  ;;  %v481_v27 = vpop.f32.mrb[29].mxu0 }
 0x18f   : > { %v14272_v28 = vpop.f32.mrb[30].mxu0 }
 0x190   : > { %600 = vrot.lane.b32.xlu0 %v14134_v50, %s13841_s7  ;;  %568 = vrot.lane.b32.xlu1 %v14134_v50, %s13845_s9  ;;  %18705 = vst [vmem:[#allocation33_spill] sm:$0xff] %v14272_v28  ;;  %v487_v29 = vpop.f32.mrb[31].mxu0 }
 0x191   : > { %v14288_v31 = vpack.c.bf16 %v487_v29, %v481_v27  ;;  %v14290_v32 = vpack.i.bf16 %v487_v29, %v481_v27 }
 0x193   : > { %18706 = vst [vmem:[#allocation34_spill] sm:$0xff] %v14288_v31  ;;  %18707 = vst [vmem:[#allocation35_spill] sm:$0xff] %v14290_v32 }
 0x194   : > { %12587 = vrot.lane.b32.xlu1 %v14141_v53, %s13842_s8  ;;  %12582 = vrot.lane.b32.xlu0 %v14141_v53, %s13840_s23 }
 0x198   : > { %586 = vrot.lane.b32.xlu1 %v14145_v55, %s13839_s21  ;;  %506 = vrot.lane.b32.xlu0 %v14145_v55, %s13840_s23 }
 0x19c   : > { %602 = vrot.lane.b32.xlu1 %v14145_v55, %s13841_s7  ;;  %522 = vrot.lane.b32.xlu0 %v14145_v55, %s13842_s8 }
 0x1a0   : > { %538 = vrot.lane.b32.xlu0 %v14145_v55, %s13843_s30  ;;  %508 = vrot.lane.b32.xlu1 %v14149_v57, %s13840_s23 }
 0x1a4   : > { %554 = vrot.lane.b32.xlu0 %v14145_v55, %s13844_s6  ;;  %524 = vrot.lane.b32.xlu1 %v14149_v57, %s13842_s8 }
 0x1a8   : > { %570 = vrot.lane.b32.xlu0 %v14145_v55, %s13845_s9  ;;  %540 = vrot.lane.b32.xlu1 %v14149_v57, %s13843_s30 }
 0x1ac   : > { %556 = vrot.lane.b32.xlu0 %v14149_v57, %s13844_s6  ;;  %12592 = vrot.lane.b32.xlu1 %v12591_v59, %s13846_s28 }
 0x1b0   : > { %572 = vrot.lane.b32.xlu0 %v14149_v57, %s13845_s9  ;;  %12597 = vrot.lane.b32.xlu1 %v14157_v60, %s13840_s23 }
 0x1b4   : > { %588 = vrot.lane.b32.xlu0 %v14149_v57, %s13839_s21  ;;  %12602 = vrot.lane.b32.xlu1 %v14157_v60, %s13842_s8 }
 0x1b8   : > { %604 = vrot.lane.b32.xlu0 %v14149_v57, %s13841_s7  ;;  %558 = vrot.lane.b32.xlu1 %v14161_v62, %s13844_s6 }
 0x1bc   : > { %574 = vrot.lane.b32.xlu1 %v14161_v62, %s13845_s9  ;;  %510 = vrot.lane.b32.xlu0 %v14161_v62, %s13840_s23 }
 0x1c0   : > { %590 = vrot.lane.b32.xlu1 %v14161_v62, %s13839_s21  ;;  %526 = vrot.lane.b32.xlu0 %v14161_v62, %s13842_s8 }
 0x1c4   : > { %606 = vrot.lane.b32.xlu1 %v14161_v62, %s13841_s7  ;;  %542 = vrot.lane.b32.xlu0 %v14161_v62, %s13843_s30 }
 0x1c6   : > { %v14304_v33 = vpop.permute.xlu1 %578  ;;  %v14306_v34 = vpop.permute.xlu0 %498 }
 0x1c8   : > { %12607 = vrot.lane.b32.xlu0 %v12606_v2, %s13846_s28  ;;  %512 = vrot.lane.b32.xlu1 %v14167_v0, %s13840_s23 }
 0x1ca   : > { %v14314_v35 = vpop.permute.xlu1 %594  ;;  %v14316_v36 = vpop.permute.xlu0 %514 }
 0x1cb   : > { %18708 = vst [vmem:[#allocation36_spill] sm:$0xff] %v14314_v35  ;;  %10767 = vmatprep.mubr.msk.f32.mxu0 %vm1098_vm1, %v14316_v36 }
 0x1cc   : > { %576 = vrot.lane.b32.xlu0 %v14167_v0, %s13845_s9  ;;  %528 = vrot.lane.b32.xlu1 %v14167_v0, %s13842_s8 }
 0x1ce   : > { %v14324_v37 = vpop.permute.xlu0 %530  ;;  %v14326_v38 = vpop.permute.xlu1 %516 }
 0x1cf   : > { %18709 = vst [vmem:[#allocation37_spill] sm:$0xff] %v14324_v37 }
 0x1d0   : > { %592 = vrot.lane.b32.xlu0 %v14167_v0, %s13839_s21  ;;  %544 = vrot.lane.b32.xlu1 %v14167_v0, %s13843_s30 }
 0x1d2   : > { %v14332_v39 = vpop.permute.xlu0 %546  ;;  %v14334_v40 = vpop.permute.xlu1 %532 }
 0x1d3   : > { %18710 = vst [vmem:[#allocation38_spill] sm:$0xff] %v14334_v40 }
 0x1d4   : > { %608 = vrot.lane.b32.xlu0 %v14167_v0, %s13841_s7  ;;  %560 = vrot.lane.b32.xlu1 %v14167_v0, %s13844_s6 }
 0x1d6   : > { %v14340_v41 = vpop.permute.xlu0 %562  ;;  %v12563_v42 = vpop.permute.xlu1 %12562 }
 0x1d7   : > { %18711 = vst [vmem:[#allocation39_spill] sm:$0xff] %v14340_v41  ;;  %v12565_v44 = vunpack.i.h.bf16 %v12563_v42  ;;  %v12564_v45 = vunpack.i.l.bf16 %v12563_v42 }
 0x1d8   : > { %12612 = vrot.lane.b32.xlu0 %v14175_v3, %s13840_s23  ;;  %618 = vrot.lane.b32.xlu1 %v14179_v5, %s13840_s23 }
 0x1d9   : > { %v11831_v51 = vpack.c.bf16 %v12565_v44, %v12564_v45 }
 0x1da   : > { %v14352_v52 = vpop.permute.xlu0 %500  ;;  %v14354_v56 = vpop.permute.xlu1 %12572 }
 0x1db   : > { %18715 = vst [vmem:[#allocation41_spill] sm:$0xff] %v14354_v56  ;;  %11833 = vmatprep.subr.msk.bf16.mxu1 %vm14348_vm2, %v11831_v51 }
 0x1dc   : > { %11836 = vmatpush3.bf16.xpose.msk.msra.mxu1 %vm14348_vm2, %v11831_v51  ;;  %634 = vrot.lane.b32.xlu1 %v14179_v5, %s13842_s8 }
 0x1dd   : > { %620 = vrot.lane.b32.xlu0 %v14185_v7, %s13840_s23 }
 0x1de   : > { %v14364_v58 = vpop.permute.xlu0 %548  ;;  %v14366_v59 = vpop.permute.xlu1 %502 }
 0x1e0   : > { %650 = vrot.lane.b32.xlu1 %v14179_v5, %s13843_s30 }
 0x1e1   : > { %636 = vrot.lane.b32.xlu0 %v14185_v7, %s13842_s8 }
 0x1e2   : > { %v14372_v63 = vpop.permute.xlu0 %564  ;;  %v14374_v1 = vpop.permute.xlu1 %550 }
 0x1e3   : > { %18716 = vst [vmem:[#allocation42_spill] sm:$0xff] %v14372_v63 }
 0x1e4   : > { %666 = vrot.lane.b32.xlu1 %v14179_v5, %s13844_s6 }
 0x1e5   : > { %652 = vrot.lane.b32.xlu0 %v14185_v7, %s13843_s30 }
 0x1e6   : > { %v14380_v2 = vpop.permute.xlu0 %580  ;;  %v14382_v6 = vpop.permute.xlu1 %566 }
 0x1e7   : > { %18717 = vst [vmem:[#allocation43_spill] sm:$0xff] %v14380_v2  ;;  %18718 = vst [vmem:[#allocation44_spill] sm:$0xff] %v14382_v6 }
 0x1e8   : > { %682 = vrot.lane.b32.xlu1 %v14179_v5, %s13845_s9 }
 0x1e9   : > { %12617 = vrot.lane.b32.xlu0 %v12616_v9, %s13846_s28 }
 0x1ea   : > { %v14390_v8 = vpop.permute.xlu0 %596  ;;  %v14392_v13 = vpop.permute.xlu1 %582 }
 0x1eb   : > { %18719 = vst [vmem:[#allocation45_spill] sm:$0xff] %v14390_v8  ;;  %18720 = vst [vmem:[#allocation46_spill] sm:$0xff] %v14392_v13 }
 0x1ec   : > { %698 = vrot.lane.b32.xlu1 %v14179_v5, %s13839_s21 }
 0x1ed   : > { %668 = vrot.lane.b32.xlu0 %v14185_v7, %s13844_s6 }
 0x1ee   : > { %v14398_v15 = vpop.permute.xlu0 %12567  ;;  %v14400_v20 = vpop.permute.xlu1 %598 }
 0x1ef   : > { %18721 = vst [vmem:[#allocation47_spill] sm:$0xff] %v14398_v15  ;;  %18722 = vst [vmem:[#allocation48_spill] sm:$0xff] %v14400_v20 }
 0x1f0   : > { %714 = vrot.lane.b32.xlu1 %v14179_v5, %s13841_s7 }
 0x1f1   : > { %684 = vrot.lane.b32.xlu0 %v14185_v7, %s13845_s9 }
 0x1f2   : > { %v14406_v9 = vpop.permute.xlu0 %518  ;;  %v14408_v22 = vpop.permute.xlu1 %504 }
 0x1f4   : > { %622 = vrot.lane.b32.xlu1 %v14197_v12, %s13840_s23 }
 0x1f5   : > { %700 = vrot.lane.b32.xlu0 %v14185_v7, %s13839_s21 }
 0x1f6   : > { %v14414_v27 = vpop.permute.xlu0 %534  ;;  %v14416_v29 = vpop.permute.xlu1 %520 }
 0x1f8   : > { %638 = vrot.lane.b32.xlu1 %v14197_v12, %s13842_s8 }
 0x1f9   : > { %716 = vrot.lane.b32.xlu0 %v14185_v7, %s13841_s7 }
 0x1fa   : > { %v12578_v42 = vpop.permute.xlu0 %12577  ;;  %v14422_v44 = vpop.permute.xlu1 %536 }
 0x1fb   : > { %v12580_v45 = vunpack.i.h.bf16 %v12578_v42  ;;  %v12579_v51 = vunpack.i.l.bf16 %v12578_v42 }
 0x1fc   : > { %654 = vrot.lane.b32.xlu1 %v14197_v12, %s13843_s30 }
 0x1fd   : > { %v11837_v30 = vpack.c.bf16 %v12580_v45, %v12579_v51  ;;  %624 = vrot.lane.b32.xlu0 %v14203_v14, %s13840_s23 }
 0x1fe   : > { %v14428_v23 = vpop.permute.xlu0 %584  ;;  %v14430_v16 = vpop.permute.xlu1 %552 }
 0x1ff   : > { %18723 = vst [vmem:[#allocation49_spill] sm:$0xff] %v14428_v23  ;;  %11839 = vmatprep.subr.msk.bf16.mxu1 %vm14348_vm2, %v11837_v30 }
 0x200   : > { %11842 = vmatpush3.bf16.xpose.msk.msra.mxu1 %vm14348_vm2, %v11837_v30  ;;  %670 = vrot.lane.b32.xlu1 %v14197_v12, %s13844_s6 }
 0x201   : > { %640 = vrot.lane.b32.xlu0 %v14203_v14, %s13842_s8 }
 0x202   : > { %v14440_v42 = vpop.permute.xlu0 %600  ;;  %v14442_v45 = vpop.permute.xlu1 %568 }
 0x203   : > { %18724 = vst [vmem:[#allocation50_spill] sm:$0xff] %v14440_v42  ;;  %18725 = vst [vmem:[#allocation51_spill] sm:$0xff] %v14442_v45 }
 0x204   : > { %686 = vrot.lane.b32.xlu1 %v14197_v12, %s13845_s9 }
 0x205   : > { %656 = vrot.lane.b32.xlu0 %v14203_v14, %s13843_s30 }
 0x206   : > { %v14448_v51 = vpop.permute.xlu1 %12587  ;;  %v14450_v32 = vpop.permute.xlu0 %12582 }
 0x207   : > { %18726 = vst [vmem:[#allocation52_spill] sm:$0xff] %v14448_v51  ;;  %18727 = vst [vmem:[#allocation53_spill] sm:$0xff] %v14450_v32 }
 0x208   : > { %702 = vrot.lane.b32.xlu1 %v14197_v12, %s13839_s21 }
 0x209   : > { %672 = vrot.lane.b32.xlu0 %v14203_v14, %s13844_s6 }
 0x20a   : > { %v14456_v30 = vpop.permute.xlu1 %586  ;;  %v14458_v25 = vpop.permute.xlu0 %506 }
 0x20b   : > { %18728 = vst [vmem:[#allocation54_spill] sm:$0xff] %v14456_v30 }
 0x20c   : > { %718 = vrot.lane.b32.xlu1 %v14197_v12, %s13841_s7 }
 0x20d   : > { %688 = vrot.lane.b32.xlu0 %v14203_v14, %s13845_s9 }
 0x20e   : > { %v14464_v31 = vpop.permute.xlu1 %602  ;;  %v14466_v24 = vpop.permute.xlu0 %522 }
 0x20f   : > { %18729 = vst [vmem:[#allocation55_spill] sm:$0xff] %v14464_v31 }
 0x210   : > { %12622 = vrot.lane.b32.xlu1 %v18730_v18, %s13846_s28 }
 0x211   : > { %704 = vrot.lane.b32.xlu0 %v14203_v14, %s13839_s21 }
 0x212   : > { %v14474_v11 = vpop.permute.xlu0 %538  ;;  %v14476_v17 = vpop.permute.xlu1 %508 }
 0x214   : > { %626 = vrot.lane.b32.xlu1 %v14230_v19, %s13840_s23 }
 0x215   : > { %720 = vrot.lane.b32.xlu0 %v14203_v14, %s13841_s7 }
 0x216   : > { %v14482_v10 = vpop.permute.xlu0 %554  ;;  %v14484_v32 = vpop.permute.xlu1 %524 }
 0x218   : > { %642 = vrot.lane.b32.xlu1 %v14230_v19, %s13842_s8 }
 0x219   : > { %628 = vrot.lane.b32.xlu0 %v14232_v21, %s13840_s23 }
 0x21a   : > { %v14490_v18 = vpop.permute.xlu0 %570  ;;  %v14492_v51 = vpop.permute.xlu1 %540 }
 0x21b   : > { %18731 = vst [vmem:[#allocation56_spill] sm:$0xff] %v14490_v18 }
 0x21c   : > { %658 = vrot.lane.b32.xlu1 %v14230_v19, %s13843_s30 }
 0x21d   : > { %644 = vrot.lane.b32.xlu0 %v14232_v21, %s13842_s8 }
 0x21e   : > { %v14498_v56 = vpop.permute.xlu0 %556  ;;  %v12593_v4 = vpop.permute.xlu1 %12592 }
 0x21f   : > { %v12595_v15 = vunpack.i.h.bf16 %v12593_v4  ;;  %v12594_v61 = vunpack.i.l.bf16 %v12593_v4 }
 0x220   : > { %674 = vrot.lane.b32.xlu1 %v14230_v19, %s13844_s6 }
 0x221   : > { %v11843_v54 = vpack.c.bf16 %v12595_v15, %v12594_v61  ;;  %660 = vrot.lane.b32.xlu0 %v14232_v21, %s13843_s30 }
 0x222   : > { %v14504_v47 = vpop.permute.xlu0 %572  ;;  %v14506_v14 = vpop.permute.xlu1 %12597 }
 0x223   : > { %18732 = vst [vmem:[#allocation57_spill] sm:$0xff] %v14504_v47  ;;  %18733 = vst [vmem:[#allocation58_spill] sm:$0xff] %v14506_v14  ;;  %11845 = vmatprep.subr.msk.bf16.mxu1 %vm14348_vm2, %v11843_v54 }
 0x224   : > { %11848 = vmatpush3.bf16.xpose.msk.msra.mxu1 %vm14348_vm2, %v11843_v54  ;;  %690 = vrot.lane.b32.xlu1 %v14230_v19, %s13845_s9 }
 0x225   : > { %676 = vrot.lane.b32.xlu0 %v14232_v21, %s13844_s6 }
 0x226   : > { %v14516_v61 = vpop.permute.xlu0 %588  ;;  %v14518_v4 = vpop.permute.xlu1 %12602 }
 0x227   : > { %18734 = vst [vmem:[#allocation59_spill] sm:$0xff] %v14516_v61  ;;  %18735 = vst [vmem:[#allocation60_spill] sm:$0xff] %v14518_v4  ;;  %v18738_v4 = vpack.i.bf16 %v14232_v21, %v14230_v19 }
 0x228   : > { %706 = vrot.lane.b32.xlu1 %v14230_v19, %s13839_s21 }
 0x229   : > { %692 = vrot.lane.b32.xlu0 %v14232_v21, %s13845_s9 }
 0x22a   : > { %v14524_v15 = vpop.permute.xlu0 %604  ;;  %v14526_v14 = vpop.permute.xlu1 %558 }
 0x22b   : > { %18736 = vst [vmem:[#allocation61_spill] sm:$0xff] %v14524_v15 }
 0x22c   : > { %722 = vrot.lane.b32.xlu1 %v14230_v19, %s13841_s7 }
 0x22d   : > { %708 = vrot.lane.b32.xlu0 %v14232_v21, %s13839_s21 }
 0x22e   : > { %v14532_v54 = vpop.permute.xlu1 %574  ;;  %v14534_v12 = vpop.permute.xlu0 %510 }
 0x22f   : > { %18737 = vst [vmem:[#allocation62_spill] sm:$0xff] %v14532_v54 }
 0x230   : > { %12627 = vrot.lane.b32.xlu1 %v18738_v4, %s13846_s28 }
 0x231   : > { %724 = vrot.lane.b32.xlu0 %v14232_v21, %s13841_s7 }
 0x232   : > { %v14542_v7 = vpop.permute.xlu1 %590  ;;  %v14544_v5 = vpop.permute.xlu0 %526 }
 0x233   : > { %18739 = vst [vmem:[#allocation63_spill] sm:$0xff] %v14542_v7 }
 0x234   : > { %630 = vrot.lane.b32.xlu1 %v14270_v26, %s13840_s23 }
 0x235   : > { %632 = vrot.lane.b32.xlu0 %v14272_v28, %s13840_s23 }
 0x236   : > { %v14550_v60 = vpop.permute.xlu1 %606  ;;  %v14552_v3 = vpop.permute.xlu0 %542 }
 0x237   : > { %18740 = vst [vmem:[#allocation64_spill] sm:$0xff] %v14550_v60  ;;  %18741 = vst [vmem:[#allocation65_spill] sm:$0xff] %v14552_v3 }
 0x238   : > { %646 = vrot.lane.b32.xlu1 %v14270_v26, %s13842_s8 }
 0x239   : > { %648 = vrot.lane.b32.xlu0 %v14272_v28, %s13842_s8 }
 0x23a   : > { %v12608_v4 = vpop.permute.xlu0 %12607  ;;  %v14558_v21 = vpop.permute.xlu1 %512 }
 0x23b   : > { %v12610_v19 = vunpack.i.h.bf16 %v12608_v4  ;;  %v12609_v53 = vunpack.i.l.bf16 %v12608_v4 }
 0x23c   : > { %662 = vrot.lane.b32.xlu1 %v14270_v26, %s13843_s30 }
 0x23d   : > { %v11849_v46 = vpack.c.bf16 %v12610_v19, %v12609_v53  ;;  %664 = vrot.lane.b32.xlu0 %v14272_v28, %s13843_s30 }
 0x23e   : > { %v14564_v60 = vpop.permute.xlu0 %576  ;;  %v14566_v7 = vpop.permute.xlu1 %528 }
 0x23f   : > { %18742 = vst [vmem:[#allocation66_spill] sm:$0xff] %v14564_v60  ;;  %11851 = vmatprep.subr.msk.bf16.mxu1 %vm14348_vm2, %v11849_v46 }
 0x240   : > { %11854 = vmatpush3.bf16.xpose.msk.msra.mxu1 %vm14348_vm2, %v11849_v46  ;;  %678 = vrot.lane.b32.xlu1 %v14270_v26, %s13844_s6 }
 0x241   : > { %680 = vrot.lane.b32.xlu0 %v14272_v28, %s13844_s6 }
 0x242   : > { %v14576_v53 = vpop.permute.xlu0 %592  ;;  %v14578_v19 = vpop.permute.xlu1 %544 }
 0x243   : > { %18743 = vst [vmem:[#allocation67_spill] sm:$0xff] %v14576_v53  ;;  %18744 = vst [vmem:[#allocation68_spill] sm:$0xff] %v14578_v19 }
 0x244   : > { %694 = vrot.lane.b32.xlu1 %v14270_v26, %s13845_s9 }
 0x245   : > { %696 = vrot.lane.b32.xlu0 %v14272_v28, %s13845_s9 }
 0x246   : > { %v14584_v4 = vpop.permute.xlu0 %608  ;;  %v14586_v49 = vpop.permute.xlu1 %560 }
 0x247   : > { %18745 = vst [vmem:[#allocation69_spill] sm:$0xff] %v14584_v4  ;;  %10712 = vmatmul.mubr.msk.f32.vlgmr.msra.gmra.mrb[0].mxu1 %vm1098_vm1, %v14120_v43 }
 0x248   : > { %10714 = vmatprep.mubr.msk.f32.mxu1 %vm1098_vm1, %v14129_v48  ;;  %710 = vrot.lane.b32.xlu1 %v14270_v26, %s13839_s21  ;;  %v12646_v48 = vpack.i.bf16 %v14334_v40, %v14324_v37  ;;  %v12651_v40 = vpack.i.bf16 %v14364_v58, %v14332_v39 }
 0x249   : > { %712 = vrot.lane.b32.xlu0 %v14272_v28, %s13839_s21 }
 0x24a   : > { %v14596_v46 = vpop.permute.xlu0 %12612  ;;  %v14598_v53 = vpop.permute.xlu1 %618 }
 0x24b   : > { %18746 = vst [vmem:[#allocation70_spill] sm:$0xff] %v14596_v46  ;;  %18747 = vst [vmem:[#allocation71_spill] sm:$0xff] %v14598_v53  ;;  %10715 = vmatmul.mubr.msk.f32.gmra.mrb[2].mxu1 %vm1098_vm1, %v14134_v50  ;;  %v18749_v50 = vpack.i.bf16 %v14272_v28, %v14270_v26 }
 0x24c   : > { %10717 = vmatprep.mubr.msk.f32.mxu1 %vm1098_vm1, %v14145_v55  ;;  %726 = vrot.lane.b32.xlu1 %v14270_v26, %s13841_s7  ;;  %v12636_v55 = vpack.i.bf16 %v14352_v52, %v14306_v34  ;;  %v12696_v26 = vpack.i.bf16 %v14428_v23, %v14392_v13  ;;  %v12711_v23 = vpack.i.bf16 %v14484_v32, %v14466_v24 }
 0x24d   : > { %728 = vrot.lane.b32.xlu0 %v14272_v28, %s13841_s7 }
 0x24e   : > { %v14608_v43 = vpop.permute.xlu1 %634 }
 0x24f   : > { %v14612_v46 = vpop.permute.xlu0 %620  ;;  %10718 = vmatmul.mubr.msk.f32.gmra.mrb[4].mxu1 %vm1098_vm1, %v14149_v57  ;;  %v12641_v57 = vpack.i.bf16 %v14326_v38, %v14316_v36 }
 0x250   : > { %18748 = vst [vmem:[#allocation72_spill] sm:$0xff] %v14612_v46  ;;  %10720 = vmatprep.mubr.msk.f32.mxu1 %vm1098_vm1, %v14161_v62  ;;  %12632 = vrot.lane.b32.xlu1 %v18749_v50, %s13846_s28 }
 0x251   : > { %12647 = vrot.lane.b32.xlu0 %v12646_v48, %s13846_s28  ;;  %v12656_v48 = vpack.i.bf16 %v14372_v63, %v14340_v41 }
 0x252   : > { %v14625_v4 = vpop.permute.xlu1 %650 }
 0x253   : > { %18750 = vst [vmem:[#allocation73_spill] sm:$0xff] %v14625_v4  ;;  %v14629_v37 = vpop.permute.xlu0 %636  ;;  %10721 = vmatmul.mubr.msk.f32.gmra.mrb[6].mxu1 %vm1098_vm1, %v14167_v0  ;;  %v12676_v0 = vpack.i.bf16 %v14416_v29, %v14406_v9 }
 0x254   : > { %18751 = vst [vmem:[#allocation74_spill] sm:$0xff] %v14629_v37  ;;  %10739 = vmatprep.mubr.msk.f32.mxu1 %vm1098_vm1, %v14306_v34  ;;  %12637 = vrot.lane.b32.xlu1 %v12636_v55, %s13846_s28  ;;  %v12686_v55 = vpack.i.bf16 %v14430_v16, %v14374_v1 }
 0x255   : > { %12652 = vrot.lane.b32.xlu0 %v12651_v40, %s13846_s28  ;;  %v12661_v40 = vpack.i.bf16 %v14380_v2, %v14304_v33  ;;  %v12721_v2 = vpack.i.bf16 %v14498_v56, %v14482_v10 }
 0x256   : > { %v14639_v62 = vpop.permute.xlu1 %666 }
 0x257   : > { %18752 = vst [vmem:[#allocation75_spill] sm:$0xff] %v14639_v62  ;;  %v14643_v50 = vpop.permute.xlu0 %652 }
 0x258   : > { %18753 = vst [vmem:[#allocation76_spill] sm:$0xff] %v14643_v50  ;;  %12642 = vrot.lane.b32.xlu1 %v12641_v57, %s13846_s28 }
 0x259   : > { %12657 = vrot.lane.b32.xlu0 %v12656_v48, %s13846_s28  ;;  %v12666_v48 = vpack.i.bf16 %v14390_v8, %v14314_v35  ;;  %v12706_v8 = vpack.i.bf16 %v14476_v17, %v14458_v25 }
 0x25a   : > { %v14649_v34 = vpop.permute.xlu1 %682 }
 0x25b   : > { %18754 = vst [vmem:[#allocation77_spill] sm:$0xff] %v14649_v34  ;;  %v14653_v36 = vpop.permute.xlu0 %12617 }
 0x25c   : > { %18755 = vst [vmem:[#allocation78_spill] sm:$0xff] %v14653_v36  ;;  %12677 = vrot.lane.b32.xlu1 %v12676_v0, %s13846_s28  ;;  %v18773_v36 = vld [vmem:[#allocation63_spill] sm:$0xff] }
 0x25d   : > { %12662 = vrot.lane.b32.xlu0 %v12661_v40, %s13846_s28  ;;  %v12671_v40 = vpack.i.bf16 %v14408_v22, %v14366_v59 }
 0x25e   : > { %v14659_v57 = vpop.permute.xlu1 %698 }
 0x25f   : > { %18756 = vst [vmem:[#allocation79_spill] sm:$0xff] %v14659_v57  ;;  %v14663_v28 = vpop.permute.xlu0 %668 }
 0x260   : > { %18757 = vst [vmem:[#allocation80_spill] sm:$0xff] %v14663_v28  ;;  %12687 = vrot.lane.b32.xlu1 %v12686_v55, %s13846_s28 }
 0x261   : > { %12667 = vrot.lane.b32.xlu0 %v12666_v48, %s13846_s28  ;;  %v12681_v48 = vpack.i.bf16 %v14422_v44, %v14414_v27 }
 0x262   : > { %v14669_v0 = vpop.permute.xlu1 %714 }
 0x263   : > { %18758 = vst [vmem:[#allocation81_spill] sm:$0xff] %v14669_v0  ;;  %v14673_v63 = vpop.permute.xlu0 %684 }
 0x264   : > { %18759 = vst [vmem:[#allocation82_spill] sm:$0xff] %v14673_v63  ;;  %12697 = vrot.lane.b32.xlu1 %v12696_v26, %s13846_s28 }
 0x265   : > { %12672 = vrot.lane.b32.xlu0 %v12671_v40, %s13846_s28  ;;  %v12691_v40 = vpack.i.bf16 %v14442_v45, %v14382_v6  ;;  %v12731_v45 = vpack.i.bf16 %v14516_v61, %v14456_v30  ;;  %v12751_v61 = vpack.i.bf16 %v14578_v19, %v14552_v3  ;;  %v18774_v19 = vld [vmem:[#allocation67_spill] sm:$0xff] }
 0x266   : > { %v14679_v55 = vpop.permute.xlu1 %622  ;;  %v12766_v3 = vpack.i.bf16 %v18774_v19, %v18773_v36 }
 0x267   : > { %18760 = vst [vmem:[#allocation83_spill] sm:$0xff] %v14679_v55  ;;  %v14683_v35 = vpop.permute.xlu0 %700 }
 0x268   : > { %18761 = vst [vmem:[#allocation84_spill] sm:$0xff] %v14683_v35  ;;  %12707 = vrot.lane.b32.xlu1 %v12706_v8, %s13846_s28 }
 0x269   : > { %12682 = vrot.lane.b32.xlu0 %v12681_v48, %s13846_s28  ;;  %v12701_v48 = vpack.i.bf16 %v14440_v42, %v14400_v20  ;;  %v12746_v42 = vpack.i.bf16 %v14566_v7, %v14544_v5 }
 0x26a   : > { %v14689_v26 = vpop.permute.xlu1 %638 }
 0x26b   : > { %v14693_v13 = vpop.permute.xlu0 %716 }
 0x26c   : > { %18762 = vst [vmem:[#allocation85_spill] sm:$0xff] %v14693_v13  ;;  %12712 = vrot.lane.b32.xlu1 %v12711_v23, %s13846_s28 }
 0x26d   : > { %12692 = vrot.lane.b32.xlu0 %v12691_v40, %s13846_s28  ;;  %v12716_v40 = vpack.i.bf16 %v14492_v51, %v14474_v11 }
 0x26e   : > { %v14699_v8 = vpop.permute.xlu1 %654 }
 0x26f   : > { %18763 = vst [vmem:[#allocation86_spill] sm:$0xff] %v14699_v8  ;;  %v14703_v41 = vpop.permute.xlu0 %624 }
 0x270   : > { %18764 = vst [vmem:[#allocation87_spill] sm:$0xff] %v14703_v41  ;;  %12722 = vrot.lane.b32.xlu1 %v12721_v2, %s13846_s28 }
 0x271   : > { %12702 = vrot.lane.b32.xlu0 %v12701_v48, %s13846_s28  ;;  %v12726_v48 = vpack.i.bf16 %v14504_v47, %v14490_v18  ;;  %v12756_v47 = vpack.i.bf16 %v14586_v49, %v14526_v14 }
 0x272   : > { %v14709_v23 = vpop.permute.xlu1 %670 }
 0x273   : > { %18765 = vst [vmem:[#allocation88_spill] sm:$0xff] %v14709_v23  ;;  %v14713_v6 = vpop.permute.xlu0 %640 }
 0x274   : > { %12732 = vrot.lane.b32.xlu1 %v12731_v45, %s13846_s28 }
 0x275   : > { %12717 = vrot.lane.b32.xlu0 %v12716_v40, %s13846_s28  ;;  %v12736_v40 = vpack.i.bf16 %v14524_v15, %v14464_v31  ;;  %v12761_v15 = vpack.i.bf16 %v14564_v60, %v14532_v54 }
 0x276   : > { %v14719_v2 = vpop.permute.xlu1 %686 }
 0x277   : > { %18766 = vst [vmem:[#allocation89_spill] sm:$0xff] %v14719_v2  ;;  %v14723_v20 = vpop.permute.xlu0 %656 }
 0x278   : > { %18767 = vst [vmem:[#allocation90_spill] sm:$0xff] %v14723_v20  ;;  %12747 = vrot.lane.b32.xlu1 %v12746_v42, %s13846_s28 }
 0x279   : > { %12727 = vrot.lane.b32.xlu0 %v12726_v48, %s13846_s28  ;;  %v12741_v48 = vpack.i.bf16 %v14558_v21, %v14534_v12 }
 0x27a   : > { %v14729_v45 = vpop.permute.xlu1 %702 }
 0x27b   : > { %18768 = vst [vmem:[#allocation91_spill] sm:$0xff] %v14729_v45  ;;  %v14733_v30 = vpop.permute.xlu0 %672 }
 0x27c   : > { %18769 = vst [vmem:[#allocation92_spill] sm:$0xff] %v14733_v30  ;;  %12752 = vrot.lane.b32.xlu1 %v12751_v61, %s13846_s28 }
 0x27d   : > { %12737 = vrot.lane.b32.xlu0 %v12736_v40, %s13846_s28  ;;  %v12776_v40 = vpack.i.bf16 %v14612_v46, %v14598_v53  ;;  %v18777_v46 = vld [vmem:[#allocation64_spill] sm:$0xff]  ;;  %v18778_v53 = vld [vmem:[#allocation69_spill] sm:$0xff] }
 0x27e   : > { %v14739_v42 = vpop.permute.xlu1 %718  ;;  %v12771_v54 = vpack.i.bf16 %v18778_v53, %v18777_v46 }
 0x27f   : > { %18770 = vst [vmem:[#allocation93_spill] sm:$0xff] %v14739_v42  ;;  %v14743_v18 = vpop.permute.xlu0 %688 }
 0x280   : > { %18771 = vst [vmem:[#allocation94_spill] sm:$0xff] %v14743_v18  ;;  %12757 = vrot.lane.b32.xlu1 %v12756_v47, %s13846_s28 }
 0x281   : > { %12742 = vrot.lane.b32.xlu0 %v12741_v48, %s13846_s28  ;;  %v12781_v48 = vpack.i.bf16 %v14629_v37, %v14608_v43  ;;  %v12816_v37 = vpack.i.bf16 %v14713_v6, %v14689_v26 }
 0x282   : > { %v14749_v61 = vpop.permute.xlu1 %12622 }
 0x283   : > { %v14753_v31 = vpop.permute.xlu0 %704 }
 0x284   : > { %18772 = vst [vmem:[#allocation95_spill] sm:$0xff] %v14753_v31  ;;  %12762 = vrot.lane.b32.xlu1 %v12761_v15, %s13846_s28 }
 0x285   : > { %12777 = vrot.lane.b32.xlu0 %v12776_v40, %s13846_s28  ;;  %v12786_v40 = vpack.i.bf16 %v14643_v50, %v14625_v4  ;;  %v12826_v50 = vpack.i.bf16 %v14733_v30, %v14709_v23 }
 0x286   : > { %v14759_v47 = vpop.permute.xlu1 %626 }
 0x287   : > { %18775 = vst [vmem:[#allocation63_spill] sm:$0xff] %v14759_v47  ;;  %v14763_v60 = vpop.permute.xlu0 %720 }
 0x288   : > { %18776 = vst [vmem:[#allocation96_spill] sm:$0xff] %v14763_v60  ;;  %12767 = vrot.lane.b32.xlu1 %v12766_v3, %s13846_s28 }
 0x289   : > { %12782 = vrot.lane.b32.xlu0 %v12781_v48, %s13846_s28  ;;  %v12791_v48 = vpack.i.bf16 %v14663_v28, %v14639_v62  ;;  %v12836_v28 = vpack.i.bf16 %v14753_v31, %v14729_v45 }
 0x28a   : > { %v14769_v15 = vpop.permute.xlu1 %642 }
 0x28b   : > { %v14773_v19 = vpop.permute.xlu0 %628 }
 0x28c   : > { %18779 = vst [vmem:[#allocation64_spill] sm:$0xff] %v14773_v19  ;;  %12772 = vrot.lane.b32.xlu1 %v12771_v54, %s13846_s28 }
 0x28d   : > { %12787 = vrot.lane.b32.xlu0 %v12786_v40, %s13846_s28  ;;  %v12796_v40 = vpack.i.bf16 %v14673_v63, %v14649_v34 }
 0x28e   : > { %v14779_v3 = vpop.permute.xlu1 %658 }
 0x28f   : > { %18780 = vst [vmem:[#allocation97_spill] sm:$0xff] %v14779_v3  ;;  %v14783_v53 = vpop.permute.xlu0 %644 }
 0x290   : > { %12817 = vrot.lane.b32.xlu1 %v12816_v37, %s13846_s28  ;;  %v12851_v63 = vpack.i.bf16 %v14783_v53, %v14769_v15 }
 0x291   : > { %12792 = vrot.lane.b32.xlu0 %v12791_v48, %s13846_s28  ;;  %v12801_v48 = vpack.i.bf16 %v14683_v35, %v14659_v57 }
 0x292   : > { %v14789_v54 = vpop.permute.xlu1 %674 }
 0x293   : > { %18781 = vst [vmem:[#allocation98_spill] sm:$0xff] %v14789_v54  ;;  %v14793_v4 = vpop.permute.xlu0 %660 }
 0x294   : > { %18782 = vst [vmem:[#allocation99_spill] sm:$0xff] %v14793_v4  ;;  %12827 = vrot.lane.b32.xlu1 %v12826_v50, %s13846_s28 }
 0x295   : > { %12797 = vrot.lane.b32.xlu0 %v12796_v40, %s13846_s28  ;;  %v12806_v40 = vpack.i.bf16 %v14693_v13, %v14669_v0 }
 0x296   : > { %v14799_v37 = vpop.permute.xlu1 %690 }
 0x297   : > { %18783 = vst [vmem:[#allocation100_spill] sm:$0xff] %v14799_v37  ;;  %v14803_v30 = vpop.permute.xlu0 %676 }
 0x298   : > { %18784 = vst [vmem:[#allocation101_spill] sm:$0xff] %v14803_v30  ;;  %12837 = vrot.lane.b32.xlu1 %v12836_v28, %s13846_s28  ;;  %v12861_v45 = vpack.i.bf16 %v14803_v30, %v14789_v54 }
 0x299   : > { %12802 = vrot.lane.b32.xlu0 %v12801_v48, %s13846_s28  ;;  %v12811_v48 = vpack.i.bf16 %v14703_v41, %v14679_v55 }
 0x29a   : > { %v14809_v50 = vpop.permute.xlu1 %706 }
 0x29b   : > { %18785 = vst [vmem:[#allocation102_spill] sm:$0xff] %v14809_v50  ;;  %v14813_v31 = vpop.permute.xlu0 %692 }
 0x29c   : > { %18786 = vst [vmem:[#allocation103_spill] sm:$0xff] %v14813_v31  ;;  %12852 = vrot.lane.b32.xlu1 %v12851_v63, %s13846_s28 }
 0x29d   : > { %12807 = vrot.lane.b32.xlu0 %v12806_v40, %s13846_s28  ;;  %v12821_v40 = vpack.i.bf16 %v14723_v20, %v14699_v8 }
 0x29e   : > { %v14819_v28 = vpop.permute.xlu1 %722 }
 0x29f   : > { %18787 = vst [vmem:[#allocation104_spill] sm:$0xff] %v14819_v28  ;;  %v14823_v35 = vpop.permute.xlu0 %708 }
 0x2a0   : > { %18788 = vst [vmem:[#allocation105_spill] sm:$0xff] %v14823_v35  ;;  %12862 = vrot.lane.b32.xlu1 %v12861_v45, %s13846_s28  ;;  %v12871_v13 = vpack.i.bf16 %v14823_v35, %v14809_v50  ;;  %v12831_v45 = vpack.i.bf16 %v14743_v18, %v14719_v2 }
 0x2a1   : > { %12812 = vrot.lane.b32.xlu0 %v12811_v48, %s13846_s28 }
 0x2a2   : > { %v14829_v63 = vpop.permute.xlu1 %12627 }
 0x2a3   : > { %v14833_v0 = vpop.permute.xlu0 %724 }
 0x2a4   : > { %18789 = vst [vmem:[#allocation106_spill] sm:$0xff] %v14833_v0  ;;  %12872 = vrot.lane.b32.xlu1 %v12871_v13, %s13846_s28  ;;  %v12841_v13 = vpack.i.bf16 %v14763_v60, %v14739_v42 }
 0x2a5   : > { %12822 = vrot.lane.b32.xlu0 %v12821_v40, %s13846_s28 }
 0x2a6   : > { %v14837_v34 = vpop.permute.xlu1 %630 }
 0x2a7   : > { %18790 = vst [vmem:[#allocation107_spill] sm:$0xff] %v14837_v34  ;;  %v14841_v48 = vpop.permute.xlu0 %632 }
 0x2a8   : > { %18791 = vst [vmem:[#allocation108_spill] sm:$0xff] %v14841_v48  ;;  %v12886_v35 = vpack.i.bf16 %v14841_v48, %v14837_v34 }
 0x2a9   : > { %12832 = vrot.lane.b32.xlu0 %v12831_v45, %s13846_s28  ;;  %v12846_v45 = vpack.i.bf16 %v14773_v19, %v14759_v47 }
 0x2aa   : > { %12887 = vrot.lane.b32.xlu1 %v12886_v35, %s13846_s28  ;;  %v14847_v50 = vpop.permute.xlu1 %646 }
 0x2ab   : > { %18792 = vst [vmem:[#allocation109_spill] sm:$0xff] %v14847_v50  ;;  %v14851_v40 = vpop.permute.xlu0 %648 }
 0x2ac   : > { %18793 = vst [vmem:[#allocation110_spill] sm:$0xff] %v14851_v40  ;;  %v12891_v57 = vpack.i.bf16 %v14851_v40, %v14847_v50 }
 0x2ad   : > { %12842 = vrot.lane.b32.xlu0 %v12841_v13, %s13846_s28  ;;  %v12856_v13 = vpack.i.bf16 %v14793_v4, %v14779_v3 }
 0x2ae   : > { %12892 = vrot.lane.b32.xlu1 %v12891_v57, %s13846_s28  ;;  %v14857_v18 = vpop.permute.xlu1 %662 }
 0x2af   : > { %18794 = vst [vmem:[#allocation111_spill] sm:$0xff] %v14857_v18  ;;  %v14861_v35 = vpop.permute.xlu0 %664 }
 0x2b0   : > { %18795 = vst [vmem:[#allocation112_spill] sm:$0xff] %v14861_v35  ;;  %v12896_v2 = vpack.i.bf16 %v14861_v35, %v14857_v18 }
 0x2b1   : > { %12847 = vrot.lane.b32.xlu0 %v12846_v45, %s13846_s28  ;;  %v12866_v45 = vpack.i.bf16 %v14813_v31, %v14799_v37 }
 0x2b2   : > { %12897 = vrot.lane.b32.xlu1 %v12896_v2, %s13846_s28  ;;  %v14867_v60 = vpop.permute.xlu1 %678 }
 0x2b3   : > { %18796 = vst [vmem:[#allocation113_spill] sm:$0xff] %v14867_v60  ;;  %v14871_v57 = vpop.permute.xlu0 %680 }
 0x2b4   : > { %18797 = vst [vmem:[#allocation114_spill] sm:$0xff] %v14871_v57  ;;  %v12901_v42 = vpack.i.bf16 %v14871_v57, %v14867_v60 }
 0x2b5   : > { %12857 = vrot.lane.b32.xlu0 %v12856_v13, %s13846_s28  ;;  %v12876_v13 = vpack.i.bf16 %v14833_v0, %v14819_v28 }
 0x2b6   : > { %12902 = vrot.lane.b32.xlu1 %v12901_v42, %s13846_s28  ;;  %v14877_v20 = vpop.permute.xlu1 %694 }
 0x2b7   : > { %18798 = vst [vmem:[#allocation115_spill] sm:$0xff] %v14877_v20  ;;  %v14881_v2 = vpop.permute.xlu0 %696 }
 0x2b8   : > { %18799 = vst [vmem:[#allocation116_spill] sm:$0xff] %v14881_v2  ;;  %v12906_v35 = vpack.i.bf16 %v14881_v2, %v14877_v20 }
 0x2b9   : > { %12867 = vrot.lane.b32.xlu0 %v12866_v45, %s13846_s28  ;;  %v18804_v45 = vld [vmem:[#allocation12_spill] sm:$0xff] }
 0x2ba   : > { %12907 = vrot.lane.b32.xlu1 %v12906_v35, %s13846_s28  ;;  %v14887_v18 = vpop.permute.xlu1 %710 }
 0x2bb   : > { %18800 = vst [vmem:[#allocation117_spill] sm:$0xff] %v14887_v18  ;;  %v14891_v42 = vpop.permute.xlu0 %712 }
 0x2bc   : > { %18801 = vst [vmem:[#allocation118_spill] sm:$0xff] %v14891_v42  ;;  %v12911_v4 = vpack.i.bf16 %v14891_v42, %v14887_v18 }
 0x2bd   : > { %12877 = vrot.lane.b32.xlu0 %v12876_v13, %s13846_s28  ;;  %v18805_v13 = vld [vmem:[#allocation14_spill] sm:$0xff] }
 0x2be   : > { %12912 = vrot.lane.b32.xlu1 %v12911_v4, %s13846_s28  ;;  %v14897_v31 = vpop.permute.xlu1 %726  ;;  %v18806_v4 = vld [vmem:[#allocation18_spill] sm:$0xff] }
 0x2bf   : > { %18802 = vst [vmem:[#allocation119_spill] sm:$0xff] %v14897_v31  ;;  %v14899_v2 = vpop.permute.xlu0 %728 }
 0x2c0   : > { %18803 = vst [vmem:[#allocation120_spill] sm:$0xff] %v14899_v2  ;;  %v12916_v35 = vpack.i.bf16 %v14899_v2, %v14897_v31 }
 0x2c1   : > { %12882 = vrot.lane.b32.xlu0 %v18804_v45, %s13843_s30 }
 0x2c2   : > { %12917 = vrot.lane.b32.xlu1 %v12916_v35, %s13846_s28  ;;  %v14906_v0 = vpop.permute.xlu1 %12632  ;;  %v18807_v35 = vld [vmem:[#allocation16_spill] sm:$0xff] }
 0x2c3   : > { %v14908_v28 = vpop.permute.xlu0 %12647 }
 0x2c5   : > { %12927 = vrot.lane.b32.xlu0 %v18805_v13, %s13843_s30 }
 0x2c6   : > { %12922 = vrot.lane.b32.xlu1 %v18806_v4, %s13842_s8  ;;  %v12638_v20 = vpop.permute.xlu1 %12637 }
 0x2c7   : > { %v12640_v37 = vunpack.i.h.bf16 %v12638_v20  ;;  %v12639_v42 = vunpack.i.l.bf16 %v12638_v20  ;;  %v12653_v18 = vpop.permute.xlu0 %12652 }
 0x2c9   : > { %v11855_v2 = vpack.c.bf16 %v12640_v37, %v12639_v42  ;;  %12937 = vrot.lane.b32.xlu0 %v18804_v45, %s13844_s6 }
 0x2ca   : > { %12932 = vrot.lane.b32.xlu1 %v18807_v35, %s13843_s30  ;;  %v12643_v31 = vpop.permute.xlu1 %12642 }
 0x2cb   : > { %v12645_v3 = vunpack.i.h.bf16 %v12643_v31  ;;  %v12644_v57 = vunpack.i.l.bf16 %v12643_v31  ;;  %v14918_v60 = vpop.permute.xlu0 %12657  ;;  %11857 = vmatprep.subr.msk.bf16.mxu1 %vm14348_vm2, %v11855_v2 }
 0x2cc   : > { %11860 = vmatpush3.bf16.xpose.msk.msra.mxu1 %vm14348_vm2, %v11855_v2 }
 0x2cd   : > { %v11879_v20 = vpack.c.bf16 %v12645_v3, %v12644_v57 }
 0x2ce   : > { %v12678_v4 = vpop.permute.xlu1 %12677 }
 0x2cf   : > { %v12680_v37 = vunpack.i.h.bf16 %v12678_v4  ;;  %v12679_v42 = vunpack.i.l.bf16 %v12678_v4  ;;  %v14924_v8 = vpop.permute.xlu0 %12662  ;;  %11881 = vmatprep.subr.msk.bf16.mxu0 %vm14348_vm2, %v11879_v20 }
 0x2d0   : > { %11884 = vmatpush3.bf16.xpose.msk.msra.mxu0 %vm14348_vm2, %v11879_v20 }
 0x2d1   : > { %v11885_v31 = vpack.c.bf16 %v12680_v37, %v12679_v42 }
 0x2d2   : > { %v12688_v45 = vpop.permute.xlu1 %12687 }
 0x2d3   : > { %v14930_v35 = vpop.permute.xlu0 %12667  ;;  %11887 = vmatprep.subr.msk.bf16.mxu0 %vm14348_vm2, %v11885_v31  ;;  %v12689_v50 = vunpack.i.l.bf16 %v12688_v45 }
 0x2d6   : > { %v14934_v2 = vpop.permute.xlu1 %12697 }
 0x2d7   : > { %v12673_v3 = vpop.permute.xlu0 %12672 }
 0x2d8   : > { %v12675_v57 = vunpack.i.h.bf16 %v12673_v3  ;;  %v12674_v4 = vunpack.i.l.bf16 %v12673_v3  ;;  %11890 = vmatpush3.bf16.xpose.msk.msra.mxu0 %vm14348_vm2, %v11885_v31 }
 0x2da   : > { %v11861_v30 = vpack.c.bf16 %v12675_v57, %v12674_v4  ;;  %v12708_v54 = vpop.permute.xlu1 %12707  ;;  %v12654_v4 = vunpack.i.l.bf16 %v12653_v18 }
 0x2db   : > { %v12710_v23 = vunpack.i.h.bf16 %v12708_v54  ;;  %v12709_v48 = vunpack.i.l.bf16 %v12708_v54  ;;  %v12683_v20 = vpop.permute.xlu0 %12682 }
 0x2dc   : > { %11863 = vmatprep.subr.msk.bf16.mxu1 %vm14348_vm2, %v11861_v30 }
 0x2dd   : > { %v11867_v37 = vpack.c.bf16 %v12710_v23, %v12709_v48  ;;  %11866 = vmatpush3.bf16.xpose.msk.msra.mxu1 %vm14348_vm2, %v11861_v30  ;;  %v12655_v48 = vunpack.i.h.bf16 %v12653_v18  ;;  %v12649_v18 = vunpack.i.l.bf16 %v14908_v28 }
 0x2de   : > { %v12713_v42 = vpop.permute.xlu1 %12712 }
 0x2df   : > { %v12715_v34 = vunpack.i.h.bf16 %v12713_v42  ;;  %v12714_v19 = vunpack.i.l.bf16 %v12713_v42  ;;  %v14942_v62 = vpop.permute.xlu0 %12692  ;;  %11869 = vmatprep.subr.msk.bf16.mxu1 %vm14348_vm2, %v11867_v37  ;;  %v11927_v40 = vpack.c.bf16 %v12655_v48, %v12654_v4 }
 0x2e1   : > { %v11891_v31 = vpack.c.bf16 %v12715_v34, %v12714_v19 }
 0x2e2   : > { %v12723_v3 = vpop.permute.xlu1 %12722 }
 0x2e3   : > { %v14946_v57 = vpop.permute.xlu0 %12702  ;;  %11893 = vmatprep.subr.msk.bf16.mxu0 %vm14348_vm2, %v11891_v31 }
 0x2e4   : > { %11896 = vmatpush3.bf16.xpose.msk.msra.mxu0 %vm14348_vm2, %v11891_v31 }
 0x2e5   : > { %11872 = vmatpush3.bf16.xpose.msk.msra.mxu1 %vm14348_vm2, %v11867_v37  ;;  %v12650_v37 = vunpack.i.h.bf16 %v14908_v28  ;;  %v12724_v28 = vunpack.i.l.bf16 %v12723_v3 }
 0x2e6   : > { %v14954_v30 = vpop.permute.xlu1 %12732 }
 0x2e7   : > { %v12718_v23 = vpop.permute.xlu0 %12717 }
 0x2ea   : > { %v12748_v54 = vpop.permute.xlu1 %12747 }
 0x2eb   : > { %v12750_v42 = vunpack.i.h.bf16 %v12748_v54  ;;  %v12749_v19 = vunpack.i.l.bf16 %v12748_v54  ;;  %v14956_v34 = vpop.permute.xlu0 %12727  ;;  %v12690_v54 = vunpack.i.h.bf16 %v12688_v45 }
 0x2ed   : > { %v11897_v47 = vpack.c.bf16 %v12750_v42, %v12749_v19  ;;  %v11903_v19 = vpack.c.bf16 %v12650_v37, %v12649_v18  ;;  %v11933_v55 = vpack.c.bf16 %v12690_v54, %v12689_v50  ;;  %v12694_v54 = vunpack.i.l.bf16 %v14942_v62 }
 0x2ee   : > { %v12753_v50 = vpop.permute.xlu1 %12752 }
 0x2ef   : > { %v14958_v41 = vpop.permute.xlu0 %12737  ;;  %11899 = vmatprep.subr.msk.bf16.mxu0 %vm14348_vm2, %v11897_v47 }
 0x2f0   : > { %11902 = vmatpush3.bf16.xpose.msk.msra.mxu0 %vm14348_vm2, %v11897_v47  ;;  %v12684_v47 = vunpack.i.l.bf16 %v12683_v20 }
 0x2f1   : > { %11929 = vmatprep.subr.msk.bf16.mxu0 %vm14348_vm2, %v11927_v40 }
 0x2f3   : > { %v12743_v31 = vpop.permute.xlu0 %12742 }
 0x2f4   : > { %v12745_v42 = vunpack.i.h.bf16 %v12743_v31  ;;  %v12744_v48 = vunpack.i.l.bf16 %v12743_v31 }
 0x2f6   : > { %v11873_v4 = vpack.c.bf16 %v12745_v42, %v12744_v48 }
 0x2f7   : > { %10768 = vmatmul.mubr.msk.f32.vlgmr.msra.gmra.mrb[32].mxu0 %vm1098_vm1, %v14326_v38  ;;  %v12685_v38 = vunpack.i.h.bf16 %v12683_v20 }
 0x2f8   : > { %11875 = vmatprep.subr.msk.bf16.mxu1 %vm14348_vm2, %v11873_v4  ;;  %10770 = vmatprep.mubr.msk.f32.mxu0 %vm1098_vm1, %v14406_v9  ;;  %v12725_v9 = vunpack.i.h.bf16 %v12723_v3  ;;  %v12700_v3 = vunpack.i.h.bf16 %v14934_v2 }
 0x2f9   : > { %11878 = vmatpush3.bf16.xpose.msk.msra.mxu1 %vm14348_vm2, %v11873_v4  ;;  %11932 = vmatpush3.bf16.xpose.msk.msra.mxu0 %vm14348_vm2, %v11927_v40  ;;  %v11909_v40 = vpack.c.bf16 %v12685_v38, %v12684_v47  ;;  %v12735_v4 = vunpack.i.h.bf16 %v14954_v30  ;;  %v18810_v47 = vld [vmem:[#allocation38_spill] sm:$0xff] }
 0x2fa   : > { %11905 = vmatprep.subr.msk.bf16.mxu1 %vm14348_vm2, %v11903_v19  ;;  %11935 = vmatprep.subr.msk.bf16.mxu0 %vm14348_vm2, %v11933_v55  ;;  %v11939_v45 = vpack.c.bf16 %v12725_v9, %v12724_v28 }
 0x2fb   : > { %10771 = vmatmul.mubr.msk.f32.gmra.mrb[34].mxu0 %vm1098_vm1, %v14416_v29 }
 0x2fc   : > { %10773 = vmatprep.mubr.msk.f32.mxu0 %vm1098_vm1, %v14466_v24  ;;  %v12758_v24 = vpop.permute.xlu1 %12757 }
 0x2ff   : > { %10774 = vmatmul.mubr.msk.f32.gmra.mrb[36].mxu0 %vm1098_vm1, %v14484_v32  ;;  %v12719_v32 = vunpack.i.l.bf16 %v12718_v23 }
 0x300   : > { %10740 = vmatmul.mubr.msk.f32.vlgmr.msra.gmra.mrb[8].mxu1 %vm1098_vm1, %v14352_v52  ;;  %10776 = vmatprep.mubr.msk.f32.mxu0 %vm1098_vm1, %v14544_v5  ;;  %v12720_v5 = vunpack.i.h.bf16 %v12718_v23  ;;  %v12760_v52 = vunpack.i.h.bf16 %v12758_v24  ;;  %v12699_v23 = vunpack.i.l.bf16 %v14934_v2  ;;  %v12695_v2 = vunpack.i.h.bf16 %v14942_v62  ;;  %v12763_v42 = vpop.permute.xlu1 %12762 }
 0x301   : > { %10742 = vmatprep.mubr.msk.f32.mxu1 %vm1098_vm1, %v14366_v59  ;;  %11908 = vmatpush3.bf16.xpose.msk.msra.mxu1 %vm14348_vm2, %v11903_v19  ;;  %v12759_v59 = vunpack.i.l.bf16 %v12758_v24  ;;  %v12734_v19 = vunpack.i.l.bf16 %v14954_v30 }
 0x302   : > { %11938 = vmatpush3.bf16.xpose.msk.msra.mxu0 %vm14348_vm2, %v11933_v55  ;;  %11911 = vmatprep.subr.msk.bf16.mxu1 %vm14348_vm2, %v11909_v40  ;;  %v11915_v29 = vpack.c.bf16 %v12720_v5, %v12719_v32  ;;  %v11981_v18 = vpack.c.bf16 %v12700_v3, %v12699_v23  ;;  %v11957_v62 = vpack.c.bf16 %v12695_v2, %v12694_v54  ;;  %v12625_v3 = vunpack.i.h.bf16 %v14749_v61  ;;  %v18815_v54 = vld [vmem:[#allocation43_spill] sm:$0xff] }
 0x303   : > { %11941 = vmatprep.subr.msk.bf16.mxu0 %vm14348_vm2, %v11939_v45  ;;  %10777 = vmatmul.mubr.msk.f32.gmra.mrb[38].mxu0 %vm1098_vm1, %v14566_v7  ;;  %v11945_v55 = vpack.c.bf16 %v12760_v52, %v12759_v59  ;;  %v12755_v7 = vunpack.i.h.bf16 %v12753_v50  ;;  %v11987_v9 = vpack.c.bf16 %v12735_v4, %v12734_v19  ;;  %v18811_v59 = vld [vmem:[#allocation65_spill] sm:$0xff]  ;;  %v12624_v23 = vunpack.i.l.bf16 %v14749_v61  ;;  %v18816_v4 = vld [vmem:[#allocation46_spill] sm:$0xff] }
 0x304   : > { %10743 = vmatmul.mubr.msk.f32.gmra.mrb[10].mxu1 %vm1098_vm1, %v14408_v22  ;;  %10823 = vmatprep.mubr.msk.f32.mxu0 %vm1098_vm1, %v14332_v39  ;;  %v18809_v39 = vld [vmem:[#allocation37_spill] sm:$0xff]  ;;  %v12705_v61 = vunpack.i.h.bf16 %v14946_v57 }
 0x305   : > { %10745 = vmatprep.mubr.msk.f32.mxu1 %vm1098_vm1, %v14458_v25  ;;  %v12754_v25 = vunpack.i.l.bf16 %v12753_v50  ;;  %v15082_v50 = vpop.permute.xlu0 %12777  ;;  %v18817_v19 = vld [vmem:[#allocation49_spill] sm:$0xff] }
 0x307   : > { %v11921_v22 = vpack.c.bf16 %v12755_v7, %v12754_v25  ;;  %v18813_v7 = vld [vmem:[#allocation78_spill] sm:$0xff] }
 0x308   : > { %10746 = vmatmul.mubr.msk.f32.gmra.mrb[12].mxu1 %vm1098_vm1, %v14476_v17  ;;  %v12665_v17 = vunpack.i.h.bf16 %v14924_v8  ;;  %v12620_v25 = vunpack.i.h.bf16 %v18813_v7 }
 0x309   : > { %10748 = vmatprep.mubr.msk.f32.mxu1 %vm1098_vm1, %v14534_v12  ;;  %11914 = vmatpush3.bf16.xpose.msk.msra.mxu1 %vm14348_vm2, %v11909_v40  ;;  %v12664_v12 = vunpack.i.l.bf16 %v14924_v8  ;;  %v12659_v8 = vunpack.i.l.bf16 %v14918_v60  ;;  %v12730_v40 = vunpack.i.h.bf16 %v14956_v34  ;;  %v15116_v52 = vpop.permute.xlu0 %12782 }
 0x30a   : > { %11944 = vmatpush3.bf16.xpose.msk.msra.mxu0 %vm14348_vm2, %v11939_v45  ;;  %11917 = vmatprep.subr.msk.bf16.mxu1 %vm14348_vm2, %v11915_v29  ;;  %v12729_v45 = vunpack.i.l.bf16 %v14956_v34 }
 0x30b   : > { %11947 = vmatprep.subr.msk.bf16.mxu0 %vm14348_vm2, %v11945_v55  ;;  %v11975_v20 = vpack.c.bf16 %v12665_v17, %v12664_v12  ;;  %v12619_v17 = vunpack.i.l.bf16 %v18813_v7 }
 0x30c   : > { %10749 = vmatmul.mubr.msk.f32.gmra.mrb[14].mxu1 %vm1098_vm1, %v14558_v21  ;;  %v12660_v21 = vunpack.i.h.bf16 %v14918_v60 }
 0x30d   : > { %10795 = vmatprep.mubr.msk.f32.mxu1 %vm1098_vm1, %v18809_v39  ;;  %v15138_v12 = vpop.permute.xlu0 %12787  ;;  %v18814_v39 = vld [vmem:[#allocation39_spill] sm:$0xff] }
 0x30e   : > { %v11951_v37 = vpack.c.bf16 %v12660_v21, %v12659_v8 }
 0x311   : > { %11920 = vmatpush3.bf16.xpose.msk.msra.mxu1 %vm14348_vm2, %v11915_v29  ;;  %v12764_v29 = vunpack.i.l.bf16 %v12763_v42  ;;  %v15148_v21 = vpop.permute.xlu0 %12792 }
 0x312   : > { %11950 = vmatpush3.bf16.xpose.msk.msra.mxu0 %vm14348_vm2, %v11945_v55  ;;  %11923 = vmatprep.subr.msk.bf16.mxu1 %vm14348_vm2, %v11921_v22  ;;  %v18812_v55 = vld [vmem:[#allocation68_spill] sm:$0xff] }
 0x313   : > { %11977 = vmatprep.subr.msk.bf16.mxu0 %vm14348_vm2, %v11975_v20 }
 0x315   : > { %v15156_v2 = vpop.permute.xlu0 %12797 }
 0x319   : > { %10824 = vmatmul.mubr.msk.f32.vlgmr.msra.gmra.mrb[40].mxu0 %vm1098_vm1, %v14364_v58  ;;  %11926 = vmatpush3.bf16.xpose.msk.msra.mxu1 %vm14348_vm2, %v11921_v22 }
 0x31a   : > { %10826 = vmatprep.mubr.msk.f32.mxu0 %vm1098_vm1, %v14374_v1  ;;  %11980 = vmatpush3.bf16.xpose.msk.msra.mxu0 %vm14348_vm2, %v11975_v20  ;;  %v15048_v31 = vpop.f32.mrb[0].mxu1  ;;  %v12023_v20 = vpack.c.bf16 %v12620_v25, %v12619_v17  ;;  %v18828_v25 = vld [vmem:[#allocation66_spill] sm:$0xff] }
 0x31b   : > { %11953 = vmatprep.subr.msk.bf16.mxu1 %vm14348_vm2, %v11951_v37  ;;  %11983 = vmatprep.subr.msk.bf16.mxu0 %vm14348_vm2, %v11981_v18  ;;  %v15054_v60 = vpop.f32.mrb[1].mxu1  ;;  %v3534_v58 = vsel %vm280_vm0, %v15048_v31, -inf }
 0x31c   : > { %3535 = vmax.xlane.f32.xlu0 %v3534_v58  ;;  %v3531_v1 = vsel %vm280_vm0, %v15054_v60, -inf  ;;  %v12029_v58 = vpack.c.bf16 %v12625_v3, %v12624_v23  ;;  %v12784_v3 = vunpack.i.l.bf16 %v15116_v52 }
 0x31d   : > { %10827 = vmatmul.mubr.msk.f32.gmra.mrb[42].mxu0 %vm1098_vm1, %v14430_v16  ;;  %3532 = vmax.xlane.f32.xlu1 %v3531_v1 }
 0x31e   : > { %10829 = vmatprep.mubr.msk.f32.mxu0 %vm1098_vm1, %v14482_v10  ;;  %v15066_v48 = vpop.f32.mrb[2].mxu1 }
 0x31f   : > { %v15070_v38 = vpop.f32.mrb[3].mxu1  ;;  %v3540_v10 = vsel %vm280_vm0, %v15066_v48, -inf }
 0x320   : > { %10796 = vmatmul.mubr.msk.f32.vlgmr.msra.gmra.mrb[16].mxu1 %vm1098_vm1, %v18810_v47  ;;  %v3537_v16 = vsel %vm280_vm0, %v15070_v38, -inf  ;;  %v12630_v47 = vunpack.i.h.bf16 %v14829_v63 }
 0x321   : > { %10830 = vmatmul.mubr.msk.f32.gmra.mrb[44].mxu0 %vm1098_vm1, %v14498_v56  ;;  %10798 = vmatprep.mubr.msk.f32.mxu1 %vm1098_vm1, %v14414_v27  ;;  %v12768_v27 = vpop.permute.xlu1 %12767 }
 0x322   : > { %10832 = vmatprep.mubr.msk.f32.mxu0 %vm1098_vm1, %v14526_v14  ;;  %11956 = vmatpush3.bf16.xpose.msk.msra.mxu1 %vm14348_vm2, %v11951_v37  ;;  %v15088_v30 = vpop.f32.mrb[4].mxu1  ;;  %v12770_v5 = vunpack.i.h.bf16 %v12768_v27  ;;  %v12769_v32 = vunpack.i.l.bf16 %v12768_v27  ;;  %v12670_v37 = vunpack.i.h.bf16 %v14930_v35  ;;  %v18819_v27 = vld [vmem:[#allocation42_spill] sm:$0xff] }
 0x323   : > { %11986 = vmatpush3.bf16.xpose.msk.msra.mxu0 %vm14348_vm2, %v11981_v18  ;;  %3538 = vmax.xlane.f32.xlu0 %v3537_v16  ;;  %v15092_v56 = vpop.f32.mrb[5].mxu1  ;;  %v3546_v28 = vsel %vm280_vm0, %v15088_v30, -inf  ;;  %v12669_v18 = vunpack.i.l.bf16 %v14930_v35  ;;  %v12704_v35 = vunpack.i.l.bf16 %v14946_v57  ;;  %v12629_v16 = vunpack.i.l.bf16 %v14829_v63  ;;  %v18821_v57 = vld [vmem:[#allocation44_spill] sm:$0xff]  ;;  %v18822_v63 = vld [vmem:[#allocation51_spill] sm:$0xff] }
 0x324   : > { %3541 = vmax.xlane.f32.xlu1 %v3540_v10  ;;  %11959 = vmatprep.subr.msk.bf16.mxu1 %vm14348_vm2, %v11957_v62  ;;  %v3543_v14 = vsel %vm280_vm0, %v15092_v56, -inf  ;;  %v18818_v10 = vld [vmem:[#allocation54_spill] sm:$0xff] }
 0x325   : > { %11989 = vmatprep.subr.msk.bf16.mxu0 %vm14348_vm2, %v11987_v9  ;;  %10799 = vmatmul.mubr.msk.f32.gmra.mrb[18].mxu1 %vm1098_vm1, %v14422_v44  ;;  %v12773_v8 = vpop.permute.xlu1 %12772  ;;  %v11999_v1 = vpack.c.bf16 %v12670_v37, %v12669_v18 }
 0x326   : > { %10833 = vmatmul.mubr.msk.f32.gmra.mrb[46].mxu0 %vm1098_vm1, %v14586_v49  ;;  %10801 = vmatprep.mubr.msk.f32.mxu1 %vm1098_vm1, %v14474_v11  ;;  %v15110_v24 = vpop.f32.mrb[6].mxu1  ;;  %v11963_v49 = vpack.c.bf16 %v12730_v40, %v12729_v45  ;;  %v12035_v40 = vpack.c.bf16 %v12630_v47, %v12629_v16  ;;  %v12740_v45 = vunpack.i.h.bf16 %v14958_v41  ;;  %v12775_v17 = vunpack.i.h.bf16 %v12773_v8  ;;  %v18830_v47 = vld [vmem:[#allocation21_spill] sm:$0xff]  ;;  %v18831_v16 = vld [vmem:[#allocation24_spill] sm:$0xff] }
 0x327   : > { %10879 = vmatprep.mubr.msk.f32.mxu0 %vm1098_vm1, %v14304_v33  ;;  %3544 = vmax.xlane.f32.xlu0 %v3543_v14  ;;  %v15114_v44 = vpop.f32.mrb[7].mxu1  ;;  %v3552_v11 = vsel %vm280_vm0, %v15110_v24, -inf  ;;  %v11993_v33 = vpack.c.bf16 %v12770_v5, %v12769_v32  ;;  %v12005_v14 = vpack.c.bf16 %v12705_v61, %v12704_v35  ;;  %v12739_v5 = vunpack.i.l.bf16 %v14958_v41  ;;  %v18823_v32 = vld [vmem:[#allocation67_spill] sm:$0xff] }
 0x328   : > { %3547 = vmax.xlane.f32.xlu1 %v3546_v28  ;;  %v3549_v34 = vsel %vm280_vm0, %v15114_v44, -inf  ;;  %v18820_v28 = vld [vmem:[#allocation59_spill] sm:$0xff] }
 0x329   : > { %10802 = vmatmul.mubr.msk.f32.gmra.mrb[20].mxu1 %vm1098_vm1, %v14492_v51  ;;  %v12765_v51 = vunpack.i.h.bf16 %v12763_v42  ;;  %v15162_v42 = vpop.permute.xlu1 %12817  ;;  %v12011_v41 = vpack.c.bf16 %v12740_v45, %v12739_v5  ;;  %v18835_v5 = vld [vmem:[#allocation29_spill] sm:$0xff] }
 0x32a   : > { %10804 = vmatprep.mubr.msk.f32.mxu1 %vm1098_vm1, %v18811_v59  ;;  %11962 = vmatpush3.bf16.xpose.msk.msra.mxu1 %vm14348_vm2, %v11957_v62  ;;  %v15180_v62 = vpop.permute.xlu0 %12802 }
 0x32b   : > { %11992 = vmatpush3.bf16.xpose.msk.msra.mxu0 %vm14348_vm2, %v11987_v9  ;;  %3550 = vmax.xlane.f32.xlu0 %v3549_v34  ;;  %v11969_v22 = vpack.c.bf16 %v12765_v51, %v12764_v29  ;;  %v18824_v34 = vld [vmem:[#allocation56_spill] sm:$0xff]  ;;  %v18826_v51 = vld [vmem:[#allocation57_spill] sm:$0xff]  ;;  %v18827_v29 = vld [vmem:[#allocation62_spill] sm:$0xff] }
 0x32c   : > { %3553 = vmax.xlane.f32.xlu1 %v3552_v11  ;;  %11965 = vmatprep.subr.msk.bf16.mxu1 %vm14348_vm2, %v11963_v49  ;;  %v12635_v11 = vunpack.i.h.bf16 %v14906_v0 }
 0x32d   : > { %11995 = vmatprep.subr.msk.bf16.mxu0 %vm14348_vm2, %v11993_v33  ;;  %10805 = vmatmul.mubr.msk.f32.gmra.mrb[22].mxu1 %vm1098_vm1, %v18812_v55  ;;  %v15182_v9 = vpop.permute.xlu1 %12827 }
 0x32e   : > { %10851 = vmatprep.mubr.msk.f32.mxu1 %vm1098_vm1, %v18814_v39  ;;  %v12774_v39 = vunpack.i.l.bf16 %v12773_v8  ;;  %v12779_v8 = vunpack.i.l.bf16 %v15082_v50 }
 0x330   : > { %v12017_v23 = vpack.c.bf16 %v12775_v17, %v12774_v39  ;;  %v18841_v17 = vld [vmem:[#allocation61_spill] sm:$0xff] }
 0x331   : > { %v15212_v59 = vpop.permute.xlu1 %12837 }
 0x332   : > { %11968 = vmatpush3.bf16.xpose.msk.msra.mxu1 %vm14348_vm2, %v11963_v49  ;;  %v12634_v49 = vunpack.i.l.bf16 %v14906_v0 }
 0x333   : > { %11998 = vmatpush3.bf16.xpose.msk.msra.mxu0 %vm14348_vm2, %v11993_v33  ;;  %11971 = vmatprep.subr.msk.bf16.mxu1 %vm14348_vm2, %v11969_v22  ;;  %v18825_v33 = vld [vmem:[#allocation20_spill] sm:$0xff] }
 0x334   : > { %12025 = vmatprep.subr.msk.bf16.mxu0 %vm14348_vm2, %v12023_v20  ;;  %v12041_v55 = vpack.c.bf16 %v12635_v11, %v12634_v49  ;;  %v18837_v49 = vld [vmem:[#allocation32_spill] sm:$0xff] }
 0x335   : > { %v12853_v0 = vpop.permute.xlu1 %12852 }
 0x33a   : > { %10880 = vmatmul.mubr.msk.f32.vlgmr.msra.gmra.mrb[48].mxu0 %vm1098_vm1, %v18815_v54  ;;  %11974 = vmatpush3.bf16.xpose.msk.msra.mxu1 %vm14348_vm2, %v11969_v22  ;;  %v18829_v22 = vld [vmem:[#allocation36_spill] sm:$0xff]  ;;  %v12819_v54 = vunpack.i.l.bf16 %v15162_v42 }
 0x33b   : > { %10882 = vmatprep.mubr.msk.f32.mxu0 %vm1098_vm1, %v18816_v4  ;;  %12028 = vmatpush3.bf16.xpose.msk.msra.mxu0 %vm14348_vm2, %v12023_v20  ;;  %v12785_v20 = vunpack.i.h.bf16 %v15116_v52  ;;  %v12780_v52 = vunpack.i.h.bf16 %v15082_v50 }
 0x33c   : > { %12001 = vmatprep.subr.msk.bf16.mxu1 %vm14348_vm2, %v11999_v1  ;;  %12031 = vmatprep.subr.msk.bf16.mxu0 %vm14348_vm2, %v12029_v58 }
 0x33d   : > { %v12071_v18 = vpack.c.bf16 %v12785_v20, %v12784_v3  ;;  %v12047_v35 = vpack.c.bf16 %v12780_v52, %v12779_v8 }
 0x33e   : > { %10883 = vmatmul.mubr.msk.f32.gmra.mrb[50].mxu0 %vm1098_vm1, %v18817_v19 }
 0x33f   : > { %10885 = vmatprep.mubr.msk.f32.mxu0 %vm1098_vm1, %v18818_v10 }
 0x341   : > { %10852 = vmatmul.mubr.msk.f32.vlgmr.msra.gmra.mrb[24].mxu1 %vm1098_vm1, %v18819_v27 }
 0x342   : > { %10886 = vmatmul.mubr.msk.f32.gmra.mrb[52].mxu0 %vm1098_vm1, %v18820_v28  ;;  %10854 = vmatprep.mubr.msk.f32.mxu1 %vm1098_vm1, %v18821_v57  ;;  %v12855_v28 = vunpack.i.h.bf16 %v12853_v0  ;;  %v12854_v57 = vunpack.i.l.bf16 %v12853_v0 }
 0x343   : > { %10888 = vmatprep.mubr.msk.f32.mxu0 %vm1098_vm1, %v18773_v36  ;;  %12004 = vmatpush3.bf16.xpose.msk.msra.mxu1 %vm14348_vm2, %v11999_v1  ;;  %v15204_v36 = vpop.permute.xlu0 %12807  ;;  %v12820_v1 = vunpack.i.h.bf16 %v15162_v42 }
 0x344   : > { %12034 = vmatpush3.bf16.xpose.msk.msra.mxu0 %vm14348_vm2, %v12029_v58  ;;  %12007 = vmatprep.subr.msk.bf16.mxu1 %vm14348_vm2, %v12005_v14  ;;  %v15236_v58 = vpop.permute.xlu1 %12862 }
 0x345   : > { %12037 = vmatprep.subr.msk.bf16.mxu0 %vm14348_vm2, %v12035_v40  ;;  %10855 = vmatmul.mubr.msk.f32.gmra.mrb[26].mxu1 %vm1098_vm1, %v18822_v63  ;;  %v12077_v19 = vpack.c.bf16 %v12820_v1, %v12819_v54  ;;  %v18834_v63 = vld [vmem:[#allocation45_spill] sm:$0xff]  ;;  %v12790_v1 = vunpack.i.h.bf16 %v15138_v12  ;;  %v12789_v54 = vunpack.i.l.bf16 %v15138_v12 }
 0x346   : > { %10889 = vmatmul.mubr.msk.f32.gmra.mrb[54].mxu0 %vm1098_vm1, %v18823_v32  ;;  %10857 = vmatprep.mubr.msk.f32.mxu1 %vm1098_vm1, %v18824_v34  ;;  %v18836_v32 = vld [vmem:[#allocation48_spill] sm:$0xff]  ;;  %v12083_v34 = vpack.c.bf16 %v12855_v28, %v12854_v57  ;;  %v18846_v28 = vld [vmem:[#allocation83_spill] sm:$0xff] }
 0x347   : > { %10935 = vmatprep.mubr.msk.f32.mxu0 %vm1098_vm1, %v18825_v33  ;;  %v12813_v7 = vpop.permute.xlu0 %12812 }
 0x348   : > { %v15252_v61 = vpop.permute.xlu1 %12872  ;;  %v12815_v42 = vunpack.i.h.bf16 %v12813_v7  ;;  %v12814_v10 = vunpack.i.l.bf16 %v12813_v7  ;;  %v18840_v7 = vld [vmem:[#allocation55_spill] sm:$0xff] }
 0x349   : > { %10858 = vmatmul.mubr.msk.f32.gmra.mrb[28].mxu1 %vm1098_vm1, %v18826_v51  ;;  %v18838_v51 = vld [vmem:[#allocation50_spill] sm:$0xff] }
 0x34a   : > { %10860 = vmatprep.mubr.msk.f32.mxu1 %vm1098_vm1, %v18827_v29  ;;  %v12053_v45 = vpack.c.bf16 %v12815_v42, %v12814_v10  ;;  %v12865_v10 = vunpack.i.h.bf16 %v15236_v58 }
 0x34b   : > { %12010 = vmatpush3.bf16.xpose.msk.msra.mxu1 %vm14348_vm2, %v12005_v14  ;;  %v15234_v37 = vpop.permute.xlu0 %12822  ;;  %v18832_v14 = vld [vmem:[#allocation25_spill] sm:$0xff] }
 0x34c   : > { %12040 = vmatpush3.bf16.xpose.msk.msra.mxu0 %vm14348_vm2, %v12035_v40  ;;  %12013 = vmatprep.subr.msk.bf16.mxu1 %vm14348_vm2, %v12011_v41  ;;  %v12888_v27 = vpop.permute.xlu1 %12887  ;;  %v18833_v40 = vld [vmem:[#allocation28_spill] sm:$0xff]  ;;  %v12825_v12 = vunpack.i.h.bf16 %v15234_v37 }
 0x34d   : > { %12043 = vmatprep.subr.msk.bf16.mxu0 %vm14348_vm2, %v12041_v55  ;;  %10861 = vmatmul.mubr.msk.f32.gmra.mrb[30].mxu1 %vm1098_vm1, %v18828_v25  ;;  %v12890_v20 = vunpack.i.h.bf16 %v12888_v27  ;;  %v12889_v3 = vunpack.i.l.bf16 %v12888_v27  ;;  %v18845_v27 = vld [vmem:[#allocation72_spill] sm:$0xff] }
 0x34e   : > { %10907 = vmatprep.mubr.msk.f32.mxu1 %vm1098_vm1, %v18829_v22 }
 0x34f   : > { %v15250_v4 = vpop.permute.xlu0 %12832  ;;  %v12065_v52 = vpack.c.bf16 %v12890_v20, %v12889_v3  ;;  %v12839_v20 = vunpack.i.l.bf16 %v15212_v59 }
 0x350   : > { %v12893_v33 = vpop.permute.xlu1 %12892 }
 0x351   : > { %v12895_v0 = vunpack.i.h.bf16 %v12893_v33  ;;  %v12894_v25 = vunpack.i.l.bf16 %v12893_v33  ;;  %v18853_v33 = vld [vmem:[#allocation107_spill] sm:$0xff] }
 0x353   : > { %12016 = vmatpush3.bf16.xpose.msk.msra.mxu1 %vm14348_vm2, %v12011_v41  ;;  %v15266_v50 = vpop.permute.xlu0 %12842  ;;  %v12089_v22 = vpack.c.bf16 %v12895_v0, %v12894_v25  ;;  %v12805_v0 = vunpack.i.h.bf16 %v15180_v62  ;;  %v12804_v25 = vunpack.i.l.bf16 %v15180_v62  ;;  %v12840_v62 = vunpack.i.h.bf16 %v15212_v59 }
 0x354   : > { %12046 = vmatpush3.bf16.xpose.msk.msra.mxu0 %vm14348_vm2, %v12041_v55  ;;  %12019 = vmatprep.subr.msk.bf16.mxu1 %vm14348_vm2, %v12017_v23  ;;  %v18839_v55 = vld [vmem:[#allocation33_spill] sm:$0xff]  ;;  %v12898_v42 = vpop.permute.xlu1 %12897  ;;  %v12834_v59 = vunpack.i.l.bf16 %v15250_v4 }
 0x355   : > { %12073 = vmatprep.subr.msk.bf16.mxu0 %vm14348_vm2, %v12071_v18 }
 0x357   : > { %v12848_v11 = vpop.permute.xlu0 %12847 }
 0x358   : > { %v12850_v41 = vunpack.i.h.bf16 %v12848_v11  ;;  %v12849_v29 = vunpack.i.l.bf16 %v12848_v11  ;;  %v18852_v11 = vld [vmem:[#allocation64_spill] sm:$0xff] }
 0x35a   : > { %v12059_v39 = vpack.c.bf16 %v12850_v41, %v12849_v29  ;;  %v18854_v41 = vld [vmem:[#allocation108_spill] sm:$0xff]  ;;  %v12900_v29 = vunpack.i.h.bf16 %v12898_v42 }
 0x35b   : > { %10936 = vmatmul.mubr.msk.f32.vlgmr.msra.gmra.mrb[56].mxu0 %vm1098_vm1, %v18830_v47  ;;  %12022 = vmatpush3.bf16.xpose.msk.msra.mxu1 %vm14348_vm2, %v12017_v23  ;;  %v18843_v23 = vld [vmem:[#allocation71_spill] sm:$0xff]  ;;  %v12858_v57 = vpop.permute.xlu0 %12857 }
 0x35c   : > { %10938 = vmatprep.mubr.msk.f32.mxu0 %vm1098_vm1, %v18831_v16  ;;  %12076 = vmatpush3.bf16.xpose.msk.msra.mxu0 %vm14348_vm2, %v12071_v18  ;;  %v12794_v18 = vunpack.i.l.bf16 %v15148_v21  ;;  %v18844_v16 = vld [vmem:[#allocation74_spill] sm:$0xff] }
 0x35d   : > { %12049 = vmatprep.subr.msk.bf16.mxu1 %vm14348_vm2, %v12047_v35  ;;  %12079 = vmatprep.subr.msk.bf16.mxu0 %vm14348_vm2, %v12077_v19 }
 0x35f   : > { %10939 = vmatmul.mubr.msk.f32.gmra.mrb[58].mxu0 %vm1098_vm1, %v18832_v14 }
 0x360   : > { %10941 = vmatprep.mubr.msk.f32.mxu0 %vm1098_vm1, %v18833_v40  ;;  %v12859_v40 = vunpack.i.l.bf16 %v12858_v57 }
 0x362   : > { %10908 = vmatmul.mubr.msk.f32.vlgmr.msra.gmra.mrb[32].mxu1 %vm1098_vm1, %v18834_v63  ;;  %v18849_v63 = vld [vmem:[#allocation110_spill] sm:$0xff] }
 0x363   : > { %10942 = vmatmul.mubr.msk.f32.gmra.mrb[60].mxu0 %vm1098_vm1, %v18835_v5  ;;  %10910 = vmatprep.mubr.msk.f32.mxu1 %vm1098_vm1, %v18836_v32 }
 0x364   : > { %10944 = vmatprep.mubr.msk.f32.mxu0 %vm1098_vm1, %v18837_v49  ;;  %12052 = vmatpush3.bf16.xpose.msk.msra.mxu1 %vm14348_vm2, %v12047_v35  ;;  %v12829_v35 = vunpack.i.l.bf16 %v15182_v9 }
 0x365   : > { %12082 = vmatpush3.bf16.xpose.msk.msra.mxu0 %vm14348_vm2, %v12077_v19  ;;  %12055 = vmatprep.subr.msk.bf16.mxu1 %vm14348_vm2, %v12053_v45  ;;  %v12095_v19 = vpack.c.bf16 %v12790_v1, %v12789_v54  ;;  %v12875_v1 = vunpack.i.h.bf16 %v15252_v61  ;;  %v12874_v54 = vunpack.i.l.bf16 %v15252_v61 }
 0x366   : > { %12085 = vmatprep.subr.msk.bf16.mxu0 %vm14348_vm2, %v12083_v34  ;;  %10911 = vmatmul.mubr.msk.f32.gmra.mrb[34].mxu1 %vm1098_vm1, %v18838_v51 }
 0x367   : > { %10945 = vmatmul.mubr.msk.f32.gmra.mrb[62].mxu0 %vm1098_vm1, %v18839_v55  ;;  %10913 = vmatprep.mubr.msk.f32.mxu1 %vm1098_vm1, %v18840_v7  ;;  %v12899_v55 = vunpack.i.l.bf16 %v12898_v42  ;;  %v18855_v7 = vld [vmem:[#allocation73_spill] sm:$0xff]  ;;  %v18864_v42 = vld [vmem:[#allocation90_spill] sm:$0xff] }
 0x368   : > { %10991 = vmatprep.mubr.msk.f32.mxu0 %vm1098_vm1, %v14608_v43  ;;  %v18842_v43 = vld [vmem:[#allocation69_spill] sm:$0xff] }
 0x36a   : > { %10914 = vmatmul.mubr.msk.f32.gmra.mrb[36].mxu1 %vm1098_vm1, %v18841_v17  ;;  %v12113_v17 = vpack.c.bf16 %v12900_v29, %v12899_v55  ;;  %v18875_v29 = vld [vmem:[#allocation15_spill] sm:$0xff]  ;;  %v12845_v55 = vunpack.i.h.bf16 %v15266_v50 }
 0x36b   : > { %10916 = vmatprep.mubr.msk.f32.mxu1 %vm1098_vm1, %v18777_v46  ;;  %v12795_v46 = vunpack.i.h.bf16 %v15148_v21  ;;  %v12830_v21 = vunpack.i.h.bf16 %v15182_v9  ;;  %v12824_v9 = vunpack.i.l.bf16 %v15234_v37 }
 0x36c   : > { %12058 = vmatpush3.bf16.xpose.msk.msra.mxu1 %vm14348_vm2, %v12053_v45  ;;  %v18850_v45 = vld [vmem:[#allocation63_spill] sm:$0xff] }
 0x36d   : > { %12088 = vmatpush3.bf16.xpose.msk.msra.mxu0 %vm14348_vm2, %v12083_v34  ;;  %12061 = vmatprep.subr.msk.bf16.mxu1 %vm14348_vm2, %v12059_v39  ;;  %v12119_v8 = vpack.c.bf16 %v12795_v46, %v12794_v18  ;;  %v12125_v47 = vpack.c.bf16 %v12830_v21, %v12829_v35  ;;  %v12101_v14 = vpack.c.bf16 %v12825_v12, %v12824_v9  ;;  %v18851_v34 = vld [vmem:[#allocation75_spill] sm:$0xff]  ;;  %v18856_v46 = vld [vmem:[#allocation80_spill] sm:$0xff]  ;;  %v18859_v21 = vld [vmem:[#allocation98_spill] sm:$0xff]  ;;  %v12868_v12 = vpop.permute.xlu0 %12867 }
 0x36e   : > { %12091 = vmatprep.subr.msk.bf16.mxu0 %vm14348_vm2, %v12089_v22  ;;  %10917 = vmatmul.mubr.msk.f32.gmra.mrb[38].mxu1 %vm1098_vm1, %v18842_v43  ;;  %v12799_v43 = vunpack.i.l.bf16 %v15156_v2  ;;  %v18857_v18 = vld [vmem:[#allocation88_spill] sm:$0xff]  ;;  %v18863_v9 = vld [vmem:[#allocation113_spill] sm:$0xff] }
 0x36f   : > { %10963 = vmatprep.mubr.msk.f32.mxu1 %vm1098_vm1, %v18843_v23  ;;  %v12173_v23 = vpack.c.bf16 %v12840_v62, %v12839_v20  ;;  %v18860_v35 = vld [vmem:[#allocation76_spill] sm:$0xff] }
 0x374   : > { %12064 = vmatpush3.bf16.xpose.msk.msra.mxu1 %vm14348_vm2, %v12059_v39  ;;  %v12167_v39 = vpack.c.bf16 %v12805_v0, %v12804_v25  ;;  %v18877_v0 = vld [vmem:[#allocation102_spill] sm:$0xff]  ;;  %v18878_v25 = vld [vmem:[#allocation17_spill] sm:$0xff] }
 0x375   : > { %12094 = vmatpush3.bf16.xpose.msk.msra.mxu0 %vm14348_vm2, %v12089_v22  ;;  %12067 = vmatprep.subr.msk.bf16.mxu1 %vm14348_vm2, %v12065_v52  ;;  %v12800_v22 = vunpack.i.h.bf16 %v15156_v2  ;;  %v12835_v2 = vunpack.i.h.bf16 %v15250_v4  ;;  %v12179_v4 = vpack.c.bf16 %v12875_v1, %v12874_v54 }
 0x376   : > { %12121 = vmatprep.subr.msk.bf16.mxu0 %vm14348_vm2, %v12119_v8 }
 0x377   : > { %v12143_v3 = vpack.c.bf16 %v12800_v22, %v12799_v43  ;;  %v18880_v22 = vld [vmem:[#allocation105_spill] sm:$0xff] }
 0x378   : > { %v18881_v43 = vld [vmem:[#allocation89_spill] sm:$0xff] }
 0x37c   : > { %10992 = vmatmul.mubr.msk.f32.vlgmr.msra.gmra.mrb[64].mxu0 %vm1098_vm1, %v18844_v16  ;;  %12070 = vmatpush3.bf16.xpose.msk.msra.mxu1 %vm14348_vm2, %v12065_v52  ;;  %v18862_v16 = vld [vmem:[#allocation86_spill] sm:$0xff] }
 0x37d   : > { %10994 = vmatprep.mubr.msk.f32.mxu0 %vm1098_vm1, %v14689_v26  ;;  %12124 = vmatpush3.bf16.xpose.msk.msra.mxu0 %vm14348_vm2, %v12119_v8  ;;  %v12864_v26 = vunpack.i.l.bf16 %v15236_v58  ;;  %v12903_v58 = vpop.permute.xlu1 %12902  ;;  %v18858_v8 = vld [vmem:[#allocation92_spill] sm:$0xff] }
 0x37e   : > { %12097 = vmatprep.subr.msk.bf16.mxu1 %vm14348_vm2, %v12095_v19  ;;  %12127 = vmatprep.subr.msk.bf16.mxu0 %vm14348_vm2, %v12125_v47  ;;  %v12905_v5 = vunpack.i.h.bf16 %v12903_v58  ;;  %v12904_v32 = vunpack.i.l.bf16 %v12903_v58 }
 0x37f   : > { %v12131_v37 = vpack.c.bf16 %v12865_v10, %v12864_v26  ;;  %v12870_v10 = vunpack.i.h.bf16 %v12868_v12  ;;  %v12869_v26 = vunpack.i.l.bf16 %v12868_v12 }
 0x380   : > { %10995 = vmatmul.mubr.msk.f32.gmra.mrb[66].mxu0 %vm1098_vm1, %v14713_v6  ;;  %v18847_v6 = vld [vmem:[#allocation109_spill] sm:$0xff]  ;;  %v12137_v51 = vpack.c.bf16 %v12905_v5, %v12904_v32 }
 0x381   : > { %10997 = vmatprep.mubr.msk.f32.mxu0 %vm1098_vm1, %v14769_v15  ;;  %v12860_v15 = vunpack.i.h.bf16 %v12858_v57  ;;  %v12908_v52 = vpop.permute.xlu1 %12907  ;;  %v18867_v57 = vld [vmem:[#allocation79_spill] sm:$0xff]  ;;  %v12155_v58 = vpack.c.bf16 %v12870_v10, %v12869_v26  ;;  %v18871_v5 = vld [vmem:[#allocation77_spill] sm:$0xff] }
 0x382   : > { %v18891_v10 = vld [vmem:[#allocation81_spill] sm:$0xff] }
 0x383   : > { %10964 = vmatmul.mubr.msk.f32.vlgmr.msra.gmra.mrb[40].mxu1 %vm1098_vm1, %v18845_v27  ;;  %v12107_v49 = vpack.c.bf16 %v12860_v15, %v12859_v40  ;;  %v18865_v27 = vld [vmem:[#allocation114_spill] sm:$0xff]  ;;  %v18870_v40 = vld [vmem:[#allocation112_spill] sm:$0xff] }
 0x384   : > { %10998 = vmatmul.mubr.msk.f32.gmra.mrb[68].mxu0 %vm1098_vm1, %v14783_v53  ;;  %10966 = vmatprep.mubr.msk.f32.mxu1 %vm1098_vm1, %v18846_v28  ;;  %v18848_v53 = vld [vmem:[#allocation87_spill] sm:$0xff] }
 0x385   : > { %11000 = vmatprep.mubr.msk.f32.mxu0 %vm1098_vm1, %v18847_v6  ;;  %12100 = vmatpush3.bf16.xpose.msk.msra.mxu1 %vm14348_vm2, %v12095_v19  ;;  %v12149_v19 = vpack.c.bf16 %v12835_v2, %v12834_v59  ;;  %v12913_v61 = vpop.permute.xlu1 %12912  ;;  %v18868_v6 = vld [vmem:[#allocation99_spill] sm:$0xff] }
 0x386   : > { %12130 = vmatpush3.bf16.xpose.msk.msra.mxu0 %vm14348_vm2, %v12125_v47  ;;  %12103 = vmatprep.subr.msk.bf16.mxu1 %vm14348_vm2, %v12101_v14  ;;  %v18861_v47 = vld [vmem:[#allocation101_spill] sm:$0xff]  ;;  %v12915_v28 = vunpack.i.h.bf16 %v12913_v61 }
 0x387   : > { %12133 = vmatprep.subr.msk.bf16.mxu0 %vm14348_vm2, %v12131_v37  ;;  %10967 = vmatmul.mubr.msk.f32.gmra.mrb[42].mxu1 %vm1098_vm1, %v18848_v53  ;;  %v18869_v53 = vld [vmem:[#allocation111_spill] sm:$0xff] }
 0x388   : > { %11001 = vmatmul.mubr.msk.f32.gmra.mrb[70].mxu0 %vm1098_vm1, %v18849_v63  ;;  %10969 = vmatprep.mubr.msk.f32.mxu1 %vm1098_vm1, %v18850_v45  ;;  %v12910_v63 = vunpack.i.h.bf16 %v12908_v52  ;;  %v12909_v45 = vunpack.i.l.bf16 %v12908_v52  ;;  %v18886_v52 = vld [vmem:[#allocation118_spill] sm:$0xff] }
 0x389   : > { %11047 = vmatprep.mubr.msk.f32.mxu0 %vm1098_vm1, %v18851_v34  ;;  %v18872_v34 = vld [vmem:[#allocation13_spill] sm:$0xff] }
 0x38a   : > { %v12161_v32 = vpack.c.bf16 %v12910_v63, %v12909_v45 }
 0x38b   : > { %10970 = vmatmul.mubr.msk.f32.gmra.mrb[44].mxu1 %vm1098_vm1, %v18852_v11  ;;  %v12810_v11 = vunpack.i.h.bf16 %v15204_v36 }
 0x38c   : > { %10972 = vmatprep.mubr.msk.f32.mxu1 %vm1098_vm1, %v18853_v33 }
 0x38d   : > { %12106 = vmatpush3.bf16.xpose.msk.msra.mxu1 %vm14348_vm2, %v12101_v14  ;;  %v18866_v14 = vld [vmem:[#allocation97_spill] sm:$0xff] }
 0x38e   : > { %12136 = vmatpush3.bf16.xpose.msk.msra.mxu0 %vm14348_vm2, %v12131_v37  ;;  %12109 = vmatprep.subr.msk.bf16.mxu1 %vm14348_vm2, %v12107_v49  ;;  %v12914_v37 = vunpack.i.l.bf16 %v12913_v61 }
 0x38f   : > { %12139 = vmatprep.subr.msk.bf16.mxu0 %vm14348_vm2, %v12137_v51  ;;  %10973 = vmatmul.mubr.msk.f32.gmra.mrb[46].mxu1 %vm1098_vm1, %v18854_v41  ;;  %v18874_v41 = vld [vmem:[#allocation91_spill] sm:$0xff] }
 0x390   : > { %11019 = vmatprep.mubr.msk.f32.mxu1 %vm1098_vm1, %v18855_v7  ;;  %v12185_v15 = vpack.c.bf16 %v12915_v28, %v12914_v37  ;;  %v18876_v7 = vld [vmem:[#allocation95_spill] sm:$0xff] }
 0x395   : > { %12112 = vmatpush3.bf16.xpose.msk.msra.mxu1 %vm14348_vm2, %v12107_v49  ;;  %v12809_v49 = vunpack.i.l.bf16 %v15204_v36  ;;  %v12844_v36 = vunpack.i.l.bf16 %v15266_v50  ;;  %v18882_v50 = vld [vmem:[#allocation47_spill] sm:$0xff] }
 0x396   : > { %12142 = vmatpush3.bf16.xpose.msk.msra.mxu0 %vm14348_vm2, %v12137_v51  ;;  %12115 = vmatprep.subr.msk.bf16.mxu1 %vm14348_vm2, %v12113_v17  ;;  %v18873_v51 = vld [vmem:[#allocation84_spill] sm:$0xff]  ;;  %v12570_v62 = vunpack.i.h.bf16 %v18882_v50  ;;  %v12569_v20 = vunpack.i.l.bf16 %v18882_v50 }
 0x397   : > { %12169 = vmatprep.subr.msk.bf16.mxu0 %vm14348_vm2, %v12167_v39  ;;  %v12191_v33 = vpack.c.bf16 %v12810_v11, %v12809_v49  ;;  %v18896_v50 = vld [vmem:[#allocation60_spill] sm:$0xff] }
 0x398   : > { %v15511_v54 = vpack.c.bf16 %v12570_v62, %v12569_v20  ;;  %v12605_v62 = vunpack.i.h.bf16 %v18896_v50  ;;  %v12604_v20 = vunpack.i.l.bf16 %v18896_v50 }
 0x39d   : > { %11048 = vmatmul.mubr.msk.f32.vlgmr.msra.gmra.mrb[72].mxu0 %vm1098_vm1, %v18856_v46  ;;  %12118 = vmatpush3.bf16.xpose.msk.msra.mxu1 %vm14348_vm2, %v12113_v17  ;;  %v18879_v17 = vld [vmem:[#allocation82_spill] sm:$0xff]  ;;  %v18884_v46 = vld [vmem:[#allocation19_spill] sm:$0xff] }
 0x39e   : > { %11050 = vmatprep.mubr.msk.f32.mxu0 %vm1098_vm1, %v18857_v18  ;;  %12172 = vmatpush3.bf16.xpose.msk.msra.mxu0 %vm14348_vm2, %v12167_v39  ;;  %v12197_v39 = vpack.c.bf16 %v12845_v55, %v12844_v36  ;;  %v18885_v18 = vld [vmem:[#allocation94_spill] sm:$0xff] }
 0x39f   : > { %12145 = vmatprep.subr.msk.bf16.mxu1 %vm14348_vm2, %v12143_v3  ;;  %12175 = vmatprep.subr.msk.bf16.mxu0 %vm14348_vm2, %v12173_v23 }
 0x3a1   : > { %11051 = vmatmul.mubr.msk.f32.gmra.mrb[74].mxu0 %vm1098_vm1, %v18858_v8  ;;  %v18887_v8 = vld [vmem:[#allocation100_spill] sm:$0xff] }
 0x3a2   : > { %11053 = vmatprep.mubr.msk.f32.mxu0 %vm1098_vm1, %v18859_v21 }
 0x3a4   : > { %11020 = vmatmul.mubr.msk.f32.vlgmr.msra.gmra.mrb[48].mxu1 %vm1098_vm1, %v18860_v35  ;;  %v18888_v35 = vld [vmem:[#allocation103_spill] sm:$0xff] }
 0x3a5   : > { %11054 = vmatmul.mubr.msk.f32.gmra.mrb[76].mxu0 %vm1098_vm1, %v18861_v47  ;;  %11022 = vmatprep.mubr.msk.f32.mxu1 %vm1098_vm1, %v18862_v16  ;;  %v18889_v47 = vld [vmem:[#allocation115_spill] sm:$0xff] }
 0x3a6   : > { %11056 = vmatprep.mubr.msk.f32.mxu0 %vm1098_vm1, %v18863_v9  ;;  %12148 = vmatpush3.bf16.xpose.msk.msra.mxu1 %vm14348_vm2, %v12143_v3  ;;  %v12878_v3 = vpop.permute.xlu0 %12877  ;;  %v18890_v9 = vld [vmem:[#allocation116_spill] sm:$0xff] }
 0x3a7   : > { %12178 = vmatpush3.bf16.xpose.msk.msra.mxu0 %vm14348_vm2, %v12173_v23  ;;  %12151 = vmatprep.subr.msk.bf16.mxu1 %vm14348_vm2, %v12149_v19  ;;  %v18883_v23 = vld [vmem:[#allocation117_spill] sm:$0xff]  ;;  %v12880_v2 = vunpack.i.h.bf16 %v12878_v3  ;;  %v12879_v59 = vunpack.i.l.bf16 %v12878_v3 }
 0x3a8   : > { %12181 = vmatprep.subr.msk.bf16.mxu0 %vm14348_vm2, %v12179_v4  ;;  %11023 = vmatmul.mubr.msk.f32.gmra.mrb[50].mxu1 %vm1098_vm1, %v18864_v42  ;;  %v18897_v3 = vld [vmem:[#allocation85_spill] sm:$0xff] }
 0x3a9   : > { %11057 = vmatmul.mubr.msk.f32.gmra.mrb[78].mxu0 %vm1098_vm1, %v18865_v27  ;;  %11025 = vmatprep.mubr.msk.f32.mxu1 %vm1098_vm1, %v18866_v14 }
 0x3aa   : > { %11103 = vmatprep.mubr.msk.f32.mxu0 %vm1098_vm1, %v18867_v57 }
 0x3ac   : > { %11026 = vmatmul.mubr.msk.f32.gmra.mrb[52].mxu1 %vm1098_vm1, %v18868_v6 }
 0x3ad   : > { %11028 = vmatprep.mubr.msk.f32.mxu1 %vm1098_vm1, %v18869_v53 }
 0x3ae   : > { %12154 = vmatpush3.bf16.xpose.msk.msra.mxu1 %vm14348_vm2, %v12149_v19  ;;  %v12203_v19 = vpack.c.bf16 %v12880_v2, %v12879_v59 }
 0x3af   : > { %12184 = vmatpush3.bf16.xpose.msk.msra.mxu0 %vm14348_vm2, %v12179_v4  ;;  %12157 = vmatprep.subr.msk.bf16.mxu1 %vm14348_vm2, %v12155_v58  ;;  %v12918_v4 = vpop.permute.xlu1 %12917 }
 0x3b0   : > { %12187 = vmatprep.subr.msk.bf16.mxu0 %vm14348_vm2, %v12185_v15  ;;  %11029 = vmatmul.mubr.msk.f32.gmra.mrb[54].mxu1 %vm1098_vm1, %v18870_v40  ;;  %v12920_v61 = vunpack.i.h.bf16 %v12918_v4  ;;  %v12919_v42 = vunpack.i.l.bf16 %v12918_v4  ;;  %v18900_v4 = vld [vmem:[#allocation104_spill] sm:$0xff] }
 0x3b1   : > { %11075 = vmatprep.mubr.msk.f32.mxu1 %vm1098_vm1, %v18871_v5  ;;  %v18892_v5 = vld [vmem:[#allocation41_spill] sm:$0xff] }
 0x3b2   : > { %v12209_v6 = vpack.c.bf16 %v12920_v61, %v12919_v42 }
 0x3b6   : > { %12160 = vmatpush3.bf16.xpose.msk.msra.mxu1 %vm14348_vm2, %v12155_v58 }
 0x3b7   : > { %12190 = vmatpush3.bf16.xpose.msk.msra.mxu0 %vm14348_vm2, %v12185_v15  ;;  %12163 = vmatprep.subr.msk.bf16.mxu1 %vm14348_vm2, %v12161_v32 }
 0x3b8   : > { %12216 = vmatprep.subr.bf16.mxu0 %v18872_v34 }
 0x3be   : > { %11104 = vmatmul.mubr.msk.f32.vlgmr.msra.gmra.mrb[80].mxu0 %vm1098_vm1, %v18873_v51  ;;  %12166 = vmatpush3.bf16.xpose.msk.msra.mxu1 %vm14348_vm2, %v12161_v32  ;;  %v12575_v32 = vunpack.i.h.bf16 %v18892_v5 }
 0x3bf   : > { %11106 = vmatprep.mubr.msk.f32.mxu0 %vm1098_vm1, %v18874_v41  ;;  %12218 = vmatpush3.bf16.msra.mxu0 %v18872_v34  ;;  %v12574_v34 = vunpack.i.l.bf16 %v18892_v5 }
 0x3c0   : > { %12193 = vmatprep.subr.msk.bf16.mxu1 %vm14348_vm2, %v12191_v33  ;;  %12220 = vmatprep.subr.bf16.mxu0 %v18875_v29 }
 0x3c1   : > { %v12247_v41 = vpack.c.bf16 %v12575_v32, %v12574_v34 }
 0x3c2   : > { %11107 = vmatmul.mubr.msk.f32.gmra.mrb[82].mxu0 %vm1098_vm1, %v18876_v7 }
 0x3c3   : > { %11109 = vmatprep.mubr.msk.f32.mxu0 %vm1098_vm1, %v18877_v0  ;;  %12222 = vmatpush3.bf16.msra.mxu0 %v18875_v29  ;;  %v15571_v29 = vpop.permute.xlu0 %12882 }
 0x3c4   : > { %12224 = vmatprep.subr.bf16.mxu0 %v18878_v25  ;;  %18893 = vst [vmem:[#allocation40_spill] sm:$0xff] %v15571_v29 }
 0x3c5   : > { %11076 = vmatmul.mubr.msk.f32.vlgmr.msra.gmra.mrb[56].mxu1 %vm1098_vm1, %v18879_v17 }
 0x3c6   : > { %11110 = vmatmul.mubr.msk.f32.gmra.mrb[84].mxu0 %vm1098_vm1, %v18880_v22  ;;  %11078 = vmatprep.mubr.msk.f32.mxu1 %vm1098_vm1, %v18881_v43 }
 0x3c7   : > { %11112 = vmatprep.mubr.msk.f32.mxu0 %vm1098_vm1, %v18883_v23  ;;  %12196 = vmatpush3.bf16.xpose.msk.msra.mxu1 %vm14348_vm2, %v12191_v33  ;;  %v15587_v22 = vpop.permute.xlu0 %12927 }
 0x3c8   : > { %12226 = vmatpush3.bf16.msra.mxu0 %v18878_v25  ;;  %12199 = vmatprep.subr.msk.bf16.mxu1 %vm14348_vm2, %v12197_v39  ;;  %v18894_v25 = vld [vmem:[#allocation52_spill] sm:$0xff]  ;;  %18895 = vst [vmem:[#allocation37_spill] sm:$0xff] %v15587_v22 }
 0x3c9   : > { %12228 = vmatprep.subr.bf16.mxu0 %v18884_v46  ;;  %11079 = vmatmul.mubr.msk.f32.gmra.mrb[58].mxu1 %vm1098_vm1, %v18885_v18  ;;  %v12590_v17 = vunpack.i.h.bf16 %v18894_v25  ;;  %v18898_v18 = vld [vmem:[#allocation93_spill] sm:$0xff] }
 0x3ca   : > { %11113 = vmatmul.mubr.msk.f32.gmra.mrb[86].mxu0 %vm1098_vm1, %v18886_v52  ;;  %11081 = vmatprep.mubr.msk.f32.mxu1 %vm1098_vm1, %v18887_v8  ;;  %v15509_v1 = vpop.f32.mrb[32].mxu0 }
 0x3cb   : > { %v15513_v21 = vpop.f32.mrb[33].mxu0  ;;  %v3582_v63 = vsel %vm280_vm0, %v15509_v1, -inf }
 0x3cc   : > { %12230 = vmatpush3.bf16.msra.mxu0 %v18884_v46  ;;  %v3579_v33 = vsel %vm280_vm0, %v15513_v21, -inf  ;;  %v12923_v46 = vpop.permute.xlu1 %12922 }
 0x3cd   : > { %12232 = vmatprep.subr.bf16.mxu0 %v15511_v54  ;;  %11082 = vmatmul.mubr.msk.f32.gmra.mrb[60].mxu1 %vm1098_vm1, %v18888_v35  ;;  %v12925_v52 = vunpack.i.h.bf16 %v12923_v46  ;;  %v12924_v8 = vunpack.i.l.bf16 %v12923_v46  ;;  %v18899_v35 = vld [vmem:[#allocation96_spill] sm:$0xff] }
 0x3ce   : > { %11084 = vmatprep.mubr.msk.f32.mxu1 %vm1098_vm1, %v18889_v47  ;;  %v15521_v16 = vpop.f32.mrb[34].mxu0  ;;  %v12938_v47 = vpop.permute.xlu0 %12937 }
 0x3cf   : > { %12202 = vmatpush3.bf16.xpose.msk.msra.mxu1 %vm14348_vm2, %v12197_v39  ;;  %v15525_v12 = vpop.f32.mrb[35].mxu0  ;;  %v12589_v39 = vunpack.i.l.bf16 %v18894_v25  ;;  %v3588_v13 = vsel %vm280_vm0, %v15521_v16, -inf }
 0x3d0   : > { %12205 = vmatprep.subr.msk.bf16.mxu1 %vm14348_vm2, %v12203_v19  ;;  %v3585_v2 = vsel %vm280_vm0, %v15525_v12, -inf  ;;  %v15621_v34 = vpop.permute.xlu1 %12932 }
 0x3d1   : > { %11085 = vmatmul.mubr.msk.f32.gmra.mrb[62].mxu1 %vm1098_vm1, %v18890_v9  ;;  %v12251_v23 = vpack.c.bf16 %v12590_v17, %v12589_v39  ;;  %18907 = vst [vmem:[#allocation39_spill] sm:$0xff] %v15621_v34 }
 0x3d2   : > { %11131 = vmatprep.mubr.msk.f32.mxu1 %vm1098_vm1, %v18891_v10  ;;  %v15533_v26 = vpop.f32.mrb[36].mxu0  ;;  %v12940_v10 = vunpack.i.h.bf16 %v12938_v47  ;;  %v3536_v46 = vpop.xlane.xlu0 %3535 }
 0x3d3   : > { %v15535_v27 = vpop.f32.mrb[8].mxu1  ;;  %v15537_v14 = vpop.f32.mrb[37].mxu0  ;;  %v3594_v0 = vsel %vm280_vm0, %v15533_v26, -inf }
 0x3d4   : > { %v15539_v28 = vpop.f32.mrb[9].mxu1  ;;  %v3558_v37 = vsel %vm280_vm0, %v15535_v27, -inf  ;;  %v3591_v59 = vsel %vm280_vm0, %v15537_v14, -inf }
 0x3d5   : > { %3559 = vmax.xlane.f32.xlu1 %v3558_v37  ;;  %v3555_v57 = vsel %vm280_vm0, %v15539_v28, -inf  ;;  %v12939_v37 = vunpack.i.l.bf16 %v12938_v47 }
 0x3d6   : > { %3556 = vmax.xlane.f32.xlu0 %v3555_v57  ;;  %v15545_v58 = vpop.f32.mrb[38].mxu0  ;;  %v18903_v57 = vld [vmem:[#allocation106_spill] sm:$0xff] }
 0x3d7   : > { %12208 = vmatpush3.bf16.xpose.msk.msra.mxu1 %vm14348_vm2, %v12203_v19  ;;  %v15549_v53 = vpop.f32.mrb[10].mxu1  ;;  %v15551_v15 = vpop.f32.mrb[39].mxu0  ;;  %v12255_v19 = vpack.c.bf16 %v12605_v62, %v12604_v20  ;;  %v3600_v32 = vsel %vm280_vm0, %v15545_v58, -inf }
 0x3d8   : > { %12211 = vmatprep.subr.msk.bf16.mxu1 %vm14348_vm2, %v12209_v6  ;;  %v15555_v40 = vpop.f32.mrb[11].mxu1  ;;  %v3564_v7 = vsel %vm280_vm0, %v15549_v53, -inf }
 0x3d9   : > { %3583 = vmax.xlane.f32.xlu1 %v3582_v63  ;;  %v3561_v45 = vsel %vm280_vm0, %v15555_v40, -inf  ;;  %v18904_v63 = vld [vmem:[#allocation119_spill] sm:$0xff] }
 0x3da   : > { %3562 = vmax.xlane.f32.xlu0 %v3561_v45 }
 0x3db   : > { %v15563_v11 = vpop.f32.mrb[12].mxu1 }
 0x3dc   : > { %v15565_v49 = vpop.f32.mrb[13].mxu1  ;;  %v3570_v51 = vsel %vm280_vm0, %v15563_v11, -inf }
 0x3dd   : > { %3580 = vmax.xlane.f32.xlu1 %v3579_v33  ;;  %v3567_v43 = vsel %vm280_vm0, %v15565_v49, -inf  ;;  %v18908_v33 = vld [vmem:[#allocation120_spill] sm:$0xff] }
 0x3de   : > { %3571 = vmax.xlane.f32.xlu0 %v3570_v51  ;;  %v15625_v51 = vpack.c.bf16 %v12940_v10, %v12939_v37 }
 0x3df   : > { %12214 = vmatpush3.bf16.xpose.msk.msra.mxu1 %vm14348_vm2, %v12209_v6  ;;  %v15575_v55 = vpop.f32.mrb[14].mxu1  ;;  %v12259_v6 = vpack.c.bf16 %v12925_v52, %v12924_v8 }
 0x3e0   : > { %12248 = vmatprep.subr.bf16.mxu1 %v12247_v41  ;;  %v15577_v36 = vpop.f32.mrb[15].mxu1  ;;  %v3576_v42 = vsel %vm280_vm0, %v15575_v55, -inf  ;;  %18909 = vst [vmem:[#allocation43_spill] sm:$0xff] %v15625_v51 }
 0x3e1   : > { %3565 = vmax.xlane.f32.xlu1 %v3564_v7  ;;  %v3573_v39 = vsel %vm280_vm0, %v15577_v36, -inf }
 0x3e2   : > { %3595 = vmax.xlane.f32.xlu0 %v3594_v0 }
 0x3e5   : > { %3589 = vmax.xlane.f32.xlu1 %v3588_v13  ;;  %v3533_v13 = vpop.xlane.xlu1 %3532 }
 0x3e6   : > { %11132 = vmatmul.mubr.msk.f32.vlgmr.msra.gmra.mrb[64].mxu1 %vm1098_vm1, %v18897_v3  ;;  %3568 = vmax.xlane.f32.xlu0 %v3567_v43  ;;  %v3597_v3 = vsel %vm280_vm0, %v15551_v15, -inf }
 0x3e7   : > { %11134 = vmatprep.mubr.msk.f32.mxu1 %vm1098_vm1, %v18898_v18  ;;  %12250 = vmatpush3.bf16.msra.mxu1 %v12247_v41 }
 0x3e8   : > { %12252 = vmatprep.subr.bf16.mxu1 %v12251_v23 }
 0x3e9   : > { %3586 = vmax.xlane.f32.xlu1 %v3585_v2  ;;  %v3542_v18 = vpop.xlane.xlu1 %3541 }
 0x3ea   : > { %11135 = vmatmul.mubr.msk.f32.gmra.mrb[66].mxu1 %vm1098_vm1, %v18899_v35  ;;  %3592 = vmax.xlane.f32.xlu0 %v3591_v59  ;;  %v3916_v35 = vsub.f32 %v15048_v31, %v3536_v46 }
 0x3eb   : > { %11137 = vmatprep.mubr.msk.f32.mxu1 %vm1098_vm1, %v18900_v4  ;;  %12254 = vmatpush3.bf16.msra.mxu1 %v12251_v23 }
 0x3ec   : > { %12256 = vmatprep.subr.bf16.mxu1 %v12255_v19  ;;  %v15605_v9 = vpop.f32.mrb[40].mxu0 }
 0x3ed   : > { %18901 = vst [vmem:[#allocation38_spill] sm:$0xff] %v15605_v9  ;;  %v15607_v61 = vpop.f32.mrb[41].mxu0  ;;  %v3630_v50 = vsel %vm280_vm0, %v15605_v9, -inf  ;;  %v3548_v37 = vpop.xlane.xlu1 %3547 }
 0x3ee   : > { %18902 = vst [vmem:[#allocation65_spill] sm:$0xff] %v15607_v61  ;;  %11138 = vmatmul.mubr.msk.f32.gmra.mrb[68].mxu1 %vm1098_vm1, %v18903_v57  ;;  %3577 = vmax.xlane.f32.xlu0 %v3576_v42  ;;  %v3627_v4 = vsel %vm280_vm0, %v15607_v61, -inf  ;;  %v4045_v57 = vmul.f32 1.442695, %v3916_v35 }
 0x3ef   : > { %11140 = vmatprep.mubr.msk.f32.mxu1 %vm1098_vm1, %v18904_v63  ;;  %12258 = vmatpush3.bf16.msra.mxu1 %v12255_v19  ;;  %v3915_v19 = vsub.f32 %v15054_v60, %v3533_v13  ;;  %v3539_v60 = vpop.xlane.xlu0 %3538 }
 0x3f0   : > { %12260 = vmatprep.subr.bf16.mxu1 %v12259_v6  ;;  %v15615_v45 = vpop.f32.mrb[42].mxu0  ;;  %13161 = vpow2.f32 %v4045_v57 }
 0x3f1   : > { %18905 = vst [vmem:[#allocation68_spill] sm:$0xff] %v15615_v45  ;;  %v15617_v5 = vpop.f32.mrb[43].mxu0  ;;  %v4043_v63 = vmul.f32 1.442695, %v3915_v19  ;;  %v3636_v13 = vsel %vm280_vm0, %v15615_v45, -inf }
 0x3f2   : > { %18906 = vst [vmem:[#allocation78_spill] sm:$0xff] %v15617_v5  ;;  %11141 = vmatmul.mubr.msk.f32.gmra.mrb[70].mxu1 %vm1098_vm1, %v18908_v33  ;;  %3601 = vmax.xlane.f32.xlu0 %v3600_v32 }
 0x3f3   : > { %12262 = vmatpush3.bf16.msra.mxu1 %v12259_v6  ;;  %v15627_v41 = vpop.f32.mrb[16].mxu1  ;;  %v3918_v6 = vsub.f32 %v15066_v48, %v3542_v18  ;;  %13163 = vpow2.f32 %v4043_v63  ;;  %v3917_v18 = vsub.f32 %v15070_v38, %v3539_v60  ;;  %v3633_v38 = vsel %vm280_vm0, %v15617_v5, -inf }
 0x3f4   : > { %12280 = vmatprep.subr.bf16.mxu1 %v15625_v51  ;;  %v15630_v7 = vpop.f32.mrb[44].mxu0  ;;  %v15632_v0 = vpop.f32.mrb[17].mxu1  ;;  %v3606_v25 = vsel %vm280_vm0, %v15627_v41, -inf }
 0x3f5   : > { %v15636_v17 = vpop.f32.mrb[45].mxu0  ;;  %3607 = vmax.xlane.f32.xlu1 %v3606_v25  ;;  %v3603_v59 = vsel %vm280_vm0, %v15632_v0, -inf  ;;  %v3642_v10 = vsel %vm280_vm0, %v15630_v7, -inf  ;;  %v4049_v33 = vmul.f32 1.442695, %v3918_v6  ;;  %v3920_v25 = vsub.f32 %v15088_v30, %v3548_v37 }
 0x3f6   : > { %3574 = vmax.xlane.f32.xlu0 %v3573_v39  ;;  %v3554_v39 = vpop.xlane.xlu1 %3553  ;;  %v3639_v48 = vsel %vm280_vm0, %v15636_v17, -inf }
 0x3f7   : > { %13165 = vpow2.f32 %v4049_v33  ;;  %v3922_v46 = vsub.f32 %v15110_v24, %v3554_v39 }
 0x3f8   : > { %v15640_v43 = vpop.f32.mrb[18].mxu1 }
 0x3f9   : > { %18910 = vst [vmem:[#allocation46_spill] sm:$0xff] %v15640_v43  ;;  %v15644_v62 = vpop.f32.mrb[46].mxu0  ;;  %v15646_v20 = vpop.f32.mrb[19].mxu1  ;;  %3631 = vmax.xlane.f32.xlu1 %v3630_v50  ;;  %v3612_v31 = vsel %vm280_vm0, %v15640_v43, -inf  ;;  %v4053_v50 = vmul.f32 1.442695, %v3920_v25 }
 0x3fa   : > { %18911 = vst [vmem:[#allocation49_spill] sm:$0xff] %v15644_v62  ;;  %18912 = vst [vmem:[#allocation54_spill] sm:$0xff] %v15646_v20  ;;  %v15650_v23 = vpop.f32.mrb[47].mxu0  ;;  %3598 = vmax.xlane.f32.xlu0 %v3597_v3  ;;  %v3545_v3 = vpop.xlane.xlu0 %3544  ;;  %v3609_v30 = vsel %vm280_vm0, %v15646_v20, -inf  ;;  %v4057_v19 = vmul.f32 1.442695, %v3922_v46 }
 0x3fb   : > { %13167 = vpow2.f32 %v4053_v50  ;;  %v15693_v24 = vpop.eup %13161  ;;  %v3648_v6 = vsel %vm280_vm0, %v15644_v62, -inf }
 0x3fc   : > { %v15652_v2 = vpop.f32.mrb[20].mxu1  ;;  %13169 = vpow2.f32 %v4057_v19  ;;  %v4302_v33 = vsel %vm280_vm0, %v15693_v24, 0.0 }
 0x3fd   : > { %v15656_v52 = vpop.f32.mrb[21].mxu1  ;;  %3604 = vmax.xlane.f32.xlu1 %v3603_v59  ;;  %v3618_v8 = vsel %vm280_vm0, %v15652_v2, -inf  ;;  %v15699_v63 = vpop.eup %13163 }
 0x3fe   : > { %3619 = vmax.xlane.f32.xlu0 %v3618_v8  ;;  %v3615_v32 = vsel %vm280_vm0, %v15656_v52, -inf  ;;  %v3551_v37 = vpop.xlane.xlu0 %3550 }
 0x3ff   : > { %v3921_v60 = vsub.f32 %v15114_v44, %v3551_v37 }
 0x400   : > { %v15662_v47 = vpop.f32.mrb[22].mxu1 }
 0x401   : > { %v15666_v42 = vpop.f32.mrb[23].mxu1  ;;  %3628 = vmax.xlane.f32.xlu1 %v3627_v4  ;;  %v3624_v8 = vsel %vm280_vm0, %v15662_v47, -inf  ;;  %v4047_v4 = vmul.f32 1.442695, %v3917_v18  ;;  %v15708_v25 = vpop.eup %13165  ;;  %v4055_v44 = vmul.f32 1.442695, %v3921_v60 }
 0x402   : > { %3643 = vmax.xlane.f32.xlu0 %v3642_v10  ;;  %v3919_v10 = vsub.f32 %v15092_v56, %v3545_v3  ;;  %18917 = vst [vmem:[#allocation67_spill] sm:$0xff] %v15708_v25  ;;  %v4308_v46 = vsel %vm280_vm0, %v15708_v25, 0.0  ;;  %v3621_v19 = vsel %vm280_vm0, %v15666_v42, -inf }
 0x403   : > { %13171 = vpow2.f32 %v4047_v4 }
 0x404   : > { %v4051_v56 = vmul.f32 1.442695, %v3919_v10 }
 0x405   : > { %3613 = vmax.xlane.f32.xlu1 %v3612_v31  ;;  %v15722_v18 = vpop.eup %13167 }
 0x406   : > { %3616 = vmax.xlane.f32.xlu0 %v3615_v32  ;;  %13173 = vpow2.f32 %v4051_v56  ;;  %18922 = vst [vmem:[#allocation66_spill] sm:$0xff] %v15722_v18  ;;  %v15736_v37 = vpop.eup %13169  ;;  %v3645_v56 = vsel %vm280_vm0, %v15650_v23, -inf }
 0x407   : > { %13175 = vpow2.f32 %v4055_v44  ;;  %18927 = vst [vmem:[#allocation28_spill] sm:$0xff] %v15736_v37 }
 0x409   : > { %3637 = vmax.xlane.f32.xlu1 %v3636_v13 }
 0x40a   : > { %3640 = vmax.xlane.f32.xlu0 %v3639_v48  ;;  %v4299_v48 = vsel %vm280_vm0, %v15699_v63, 0.0 }
 0x40d   : > { %v15684_v59 = vpop.f32.mrb[48].mxu0  ;;  %3610 = vmax.xlane.f32.xlu1 %v3609_v30  ;;  %v15742_v60 = vpop.eup %13171 }
 0x40e   : > { %18913 = vst [vmem:[#allocation42_spill] sm:$0xff] %v15684_v59  ;;  %v15688_v35 = vpop.f32.mrb[49].mxu0  ;;  %3625 = vmax.xlane.f32.xlu0 %v3624_v8  ;;  %18929 = vst [vmem:[#allocation29_spill] sm:$0xff] %v15742_v60  ;;  %v3678_v34 = vsel %vm280_vm0, %v15684_v59, -inf }
 0x40f   : > { %18914 = vst [vmem:[#allocation59_spill] sm:$0xff] %v15688_v35 }
 0x411   : > { %v15695_v57 = vpop.f32.mrb[50].mxu0  ;;  %3634 = vmax.xlane.f32.xlu1 %v3633_v38  ;;  %v4314_v38 = vsel %vm280_vm0, %v15722_v18, 0.0 }
 0x412   : > { %18915 = vst [vmem:[#allocation44_spill] sm:$0xff] %v15695_v57  ;;  %v15701_v31 = vpop.f32.mrb[51].mxu0  ;;  %3649 = vmax.xlane.f32.xlu0 %v3648_v6 }
 0x413   : > { %18916 = vst [vmem:[#allocation51_spill] sm:$0xff] %v15701_v31 }
 0x414   : > { %v15704_v32 = vpop.f32.mrb[24].mxu1 }
 0x415   : > { %v15710_v39 = vpop.f32.mrb[52].mxu0  ;;  %v15712_v13 = vpop.f32.mrb[25].mxu1  ;;  %4303 = vadd.xlane.f32.xlu1 %v4302_v33 }
 0x416   : > { %18918 = vst [vmem:[#allocation56_spill] sm:$0xff] %v15710_v39  ;;  %18919 = vst [vmem:[#allocation20_spill] sm:$0xff] %v15712_v13  ;;  %v15716_v50 = vpop.f32.mrb[53].mxu0  ;;  %4300 = vadd.xlane.f32.xlu0 %v4299_v48  ;;  %v4320_v48 = vsel %vm280_vm0, %v15736_v37, 0.0 }
 0x417   : > { %18920 = vst [vmem:[#allocation57_spill] sm:$0xff] %v15716_v50 }
 0x418   : > { %v15718_v3 = vpop.f32.mrb[26].mxu1 }
 0x419   : > { %18921 = vst [vmem:[#allocation62_spill] sm:$0xff] %v15718_v3  ;;  %v15724_v30 = vpop.f32.mrb[54].mxu0  ;;  %v15726_v8 = vpop.f32.mrb[27].mxu1  ;;  %4309 = vadd.xlane.f32.xlu1 %v4308_v46  ;;  %v4305_v46 = vsel %vm280_vm0, %v15742_v60, 0.0 }
 0x41a   : > { %18923 = vst [vmem:[#allocation36_spill] sm:$0xff] %v15724_v30  ;;  %18924 = vst [vmem:[#allocation21_spill] sm:$0xff] %v15726_v8  ;;  %v15730_v4 = vpop.f32.mrb[55].mxu0  ;;  %3622 = vmax.xlane.f32.xlu0 %v3621_v19  ;;  %v15752_v19 = vpop.eup %13173 }
 0x41b   : > { %18925 = vst [vmem:[#allocation24_spill] sm:$0xff] %v15730_v4  ;;  %18932 = vst [vmem:[#allocation50_spill] sm:$0xff] %v15752_v19  ;;  %v15758_v51 = vpop.eup %13175 }
 0x41c   : > { %v15732_v10 = vpop.f32.mrb[28].mxu1  ;;  %18933 = vst [vmem:[#allocation33_spill] sm:$0xff] %v15758_v51 }
 0x41d   : > { %18926 = vst [vmem:[#allocation25_spill] sm:$0xff] %v15732_v10  ;;  %v15738_v6 = vpop.f32.mrb[29].mxu1  ;;  %4315 = vadd.xlane.f32.xlu1 %v4314_v38  ;;  %v3654_v38 = vsel %vm280_vm0, %v15704_v32, -inf }
 0x41e   : > { %18928 = vst [vmem:[#allocation45_spill] sm:$0xff] %v15738_v6  ;;  %3646 = vmax.xlane.f32.xlu0 %v3645_v56  ;;  %v4311_v56 = vsel %vm280_vm0, %v15752_v19, 0.0 }
 0x420   : > { %v15744_v33 = vpop.f32.mrb[30].mxu1 }
 0x421   : > { %18930 = vst [vmem:[#allocation48_spill] sm:$0xff] %v15744_v33  ;;  %v15748_v44 = vpop.f32.mrb[31].mxu1  ;;  %4321 = vadd.xlane.f32.xlu1 %v4320_v48  ;;  %v4317_v48 = vsel %vm280_vm0, %v15758_v51, 0.0  ;;  %v3687_v51 = vsel %vm280_vm0, %v15716_v50, -inf  ;;  %v3681_v50 = vsel %vm280_vm0, %v15701_v31, -inf }
 0x422   : > { %18931 = vst [vmem:[#allocation32_spill] sm:$0xff] %v15748_v44  ;;  %4306 = vadd.xlane.f32.xlu0 %v4305_v46  ;;  %v3651_v46 = vsel %vm280_vm0, %v15712_v13, -inf }
 0x425   : > { %3655 = vmax.xlane.f32.xlu1 %v3654_v38  ;;  %v3666_v38 = vsel %vm280_vm0, %v15732_v10, -inf }
 0x426   : > { %4312 = vadd.xlane.f32.xlu0 %v4311_v56  ;;  %v3675_v56 = vsel %vm280_vm0, %v15688_v35, -inf }
 0x429   : > { %3679 = vmax.xlane.f32.xlu1 %v3678_v34  ;;  %v3690_v34 = vsel %vm280_vm0, %v15710_v39, -inf }
 0x42a   : > { %4318 = vadd.xlane.f32.xlu0 %v4317_v48 }
 0x42d   : > { %3652 = vmax.xlane.f32.xlu1 %v3651_v46  ;;  %v3660_v46 = vsel %vm280_vm0, %v15718_v3, -inf }
 0x42e   : > { %v15768_v22 = vpop.f32.mrb[56].mxu0  ;;  %3667 = vmax.xlane.f32.xlu0 %v3666_v38  ;;  %v3663_v38 = vsel %vm280_vm0, %v15738_v6, -inf }
 0x42f   : > { %18934 = vst [vmem:[#allocation55_spill] sm:$0xff] %v15768_v22  ;;  %v15770_v5 = vpop.f32.mrb[57].mxu0 }
 0x430   : > { %18935 = vst [vmem:[#allocation61_spill] sm:$0xff] %v15770_v5 }
 0x431   : > { %3676 = vmax.xlane.f32.xlu1 %v3675_v56 }
 0x432   : > { %v15776_v48 = vpop.f32.mrb[58].mxu0  ;;  %3691 = vmax.xlane.f32.xlu0 %v3690_v34  ;;  %v3684_v34 = vsel %vm280_vm0, %v15695_v57, -inf  ;;  %v3672_v57 = vsel %vm280_vm0, %v15744_v33, -inf }
 0x433   : > { %18936 = vst [vmem:[#allocation69_spill] sm:$0xff] %v15776_v48  ;;  %v15778_v13 = vpop.f32.mrb[59].mxu0 }
 0x434   : > { %18937 = vst [vmem:[#allocation71_spill] sm:$0xff] %v15778_v13 }
 0x435   : > { %v15782_v20 = vpop.f32.mrb[32].mxu1  ;;  %3661 = vmax.xlane.f32.xlu1 %v3660_v46 }
 0x436   : > { %18938 = vst [vmem:[#allocation74_spill] sm:$0xff] %v15782_v20  ;;  %v15786_v45 = vpop.f32.mrb[60].mxu0  ;;  %v15788_v56 = vpop.f32.mrb[33].mxu1  ;;  %3664 = vmax.xlane.f32.xlu0 %v3663_v38  ;;  %v3657_v38 = vsel %vm280_vm0, %v15726_v8, -inf  ;;  %v3669_v8 = vsel %vm280_vm0, %v15748_v44, -inf }
 0x437   : > { %18939 = vst [vmem:[#allocation72_spill] sm:$0xff] %v15786_v45  ;;  %18940 = vst [vmem:[#allocation83_spill] sm:$0xff] %v15788_v56  ;;  %v15790_v37 = vpop.f32.mrb[61].mxu0 }
 0x438   : > { %18941 = vst [vmem:[#allocation109_spill] sm:$0xff] %v15790_v37 }
 0x439   : > { %v15794_v43 = vpop.f32.mrb[34].mxu1  ;;  %3685 = vmax.xlane.f32.xlu1 %v3684_v34 }
 0x43a   : > { %18942 = vst [vmem:[#allocation87_spill] sm:$0xff] %v15794_v43  ;;  %v15798_v46 = vpop.f32.mrb[62].mxu0  ;;  %v15800_v3 = vpop.f32.mrb[35].mxu1  ;;  %3688 = vmax.xlane.f32.xlu0 %v3687_v51  ;;  %v3696_v51 = vsel %vm280_vm0, %v15724_v30, -inf  ;;  %v3699_v30 = vsel %vm280_vm0, %v15788_v56, -inf }
 0x43b   : > { %18943 = vst [vmem:[#allocation110_spill] sm:$0xff] %v15798_v46  ;;  %18944 = vst [vmem:[#allocation63_spill] sm:$0xff] %v15800_v3  ;;  %v15802_v6 = vpop.f32.mrb[63].mxu0 }
 0x43c   : > { %18945 = vst [vmem:[#allocation75_spill] sm:$0xff] %v15802_v6 }
 0x43d   : > { %v15806_v18 = vpop.f32.mrb[36].mxu1  ;;  %3658 = vmax.xlane.f32.xlu1 %v3657_v38  ;;  %v3702_v38 = vsel %vm280_vm0, %v15782_v20, -inf  ;;  %v3744_v20 = vsel %vm280_vm0, %v15798_v46, -inf }
 0x43e   : > { %18946 = vst [vmem:[#allocation64_spill] sm:$0xff] %v15806_v18  ;;  %v15810_v34 = vpop.f32.mrb[37].mxu1  ;;  %3673 = vmax.xlane.f32.xlu0 %v3672_v57  ;;  %v3726_v57 = vsel %vm280_vm0, %v15768_v22, -inf  ;;  %v3705_v22 = vsel %vm280_vm0, %v15800_v3, -inf }
 0x43f   : > { %18947 = vst [vmem:[#allocation107_spill] sm:$0xff] %v15810_v34 }
 0x441   : > { %v15814_v61 = vpop.f32.mrb[38].mxu1  ;;  %3682 = vmax.xlane.f32.xlu1 %v3681_v50  ;;  %v3693_v50 = vsel %vm280_vm0, %v15730_v4, -inf }
 0x442   : > { %18948 = vst [vmem:[#allocation108_spill] sm:$0xff] %v15814_v61  ;;  %v15818_v39 = vpop.f32.mrb[39].mxu1  ;;  %3697 = vmax.xlane.f32.xlu0 %v3696_v51  ;;  %v3714_v51 = vsel %vm280_vm0, %v15806_v18, -inf }
 0x443   : > { %18949 = vst [vmem:[#allocation73_spill] sm:$0xff] %v15818_v39 }
 0x445   : > { %3703 = vmax.xlane.f32.xlu1 %v3702_v38 }
 0x446   : > { %3670 = vmax.xlane.f32.xlu0 %v3669_v8  ;;  %v3723_v8 = vsel %vm280_vm0, %v15770_v5, -inf }
 0x449   : > { %3727 = vmax.xlane.f32.xlu1 %v3726_v57  ;;  %v3738_v57 = vsel %vm280_vm0, %v15786_v45, -inf }
 0x44a   : > { %3694 = vmax.xlane.f32.xlu0 %v3693_v50 }
 0x44d   : > { %3700 = vmax.xlane.f32.xlu1 %v3699_v30  ;;  %v3708_v30 = vsel %vm280_vm0, %v15794_v43, -inf  ;;  %v3735_v43 = vsel %vm280_vm0, %v15790_v37, -inf }
 0x44e   : > { %3715 = vmax.xlane.f32.xlu0 %v3714_v51  ;;  %v3711_v51 = vsel %vm280_vm0, %v15810_v34, -inf }
 0x44f   : > { %v15832_v38 = vpop.f32.mrb[64].mxu0 }
 0x450   : > { %18950 = vst [vmem:[#allocation80_spill] sm:$0xff] %v15832_v38  ;;  %v15834_v44 = vpop.f32.mrb[65].mxu0 }
 0x451   : > { %18951 = vst [vmem:[#allocation88_spill] sm:$0xff] %v15834_v44  ;;  %3724 = vmax.xlane.f32.xlu1 %v3723_v8 }
 0x452   : > { %3739 = vmax.xlane.f32.xlu0 %v3738_v57  ;;  %v3732_v57 = vsel %vm280_vm0, %v15776_v48, -inf  ;;  %v3720_v48 = vsel %vm280_vm0, %v15814_v61, -inf }
 0x453   : > { %v15840_v50 = vpop.f32.mrb[66].mxu0 }
 0x454   : > { %18952 = vst [vmem:[#allocation92_spill] sm:$0xff] %v15840_v50  ;;  %v15842_v56 = vpop.f32.mrb[67].mxu0 }
 0x455   : > { %18953 = vst [vmem:[#allocation98_spill] sm:$0xff] %v15842_v56  ;;  %3709 = vmax.xlane.f32.xlu1 %v3708_v30 }
 0x456   : > { %v15848_v18 = vpop.f32.mrb[40].mxu1  ;;  %3712 = vmax.xlane.f32.xlu0 %v3711_v51 }
 0x457   : > { %18954 = vst [vmem:[#allocation76_spill] sm:$0xff] %v15848_v18  ;;  %v15850_v5 = vpop.f32.mrb[68].mxu0  ;;  %v15852_v8 = vpop.f32.mrb[41].mxu1  ;;  %v3750_v61 = vsel %vm280_vm0, %v15848_v18, -inf }
 0x458   : > { %18955 = vst [vmem:[#allocation101_spill] sm:$0xff] %v15850_v5  ;;  %18956 = vst [vmem:[#allocation86_spill] sm:$0xff] %v15852_v8  ;;  %v15854_v45 = vpop.f32.mrb[69].mxu0  ;;  %v3747_v46 = vsel %vm280_vm0, %v15852_v8, -inf }
 0x459   : > { %18957 = vst [vmem:[#allocation113_spill] sm:$0xff] %v15854_v45  ;;  %3733 = vmax.xlane.f32.xlu1 %v3732_v57 }
 0x45a   : > { %v15860_v30 = vpop.f32.mrb[42].mxu1  ;;  %3736 = vmax.xlane.f32.xlu0 %v3735_v43  ;;  %v3729_v43 = vsel %vm280_vm0, %v15778_v13, -inf }
 0x45b   : > { %18958 = vst [vmem:[#allocation90_spill] sm:$0xff] %v15860_v30  ;;  %v15862_v34 = vpop.f32.mrb[70].mxu0  ;;  %v15864_v4 = vpop.f32.mrb[43].mxu1 }
 0x45c   : > { %18959 = vst [vmem:[#allocation114_spill] sm:$0xff] %v15862_v34  ;;  %18960 = vst [vmem:[#allocation97_spill] sm:$0xff] %v15864_v4  ;;  %v15866_v51 = vpop.f32.mrb[71].mxu0 }
 0x45d   : > { %18961 = vst [vmem:[#allocation79_spill] sm:$0xff] %v15866_v51  ;;  %3706 = vmax.xlane.f32.xlu1 %v3705_v22 }
 0x45e   : > { %v15872_v57 = vpop.f32.mrb[44].mxu1  ;;  %3721 = vmax.xlane.f32.xlu0 %v3720_v48  ;;  %v3717_v48 = vsel %vm280_vm0, %v15818_v39, -inf }
 0x45f   : > { %18962 = vst [vmem:[#allocation99_spill] sm:$0xff] %v15872_v57  ;;  %v15874_v37 = vpop.f32.mrb[45].mxu1 }
 0x460   : > { %18963 = vst [vmem:[#allocation111_spill] sm:$0xff] %v15874_v37 }
 0x461   : > { %3730 = vmax.xlane.f32.xlu1 %v3729_v43 }
 0x462   : > { %v15880_v31 = vpop.f32.mrb[46].mxu1  ;;  %v3560_v33 = vpop.xlane.xlu1 %3559  ;;  %3745 = vmax.xlane.f32.xlu0 %v3744_v20  ;;  %v3741_v20 = vsel %vm280_vm0, %v15802_v6, -inf }
 0x463   : > { %18964 = vst [vmem:[#allocation112_spill] sm:$0xff] %v15880_v31  ;;  %v15882_v22 = vpop.f32.mrb[47].mxu1  ;;  %v3557_v3 = vpop.xlane.xlu0 %3556 }
 0x464   : > { %18965 = vst [vmem:[#allocation77_spill] sm:$0xff] %v15882_v22 }
 0x465   : > { %3751 = vmax.xlane.f32.xlu1 %v3750_v61  ;;  %v3771_v61 = vsel %vm280_vm0, %v15834_v44, -inf }
 0x466   : > { %v3584_v19 = vpop.xlane.xlu1 %3583  ;;  %3718 = vmax.xlane.f32.xlu0 %v3717_v48  ;;  %v3774_v48 = vsel %vm280_vm0, %v15832_v38, -inf }
 0x467   : > { %v3563_v43 = vpop.xlane.xlu0 %3562 }
 0x468   : > { %v3925_v10 = vsub.f32 %v15555_v40, %v3563_v43 }
 0x469   : > { %3748 = vmax.xlane.f32.xlu1 %v3747_v46  ;;  %v3923_v46 = vsub.f32 %v15539_v28, %v3557_v3  ;;  %v3753_v28 = vsel %vm280_vm0, %v15864_v4, -inf }
 0x46a   : > { %v15892_v13 = vpop.xlane.xlu1 %3580  ;;  %3742 = vmax.xlane.f32.xlu0 %v3741_v20  ;;  %v3756_v20 = vsel %vm280_vm0, %v15860_v30, -inf  ;;  %v3759_v30 = vsel %vm280_vm0, %v15874_v37, -inf }
 0x46b   : > { %v15894_v35 = vpop.xlane.xlu0 %3571  ;;  %v3931_v40 = vsub.f32 %v15513_v21, %v15892_v13 }
 0x46d   : > { %3772 = vmax.xlane.f32.xlu1 %v3771_v61  ;;  %v3780_v61 = vsel %vm280_vm0, %v15840_v50, -inf  ;;  %v4075_v21 = vmul.f32 1.442695, %v3931_v40 }
 0x46e   : > { %3775 = vmax.xlane.f32.xlu0 %v3774_v48  ;;  %v15905_v6 = vpop.xlane.xlu1 %3565  ;;  %v4059_v48 = vmul.f32 1.442695, %v3923_v46 }
 0x46f   : > { %v15900_v18 = vpop.xlane.xlu0 %3595 }
 0x470   : > { %v15903_v8 = vpop.f32.mrb[72].mxu0  ;;  %13177 = vpow2.f32 %v4059_v48 }
 0x471   : > { %18966 = vst [vmem:[#allocation13_spill] sm:$0xff] %v15903_v8  ;;  %v15909_v39 = vpop.f32.mrb[73].mxu0  ;;  %3757 = vmax.xlane.f32.xlu1 %v3756_v20  ;;  %v3924_v20 = vsub.f32 %v15535_v27, %v3560_v33  ;;  %v3932_v33 = vsub.f32 %v15509_v1, %v3584_v19 }
 0x472   : > { %18967 = vst [vmem:[#allocation84_spill] sm:$0xff] %v15909_v39  ;;  %3781 = vmax.xlane.f32.xlu0 %v3780_v61  ;;  %v15923_v25 = vpop.xlane.xlu1 %3589 }
 0x473   : > { %v15913_v44 = vpop.xlane.xlu0 %3568  ;;  %v4061_v27 = vmul.f32 1.442695, %v3924_v20  ;;  %v3765_v20 = vsel %vm280_vm0, %v15882_v22, -inf  ;;  %v4077_v19 = vmul.f32 1.442695, %v3932_v33  ;;  %v3789_v22 = vsel %vm280_vm0, %v15866_v51, -inf }
 0x474   : > { %v15915_v38 = vpop.f32.mrb[74].mxu0 }
 0x475   : > { %18968 = vst [vmem:[#allocation91_spill] sm:$0xff] %v15915_v38  ;;  %v15919_v3 = vpop.f32.mrb[75].mxu0  ;;  %3754 = vmax.xlane.f32.xlu1 %v3753_v28  ;;  %v3777_v28 = vsel %vm280_vm0, %v15842_v56, -inf  ;;  %13179 = vpow2.f32 %v4061_v27 }
 0x476   : > { %18969 = vst [vmem:[#allocation15_spill] sm:$0xff] %v15919_v3  ;;  %3760 = vmax.xlane.f32.xlu0 %v3759_v30  ;;  %v3783_v30 = vsel %vm280_vm0, %v15854_v45, -inf  ;;  %v15956_v1 = vpop.xlane.xlu1 %3586  ;;  %v4063_v45 = vmul.f32 1.442695, %v3925_v10  ;;  %13181 = vpow2.f32 %v4077_v19 }
 0x477   : > { %v15926_v61 = vpop.f32.mrb[48].mxu1  ;;  %v15928_v50 = vpop.xlane.xlu0 %3592 }
 0x478   : > { %18970 = vst [vmem:[#allocation95_spill] sm:$0xff] %v15926_v61  ;;  %v15930_v46 = vpop.f32.mrb[76].mxu0  ;;  %v15932_v60 = vpop.f32.mrb[49].mxu1  ;;  %13183 = vpow2.f32 %v4063_v45  ;;  %v3792_v45 = vsel %vm280_vm0, %v15862_v34, -inf }
 0x479   : > { %18971 = vst [vmem:[#allocation102_spill] sm:$0xff] %v15930_v46  ;;  %18972 = vst [vmem:[#allocation17_spill] sm:$0xff] %v15932_v60  ;;  %v15936_v4 = vpop.f32.mrb[77].mxu0  ;;  %3778 = vmax.xlane.f32.xlu1 %v3777_v28  ;;  %v3762_v28 = vsel %vm280_vm0, %v15872_v57, -inf  ;;  %13185 = vpow2.f32 %v4075_v21 }
 0x47a   : > { %18973 = vst [vmem:[#allocation82_spill] sm:$0xff] %v15936_v4  ;;  %3784 = vmax.xlane.f32.xlu0 %v3783_v30 }
 0x47b   : > { %v15941_v37 = vpop.f32.mrb[50].mxu1  ;;  %v15943_v48 = vpop.xlane.xlu0 %3577 }
 0x47c   : > { %18974 = vst [vmem:[#allocation105_spill] sm:$0xff] %v15941_v37  ;;  %v15946_v9 = vpop.f32.mrb[78].mxu0  ;;  %v15948_v29 = vpop.f32.mrb[51].mxu1 }
 0x47d   : > { %18975 = vst [vmem:[#allocation89_spill] sm:$0xff] %v15946_v9  ;;  %18976 = vst [vmem:[#allocation47_spill] sm:$0xff] %v15948_v29  ;;  %v15952_v56 = vpop.f32.mrb[79].mxu0  ;;  %3763 = vmax.xlane.f32.xlu1 %v3762_v28  ;;  %v3786_v28 = vsel %vm280_vm0, %v15850_v5, -inf }
 0x47e   : > { %18977 = vst [vmem:[#allocation117_spill] sm:$0xff] %v15952_v56  ;;  %3766 = vmax.xlane.f32.xlu0 %v3765_v20  ;;  %v15970_v20 = vpop.eup %13177 }
 0x47f   : > { %v15960_v43 = vpop.f32.mrb[52].mxu1  ;;  %v15962_v30 = vpop.xlane.xlu0 %3601  ;;  %18980 = vst [vmem:[#allocation118_spill] sm:$0xff] %v15970_v20  ;;  %v4323_v51 = vsel %vm280_vm0, %v15970_v20, 0.0 }
 0x480   : > { %18978 = vst [vmem:[#allocation19_spill] sm:$0xff] %v15960_v43  ;;  %v15964_v57 = vpop.f32.mrb[53].mxu1  ;;  %v15992_v40 = vpop.eup %13179 }
 0x481   : > { %18979 = vst [vmem:[#allocation94_spill] sm:$0xff] %v15964_v57  ;;  %3787 = vmax.xlane.f32.xlu1 %v3786_v28  ;;  %v3768_v28 = vsel %vm280_vm0, %v15880_v31, -inf  ;;  %18983 = vst [vmem:[#allocation115_spill] sm:$0xff] %v15992_v40  ;;  %v16008_v34 = vpop.eup %13181 }
 0x482   : > { %v15972_v27 = vpop.xlane.xlu1 %3607  ;;  %3790 = vmax.xlane.f32.xlu0 %v3789_v22  ;;  %v3928_v22 = vsub.f32 %v15563_v11, %v15894_v35  ;;  %v3936_v11 = vsub.f32 %v15533_v26, %v15900_v18  ;;  %18984 = vst [vmem:[#allocation116_spill] sm:$0xff] %v16008_v34  ;;  %v3934_v26 = vsub.f32 %v15521_v16, %v15923_v25 }
 0x483   : > { %v15974_v13 = vpop.f32.mrb[54].mxu1  ;;  %v15976_v33 = vpop.xlane.xlu0 %3574 }
 0x484   : > { %18981 = vst [vmem:[#allocation100_spill] sm:$0xff] %v15974_v13  ;;  %v15978_v10 = vpop.f32.mrb[55].mxu1  ;;  %v4069_v20 = vmul.f32 1.442695, %v3928_v22  ;;  %v3822_v22 = vsel %vm280_vm0, %v15903_v8, -inf  ;;  %v4350_v8 = vsel %vm280_vm0, %v16008_v34, 0.0 }
 0x485   : > { %18982 = vst [vmem:[#allocation103_spill] sm:$0xff] %v15978_v10  ;;  %3769 = vmax.xlane.f32.xlu1 %v3768_v28  ;;  %v3798_v28 = vsel %vm280_vm0, %v15926_v61, -inf  ;;  %v4085_v35 = vmul.f32 1.442695, %v3936_v11  ;;  %v3927_v61 = vsub.f32 %v15565_v49, %v15913_v44  ;;  %v4081_v49 = vmul.f32 1.442695, %v3934_v26 }
 0x486   : > { %v15984_v5 = vpop.xlane.xlu1 %3631  ;;  %4324 = vadd.xlane.f32.xlu0 %v4323_v51  ;;  %v3926_v51 = vsub.f32 %v15549_v53, %v15905_v6  ;;  %13187 = vpow2.f32 %v4069_v20  ;;  %v3933_v44 = vsub.f32 %v15525_v12, %v15956_v1 }
 0x487   : > { %v15988_v19 = vpop.xlane.xlu0 %3598  ;;  %v4067_v11 = vmul.f32 1.442695, %v3927_v61 }
 0x488   : > { %v4065_v6 = vmul.f32 1.442695, %v3926_v51  ;;  %v4079_v12 = vmul.f32 1.442695, %v3933_v44 }
 0x489   : > { %3793 = vmax.xlane.f32.xlu1 %v3792_v45  ;;  %v4326_v45 = vsel %vm280_vm0, %v15992_v40, 0.0 }
 0x48a   : > { %v15996_v31 = vpop.xlane.xlu1 %3604  ;;  %3799 = vmax.xlane.f32.xlu0 %v3798_v28  ;;  %v16012_v28 = vpop.eup %13183  ;;  %13189 = vpow2.f32 %v4065_v6  ;;  %v3804_v6 = vsel %vm280_vm0, %v15941_v37, -inf }
 0x48b   : > { %v16000_v21 = vpop.xlane.xlu0 %3619  ;;  %18985 = vst [vmem:[#allocation81_spill] sm:$0xff] %v16012_v28  ;;  %v16026_v40 = vpop.eup %13185  ;;  %v4329_v16 = vsel %vm280_vm0, %v16012_v28, 0.0  ;;  %13191 = vpow2.f32 %v4085_v35  ;;  %v3819_v28 = vsel %vm280_vm0, %v15909_v39, -inf }
 0x48c   : > { %18986 = vst [vmem:[#allocation41_spill] sm:$0xff] %v16026_v40  ;;  %13193 = vpow2.f32 %v4081_v49  ;;  %v3828_v49 = vsel %vm280_vm0, %v15915_v38, -inf }
 0x48d   : > { %4327 = vadd.xlane.f32.xlu1 %v4326_v45  ;;  %v4347_v45 = vsel %vm280_vm0, %v16026_v40, 0.0  ;;  %13195 = vpow2.f32 %v4067_v11 }
 0x48e   : > { %v16014_v53 = vpop.xlane.xlu1 %3628  ;;  %3823 = vmax.xlane.f32.xlu0 %v3822_v22  ;;  %13197 = vpow2.f32 %v4079_v12 }
 0x48f   : > { %v16018_v18 = vpop.xlane.xlu0 %3643 }
 0x491   : > { %v16028_v22 = vpop.f32.mrb[80].mxu0  ;;  %4351 = vadd.xlane.f32.xlu1 %v4350_v8  ;;  %v16060_v8 = vpop.eup %13187 }
 0x492   : > { %18987 = vst [vmem:[#allocation52_spill] sm:$0xff] %v16028_v22  ;;  %v16032_v25 = vpop.f32.mrb[81].mxu0  ;;  %v16034_v20 = vpop.xlane.xlu1 %3613  ;;  %4330 = vadd.xlane.f32.xlu0 %v4329_v16  ;;  %18993 = vst [vmem:[#allocation106_spill] sm:$0xff] %v16060_v8  ;;  %v4338_v12 = vsel %vm280_vm0, %v16060_v8, 0.0 }
 0x493   : > { %18988 = vst [vmem:[#allocation60_spill] sm:$0xff] %v16032_v25  ;;  %v16038_v51 = vpop.xlane.xlu0 %3616 }
 0x495   : > { %v16044_v34 = vpop.f32.mrb[82].mxu0  ;;  %4348 = vadd.xlane.f32.xlu1 %v4347_v45  ;;  %v3795_v45 = vsel %vm280_vm0, %v15932_v60, -inf  ;;  %v3935_v60 = vsub.f32 %v15537_v14, %v15928_v50 }
 0x496   : > { %18989 = vst [vmem:[#allocation85_spill] sm:$0xff] %v16044_v34  ;;  %v16048_v26 = vpop.f32.mrb[83].mxu0  ;;  %v16050_v16 = vpop.xlane.xlu1 %3637  ;;  %3805 = vmax.xlane.f32.xlu0 %v3804_v6 }
 0x497   : > { %18990 = vst [vmem:[#allocation93_spill] sm:$0xff] %v16048_v26  ;;  %v16052_v61 = vpop.xlane.xlu0 %3640 }
 0x498   : > { %18991 = vst [vmem:[#allocation96_spill] sm:$0xff] %v16052_v61  ;;  %v16054_v1 = vpop.f32.mrb[56].mxu1 }
 0x499   : > { %18992 = vst [vmem:[#allocation104_spill] sm:$0xff] %v16054_v1  ;;  %v16062_v37 = vpop.f32.mrb[84].mxu0  ;;  %v16064_v40 = vpop.f32.mrb[57].mxu1  ;;  %3796 = vmax.xlane.f32.xlu1 %v3795_v45 }
 0x49a   : > { %18994 = vst [vmem:[#allocation119_spill] sm:$0xff] %v16062_v37  ;;  %18995 = vst [vmem:[#allocation120_spill] sm:$0xff] %v16064_v40  ;;  %v16068_v44 = vpop.f32.mrb[85].mxu0  ;;  %v16070_v11 = vpop.xlane.xlu1 %3610  ;;  %3829 = vmax.xlane.f32.xlu0 %v3828_v49 }
 0x49b   : > { %18996 = vst [vmem:[#allocation121_spill] sm:$0xff] %v16068_v44  ;;  %v16072_v6 = vpop.xlane.xlu0 %3625  ;;  %v16080_v45 = vpop.eup %13189 }
 0x49c   : > { %v16074_v35 = vpop.f32.mrb[58].mxu1  ;;  %18998 = vst [vmem:[#allocation123_spill] sm:$0xff] %v16080_v45  ;;  %v16088_v49 = vpop.eup %13191  ;;  %v4332_v8 = vsel %vm280_vm0, %v16080_v45, 0.0 }
 0x49d   : > { %18997 = vst [vmem:[#allocation122_spill] sm:$0xff] %v16074_v35  ;;  %v16082_v26 = vpop.f32.mrb[86].mxu0  ;;  %v16084_v38 = vpop.f32.mrb[59].mxu1  ;;  %3820 = vmax.xlane.f32.xlu1 %v3819_v28  ;;  %19001 = vst [vmem:[#allocation126_spill] sm:$0xff] %v16088_v49  ;;  %v4362_v14 = vsel %vm280_vm0, %v16088_v49, 0.0  ;;  %v3938_v28 = vsub.f32 %v15545_v58, %v15962_v30  ;;  %v3929_v58 = vsub.f32 %v15577_v36, %v15976_v33 }
 0x49e   : > { %18999 = vst [vmem:[#allocation124_spill] sm:$0xff] %v16082_v26  ;;  %19000 = vst [vmem:[#allocation125_spill] sm:$0xff] %v16084_v38  ;;  %v16090_v44 = vpop.f32.mrb[87].mxu0  ;;  %v16092_v37 = vpop.xlane.xlu1 %3634  ;;  %4339 = vadd.xlane.f32.xlu0 %v4338_v12  ;;  %v3930_v26 = vsub.f32 %v15575_v55, %v15943_v48  ;;  %v4083_v55 = vmul.f32 1.442695, %v3935_v60 }
 0x49f   : > { %19002 = vst [vmem:[#allocation127_spill] sm:$0xff] %v16090_v44  ;;  %v16096_v39 = vpop.xlane.xlu0 %3649  ;;  %v16106_v44 = vpop.eup %13193  ;;  %v4071_v36 = vmul.f32 1.442695, %v3929_v58 }
 0x4a0   : > { %19003 = vst [vmem:[#allocation128_spill] sm:$0xff] %v16096_v39  ;;  %v16100_v34 = vpop.f32.mrb[60].mxu1  ;;  %v16112_v50 = vpop.eup %13195  ;;  %v4356_v45 = vsel %vm280_vm0, %v16106_v44, 0.0 }
 0x4a1   : > { %19004 = vst [vmem:[#allocation129_spill] sm:$0xff] %v16100_v34  ;;  %v16108_v61 = vpop.f32.mrb[61].mxu1  ;;  %4333 = vadd.xlane.f32.xlu1 %v4332_v8  ;;  %v4073_v34 = vmul.f32 1.442695, %v3930_v26  ;;  %v16120_v62 = vpop.eup %13197  ;;  %v4089_v26 = vmul.f32 1.442695, %v3938_v28 }
 0x4a2   : > { %19005 = vst [vmem:[#allocation130_spill] sm:$0xff] %v16108_v61  ;;  %v4304_v12 = vpop.xlane.xlu1 %4303  ;;  %4363 = vadd.xlane.f32.xlu0 %v4362_v14  ;;  %v4335_v14 = vsel %vm280_vm0, %v16112_v50, 0.0  ;;  %v3801_v28 = vsel %vm280_vm0, %v15948_v29, -inf }
 0x4a3   : > { %v4301_v48 = vpop.xlane.xlu0 %4300  ;;  %13199 = vrcp.f32 %v4304_v12  ;;  %v3834_v12 = vsel %vm280_vm0, %v15930_v46, -inf }
 0x4a4   : > { %v16116_v39 = vpop.f32.mrb[62].mxu1  ;;  %13201 = vrcp.f32 %v4301_v48 }
 0x4a5   : > { %19006 = vst [vmem:[#allocation131_spill] sm:$0xff] %v16116_v39  ;;  %v16122_v8 = vpop.f32.mrb[63].mxu1  ;;  %4357 = vadd.xlane.f32.xlu1 %v4356_v45  ;;  %13203 = vpow2.f32 %v4083_v55  ;;  %v4353_v45 = vsel %vm280_vm0, %v16120_v62, 0.0  ;;  %v3940_v55 = vsub.f32 %v15627_v41, %v15972_v27  ;;  %v3939_v27 = vsub.f32 %v15632_v0, %v15996_v31 }
 0x4a6   : > { %19007 = vst [vmem:[#allocation132_spill] sm:$0xff] %v16122_v8  ;;  %v4310_v60 = vpop.xlane.xlu1 %4309  ;;  %4336 = vadd.xlane.f32.xlu0 %v4335_v14  ;;  %13205 = vpow2.f32 %v4073_v34  ;;  %v3937_v14 = vsub.f32 %v15551_v15, %v15988_v19  ;;  %v3825_v15 = vsel %vm280_vm0, %v15919_v3, -inf  ;;  %v3831_v31 = vsel %vm280_vm0, %v15936_v4, -inf }
 0x4a7   : > { %v16128_v30 = vpop.xlane.xlu0 %3622  ;;  %13207 = vpow2.f32 %v4089_v26  ;;  %v4093_v41 = vmul.f32 1.442695, %v3940_v55 }
 0x4a8   : > { %13209 = vpow2.f32 %v4071_v36  ;;  %v4087_v55 = vmul.f32 1.442695, %v3937_v14  ;;  %v4091_v36 = vmul.f32 1.442695, %v3939_v27  ;;  %v19011_v14 = vld [vmem:[#allocation58_spill] sm:$0xff] }
 0x4a9   : > { %4354 = vadd.xlane.f32.xlu1 %v4353_v45  ;;  %v3807_v45 = vsel %vm280_vm0, %v15964_v57, -inf  ;;  %13211 = vrcp.f32 %v4310_v60 }
 0x4aa   : > { %v4316_v48 = vpop.xlane.xlu1 %4315  ;;  %3835 = vmax.xlane.f32.xlu0 %v3834_v12  ;;  %v19008_v12 = vld [vmem:[#allocation53_spill] sm:$0xff] }
 0x4ab   : > { %v16138_v33 = vpop.xlane.xlu0 %3646  ;;  %v12585_v49 = vunpack.i.h.bf16 %v19008_v12  ;;  %v12584_v34 = vunpack.i.l.bf16 %v19008_v12  ;;  %v12600_v12 = vunpack.i.h.bf16 %v19011_v14 }
 0x4ad   : > { %3802 = vmax.xlane.f32.xlu1 %v3801_v28  ;;  %v13200_v26 = vpop.eup %13199 }
 0x4ae   : > { %v4322_v58 = vpop.xlane.xlu1 %4321  ;;  %3808 = vmax.xlane.f32.xlu0 %v3807_v45  ;;  %v13202_v29 = vpop.eup %13201  ;;  %v4812_v45 = vmul.f32 %v13200_v26, %v15693_v24 }
 0x4af   : > { %v4307_v46 = vpop.xlane.xlu0 %4306  ;;  %v16154_v19 = vpop.eup %13203  ;;  %v4811_v0 = vmul.f32 %v13202_v29, %v15699_v63  ;;  %v12235_v29 = vpack.c.bf16 %v12585_v49, %v12584_v34  ;;  %v19014_v34 = vld [vmem:[#allocation70_spill] sm:$0xff] }
 0x4b0   : > { %19009 = vst [vmem:[#allocation53_spill] sm:$0xff] %v16154_v19  ;;  %13213 = vrcp.f32 %v4307_v46  ;;  %v16159_v28 = vpop.eup %13205  ;;  %v4359_v24 = vsel %vm280_vm0, %v16154_v19, 0.0  ;;  %v12615_v27 = vunpack.i.h.bf16 %v19014_v34  ;;  %v12614_v26 = vunpack.i.l.bf16 %v19014_v34 }
 0x4b1   : > { %3826 = vmax.xlane.f32.xlu1 %v3825_v15  ;;  %19010 = vst [vmem:[#allocation133_spill] sm:$0xff] %v16159_v28  ;;  %13215 = vpow2.f32 %v4093_v41  ;;  %11159 = vmatprep.mubr.msk.f32.mxu0 %vm280_vm0, %v4811_v0  ;;  %v12599_v15 = vunpack.i.l.bf16 %v19011_v14  ;;  %v16175_v41 = vpop.eup %13207 }
 0x4b2   : > { %v16162_v60 = vpop.xlane.xlu1 %3655  ;;  %3832 = vmax.xlane.f32.xlu0 %v3831_v31  ;;  %13217 = vrcp.f32 %v4316_v48  ;;  %11160 = vmatmul.mubr.msk.f32.vlgmr.msra.gmra.mrb[88].mxu0 %vm280_vm0, %v4812_v45  ;;  %v4344_v48 = vsel %vm280_vm0, %v16159_v28, 0.0  ;;  %19012 = vst [vmem:[#allocation58_spill] sm:$0xff] %v16175_v41  ;;  %v3810_v31 = vsel %vm280_vm0, %v15960_v43, -inf  ;;  %v16185_v45 = vpop.eup %13209  ;;  %v19023_v43 = vld [vmem:[#allocation29_spill] sm:$0xff] }
 0x4b3   : > { %v4313_v63 = vpop.xlane.xlu0 %4312  ;;  %12234 = vmatpush3.bf16.msra.mxu0 %v15511_v54  ;;  %v12239_v0 = vpack.c.bf16 %v12600_v12, %v12599_v15  ;;  %19015 = vst [vmem:[#allocation70_spill] sm:$0xff] %v16185_v45  ;;  %v13212_v14 = vpop.eup %13211  ;;  %v19018_v15 = vld [vmem:[#allocation40_spill] sm:$0xff] }
 0x4b4   : > { %13219 = vrcp.f32 %v4313_v63  ;;  %12236 = vmatprep.subr.bf16.mxu0 %v12235_v29  ;;  %v4368_v63 = vsel %vm280_vm0, %v16175_v41, 0.0  ;;  %v12884_v34 = vunpack.i.l.bf16 %v19018_v15 }
 0x4b5   : > { %13221 = vpow2.f32 %v4087_v55  ;;  %4360 = vadd.xlane.f32.xlu1 %v4359_v24 }
 0x4b6   : > { %13223 = vpow2.f32 %v4091_v36  ;;  %v16177_v49 = vpop.xlane.xlu1 %3679  ;;  %4345 = vadd.xlane.f32.xlu0 %v4344_v48  ;;  %v12885_v48 = vunpack.i.h.bf16 %v19018_v15 }
 0x4b7   : > { %19013 = vst [vmem:[#allocation134_spill] sm:$0xff] %v16177_v49  ;;  %13225 = vrcp.f32 %v4322_v58  ;;  %v4319_v54 = vpop.xlane.xlu0 %4318  ;;  %12238 = vmatpush3.bf16.msra.mxu0 %v12235_v29 }
 0x4b8   : > { %13227 = vrcp.f32 %v4319_v54  ;;  %12240 = vmatprep.subr.bf16.mxu0 %v12239_v0  ;;  %v12243_v54 = vpack.c.bf16 %v12615_v27, %v12614_v26  ;;  %v19025_v27 = vld [vmem:[#allocation67_spill] sm:$0xff] }
 0x4b9   : > { %v16187_v36 = vpop.f32.mrb[64].mxu1  ;;  %3811 = vmax.xlane.f32.xlu1 %v3810_v31  ;;  %v19021_v31 = vld [vmem:[#allocation38_spill] sm:$0xff]  ;;  %v4814_v26 = vmul.f32 %v13212_v14, %v19025_v27 }
 0x4ba   : > { %19016 = vst [vmem:[#allocation135_spill] sm:$0xff] %v16187_v36  ;;  %v16191_v58 = vpop.f32.mrb[65].mxu1  ;;  %v16193_v24 = vpop.xlane.xlu1 %3652  ;;  %4369 = vadd.xlane.f32.xlu0 %v4368_v63  ;;  %v3948_v46 = vsub.f32 %v19021_v31, %v15984_v5  ;;  %v3816_v63 = vsel %vm280_vm0, %v15974_v13, -inf  ;;  %v16228_v13 = vpack.c.bf16 %v12885_v48, %v12884_v34  ;;  %v3846_v31 = vsel %vm280_vm0, %v16054_v1, -inf }
 0x4bb   : > { %19017 = vst [vmem:[#allocation136_spill] sm:$0xff] %v16191_v58  ;;  %v13214_v12 = vpop.eup %13213  ;;  %v16197_v55 = vpop.xlane.xlu0 %3667  ;;  %12242 = vmatpush3.bf16.msra.mxu0 %v12239_v0  ;;  %v19028_v0 = vld [vmem:[#allocation59_spill] sm:$0xff] }
 0x4bc   : > { %19019 = vst [vmem:[#allocation40_spill] sm:$0xff] %v16197_v55  ;;  %v16199_v29 = vpop.eup %13215  ;;  %v4813_v57 = vmul.f32 %v13214_v12, %v19023_v43  ;;  %12244 = vmatprep.subr.bf16.mxu0 %v12243_v54  ;;  %v4341_v43 = vsel %vm280_vm0, %v16185_v45, 0.0  ;;  %v19032_v55 = vld [vmem:[#allocation65_spill] sm:$0xff] }
 0x4bd   : > { %19020 = vst [vmem:[#allocation137_spill] sm:$0xff] %v16199_v29  ;;  %v13218_v41 = vpop.eup %13217  ;;  %v16208_v28 = vpop.f32.mrb[66].mxu1  ;;  %3817 = vmax.xlane.f32.xlu1 %v3816_v63  ;;  %v19030_v63 = vld [vmem:[#allocation50_spill] sm:$0xff]  ;;  %v19038_v45 = vld [vmem:[#allocation45_spill] sm:$0xff] }
 0x4be   : > { %19024 = vst [vmem:[#allocation38_spill] sm:$0xff] %v16208_v28  ;;  %v13220_v15 = vpop.eup %13219  ;;  %v16211_v19 = vpop.f32.mrb[67].mxu1  ;;  %11162 = vmatprep.mubr.msk.f32.mxu0 %vm280_vm0, %v4813_v57  ;;  %4342 = vadd.xlane.f32.xlu0 %v4341_v43  ;;  %v4109_v57 = vmul.f32 1.442695, %v3948_v46  ;;  %v19034_v43 = vld [vmem:[#allocation66_spill] sm:$0xff] }
 0x4bf   : > { %19026 = vst [vmem:[#allocation29_spill] sm:$0xff] %v16211_v19  ;;  %v16214_v5 = vpop.xlane.xlu1 %3676  ;;  %v16218_v12 = vpop.eup %13221  ;;  %11163 = vmatmul.mubr.msk.f32.gmra.mrb[90].mxu0 %vm280_vm0, %v4814_v26  ;;  %v4815_v27 = vmul.f32 %v13220_v15, %v19030_v63  ;;  %v3947_v26 = vsub.f32 %v19032_v55, %v16014_v53  ;;  %v4374_v15 = vsel %vm280_vm0, %v16199_v29, 0.0  ;;  %v4816_v63 = vmul.f32 %v13218_v41, %v19034_v43  ;;  %v19036_v55 = vld [vmem:[#allocation62_spill] sm:$0xff]  ;;  %v19037_v41 = vld [vmem:[#allocation33_spill] sm:$0xff] }
 0x4c0   : > { %19027 = vst [vmem:[#allocation67_spill] sm:$0xff] %v16218_v12  ;;  %v16223_v14 = vpop.xlane.xlu0 %3691  ;;  %v16226_v3 = vpop.eup %13223  ;;  %12246 = vmatpush3.bf16.msra.mxu0 %v12243_v54  ;;  %v4365_v53 = vsel %vm280_vm0, %v16218_v12, 0.0  ;;  %13229 = vpow2.f32 %v4109_v57 }
 0x4c1   : > { %19029 = vst [vmem:[#allocation59_spill] sm:$0xff] %v16223_v14  ;;  %v13226_v59 = vpop.eup %13225  ;;  %v16234_v4 = vpop.f32.mrb[68].mxu1  ;;  %11165 = vmatprep.mubr.msk.f32.mxu0 %vm280_vm0, %v4815_v27  ;;  %12264 = vmatprep.subr.bf16.mxu0 %v16228_v13  ;;  %v19039_v14 = vld [vmem:[#allocation46_spill] sm:$0xff] }
 0x4c2   : > { %19033 = vst [vmem:[#allocation50_spill] sm:$0xff] %v16234_v4  ;;  %v13228_v46 = vpop.eup %13227  ;;  %v16240_v48 = vpop.f32.mrb[69].mxu1  ;;  %4375 = vadd.xlane.f32.xlu1 %v4374_v15  ;;  %4366 = vadd.xlane.f32.xlu0 %v4365_v53  ;;  %v4107_v15 = vmul.f32 1.442695, %v3947_v26  ;;  %v3942_v49 = vsub.f32 %v19039_v14, %v16034_v20  ;;  %v19041_v53 = vld [vmem:[#allocation28_spill] sm:$0xff]  ;;  %v3840_v26 = vsel %vm280_vm0, %v15946_v9, -inf }
 0x4c3   : > { %19035 = vst [vmem:[#allocation65_spill] sm:$0xff] %v16240_v48  ;;  %v16243_v34 = vpop.xlane.xlu1 %3661  ;;  %11166 = vmatmul.mubr.msk.f32.gmra.mrb[92].mxu0 %vm280_vm0, %v4816_v63  ;;  %v4817_v43 = vmul.f32 %v13228_v46, %v19037_v41  ;;  %v4371_v63 = vsel %vm280_vm0, %v16226_v3, 0.0  ;;  %v4818_v54 = vmul.f32 %v13226_v59, %v19041_v53  ;;  %v19044_v20 = vld [vmem:[#allocation44_spill] sm:$0xff] }
 0x4c4   : > { %v16250_v27 = vpop.xlane.xlu0 %3664  ;;  %13231 = vpow2.f32 %v4107_v15  ;;  %v4097_v59 = vmul.f32 1.442695, %v3942_v49  ;;  %v19048_v14 = vld [vmem:[#allocation48_spill] sm:$0xff]  ;;  %v19049_v15 = vld [vmem:[#allocation54_spill] sm:$0xff] }
 0x4c5   : > { %v16257_v29 = vpop.f32.mrb[70].mxu1  ;;  %11168 = vmatprep.mubr.msk.f32.mxu0 %vm280_vm0, %v4817_v43  ;;  %v3867_v43 = vsel %vm280_vm0, %v16032_v25, -inf }
 0x4c6   : > { %19040 = vst [vmem:[#allocation66_spill] sm:$0xff] %v16257_v29  ;;  %v16263_v12 = vpop.f32.mrb[71].mxu1  ;;  %4372 = vadd.xlane.f32.xlu1 %v4371_v63  ;;  %3841 = vmax.xlane.f32.xlu0 %v3840_v26  ;;  %v19047_v63 = vld [vmem:[#allocation68_spill] sm:$0xff]  ;;  %13233 = vpow2.f32 %v4097_v59 }
 0x4c7   : > { %19042 = vst [vmem:[#allocation62_spill] sm:$0xff] %v16263_v12  ;;  %v16265_v57 = vpop.xlane.xlu1 %3685  ;;  %11169 = vmatmul.mubr.msk.f32.gmra.mrb[94].mxu0 %vm280_vm0, %v4818_v54  ;;  %v3950_v53 = vsub.f32 %v19047_v63, %v16050_v16  ;;  %v3813_v54 = vsel %vm280_vm0, %v15978_v10, -inf  ;;  %v3941_v16 = vsub.f32 %v19049_v15, %v16070_v11  ;;  %v3870_v63 = vsel %vm280_vm0, %v16028_v22, -inf  ;;  %v19051_v10 = vld [vmem:[#allocation51_spill] sm:$0xff]  ;;  %v19055_v22 = vld [vmem:[#allocation78_spill] sm:$0xff] }
 0x4c8   : > { %19043 = vst [vmem:[#allocation33_spill] sm:$0xff] %v16265_v57  ;;  %v16272_v46 = vpop.xlane.xlu0 %3688  ;;  %v19053_v11 = vsub.f32 %v15652_v2, %v16000_v21  ;;  %v3949_v41 = vsub.f32 %v19055_v22, %v16092_v37  ;;  %v19056_v2 = vld [vmem:[#allocation74_spill] sm:$0xff]  ;;  %v19057_v37 = vsub.f32 %v15630_v7, %v16018_v18 }
 0x4c9   : > { %19045 = vst [vmem:[#allocation45_spill] sm:$0xff] %v16272_v46  ;;  %v4113_v49 = vmul.f32 1.442695, %v3950_v53 }
 0x4ca   : > { %3847 = vmax.xlane.f32.xlu1 %v3846_v31  ;;  %3814 = vmax.xlane.f32.xlu0 %v3813_v54  ;;  %v16292_v31 = vpop.eup %13229  ;;  %v3837_v54 = vsel %vm280_vm0, %v15952_v56, -inf  ;;  %v4101_v53 = vmul.f32 1.442695, %v19053_v11  ;;  %v3843_v56 = vsel %vm280_vm0, %v16064_v40, -inf  ;;  %v4117_v22 = vmul.f32 1.442695, %v19057_v37 }
 0x4cb   : > { %v16280_v9 = vpop.xlane.xlu1 %3658  ;;  %19050 = vst [vmem:[#allocation46_spill] sm:$0xff] %v16292_v31  ;;  %13235 = vpow2.f32 %v4113_v49  ;;  %v4111_v11 = vmul.f32 1.442695, %v3949_v41 }
 0x4cc   : > { %v16284_v26 = vpop.xlane.xlu0 %3673  ;;  %13237 = vpow2.f32 %v4101_v53 }
 0x4ce   : > { %3871 = vmax.xlane.f32.xlu1 %v3870_v63  ;;  %3838 = vmax.xlane.f32.xlu0 %v3837_v54  ;;  %v4095_v63 = vmul.f32 1.442695, %v3941_v16  ;;  %v4398_v54 = vsel %vm280_vm0, %v16292_v31, 0.0  ;;  %v16315_v57 = vpop.eup %13231 }
 0x4cf   : > { %v16294_v1 = vpop.xlane.xlu1 %3682 }
 0x4d0   : > { %v16300_v59 = vpop.xlane.xlu0 %3697  ;;  %13239 = vpow2.f32 %v4095_v63  ;;  %v16332_v21 = vpop.eup %13233 }
 0x4d1   : > { %19052 = vst [vmem:[#allocation28_spill] sm:$0xff] %v16300_v59  ;;  %13241 = vpow2.f32 %v4117_v22  ;;  %v4380_v16 = vsel %vm280_vm0, %v16332_v21, 0.0 }
 0x4d2   : > { %3844 = vmax.xlane.f32.xlu1 %v3843_v56  ;;  %4399 = vadd.xlane.f32.xlu0 %v4398_v54  ;;  %v19058_v56 = vld [vmem:[#allocation32_spill] sm:$0xff]  ;;  %v4395_v54 = vsel %vm280_vm0, %v16315_v57, 0.0  ;;  %13243 = vpow2.f32 %v4111_v11 }
 0x4d3   : > { %v16311_v46 = vpop.xlane.xlu1 %3703  ;;  %v19077_v11 = vld [vmem:[#allocation96_spill] sm:$0xff] }
 0x4d4   : > { %v16319_v49 = vpop.xlane.xlu0 %3670 }
 0x4d5   : > { %v16346_v25 = vpop.eup %13235 }
 0x4d6   : > { %3868 = vmax.xlane.f32.xlu1 %v3867_v43  ;;  %4396 = vadd.xlane.f32.xlu0 %v4395_v54  ;;  %v3852_v43 = vsel %vm280_vm0, %v16074_v35, -inf  ;;  %19063 = vst [vmem:[#allocation48_spill] sm:$0xff] %v16346_v25  ;;  %v19064_v54 = vld [vmem:[#allocation83_spill] sm:$0xff]  ;;  %v3849_v35 = vsel %vm280_vm0, %v16084_v38, -inf  ;;  %v4404_v53 = vsel %vm280_vm0, %v16346_v25, 0.0  ;;  %v19071_v38 = vsub.f32 %v15656_v52, %v16038_v51 }
 0x4d7   : > { %v16328_v40 = vpop.xlane.xlu1 %3727  ;;  %v19075_v52 = vsub.f32 %v15662_v47, %v16072_v6  ;;  %v19076_v51 = vld [vmem:[#allocation107_spill] sm:$0xff]  ;;  %v19079_v47 = vld [vmem:[#allocation69_spill] sm:$0xff] }
 0x4d8   : > { %19059 = vst [vmem:[#allocation44_spill] sm:$0xff] %v16328_v40  ;;  %v16336_v18 = vpop.xlane.xlu0 %3694 }
 0x4d9   : > { %19061 = vst [vmem:[#allocation68_spill] sm:$0xff] %v16336_v18 }
 0x4da   : > { %3853 = vmax.xlane.f32.xlu1 %v3852_v43  ;;  %4381 = vadd.xlane.f32.xlu0 %v4380_v16  ;;  %v16356_v43 = vpop.eup %13237  ;;  %v19078_v16 = vsub.f32 %v15636_v17, %v19077_v11  ;;  %v19081_v17 = vsub.f32 %v15666_v42, %v16128_v30 }
 0x4db   : > { %v16342_v37 = vpop.xlane.xlu1 %3700  ;;  %v16362_v31 = vpop.eup %13239  ;;  %v4386_v63 = vsel %vm280_vm0, %v16356_v43, 0.0 }
 0x4dc   : > { %v16350_v22 = vpop.xlane.xlu0 %3715  ;;  %v16375_v15 = vpop.eup %13241  ;;  %v4115_v18 = vmul.f32 1.442695, %v19078_v16  ;;  %v4103_v11 = vmul.f32 1.442695, %v19081_v17  ;;  %v19096_v16 = vld [vmem:[#allocation124_spill] sm:$0xff] }
 0x4dd   : > { %19065 = vst [vmem:[#allocation54_spill] sm:$0xff] %v16350_v22  ;;  %19072 = vst [vmem:[#allocation74_spill] sm:$0xff] %v16375_v15  ;;  %v16381_v7 = vpop.eup %13243  ;;  %v4410_v41 = vsel %vm280_vm0, %v16375_v15, 0.0 }
 0x4de   : > { %3850 = vmax.xlane.f32.xlu1 %v3849_v35  ;;  %4405 = vadd.xlane.f32.xlu0 %v4404_v53  ;;  %v4099_v35 = vmul.f32 1.442695, %v19071_v38  ;;  %v4377_v53 = vsel %vm280_vm0, %v16362_v31, 0.0  ;;  %19073 = vst [vmem:[#allocation32_spill] sm:$0xff] %v16381_v7  ;;  %v4105_v38 = vmul.f32 1.442695, %v19075_v52 }
 0x4df   : > { %v16358_v40 = vpop.xlane.xlu1 %3724 }
 0x4e0   : > { %19067 = vst [vmem:[#allocation51_spill] sm:$0xff] %v16358_v40  ;;  %v16366_v59 = vpop.xlane.xlu0 %3739  ;;  %v19074_v40 = vld [vmem:[#allocation87_spill] sm:$0xff]  ;;  %13245 = vpow2.f32 %v4099_v35 }
 0x4e1   : > { %19069 = vst [vmem:[#allocation78_spill] sm:$0xff] %v16366_v59  ;;  %13247 = vpow2.f32 %v4105_v38  ;;  %v19085_v38 = vld [vmem:[#allocation119_spill] sm:$0xff] }
 0x4e2   : > { %4387 = vadd.xlane.f32.xlu1 %v4386_v63  ;;  %4378 = vadd.xlane.f32.xlu0 %v4377_v53  ;;  %v4401_v53 = vsel %vm280_vm0, %v16381_v7, 0.0  ;;  %13249 = vpow2.f32 %v4115_v18  ;;  %v19084_v7 = vld [vmem:[#allocation85_spill] sm:$0xff]  ;;  %v3882_v42 = vsel %vm280_vm0, %v19085_v38, -inf }
 0x4e3   : > { %v16377_v25 = vpop.xlane.xlu1 %3709  ;;  %13251 = vpow2.f32 %v4103_v11  ;;  %v19086_v18 = vld [vmem:[#allocation93_spill] sm:$0xff]  ;;  %v3855_v11 = vsel %vm280_vm0, %v16108_v61, -inf }
 0x4e4   : > { %v16385_v59 = vpop.xlane.xlu0 %3712  ;;  %v3873_v17 = vsel %vm280_vm0, %v19086_v18, -inf }
 0x4e6   : > { %4411 = vadd.xlane.f32.xlu1 %v4410_v41  ;;  %4402 = vadd.xlane.f32.xlu0 %v4401_v53  ;;  %v19083_v41 = vld [vmem:[#allocation129_spill] sm:$0xff]  ;;  %v3876_v53 = vsel %vm280_vm0, %v19084_v7, -inf }
 0x4e7   : > { %v16397_v22 = vpop.xlane.xlu1 %3733  ;;  %v3858_v63 = vsel %vm280_vm0, %v19083_v41, -inf }
 0x4e8   : > { %v16403_v52 = vpop.xlane.xlu0 %3736 }
 0x4e9   : > { %19080 = vst [vmem:[#allocation83_spill] sm:$0xff] %v16403_v52 }
 0x4ea   : > { %3859 = vmax.xlane.f32.xlu1 %v3858_v63  ;;  %3877 = vmax.xlane.f32.xlu0 %v3876_v53  ;;  %v16424_v35 = vpop.eup %13245  ;;  %v19088_v53 = vsub.f32 %v15704_v32, %v16162_v60 }
 0x4eb   : > { %v16412_v15 = vpop.xlane.xlu1 %3706  ;;  %v16433_v41 = vpop.eup %13247  ;;  %v4383_v38 = vsel %vm280_vm0, %v16424_v35, 0.0 }
 0x4ec   : > { %v16416_v6 = vpop.xlane.xlu0 %3721  ;;  %v4125_v7 = vmul.f32 1.442695, %v19088_v53  ;;  %v16439_v18 = vpop.eup %13249  ;;  %v4392_v60 = vsel %vm280_vm0, %v16433_v41, 0.0 }
 0x4ed   : > { %v16447_v53 = vpop.eup %13251  ;;  %v4407_v61 = vsel %vm280_vm0, %v16439_v18, 0.0 }
 0x4ee   : > { %3883 = vmax.xlane.f32.xlu1 %v3882_v42  ;;  %3874 = vmax.xlane.f32.xlu0 %v3873_v17  ;;  %13253 = vpow2.f32 %v4125_v7  ;;  %v4389_v52 = vsel %vm280_vm0, %v16447_v53, 0.0  ;;  %v19094_v7 = vld [vmem:[#allocation121_spill] sm:$0xff] }
 0x4ef   : > { %v16420_v30 = vpop.xlane.xlu1 %3730 }
 0x4f0   : > { %v16426_v63 = vpop.xlane.xlu0 %3745 }
 0x4f1   : > { %19087 = vst [vmem:[#allocation87_spill] sm:$0xff] %v16426_v63  ;;  %v19090_v63 = vld [vmem:[#allocation20_spill] sm:$0xff] }
 0x4f2   : > { %3856 = vmax.xlane.f32.xlu1 %v3855_v11  ;;  %4384 = vadd.xlane.f32.xlu0 %v4383_v38  ;;  %v3955_v32 = vsub.f32 %v19090_v63, %v16193_v24  ;;  %v3879_v63 = vsel %vm280_vm0, %v19094_v7, -inf }
 0x4f3   : > { %v16435_v42 = vpop.xlane.xlu1 %3751 }
 0x4f4   : > { %19089 = vst [vmem:[#allocation107_spill] sm:$0xff] %v16435_v42  ;;  %v16441_v17 = vpop.xlane.xlu0 %3718  ;;  %v4123_v38 = vmul.f32 1.442695, %v3955_v32  ;;  %v3864_v32 = vsel %vm280_vm0, %v16116_v39, -inf }
 0x4f6   : > { %4393 = vadd.xlane.f32.xlu1 %v4392_v60  ;;  %4408 = vadd.xlane.f32.xlu0 %v4407_v61  ;;  %13255 = vpow2.f32 %v4123_v38 }
 0x4f7   : > { %v16449_v11 = vpop.xlane.xlu1 %3748 }
 0x4f8   : > { %19091 = vst [vmem:[#allocation96_spill] sm:$0xff] %v16449_v11  ;;  %v16453_v42 = vpop.xlane.xlu0 %3742  ;;  %v3888_v11 = vsel %vm280_vm0, %v19096_v16, -inf  ;;  %v19100_v16 = vld [vmem:[#allocation21_spill] sm:$0xff] }
 0x4f9   : > { %19092 = vst [vmem:[#allocation69_spill] sm:$0xff] %v16453_v42  ;;  %v16469_v42 = vpop.eup %13253  ;;  %v3957_v39 = vsub.f32 %v19100_v16, %v16280_v9 }
 0x4fa   : > { %4390 = vadd.xlane.f32.xlu1 %v4389_v52  ;;  %3880 = vmax.xlane.f32.xlu0 %v3879_v63  ;;  %v3861_v63 = vsel %vm280_vm0, %v16122_v8, -inf  ;;  %v4422_v38 = vsel %vm280_vm0, %v16469_v42, 0.0 }
 0x4fb   : > { %v16457_v24 = vpop.xlane.xlu1 %3772 }
 0x4fc   : > { %19093 = vst [vmem:[#allocation20_spill] sm:$0xff] %v16457_v24  ;;  %v16461_v60 = vpop.xlane.xlu0 %3775 }
 0x4fd   : > { %19095 = vst [vmem:[#allocation138_spill] sm:$0xff] %v16461_v60 }
 0x4fe   : > { %3889 = vmax.xlane.f32.xlu1 %v3888_v11  ;;  %3865 = vmax.xlane.f32.xlu0 %v3864_v32  ;;  %v19101_v32 = vsub.f32 %v15650_v23, %v16138_v33  ;;  %v3900_v33 = vsel %vm280_vm0, %v16208_v28, -inf }
 0x4ff   : > { %v16465_v61 = vpop.xlane.xlu1 %3757 }
 0x500   : > { %19097 = vst [vmem:[#allocation139_spill] sm:$0xff] %v16465_v61  ;;  %v16471_v52 = vpop.xlane.xlu0 %3781  ;;  %v4119_v24 = vmul.f32 1.442695, %v19101_v32  ;;  %v16488_v8 = vpop.eup %13255  ;;  %v4127_v61 = vmul.f32 1.442695, %v3957_v39  ;;  %v19108_v32 = vld [vmem:[#allocation128_spill] sm:$0xff]  ;;  %v19110_v39 = vsub.f32 %v19036_v55, %v16243_v34 }
 0x501   : > { %19098 = vst [vmem:[#allocation140_spill] sm:$0xff] %v16471_v52  ;;  %v19102_v52 = vld [vmem:[#allocation127_spill] sm:$0xff]  ;;  %v4419_v9 = vsel %vm280_vm0, %v16488_v8, 0.0  ;;  %v3906_v55 = vsel %vm280_vm0, %v16234_v4, -inf }
 0x502   : > { %3862 = vmax.xlane.f32.xlu1 %v3861_v63  ;;  %4423 = vadd.xlane.f32.xlu0 %v4422_v38  ;;  %v3885_v60 = vsel %vm280_vm0, %v19102_v52, -inf  ;;  %v3894_v38 = vsel %vm280_vm0, %v16187_v36, -inf  ;;  %13257 = vpow2.f32 %v4119_v24  ;;  %v4129_v24 = vmul.f32 1.442695, %v19110_v39 }
 0x503   : > { %v16475_v7 = vpop.xlane.xlu1 %3754  ;;  %13259 = vpow2.f32 %v4127_v61  ;;  %v3903_v61 = vsel %vm280_vm0, %v16240_v48, -inf }
 0x504   : > { %v16479_v11 = vpop.xlane.xlu0 %3760 }
 0x505   : > { %19099 = vst [vmem:[#allocation141_spill] sm:$0xff] %v16479_v11 }
 0x506   : > { %3886 = vmax.xlane.f32.xlu1 %v3885_v60  ;;  %3895 = vmax.xlane.f32.xlu0 %v3894_v38  ;;  %v19107_v60 = vld [vmem:[#allocation49_spill] sm:$0xff] }
 0x507   : > { %v16490_v63 = vpop.xlane.xlu1 %3778  ;;  %v19109_v52 = vsub.f32 %v19107_v60, %v19108_v32  ;;  %v3909_v32 = vsel %vm280_vm0, %v16263_v12, -inf }
 0x508   : > { %19103 = vst [vmem:[#allocation21_spill] sm:$0xff] %v16490_v63  ;;  %v16494_v11 = vpop.xlane.xlu0 %3784  ;;  %v19127_v63 = vld [vmem:[#allocation116_spill] sm:$0xff] }
 0x509   : > { %19104 = vst [vmem:[#allocation142_spill] sm:$0xff] %v16494_v11  ;;  %v4121_v38 = vmul.f32 1.442695, %v19109_v52 }
 0x50a   : > { %4420 = vadd.xlane.f32.xlu1 %v4419_v9  ;;  %3901 = vmax.xlane.f32.xlu0 %v3900_v33  ;;  %v3891_v9 = vsel %vm280_vm0, %v16191_v58, -inf  ;;  %v3897_v33 = vsel %vm280_vm0, %v16211_v19, -inf  ;;  %v19117_v58 = vld [vmem:[#allocation118_spill] sm:$0xff] }
 0x50b   : > { %v16498_v23 = vpop.xlane.xlu1 %3763  ;;  %13261 = vpow2.f32 %v4121_v38 }
 0x50c   : > { %19105 = vst [vmem:[#allocation143_spill] sm:$0xff] %v16498_v23  ;;  %v16502_v16 = vpop.xlane.xlu0 %3766  ;;  %13263 = vpow2.f32 %v4129_v24  ;;  %v16524_v52 = vpop.eup %13257 }
 0x50d   : > { %19106 = vst [vmem:[#allocation144_spill] sm:$0xff] %v16502_v16  ;;  %v16528_v39 = vpop.eup %13259  ;;  %v4413_v24 = vsel %vm280_vm0, %v16524_v52, 0.0 }
 0x50e   : > { %3892 = vmax.xlane.f32.xlu1 %v3891_v9  ;;  %3898 = vmax.xlane.f32.xlu0 %v3897_v33  ;;  %v4425_v33 = vsel %vm280_vm0, %v16528_v39, 0.0 }
 0x50f   : > { %v16512_v36 = vpop.xlane.xlu1 %3787 }
 0x510   : > { %19111 = vst [vmem:[#allocation49_spill] sm:$0xff] %v16512_v36  ;;  %v16516_v28 = vpop.xlane.xlu0 %3790 }
 0x511   : > { %19112 = vst [vmem:[#allocation128_spill] sm:$0xff] %v16516_v28 }
 0x512   : > { %3904 = vmax.xlane.f32.xlu1 %v3903_v61  ;;  %3907 = vmax.xlane.f32.xlu0 %v3906_v55 }
 0x513   : > { %v16520_v34 = vpop.xlane.xlu1 %3769 }
 0x514   : > { %19113 = vst [vmem:[#allocation145_spill] sm:$0xff] %v16520_v34  ;;  %v4325_v60 = vpop.xlane.xlu0 %4324  ;;  %v19126_v34 = vld [vmem:[#allocation41_spill] sm:$0xff] }
 0x515   : > { %13265 = vrcp.f32 %v4325_v60  ;;  %v16538_v61 = vpop.eup %13261  ;;  %v3912_v60 = vsel %vm280_vm0, %v16257_v29, -inf  ;;  %v19119_v29 = vld [vmem:[#allocation37_spill] sm:$0xff] }
 0x516   : > { %3910 = vmax.xlane.f32.xlu1 %v3909_v32  ;;  %4414 = vadd.xlane.f32.xlu0 %v4413_v24  ;;  %v16542_v12 = vpop.eup %13263  ;;  %v4416_v24 = vsel %vm280_vm0, %v16538_v61, 0.0 }
 0x517   : > { %v16530_v38 = vpop.xlane.xlu1 %3793  ;;  %v4428_v48 = vsel %vm280_vm0, %v16542_v12, 0.0 }
 0x518   : > { %19114 = vst [vmem:[#allocation146_spill] sm:$0xff] %v16530_v38  ;;  %v16534_v9 = vpop.xlane.xlu0 %3799 }
 0x519   : > { %19115 = vst [vmem:[#allocation147_spill] sm:$0xff] %v16534_v9 }
 0x51a   : > { %4426 = vadd.xlane.f32.xlu1 %v4425_v33  ;;  %3913 = vmax.xlane.f32.xlu0 %v3912_v60 }
 0x51b   : > { %v4328_v55 = vpop.xlane.xlu1 %4327 }
 0x51c   : > { %v16544_v32 = vpop.xlane.xlu0 %3823  ;;  %13267 = vrcp.f32 %v4328_v55 }
 0x51d   : > { %19116 = vst [vmem:[#allocation148_spill] sm:$0xff] %v16544_v32  ;;  %v12930_v32 = vunpack.i.h.bf16 %v19119_v29 }
 0x51e   : > { %4417 = vadd.xlane.f32.xlu1 %v4416_v24  ;;  %4429 = vadd.xlane.f32.xlu0 %v4428_v48  ;;  %v12929_v24 = vunpack.i.l.bf16 %v19119_v29  ;;  %v19122_v48 = vld [vmem:[#allocation115_spill] sm:$0xff] }
 0x51f   : > { %v4352_v4 = vpop.xlane.xlu1 %4351  ;;  %v13266_v19 = vpop.eup %13265 }
 0x520   : > { %v4331_v33 = vpop.xlane.xlu0 %4330  ;;  %v4819_v28 = vmul.f32 %v13266_v19, %v19117_v58  ;;  %v19123_v19 = vld [vmem:[#allocation39_spill] sm:$0xff] }
 0x521   : > { %13269 = vrcp.f32 %v4331_v33  ;;  %v12935_v58 = vunpack.i.h.bf16 %v19123_v19 }
 0x522   : > { %13271 = vrcp.f32 %v4352_v4  ;;  %11187 = vmatprep.mubr.msk.f32.mxu0 %vm280_vm0, %v4819_v28  ;;  %v12934_v4 = vunpack.i.l.bf16 %v19123_v19  ;;  %v12267_v28 = vpack.c.bf16 %v12930_v32, %v12929_v24  ;;  %v19128_v32 = vld [vmem:[#allocation18_spill] sm:$0xff] }
 0x523   : > { %v4349_v60 = vpop.xlane.xlu1 %4348 }
 0x524   : > { %13273 = vrcp.f32 %v4349_v60  ;;  %v16552_v55 = vpop.xlane.xlu0 %3805 }
 0x525   : > { %19118 = vst [vmem:[#allocation118_spill] sm:$0xff] %v16552_v55 }
 0x526   : > { %v13268_v9 = vpop.eup %13267 }
 0x527   : > { %v16556_v38 = vpop.xlane.xlu1 %3796  ;;  %v4820_v11 = vmul.f32 %v13268_v9, %v19122_v48  ;;  %v12271_v9 = vpack.c.bf16 %v12935_v58, %v12934_v4 }
 0x528   : > { %19120 = vst [vmem:[#allocation37_spill] sm:$0xff] %v16556_v38  ;;  %v16558_v36 = vpop.xlane.xlu0 %3829  ;;  %v19125_v38 = vld [vmem:[#allocation81_spill] sm:$0xff] }
 0x529   : > { %19121 = vst [vmem:[#allocation149_spill] sm:$0xff] %v16558_v36  ;;  %11188 = vmatmul.mubr.msk.f32.vlgmr.msra.gmra.mrb[96].mxu0 %vm280_vm0, %v4820_v11 }
 0x52a   : > { %12266 = vmatpush3.bf16.msra.mxu0 %v16228_v13  ;;  %v19129_v13 = vld [vmem:[#allocation43_spill] sm:$0xff] }
 0x52b   : > { %v16564_v33 = vpop.xlane.xlu1 %3820  ;;  %v13270_v60 = vpop.eup %13269  ;;  %12268 = vmatprep.subr.bf16.mxu0 %v12267_v28 }
 0x52c   : > { %19124 = vst [vmem:[#allocation115_spill] sm:$0xff] %v16564_v33  ;;  %v4340_v29 = vpop.xlane.xlu0 %4339  ;;  %v13272_v55 = vpop.eup %13271  ;;  %v4821_v16 = vmul.f32 %v13270_v60, %v19125_v38 }
 0x52d   : > { %v4828_v11 = vmul.f32 %v13272_v55, %v19127_v63 }
 0x52e   : > { %v13274_v36 = vpop.eup %13273  ;;  %11190 = vmatprep.mubr.msk.f32.mxu0 %vm280_vm0, %v4821_v16  ;;  %12270 = vmatpush3.bf16.msra.mxu0 %v12267_v28  ;;  %v19134_v28 = vld [vmem:[#allocation123_spill] sm:$0xff] }
 0x52f   : > { %v4334_v48 = vpop.xlane.xlu1 %4333  ;;  %v4827_v19 = vmul.f32 %v13274_v36, %v19126_v34  ;;  %12942 = vrot.lane.b32.xlu1 %v19128_v32, %s13843_s30  ;;  %12272 = vmatprep.subr.bf16.mxu0 %v12271_v9  ;;  %v19130_v36 = vld [vmem:[#allocation14_spill] sm:$0xff] }
 0x530   : > { %v4364_v24 = vpop.xlane.xlu0 %4363  ;;  %13275 = vrcp.f32 %v4334_v48 }
 0x531   : > { %11215 = vmatprep.mubr.msk.f32.mxu1 %vm280_vm0, %v4827_v19  ;;  %13277 = vrcp.f32 %v4340_v29  ;;  %v19136_v19 = vsub.f32 %v19038_v45, %v16250_v27 }
 0x532   : > { %11216 = vmatmul.mubr.msk.f32.vlgmr.msra.gmra.mrb[72].mxu1 %vm280_vm0, %v4828_v11  ;;  %12274 = vmatpush3.bf16.msra.mxu0 %v12271_v9 }
 0x533   : > { %12282 = vmatpush3.bf16.msra.mxu1 %v19129_v13  ;;  %v4358_v16 = vpop.xlane.xlu1 %4357  ;;  %v4131_v11 = vmul.f32 1.442695, %v19136_v19 }
 0x534   : > { %v4337_v38 = vpop.xlane.xlu0 %4336  ;;  %12947 = vrot.lane.b32.xlu0 %v19130_v36, %s13844_s6 }
 0x535   : > { %13279 = vrcp.f32 %v4337_v38 }
 0x536   : > { %13281 = vrcp.f32 %v4358_v16 }
 0x537   : > { %v4355_v63 = vpop.xlane.xlu1 %4354 }
 0x538   : > { %13283 = vrcp.f32 %v4355_v63  ;;  %v16578_v34 = vpop.xlane.xlu0 %3835  ;;  %v19138_v63 = vld [vmem:[#allocation106_spill] sm:$0xff] }
 0x539   : > { %19131 = vst [vmem:[#allocation39_spill] sm:$0xff] %v16578_v34  ;;  %13285 = vpow2.f32 %v4131_v11 }
 0x53a   : > { %v13276_v55 = vpop.eup %13275  ;;  %13287 = vrcp.f32 %v4364_v24 }
 0x53b   : > { %v16580_v58 = vpop.xlane.xlu1 %3802  ;;  %v4822_v60 = vmul.f32 %v13276_v55, %v19134_v28  ;;  %v13278_v48 = vpop.eup %13277  ;;  %v19139_v55 = vsub.f32 %v19028_v0, %v16214_v5  ;;  %v19143_v5 = vld [vmem:[#allocation42_spill] sm:$0xff] }
 0x53c   : > { %19132 = vst [vmem:[#allocation81_spill] sm:$0xff] %v16580_v58  ;;  %v16582_v4 = vpop.xlane.xlu0 %3808  ;;  %v4824_v34 = vmul.f32 %v13278_v48, %v19138_v63  ;;  %v19141_v48 = vld [vmem:[#allocation40_spill] sm:$0xff]  ;;  %v19144_v0 = vld [vmem:[#allocation134_spill] sm:$0xff] }
 0x53d   : > { %19133 = vst [vmem:[#allocation41_spill] sm:$0xff] %v16582_v4  ;;  %11191 = vmatmul.mubr.msk.f32.gmra.mrb[98].mxu0 %vm280_vm0, %v4822_v60  ;;  %v4139_v28 = vmul.f32 1.442695, %v19139_v55 }
 0x53f   : > { %v13280_v29 = vpop.eup %13279  ;;  %v16586_v9 = vpop.xlane.xlu1 %3826 }
 0x540   : > { %19135 = vst [vmem:[#allocation116_spill] sm:$0xff] %v16586_v9  ;;  %v16591_v13 = vpop.xlane.xlu0 %3832  ;;  %v4823_v16 = vmul.f32 %v13280_v29, %v16112_v50  ;;  %v13282_v38 = vpop.eup %13281  ;;  %v19140_v50 = vld [vmem:[#allocation25_spill] sm:$0xff] }
 0x541   : > { %19137 = vst [vmem:[#allocation18_spill] sm:$0xff] %v16591_v13  ;;  %v4830_v19 = vmul.f32 %v13282_v38, %v16106_v44  ;;  %v19142_v29 = vsub.f32 %v19140_v50, %v19141_v48  ;;  %v19149_v48 = vld [vmem:[#allocation126_spill] sm:$0xff] }
 0x542   : > { %v13284_v33 = vpop.eup %13283  ;;  %11193 = vmatprep.mubr.msk.f32.mxu0 %vm280_vm0, %v4823_v16 }
 0x543   : > { %11194 = vmatmul.mubr.msk.f32.gmra.mrb[100].mxu0 %vm280_vm0, %v4824_v34  ;;  %v4361_v60 = vpop.xlane.xlu1 %4360  ;;  %v4829_v45 = vmul.f32 %v13284_v33, %v16120_v62  ;;  %v4133_v16 = vmul.f32 1.442695, %v19142_v29  ;;  %v19145_v34 = vsub.f32 %v19143_v5, %v19144_v0  ;;  %v16614_v11 = vpop.eup %13285 }
 0x544   : > { %v4346_v27 = vpop.xlane.xlu0 %4345  ;;  %13289 = vrcp.f32 %v4361_v60  ;;  %v13288_v38 = vpop.eup %13287 }
 0x545   : > { %11218 = vmatprep.mubr.msk.f32.mxu1 %vm280_vm0, %v4829_v45  ;;  %v4141_v63 = vmul.f32 1.442695, %v19145_v34  ;;  %13291 = vpow2.f32 %v4139_v28  ;;  %v4832_v29 = vmul.f32 %v13288_v38, %v19149_v48 }
 0x546   : > { %11219 = vmatmul.mubr.msk.f32.gmra.mrb[74].mxu1 %vm280_vm0, %v4830_v19  ;;  %13293 = vpow2.f32 %v4133_v16  ;;  %v19148_v19 = vld [vmem:[#allocation53_spill] sm:$0xff] }
 0x547   : > { %v16610_v62 = vpop.xlane.xlu1 %3811  ;;  %13295 = vpow2.f32 %v4141_v63 }
 0x548   : > { %19146 = vst [vmem:[#allocation43_spill] sm:$0xff] %v16610_v62  ;;  %v4370_v33 = vpop.xlane.xlu0 %4369  ;;  %13297 = vrcp.f32 %v4346_v27  ;;  %v4431_v27 = vsel %vm280_vm0, %v16614_v11, 0.0 }
 0x54b   : > { %v16612_v44 = vpop.xlane.xlu1 %3817 }
 0x54c   : > { %19147 = vst [vmem:[#allocation14_spill] sm:$0xff] %v16612_v44  ;;  %v4343_v24 = vpop.xlane.xlu0 %4342  ;;  %v19160_v44 = vld [vmem:[#allocation58_spill] sm:$0xff] }
 0x54d   : > { %13299 = vrcp.f32 %v4343_v24 }
 0x54e   : > { %v13290_v55 = vpop.eup %13289  ;;  %13301 = vrcp.f32 %v4370_v33 }
 0x54f   : > { %v16616_v60 = vpop.xlane.xlu1 %4375  ;;  %v16618_v45 = vpop.eup %13291  ;;  %v4831_v50 = vmul.f32 %v13290_v55, %v19148_v19 }
 0x550   : > { %v4367_v28 = vpop.xlane.xlu0 %4366  ;;  %v16625_v16 = vpop.eup %13293  ;;  %v4443_v0 = vsel %vm280_vm0, %v16618_v45, 0.0 }
 0x551   : > { %13303 = vrcp.f32 %v4367_v28  ;;  %11221 = vmatprep.mubr.msk.f32.mxu1 %vm280_vm0, %v4831_v50  ;;  %19150 = vst [vmem:[#allocation123_spill] sm:$0xff] %v16625_v16  ;;  %v16630_v34 = vpop.eup %13295  ;;  %v4434_v24 = vsel %vm280_vm0, %v16625_v16, 0.0  ;;  %v19155_v50 = vld [vmem:[#allocation70_spill] sm:$0xff] }
 0x552   : > { %11222 = vmatmul.mubr.msk.f32.gmra.mrb[76].mxu1 %vm280_vm0, %v4832_v29  ;;  %19151 = vst [vmem:[#allocation106_spill] sm:$0xff] %v16630_v34  ;;  %v13298_v33 = vpop.eup %13297  ;;  %v4446_v28 = vsel %vm280_vm0, %v16630_v34, 0.0  ;;  %v19156_v29 = vld [vmem:[#allocation133_spill] sm:$0xff] }
 0x553   : > { %v4373_v5 = vpop.xlane.xlu1 %4372  ;;  %4432 = vadd.xlane.f32.xlu1 %v4431_v27  ;;  %4444 = vadd.xlane.f32.xlu0 %v4443_v0  ;;  %v4826_v27 = vmul.f32 %v13298_v33, %v19156_v29 }
 0x554   : > { %13305 = vrcp.f32 %v4373_v5  ;;  %v16632_v63 = vpop.xlane.xlu0 %3841 }
 0x555   : > { %19152 = vst [vmem:[#allocation25_spill] sm:$0xff] %v16632_v63 }
 0x557   : > { %v13300_v38 = vpop.eup %13299  ;;  %v16636_v55 = vpop.xlane.xlu1 %3847  ;;  %4435 = vadd.xlane.f32.xlu1 %v4434_v24  ;;  %4447 = vadd.xlane.f32.xlu0 %v4446_v28  ;;  %v19159_v24 = vld [vmem:[#allocation67_spill] sm:$0xff] }
 0x558   : > { %19153 = vst [vmem:[#allocation40_spill] sm:$0xff] %v16636_v55  ;;  %v16640_v19 = vpop.xlane.xlu0 %3814  ;;  %v4825_v48 = vmul.f32 %v13300_v38, %v19155_v50  ;;  %v13302_v5 = vpop.eup %13301 }
 0x559   : > { %19154 = vst [vmem:[#allocation42_spill] sm:$0xff] %v16640_v19  ;;  %v4834_v9 = vmul.f32 %v13302_v5, %v19160_v44 }
 0x55a   : > { %11196 = vmatprep.mubr.msk.f32.mxu0 %vm280_vm0, %v4825_v48 }
 0x55b   : > { %v13304_v0 = vpop.eup %13303  ;;  %11197 = vmatmul.mubr.msk.f32.gmra.mrb[102].mxu0 %vm280_vm0, %v4826_v27  ;;  %v16646_v63 = vpop.xlane.xlu1 %3871 }
 0x55c   : > { %19157 = vst [vmem:[#allocation134_spill] sm:$0xff] %v16646_v63  ;;  %v16648_v55 = vpop.xlane.xlu0 %3838  ;;  %v4833_v13 = vmul.f32 %v13304_v0, %v19159_v24 }
 0x55d   : > { %19158 = vst [vmem:[#allocation53_spill] sm:$0xff] %v16648_v55  ;;  %v19169_v55 = vsub.f32 %v19058_v56, %v16319_v49 }
 0x55e   : > { %v13306_v19 = vpop.eup %13305  ;;  %11224 = vmatprep.mubr.msk.f32.mxu1 %vm280_vm0, %v4833_v13  ;;  %v19164_v13 = vld [vmem:[#allocation16_spill] sm:$0xff] }
 0x55f   : > { %11225 = vmatmul.mubr.msk.f32.gmra.mrb[78].mxu1 %vm280_vm0, %v4834_v9  ;;  %v16654_v33 = vpop.xlane.xlu1 %3844  ;;  %v4835_v38 = vmul.f32 %v13306_v19, %v16226_v3  ;;  %v19166_v3 = vld [vmem:[#allocation12_spill] sm:$0xff] }
 0x560   : > { %19161 = vst [vmem:[#allocation126_spill] sm:$0xff] %v16654_v33  ;;  %v16657_v28 = vpop.xlane.xlu0 %4399 }
 0x561   : > { %11243 = vmatprep.mubr.msk.f32.mxu0 %vm280_vm0, %v4835_v38 }
 0x563   : > { %v16660_v50 = vpop.xlane.xlu1 %3868 }
 0x564   : > { %19162 = vst [vmem:[#allocation70_spill] sm:$0xff] %v16660_v50  ;;  %v4397_v48 = vpop.xlane.xlu0 %4396 }
 0x565   : > { %13307 = vrcp.f32 %v4397_v48 }
 0x567   : > { %v16662_v29 = vpop.xlane.xlu1 %3853 }
 0x568   : > { %19163 = vst [vmem:[#allocation133_spill] sm:$0xff] %v16662_v29  ;;  %v16664_v44 = vpop.xlane.xlu0 %4381  ;;  %12952 = vrot.lane.b32.xlu1 %v19164_v13, %s13844_s6  ;;  %v4135_v29 = vmul.f32 1.442695, %v19169_v55 }
 0x56a   : > { %13309 = vpow2.f32 %v4135_v29 }
 0x56b   : > { %v16668_v9 = vpop.xlane.xlu1 %3850 }
 0x56c   : > { %19165 = vst [vmem:[#allocation67_spill] sm:$0xff] %v16668_v9  ;;  %v16670_v27 = vpop.xlane.xlu0 %4405  ;;  %v19170_v9 = vsub.f32 %v19051_v10, %v16294_v1 }
 0x56d   : > { %12957 = vrot.lane.b32.xlu0 %v19166_v3, %s13845_s9 }
 0x56e   : > { %v4143_v33 = vmul.f32 1.442695, %v19170_v9 }
 0x56f   : > { %v13308_v19 = vpop.eup %13307  ;;  %v16674_v5 = vpop.xlane.xlu1 %4387 }
 0x570   : > { %v4379_v0 = vpop.xlane.xlu0 %4378  ;;  %v4843_v24 = vmul.f32 %v13308_v19, %v16315_v57  ;;  %v19173_v19 = vsub.f32 %v19048_v14, %v16284_v26  ;;  %13311 = vpow2.f32 %v4143_v33 }
 0x572   : > { %11271 = vmatprep.mubr.msk.f32.mxu1 %vm280_vm0, %v4843_v24  ;;  %v4137_v24 = vmul.f32 1.442695, %v19173_v19 }
 0x573   : > { %v16678_v38 = vpop.xlane.xlu1 %4411 }
 0x574   : > { %v16680_v48 = vpop.xlane.xlu0 %4402  ;;  %13313 = vpow2.f32 %v4137_v24 }
 0x577   : > { %v16682_v50 = vpop.xlane.xlu1 %3859 }
 0x578   : > { %19167 = vst [vmem:[#allocation58_spill] sm:$0xff] %v16682_v50  ;;  %v16684_v63 = vpop.xlane.xlu0 %3877  ;;  %v19174_v50 = vld [vmem:[#allocation33_spill] sm:$0xff] }
 0x579   : > { %19168 = vst [vmem:[#allocation16_spill] sm:$0xff] %v16684_v63  ;;  %v19175_v63 = vsub.f32 %v19044_v20, %v19174_v50 }
 0x57b   : > { %v16692_v62 = vpop.xlane.xlu1 %3883  ;;  %v4145_v4 = vmul.f32 1.442695, %v19175_v63 }
 0x57c   : > { %19171 = vst [vmem:[#allocation12_spill] sm:$0xff] %v16692_v62  ;;  %v16694_v57 = vpop.xlane.xlu0 %3874  ;;  %v16708_v62 = vpop.eup %13309 }
 0x57d   : > { %19172 = vst [vmem:[#allocation150_spill] sm:$0xff] %v16694_v57  ;;  %13315 = vpow2.f32 %v4145_v4  ;;  %19178 = vst [vmem:[#allocation152_spill] sm:$0xff] %v16708_v62  ;;  %v16714_v20 = vpop.eup %13311  ;;  %v4437_v33 = vsel %vm280_vm0, %v16708_v62, 0.0 }
 0x57e   : > { %19181 = vst [vmem:[#allocation155_spill] sm:$0xff] %v16714_v20  ;;  %v16720_v4 = vpop.eup %13313  ;;  %v4449_v29 = vsel %vm280_vm0, %v16714_v20, 0.0  ;;  %13317 = vrcp.f32 %v16616_v60  ;;  %v19202_v60 = vld [vmem:[#allocation57_spill] sm:$0xff] }
 0x57f   : > { %v16702_v49 = vpop.xlane.xlu1 %3856  ;;  %19183 = vst [vmem:[#allocation157_spill] sm:$0xff] %v16720_v4  ;;  %13319 = vrcp.f32 %v4379_v0  ;;  %v19203_v0 = vld [vmem:[#allocation45_spill] sm:$0xff] }
 0x580   : > { %19176 = vst [vmem:[#allocation33_spill] sm:$0xff] %v16702_v49  ;;  %v4385_v56 = vpop.xlane.xlu0 %4384  ;;  %13321 = vrcp.f32 %v16664_v44  ;;  %v19204_v23 = vsub.f32 %v19202_v60, %v19203_v0  ;;  %v19205_v44 = vsub.f32 %v19064_v54, %v16342_v37  ;;  %v19210_v37 = vsub.f32 %v19056_v2, %v16311_v46 }
 0x581   : > { %13323 = vrcp.f32 %v4385_v56 }
 0x582   : > { %13325 = vrcp.f32 %v16674_v5  ;;  %v4155_v56 = vmul.f32 1.442695, %v19205_v44  ;;  %v19206_v5 = vld [vmem:[#allocation137_spill] sm:$0xff]  ;;  %v4157_v54 = vmul.f32 1.442695, %v19210_v37 }
 0x583   : > { %v4394_v10 = vpop.xlane.xlu1 %4393 }
 0x584   : > { %v16704_v1 = vpop.xlane.xlu0 %4408 }
 0x585   : > { %v16706_v55 = vpop.f32.mrb[88].mxu0 }
 0x586   : > { %19177 = vst [vmem:[#allocation151_spill] sm:$0xff] %v16706_v55  ;;  %v16710_v14 = vpop.f32.mrb[89].mxu0  ;;  %v4440_v55 = vsel %vm280_vm0, %v16720_v4, 0.0  ;;  %v4147_v4 = vmul.f32 1.442695, %v19204_v23 }
 0x587   : > { %v4391_v9 = vpop.xlane.xlu1 %4390  ;;  %19179 = vst [vmem:[#allocation153_spill] sm:$0xff] %v16710_v14  ;;  %v16726_v19 = vpop.eup %13315 }
 0x588   : > { %v16712_v26 = vpop.xlane.xlu0 %3880  ;;  %19185 = vst [vmem:[#allocation159_spill] sm:$0xff] %v16726_v19  ;;  %13327 = vrcp.f32 %v4391_v9  ;;  %v13318_v34 = vpop.eup %13317  ;;  %v19207_v9 = vld [vmem:[#allocation56_spill] sm:$0xff] }
 0x589   : > { %19180 = vst [vmem:[#allocation154_spill] sm:$0xff] %v16712_v26  ;;  %v13320_v16 = vpop.eup %13319  ;;  %13329 = vrcp.f32 %v4394_v10 }
 0x58a   : > { %v4837_v23 = vmul.f32 %v13320_v16, %v16362_v31 }
 0x58b   : > { %v16716_v63 = vpop.xlane.xlu1 %3889 }
 0x58c   : > { %19182 = vst [vmem:[#allocation156_spill] sm:$0xff] %v16716_v63  ;;  %v16722_v50 = vpop.xlane.xlu0 %3865  ;;  %4438 = vadd.xlane.f32.xlu1 %v4437_v33  ;;  %4450 = vadd.xlane.f32.xlu0 %v4449_v29  ;;  %v4452_v63 = vsel %vm280_vm0, %v16726_v19, 0.0 }
 0x58d   : > { %19184 = vst [vmem:[#allocation158_spill] sm:$0xff] %v16722_v50 }
 0x58f   : > { %v16728_v24 = vpop.xlane.xlu1 %3862 }
 0x590   : > { %19186 = vst [vmem:[#allocation160_spill] sm:$0xff] %v16728_v24  ;;  %v16732_v14 = vpop.xlane.xlu0 %4423  ;;  %4441 = vadd.xlane.f32.xlu1 %v4440_v55  ;;  %4453 = vadd.xlane.f32.xlu0 %v4452_v63 }
 0x592   : > { %v16736_v26 = vpop.f32.mrb[90].mxu0 }
 0x593   : > { %19187 = vst [vmem:[#allocation161_spill] sm:$0xff] %v16736_v26  ;;  %v16738_v33 = vpop.f32.mrb[91].mxu0  ;;  %v16740_v50 = vpop.xlane.xlu1 %3886 }
 0x594   : > { %19188 = vst [vmem:[#allocation162_spill] sm:$0xff] %v16738_v33  ;;  %19189 = vst [vmem:[#allocation163_spill] sm:$0xff] %v16740_v50  ;;  %v16742_v57 = vpop.xlane.xlu0 %3895 }
 0x595   : > { %19190 = vst [vmem:[#allocation164_spill] sm:$0xff] %v16742_v57 }
 0x596   : > { %v16744_v29 = vpop.f32.mrb[92].mxu0 }
 0x597   : > { %19191 = vst [vmem:[#allocation165_spill] sm:$0xff] %v16744_v29  ;;  %v16746_v24 = vpop.f32.mrb[93].mxu0  ;;  %v4421_v49 = vpop.xlane.xlu1 %4420 }
 0x598   : > { %19192 = vst [vmem:[#allocation166_spill] sm:$0xff] %v16746_v24  ;;  %v16748_v58 = vpop.xlane.xlu0 %3901  ;;  %13331 = vrcp.f32 %v4421_v49 }
 0x599   : > { %19193 = vst [vmem:[#allocation167_spill] sm:$0xff] %v16748_v58  ;;  %13333 = vpow2.f32 %v4147_v4 }
 0x59a   : > { %v16750_v55 = vpop.f32.mrb[94].mxu0  ;;  %13335 = vpow2.f32 %v4155_v56 }
 0x59b   : > { %19194 = vst [vmem:[#allocation168_spill] sm:$0xff] %v16750_v55  ;;  %v16752_v20 = vpop.f32.mrb[95].mxu0  ;;  %v16754_v63 = vpop.xlane.xlu1 %3892 }
 0x59c   : > { %19195 = vst [vmem:[#allocation169_spill] sm:$0xff] %v16752_v20  ;;  %19196 = vst [vmem:[#allocation170_spill] sm:$0xff] %v16754_v63  ;;  %v16756_v26 = vpop.xlane.xlu0 %3898 }
 0x59d   : > { %19197 = vst [vmem:[#allocation171_spill] sm:$0xff] %v16756_v26 }
 0x59f   : > { %v16758_v33 = vpop.xlane.xlu1 %3904 }
 0x5a0   : > { %19198 = vst [vmem:[#allocation172_spill] sm:$0xff] %v16758_v33  ;;  %v16760_v50 = vpop.xlane.xlu0 %3907 }
 0x5a1   : > { %19199 = vst [vmem:[#allocation173_spill] sm:$0xff] %v16760_v50  ;;  %12962 = vrot.lane.b32.xlu1 %v19128_v32, %s13844_s6 }
 0x5a3   : > { %v16764_v29 = vpop.xlane.xlu1 %3910 }
 0x5a4   : > { %19200 = vst [vmem:[#allocation174_spill] sm:$0xff] %v16764_v29  ;;  %v16766_v24 = vpop.xlane.xlu0 %4414 }
 0x5a6   : > { %12967 = vrot.lane.b32.xlu0 %v19130_v36, %s13845_s9 }
 0x5a7   : > { %v16770_v55 = vpop.xlane.xlu1 %4426 }
 0x5a8   : > { %v16772_v20 = vpop.xlane.xlu0 %3913 }
 0x5a9   : > { %19201 = vst [vmem:[#allocation175_spill] sm:$0xff] %v16772_v20 }
 0x5ab   : > { %v16775_v33 = vpop.xlane.xlu1 %4417 }
 0x5ac   : > { %v16777_v50 = vpop.xlane.xlu0 %4429 }
 0x5af   : > { %v12943_v29 = vpop.permute.xlu1 %12942 }
 0x5b0   : > { %v12945_v58 = vunpack.i.h.bf16 %v12943_v29  ;;  %v12944_v26 = vunpack.i.l.bf16 %v12943_v29  ;;  %v12948_v63 = vpop.permute.xlu0 %12947  ;;  %v4836_v29 = vmul.f32 %v13318_v34, %v19206_v5 }
 0x5b1   : > { %v12950_v57 = vunpack.i.h.bf16 %v12948_v63  ;;  %v12949_v19 = vunpack.i.l.bf16 %v12948_v63 }
 0x5b2   : > { %v12275_v20 = vpack.c.bf16 %v12945_v58, %v12944_v26  ;;  %v13322_v58 = vpop.eup %13321  ;;  %v19208_v26 = vld [vmem:[#allocation59_spill] sm:$0xff] }
 0x5b3   : > { %v12283_v62 = vpack.c.bf16 %v12950_v57, %v12949_v19  ;;  %v19209_v63 = vsub.f32 %v19207_v9, %v19208_v26  ;;  %v13324_v57 = vpop.eup %13323  ;;  %v19211_v9 = vld [vmem:[#allocation63_spill] sm:$0xff] }
 0x5b4   : > { %12276 = vmatprep.subr.bf16.mxu0 %v12275_v20  ;;  %v13326_v34 = vpop.eup %13325  ;;  %v4839_v49 = vmul.f32 %v13324_v57, %v16424_v35  ;;  %v3973_v26 = vsub.f32 %v19211_v9, %v16412_v15 }
 0x5b5   : > { %12278 = vmatpush3.bf16.msra.mxu0 %v12275_v20  ;;  %12284 = vmatprep.subr.bf16.mxu1 %v12283_v62  ;;  %v4149_v60 = vmul.f32 1.442695, %v19209_v63  ;;  %v13328_v10 = vpop.eup %13327  ;;  %v4840_v46 = vmul.f32 %v13326_v34, %v16356_v43  ;;  %v19213_v34 = vld [vmem:[#allocation68_spill] sm:$0xff] }
 0x5b6   : > { %12286 = vmatpush3.bf16.msra.mxu1 %v12283_v62  ;;  %v4838_v62 = vmul.f32 %v13322_v58, %v16332_v21  ;;  %v13330_v31 = vpop.eup %13329  ;;  %v4841_v2 = vmul.f32 %v13328_v10, %v16447_v53 }
 0x5b7   : > { %13337 = vpow2.f32 %v4149_v60  ;;  %v13332_v16 = vpop.eup %13331  ;;  %v4842_v35 = vmul.f32 %v13330_v31, %v16433_v41  ;;  %v4159_v31 = vmul.f32 1.442695, %v3973_v26 }
 0x5b8   : > { %11244 = vmatmul.mubr.msk.f32.vlgmr.msra.gmra.mrb[104].mxu0 %vm280_vm0, %v4836_v29  ;;  %13339 = vpow2.f32 %v4157_v54  ;;  %v16804_v20 = vpop.eup %13333  ;;  %v4851_v4 = vmul.f32 %v13332_v16, %v16488_v8  ;;  %v19216_v16 = vld [vmem:[#allocation28_spill] sm:$0xff] }
 0x5b9   : > { %11246 = vmatprep.mubr.msk.f32.mxu0 %vm280_vm0, %v4837_v23  ;;  %v16807_v21 = vpop.eup %13335  ;;  %v4455_v43 = vsel %vm280_vm0, %v16804_v20, 0.0 }
 0x5ba   : > { %v4467_v53 = vsel %vm280_vm0, %v16807_v21, 0.0 }
 0x5bc   : > { %11247 = vmatmul.mubr.msk.f32.gmra.mrb[106].mxu0 %vm280_vm0, %v4838_v62  ;;  %v19212_v62 = vld [vmem:[#allocation24_spill] sm:$0xff] }
 0x5bd   : > { %11249 = vmatprep.mubr.msk.f32.mxu0 %vm280_vm0, %v4839_v49  ;;  %v19214_v49 = vsub.f32 %v19212_v62, %v19213_v34 }
 0x5bf   : > { %v4151_v10 = vmul.f32 1.442695, %v19214_v49 }
 0x5c0   : > { %11250 = vmatmul.mubr.msk.f32.gmra.mrb[108].mxu0 %vm280_vm0, %v4840_v46 }
 0x5c1   : > { %11252 = vmatprep.mubr.msk.f32.mxu0 %vm280_vm0, %v4841_v2  ;;  %v16814_v19 = vpop.eup %13337  ;;  %v19215_v2 = vld [vmem:[#allocation36_spill] sm:$0xff]  ;;  %13341 = vpow2.f32 %v4151_v10 }
 0x5c2   : > { %v16819_v0 = vpop.eup %13339  ;;  %v4458_v41 = vsel %vm280_vm0, %v16814_v19, 0.0  ;;  %13343 = vpow2.f32 %v4159_v31 }
 0x5c3   : > { %v4470_v8 = vsel %vm280_vm0, %v16819_v0, 0.0 }
 0x5c4   : > { %11253 = vmatmul.mubr.msk.f32.gmra.mrb[110].mxu0 %vm280_vm0, %v4842_v35  ;;  %v19217_v35 = vsub.f32 %v19215_v2, %v19216_v16 }
 0x5c5   : > { %4456 = vadd.xlane.f32.xlu1 %v4455_v43  ;;  %11299 = vmatprep.mubr.msk.f32.mxu0 %vm280_vm0, %v4851_v4  ;;  %v19218_v4 = vsub.f32 %v19074_v40, %v16377_v25 }
 0x5c6   : > { %4468 = vadd.xlane.f32.xlu0 %v4467_v53  ;;  %v4153_v15 = vmul.f32 1.442695, %v19217_v35 }
 0x5c7   : > { %v4161_v43 = vmul.f32 1.442695, %v19218_v4 }
 0x5c8   : > { %13345 = vpow2.f32 %v4153_v15 }
 0x5c9   : > { %4459 = vadd.xlane.f32.xlu1 %v4458_v41  ;;  %13347 = vpow2.f32 %v4161_v43 }
 0x5ca   : > { %4471 = vadd.xlane.f32.xlu0 %v4470_v8  ;;  %13349 = vrcp.f32 %v16657_v28 }
 0x5cb   : > { %v16848_v53 = vpop.eup %13341  ;;  %13351 = vrcp.f32 %v16680_v48 }
 0x5cc   : > { %v16850_v41 = vpop.eup %13343  ;;  %13353 = vrcp.f32 %v16670_v27 }
 0x5cd   : > { %v4473_v40 = vsel %vm280_vm0, %v16850_v41, 0.0  ;;  %13355 = vrcp.f32 %v16704_v1  ;;  %v19231_v1 = vld [vmem:[#allocation51_spill] sm:$0xff] }
 0x5ce   : > { %13357 = vrcp.f32 %v16678_v38 }
 0x5cf   : > { %13359 = vrcp.f32 %v16766_v24  ;;  %v19235_v24 = vld [vmem:[#allocation46_spill] sm:$0xff] }
 0x5d0   : > { %13361 = vrcp.f32 %v16775_v33  ;;  %v19241_v33 = vld [vmem:[#allocation44_spill] sm:$0xff] }
 0x5d2   : > { %v16856_v9 = vpop.eup %13345 }
 0x5d3   : > { %v16862_v25 = vpop.eup %13347 }
 0x5d4   : > { %v13350_v48 = vpop.eup %13349 }
 0x5d5   : > { %v13352_v27 = vpop.eup %13351 }
 0x5da   : > { %12972 = vrot.lane.b32.xlu1 %v19164_v13, %s13845_s9 }
 0x5e0   : > { %12977 = vrot.lane.b32.xlu0 %v19166_v3, %s13839_s21  ;;  %v16829_v44 = vpop.xlane.xlu1 %4432  ;;  %v16831_v56 = vpop.xlane.xlu0 %4444 }
 0x5e1   : > { %13363 = vrcp.f32 %v16831_v56  ;;  %v19243_v56 = vld [vmem:[#allocation48_spill] sm:$0xff] }
 0x5e4   : > { %v16833_v5 = vpop.xlane.xlu1 %4435  ;;  %v16835_v29 = vpop.xlane.xlu0 %4447 }
 0x5e8   : > { %v12953_v58 = vpop.permute.xlu1 %12952  ;;  %v12958_v23 = vpop.permute.xlu0 %12957 }
 0x5e9   : > { %v12955_v63 = vunpack.i.h.bf16 %v12953_v58  ;;  %v12954_v60 = vunpack.i.l.bf16 %v12953_v58  ;;  %v12960_v57 = vunpack.i.h.bf16 %v12958_v23  ;;  %v12959_v37 = vunpack.i.l.bf16 %v12958_v23 }
 0x5ea   : > { %v4461_v58 = vsel %vm280_vm0, %v16848_v53, 0.0 }
 0x5eb   : > { %v12287_v54 = vpack.c.bf16 %v12955_v63, %v12954_v60  ;;  %v12295_v46 = vpack.c.bf16 %v12960_v57, %v12959_v37  ;;  %v4464_v63 = vsel %vm280_vm0, %v16856_v9, 0.0  ;;  %v4476_v60 = vsel %vm280_vm0, %v16862_v25, 0.0 }
 0x5ed   : > { %12288 = vmatprep.subr.bf16.mxu1 %v12287_v54  ;;  %12296 = vmatprep.subr.bf16.mxu0 %v12295_v46 }
 0x5ee   : > { %12290 = vmatpush3.bf16.msra.mxu1 %v12287_v54  ;;  %12298 = vmatpush3.bf16.msra.mxu0 %v12295_v46 }
 0x5fc   : > { %v16852_v8 = vpop.f32.mrb[96].mxu0 }
 0x5fd   : > { %19219 = vst [vmem:[#allocation57_spill] sm:$0xff] %v16852_v8  ;;  %v16858_v26 = vpop.f32.mrb[97].mxu0 }
 0x5fe   : > { %19220 = vst [vmem:[#allocation45_spill] sm:$0xff] %v16858_v26  ;;  %4462 = vadd.xlane.f32.xlu1 %v4461_v58 }
 0x5ff   : > { %4474 = vadd.xlane.f32.xlu0 %v4473_v40 }
 0x602   : > { %4465 = vadd.xlane.f32.xlu1 %v4464_v63  ;;  %v19229_v63 = vsub.f32 %v19076_v51, %v16385_v59  ;;  %v13354_v59 = vpop.eup %13353  ;;  %v19236_v51 = vld [vmem:[#allocation64_spill] sm:$0xff] }
 0x603   : > { %4477 = vadd.xlane.f32.xlu0 %v4476_v60 }
 0x604   : > { %v4163_v60 = vmul.f32 1.442695, %v19229_v63  ;;  %v19240_v63 = vld [vmem:[#allocation55_spill] sm:$0xff] }
 0x605   : > { %v16868_v23 = vpop.f32.mrb[72].mxu1 }
 0x606   : > { %19221 = vst [vmem:[#allocation137_spill] sm:$0xff] %v16868_v23  ;;  %v16870_v57 = vpop.f32.mrb[73].mxu1  ;;  %13365 = vpow2.f32 %v4163_v60 }
 0x607   : > { %19222 = vst [vmem:[#allocation56_spill] sm:$0xff] %v16870_v57 }
 0x610   : > { %v16872_v37 = vpop.f32.mrb[98].mxu0 }
 0x611   : > { %19223 = vst [vmem:[#allocation59_spill] sm:$0xff] %v16872_v37  ;;  %v16874_v54 = vpop.f32.mrb[99].mxu0 }
 0x612   : > { %19224 = vst [vmem:[#allocation63_spill] sm:$0xff] %v16874_v54 }
 0x613   : > { %12982 = vrot.lane.b32.xlu1 %v19128_v32, %s13845_s9 }
 0x616   : > { %v16878_v62 = vpop.f32.mrb[100].mxu0 }
 0x617   : > { %19225 = vst [vmem:[#allocation24_spill] sm:$0xff] %v16878_v62  ;;  %v16880_v34 = vpop.f32.mrb[101].mxu0  ;;  %v19293_v62 = vld [vmem:[#allocation140_spill] sm:$0xff] }
 0x618   : > { %19226 = vst [vmem:[#allocation68_spill] sm:$0xff] %v16880_v34 }
 0x619   : > { %v16882_v49 = vpop.f32.mrb[74].mxu1  ;;  %12987 = vrot.lane.b32.xlu0 %v19130_v36, %s13839_s21  ;;  %v16886_v10 = vpop.xlane.xlu1 %4438 }
 0x61a   : > { %19227 = vst [vmem:[#allocation36_spill] sm:$0xff] %v16882_v49  ;;  %v16888_v46 = vpop.f32.mrb[75].mxu1  ;;  %v16890_v31 = vpop.xlane.xlu0 %4450 }
 0x61b   : > { %19228 = vst [vmem:[#allocation28_spill] sm:$0xff] %v16888_v46  ;;  %v19230_v46 = vld [vmem:[#allocation61_spill] sm:$0xff] }
 0x61c   : > { %v19232_v23 = vsub.f32 %v19230_v46, %v19231_v1  ;;  %v19242_v1 = vsub.f32 %v19240_v63, %v19241_v33 }
 0x61d   : > { %v16894_v2 = vpop.xlane.xlu1 %4441 }
 0x61e   : > { %v16896_v16 = vpop.xlane.xlu0 %4453  ;;  %v4171_v57 = vmul.f32 1.442695, %v19232_v23  ;;  %v19239_v23 = vld [vmem:[#allocation32_spill] sm:$0xff] }
 0x620   : > { %13367 = vpow2.f32 %v4171_v57  ;;  %v19246_v57 = vld [vmem:[#allocation74_spill] sm:$0xff] }
 0x621   : > { %v12963_v35 = vpop.permute.xlu1 %12962 }
 0x622   : > { %v12965_v15 = vunpack.i.h.bf16 %v12963_v35  ;;  %v12964_v4 = vunpack.i.l.bf16 %v12963_v35  ;;  %v12968_v43 = vpop.permute.xlu0 %12967 }
 0x623   : > { %v12970_v58 = vunpack.i.h.bf16 %v12968_v43  ;;  %v12969_v40 = vunpack.i.l.bf16 %v12968_v43 }
 0x624   : > { %v12291_v28 = vpack.c.bf16 %v12965_v15, %v12964_v4  ;;  %v4844_v15 = vmul.f32 %v13350_v48, %v19235_v24  ;;  %v19237_v4 = vld [vmem:[#allocation54_spill] sm:$0xff] }
 0x625   : > { %v12299_v49 = vpack.c.bf16 %v12970_v58, %v12969_v40  ;;  %v16908_v35 = vpop.f32.mrb[76].mxu1  ;;  %v19238_v43 = vsub.f32 %v19236_v51, %v19237_v4  ;;  %v4845_v58 = vmul.f32 %v13352_v27, %v19239_v23  ;;  %v13356_v40 = vpop.eup %13355 }
 0x626   : > { %19233 = vst [vmem:[#allocation61_spill] sm:$0xff] %v16908_v35  ;;  %12292 = vmatprep.subr.bf16.mxu1 %v12291_v28  ;;  %v16911_v38 = vpop.f32.mrb[77].mxu1  ;;  %v4173_v35 = vmul.f32 1.442695, %v19242_v1  ;;  %v4847_v48 = vmul.f32 %v13356_v40, %v16439_v18 }
 0x627   : > { %19234 = vst [vmem:[#allocation51_spill] sm:$0xff] %v16911_v38  ;;  %12294 = vmatpush3.bf16.msra.mxu1 %v12291_v28  ;;  %12300 = vmatprep.subr.bf16.mxu0 %v12299_v49  ;;  %v4165_v46 = vmul.f32 1.442695, %v19238_v43  ;;  %v13358_v28 = vpop.eup %13357  ;;  %v19262_v38 = vld [vmem:[#allocation83_spill] sm:$0xff] }
 0x628   : > { %12302 = vmatpush3.bf16.msra.mxu0 %v12299_v49  ;;  %v4846_v49 = vmul.f32 %v13354_v59, %v19243_v56  ;;  %v13360_v24 = vpop.eup %13359 }
 0x629   : > { %13369 = vpow2.f32 %v4165_v46  ;;  %v13362_v51 = vpop.eup %13361  ;;  %v4849_v4 = vmul.f32 %v13360_v24, %v16524_v52 }
 0x62a   : > { %11272 = vmatmul.mubr.msk.f32.vlgmr.msra.gmra.mrb[80].mxu1 %vm280_vm0, %v4844_v15  ;;  %13371 = vpow2.f32 %v4173_v35  ;;  %v4848_v15 = vmul.f32 %v13358_v28, %v19246_v57  ;;  %v13364_v59 = vpop.eup %13363  ;;  %v4850_v23 = vmul.f32 %v13362_v51, %v16538_v61 }
 0x62b   : > { %11274 = vmatprep.mubr.msk.f32.mxu1 %vm280_vm0, %v4845_v58  ;;  %v16937_v18 = vpop.eup %13365  ;;  %v4859_v58 = vmul.f32 %v13364_v59, %v16618_v45 }
 0x62c   : > { %v16942_v46 = vpop.eup %13367  ;;  %v4479_v52 = vsel %vm280_vm0, %v16937_v18, 0.0 }
 0x62d   : > { %v4491_v63 = vsel %vm280_vm0, %v16942_v46, 0.0 }
 0x62e   : > { %v16926_v60 = vpop.f32.mrb[102].mxu0  ;;  %11275 = vmatmul.mubr.msk.f32.gmra.mrb[82].mxu1 %vm280_vm0, %v4846_v49 }
 0x62f   : > { %19244 = vst [vmem:[#allocation46_spill] sm:$0xff] %v16926_v60  ;;  %v16929_v27 = vpop.f32.mrb[103].mxu0  ;;  %11277 = vmatprep.mubr.msk.f32.mxu1 %vm280_vm0, %v4847_v48  ;;  %v19249_v48 = vld [vmem:[#allocation73_spill] sm:$0xff] }
 0x630   : > { %19245 = vst [vmem:[#allocation64_spill] sm:$0xff] %v16929_v27  ;;  %v3977_v24 = vsub.f32 %v19249_v48, %v16441_v17 }
 0x632   : > { %v16934_v43 = vpop.f32.mrb[78].mxu1  ;;  %11278 = vmatmul.mubr.msk.f32.gmra.mrb[84].mxu1 %vm280_vm0, %v4848_v15  ;;  %v19250_v15 = vld [vmem:[#allocation71_spill] sm:$0xff] }
 0x633   : > { %19247 = vst [vmem:[#allocation54_spill] sm:$0xff] %v16934_v43  ;;  %v16939_v35 = vpop.f32.mrb[79].mxu1  ;;  %11280 = vmatprep.mubr.msk.f32.mxu1 %vm280_vm0, %v4849_v4  ;;  %v16949_v40 = vpop.eup %13369  ;;  %v3981_v51 = vsub.f32 %v19250_v15, %v16420_v30  ;;  %v19252_v30 = vsub.f32 %v19079_v47, %v16397_v22 }
 0x634   : > { %19248 = vst [vmem:[#allocation32_spill] sm:$0xff] %v16939_v35  ;;  %v16954_v33 = vpop.eup %13371  ;;  %v4482_v61 = vsel %vm280_vm0, %v16949_v40, 0.0 }
 0x635   : > { %v4494_v45 = vsel %vm280_vm0, %v16954_v33, 0.0  ;;  %v4175_v35 = vmul.f32 1.442695, %v3981_v51  ;;  %v4177_v48 = vmul.f32 1.442695, %v19252_v30 }
 0x636   : > { %11281 = vmatmul.mubr.msk.f32.gmra.mrb[86].mxu1 %vm280_vm0, %v4850_v23 }
 0x637   : > { %4480 = vadd.xlane.f32.xlu1 %v4479_v52  ;;  %11327 = vmatprep.mubr.msk.f32.mxu1 %vm280_vm0, %v4859_v58 }
 0x638   : > { %4492 = vadd.xlane.f32.xlu0 %v4491_v63  ;;  %v19251_v63 = vld [vmem:[#allocation108_spill] sm:$0xff] }
 0x63b   : > { %4483 = vadd.xlane.f32.xlu1 %v4482_v61  ;;  %v3978_v61 = vsub.f32 %v19251_v63, %v16416_v6 }
 0x63c   : > { %4495 = vadd.xlane.f32.xlu0 %v4494_v45  ;;  %v4167_v45 = vmul.f32 1.442695, %v3977_v24 }
 0x63d   : > { %v4169_v17 = vmul.f32 1.442695, %v3978_v61 }
 0x63e   : > { %13373 = vpow2.f32 %v4167_v45  ;;  %v19258_v45 = vld [vmem:[#allocation96_spill] sm:$0xff] }
 0x63f   : > { %13375 = vpow2.f32 %v4175_v35 }
 0x640   : > { %13377 = vpow2.f32 %v4169_v17  ;;  %v19259_v17 = vld [vmem:[#allocation86_spill] sm:$0xff] }
 0x641   : > { %13379 = vpow2.f32 %v4177_v48 }
 0x642   : > { %13381 = vrcp.f32 %v16732_v14  ;;  %v3987_v14 = vsub.f32 %v19259_v17, %v19258_v45 }
 0x643   : > { %13383 = vrcp.f32 %v16770_v55 }
 0x644   : > { %13385 = vrcp.f32 %v16777_v50 }
 0x645   : > { %13387 = vrcp.f32 %v16829_v44  ;;  %v19261_v44 = vld [vmem:[#allocation109_spill] sm:$0xff] }
 0x646   : > { %13389 = vrcp.f32 %v16833_v5 }
 0x647   : > { %13391 = vrcp.f32 %v16886_v10 }
 0x648   : > { %13393 = vrcp.f32 %v16894_v2  ;;  %v19272_v2 = vld [vmem:[#allocation75_spill] sm:$0xff] }
 0x64c   : > { %12992 = vrot.lane.b32.xlu1 %v19164_v13, %s13839_s21 }
 0x652   : > { %12997 = vrot.lane.b32.xlu0 %v19166_v3, %s13841_s7  ;;  %v16964_v1 = vpop.xlane.xlu1 %4456 }
 0x653   : > { %v16966_v56 = vpop.xlane.xlu0 %4468 }
 0x654   : > { %13395 = vrcp.f32 %v16966_v56 }
 0x656   : > { %v16968_v49 = vpop.xlane.xlu1 %4459 }
 0x657   : > { %v16970_v28 = vpop.xlane.xlu0 %4471 }
 0x65a   : > { %v12973_v57 = vpop.permute.xlu1 %12972 }
 0x65b   : > { %v12975_v4 = vunpack.i.h.bf16 %v12973_v57  ;;  %v12974_v59 = vunpack.i.l.bf16 %v12973_v57  ;;  %v12978_v23 = vpop.permute.xlu0 %12977  ;;  %v16981_v57 = vpop.eup %13373 }
 0x65c   : > { %v12980_v58 = vunpack.i.h.bf16 %v12978_v23  ;;  %v12979_v3 = vunpack.i.l.bf16 %v12978_v23  ;;  %v16983_v15 = vpop.eup %13375  ;;  %v4485_v6 = vsel %vm280_vm0, %v16981_v57, 0.0 }
 0x65d   : > { %v12303_v52 = vpack.c.bf16 %v12975_v4, %v12974_v59  ;;  %v16987_v24 = vpop.eup %13377 }
 0x65e   : > { %v12311_v43 = vpack.c.bf16 %v12980_v58, %v12979_v3  ;;  %v16991_v51 = vpop.eup %13379  ;;  %v4488_v22 = vsel %vm280_vm0, %v16987_v24, 0.0 }
 0x65f   : > { %12304 = vmatprep.subr.bf16.mxu0 %v12303_v52  ;;  %v4500_v47 = vsel %vm280_vm0, %v16991_v51, 0.0 }
 0x660   : > { %12306 = vmatpush3.bf16.msra.mxu0 %v12303_v52  ;;  %12312 = vmatprep.subr.bf16.mxu1 %v12311_v43 }
 0x661   : > { %12314 = vmatpush3.bf16.msra.mxu1 %v12311_v43  ;;  %v4497_v43 = vsel %vm280_vm0, %v16983_v15, 0.0 }
 0x670   : > { %4486 = vadd.xlane.f32.xlu1 %v4485_v6 }
 0x671   : > { %4498 = vadd.xlane.f32.xlu0 %v4497_v43 }
 0x674   : > { %4489 = vadd.xlane.f32.xlu1 %v4488_v22 }
 0x675   : > { %4501 = vadd.xlane.f32.xlu0 %v4500_v47  ;;  %v13382_v47 = vpop.eup %13381 }
 0x676   : > { %v13384_v17 = vpop.eup %13383  ;;  %v4852_v5 = vmul.f32 %v13382_v47, %v16469_v42 }
 0x677   : > { %v13386_v10 = vpop.eup %13385 }
 0x678   : > { %v4854_v42 = vmul.f32 %v13386_v10, %v16542_v12  ;;  %v19277_v10 = vld [vmem:[#allocation110_spill] sm:$0xff] }
 0x685   : > { %13002 = vrot.lane.b32.xlu1 %v19128_v32, %s13839_s21 }
 0x68b   : > { %13007 = vrot.lane.b32.xlu0 %v19130_v36, %s13841_s7  ;;  %v17001_v35 = vpop.xlane.xlu1 %4462  ;;  %v17003_v4 = vpop.f32.mrb[104].mxu0 }
 0x68c   : > { %19253 = vst [vmem:[#allocation55_spill] sm:$0xff] %v17003_v4  ;;  %v17005_v59 = vpop.xlane.xlu0 %4474  ;;  %v17007_v23 = vpop.f32.mrb[105].mxu0  ;;  %v19266_v4 = vld [vmem:[#allocation76_spill] sm:$0xff] }
 0x68d   : > { %19254 = vst [vmem:[#allocation44_spill] sm:$0xff] %v17007_v23 }
 0x68f   : > { %v17011_v58 = vpop.xlane.xlu1 %4465  ;;  %v17013_v3 = vpop.f32.mrb[106].mxu0 }
 0x690   : > { %19255 = vst [vmem:[#allocation48_spill] sm:$0xff] %v17013_v3  ;;  %v17015_v52 = vpop.xlane.xlu0 %4477  ;;  %v17017_v63 = vpop.f32.mrb[107].mxu0  ;;  %v19263_v3 = vsub.f32 %v19261_v44, %v19262_v38  ;;  %v19268_v38 = vld [vmem:[#allocation72_spill] sm:$0xff] }
 0x691   : > { %19256 = vst [vmem:[#allocation74_spill] sm:$0xff] %v17017_v63 }
 0x693   : > { %v12983_v36 = vpop.permute.xlu1 %12982  ;;  %v17021_v61 = vpop.f32.mrb[108].mxu0 }
 0x694   : > { %19257 = vst [vmem:[#allocation73_spill] sm:$0xff] %v17021_v61  ;;  %v12985_v30 = vunpack.i.h.bf16 %v12983_v36  ;;  %v12984_v55 = vunpack.i.l.bf16 %v12983_v36  ;;  %v12988_v48 = vpop.permute.xlu0 %12987  ;;  %v17025_v6 = vpop.f32.mrb[109].mxu0  ;;  %v4179_v61 = vmul.f32 1.442695, %v19263_v3  ;;  %v19265_v36 = vld [vmem:[#allocation107_spill] sm:$0xff]  ;;  %v19269_v3 = vld [vmem:[#allocation78_spill] sm:$0xff] }
 0x695   : > { %19260 = vst [vmem:[#allocation71_spill] sm:$0xff] %v17025_v6  ;;  %v12990_v43 = vunpack.i.h.bf16 %v12988_v48  ;;  %v12989_v22 = vunpack.i.l.bf16 %v12988_v48  ;;  %v3988_v23 = vsub.f32 %v19266_v4, %v19265_v36  ;;  %v4187_v6 = vmul.f32 1.442695, %v3987_v14  ;;  %v13388_v14 = vpop.eup %13387 }
 0x696   : > { %v12307_v50 = vpack.c.bf16 %v12985_v30, %v12984_v55  ;;  %v19270_v30 = vsub.f32 %v19268_v38, %v19269_v3  ;;  %13397 = vpow2.f32 %v4179_v61  ;;  %v4853_v4 = vmul.f32 %v13384_v17, %v16528_v39  ;;  %v13390_v56 = vpop.eup %13389  ;;  %v19273_v39 = vld [vmem:[#allocation97_spill] sm:$0xff]  ;;  %v19275_v17 = vld [vmem:[#allocation152_spill] sm:$0xff] }
 0x697   : > { %v17032_v63 = vpop.f32.mrb[110].mxu0  ;;  %v12315_v45 = vpack.c.bf16 %v12990_v43, %v12989_v22  ;;  %v4189_v48 = vmul.f32 1.442695, %v3988_v23  ;;  %13399 = vpow2.f32 %v4187_v6  ;;  %v19271_v43 = vld [vmem:[#allocation69_spill] sm:$0xff]  ;;  %v13392_v47 = vpop.eup %13391  ;;  %v3989_v23 = vsub.f32 %v19273_v39, %v16475_v7  ;;  %v19274_v6 = vld [vmem:[#allocation123_spill] sm:$0xff] }
 0x698   : > { %19264 = vst [vmem:[#allocation108_spill] sm:$0xff] %v17032_v63  ;;  %v17036_v60 = vpop.f32.mrb[111].mxu0  ;;  %12308 = vmatprep.subr.bf16.mxu0 %v12307_v50  ;;  %v4181_v55 = vmul.f32 1.442695, %v19270_v30  ;;  %v3985_v22 = vsub.f32 %v19272_v2, %v19271_v43  ;;  %v4856_v44 = vmul.f32 %v13390_v56, %v19274_v6  ;;  %v4857_v36 = vmul.f32 %v13392_v47, %v19275_v17  ;;  %v19278_v30 = vld [vmem:[#allocation157_spill] sm:$0xff]  ;;  %v19280_v43 = vld [vmem:[#allocation90_spill] sm:$0xff] }
 0x699   : > { %19267 = vst [vmem:[#allocation96_spill] sm:$0xff] %v17036_v60  ;;  %12310 = vmatpush3.bf16.msra.mxu0 %v12307_v50  ;;  %12316 = vmatprep.subr.bf16.mxu1 %v12315_v45  ;;  %v4855_v50 = vmul.f32 %v13388_v14, %v16614_v11  ;;  %v4191_v11 = vmul.f32 1.442695, %v3989_v23  ;;  %v19281_v47 = vld [vmem:[#allocation141_spill] sm:$0xff]  ;;  %v19283_v17 = vld [vmem:[#allocation143_spill] sm:$0xff] }
 0x69a   : > { %12318 = vmatpush3.bf16.msra.mxu1 %v12315_v45  ;;  %13401 = vpow2.f32 %v4181_v55  ;;  %v4183_v61 = vmul.f32 1.442695, %v3985_v22  ;;  %v13394_v45 = vpop.eup %13393  ;;  %v19291_v60 = vld [vmem:[#allocation145_spill] sm:$0xff] }
 0x69b   : > { %13403 = vpow2.f32 %v4189_v48  ;;  %v13396_v12 = vpop.eup %13395  ;;  %v4858_v55 = vmul.f32 %v13394_v45, %v19278_v30  ;;  %v19279_v48 = vld [vmem:[#allocation139_spill] sm:$0xff] }
 0x69c   : > { %11300 = vmatmul.mubr.msk.f32.vlgmr.msra.gmra.mrb[112].mxu0 %vm280_vm0, %v4852_v5  ;;  %v19276_v5 = vld [vmem:[#allocation87_spill] sm:$0xff]  ;;  %13405 = vpow2.f32 %v4183_v61  ;;  %v3990_v2 = vsub.f32 %v19280_v43, %v19279_v48 }
 0x69d   : > { %11302 = vmatprep.mubr.msk.f32.mxu0 %vm280_vm0, %v4853_v4  ;;  %v3986_v38 = vsub.f32 %v19277_v10, %v19276_v5  ;;  %v4867_v4 = vmul.f32 %v13396_v12, %v16807_v21  ;;  %13407 = vpow2.f32 %v4191_v11  ;;  %v19282_v61 = vld [vmem:[#allocation111_spill] sm:$0xff]  ;;  %v19286_v11 = vld [vmem:[#allocation80_spill] sm:$0xff] }
 0x69e   : > { %v4193_v21 = vmul.f32 1.442695, %v3990_v2  ;;  %v3991_v39 = vsub.f32 %v19282_v61, %v19281_v47 }
 0x69f   : > { %v4185_v14 = vmul.f32 1.442695, %v3986_v38  ;;  %v19285_v38 = vld [vmem:[#allocation138_spill] sm:$0xff] }
 0x6a0   : > { %11303 = vmatmul.mubr.msk.f32.gmra.mrb[114].mxu0 %vm280_vm0, %v4854_v42  ;;  %v17060_v3 = vpop.eup %13397  ;;  %v4195_v45 = vmul.f32 1.442695, %v3991_v39  ;;  %v3996_v30 = vsub.f32 %v19286_v11, %v19285_v38 }
 0x6a1   : > { %11305 = vmatprep.mubr.msk.f32.mxu0 %vm280_vm0, %v4855_v50  ;;  %v17063_v7 = vpop.eup %13399  ;;  %v4503_v22 = vsel %vm280_vm0, %v17060_v3, 0.0  ;;  %13409 = vpow2.f32 %v4185_v14 }
 0x6a2   : > { %v4515_v56 = vsel %vm280_vm0, %v17063_v7, 0.0  ;;  %13411 = vpow2.f32 %v4193_v21  ;;  %v4205_v48 = vmul.f32 1.442695, %v3996_v30 }
 0x6a3   : > { %13413 = vpow2.f32 %v4195_v45 }
 0x6a4   : > { %11306 = vmatmul.mubr.msk.f32.gmra.mrb[116].mxu0 %vm280_vm0, %v4856_v44  ;;  %v17072_v42 = vpop.eup %13401 }
 0x6a5   : > { %11308 = vmatprep.mubr.msk.f32.mxu0 %vm280_vm0, %v4857_v36  ;;  %v17077_v50 = vpop.eup %13403  ;;  %v4506_v23 = vsel %vm280_vm0, %v17072_v42, 0.0  ;;  %v19284_v36 = vld [vmem:[#allocation99_spill] sm:$0xff] }
 0x6a6   : > { %v4518_v6 = vsel %vm280_vm0, %v17077_v50, 0.0  ;;  %v17085_v44 = vpop.eup %13405  ;;  %v3992_v12 = vsub.f32 %v19284_v36, %v19283_v17 }
 0x6a7   : > { %v4509_v5 = vsel %vm280_vm0, %v17085_v44, 0.0  ;;  %v17091_v10 = vpop.eup %13407 }
 0x6a8   : > { %11309 = vmatmul.mubr.msk.f32.gmra.mrb[118].mxu0 %vm280_vm0, %v4858_v55  ;;  %v4197_v55 = vmul.f32 1.442695, %v3992_v12 }
 0x6a9   : > { %4504 = vadd.xlane.f32.xlu1 %v4503_v22  ;;  %11355 = vmatprep.mubr.msk.f32.mxu0 %vm280_vm0, %v4867_v4  ;;  %v4521_v4 = vsel %vm280_vm0, %v17091_v10, 0.0 }
 0x6aa   : > { %4516 = vadd.xlane.f32.xlu0 %v4515_v56  ;;  %13415 = vpow2.f32 %v4197_v55  ;;  %v19287_v55 = vld [vmem:[#allocation20_spill] sm:$0xff] }
 0x6ab   : > { %v17097_v14 = vpop.eup %13409  ;;  %13417 = vpow2.f32 %v4205_v48 }
 0x6ac   : > { %v4512_v43 = vsel %vm280_vm0, %v17097_v14, 0.0  ;;  %v17101_v2 = vpop.eup %13411 }
 0x6ad   : > { %4507 = vadd.xlane.f32.xlu1 %v4506_v23  ;;  %v4524_v22 = vsel %vm280_vm0, %v17101_v2, 0.0  ;;  %v17105_v56 = vpop.eup %13413 }
 0x6ae   : > { %4519 = vadd.xlane.f32.xlu0 %v4518_v6  ;;  %v4527_v21 = vsel %vm280_vm0, %v17105_v56, 0.0 }
 0x6b2   : > { %4510 = vadd.xlane.f32.xlu0 %v4509_v5 }
 0x6b4   : > { %v17111_v47 = vpop.eup %13415 }
 0x6b5   : > { %v4530_v23 = vsel %vm280_vm0, %v17111_v47, 0.0  ;;  %v17121_v6 = vpop.eup %13417 }
 0x6b6   : > { %4522 = vadd.xlane.f32.xlu0 %v4521_v4  ;;  %v4542_v17 = vsel %vm280_vm0, %v17121_v6, 0.0  ;;  %v19288_v4 = vld [vmem:[#allocation88_spill] sm:$0xff] }
 0x6b7   : > { %v3995_v48 = vsub.f32 %v19288_v4, %v19287_v55  ;;  %v19297_v4 = vld [vmem:[#allocation77_spill] sm:$0xff] }
 0x6ba   : > { %4513 = vadd.xlane.f32.xlu0 %v4512_v43 }
 0x6be   : > { %4525 = vadd.xlane.f32.xlu0 %v4524_v22  ;;  %13012 = vrot.lane.b32.xlu1 %v19164_v13, %s13841_s7  ;;  %v4203_v22 = vmul.f32 1.442695, %v3995_v48 }
 0x6c0   : > { %13419 = vpow2.f32 %v4203_v22  ;;  %v19299_v22 = vld [vmem:[#allocation113_spill] sm:$0xff] }
 0x6c2   : > { %4528 = vadd.xlane.f32.xlu0 %v4527_v21  ;;  %13017 = vrot.lane.b32.xlu1 %v19128_v32, %s13841_s7  ;;  %v19289_v21 = vld [vmem:[#allocation21_spill] sm:$0xff] }
 0x6c4   : > { %v17115_v61 = vpop.xlane.xlu1 %4480 }
 0x6c5   : > { %v17117_v39 = vpop.xlane.xlu0 %4492 }
 0x6c6   : > { %4531 = vadd.xlane.f32.xlu0 %v4530_v23  ;;  %v19290_v23 = vld [vmem:[#allocation98_spill] sm:$0xff] }
 0x6c7   : > { %v3997_v63 = vsub.f32 %v19290_v23, %v19289_v21 }
 0x6c8   : > { %v17123_v13 = vpop.xlane.xlu1 %4483 }
 0x6c9   : > { %v17125_v45 = vpop.xlane.xlu0 %4495 }
 0x6ca   : > { %4543 = vadd.xlane.f32.xlu0 %v4542_v17  ;;  %v4207_v17 = vmul.f32 1.442695, %v3997_v63 }
 0x6cc   : > { %v12993_v36 = vpop.permute.xlu1 %12992  ;;  %13421 = vpow2.f32 %v4207_v17 }
 0x6cd   : > { %v12995_v32 = vunpack.i.h.bf16 %v12993_v36  ;;  %v12994_v12 = vunpack.i.l.bf16 %v12993_v36  ;;  %v12998_v5 = vpop.permute.xlu0 %12997  ;;  %v19292_v36 = vld [vmem:[#allocation112_spill] sm:$0xff] }
 0x6ce   : > { %v13000_v38 = vunpack.i.h.bf16 %v12998_v5  ;;  %v12999_v11 = vunpack.i.l.bf16 %v12998_v5  ;;  %v3994_v27 = vsub.f32 %v19292_v36, %v19291_v60  ;;  %v19294_v5 = vld [vmem:[#allocation92_spill] sm:$0xff] }
 0x6cf   : > { %v12319_v30 = vpack.c.bf16 %v12995_v32, %v12994_v12  ;;  %v3998_v32 = vsub.f32 %v19294_v5, %v19293_v62  ;;  %v19296_v60 = vld [vmem:[#allocation144_spill] sm:$0xff] }
 0x6d0   : > { %v12327_v43 = vpack.c.bf16 %v13000_v38, %v12999_v11  ;;  %v4201_v12 = vmul.f32 1.442695, %v3994_v27  ;;  %v19295_v38 = vld [vmem:[#allocation22_spill] sm:$0xff]  ;;  %v17139_v11 = vpop.eup %13419  ;;  %v3993_v48 = vsub.f32 %v19297_v4, %v19296_v60  ;;  %v19302_v4 = vld [vmem:[#allocation147_spill] sm:$0xff] }
 0x6d1   : > { %12320 = vmatprep.subr.bf16.mxu1 %v12319_v30  ;;  %v4209_v55 = vmul.f32 1.442695, %v3998_v32  ;;  %v19300_v32 = vld [vmem:[#allocation49_spill] sm:$0xff] }
 0x6d2   : > { %12322 = vmatpush3.bf16.msra.mxu1 %v12319_v30  ;;  %12328 = vmatprep.subr.bf16.mxu0 %v12327_v43  ;;  %13423 = vpow2.f32 %v4201_v12  ;;  %v4539_v30 = vsel %vm280_vm0, %v17139_v11, 0.0  ;;  %v4199_v23 = vmul.f32 1.442695, %v3993_v48  ;;  %v19301_v12 = vld [vmem:[#allocation101_spill] sm:$0xff] }
 0x6d3   : > { %12330 = vmatpush3.bf16.msra.mxu0 %v12327_v43  ;;  %13425 = vpow2.f32 %v4209_v55  ;;  %v19298_v43 = vld [vmem:[#allocation142_spill] sm:$0xff]  ;;  %v4000_v55 = vsub.f32 %v19301_v12, %v19300_v32 }
 0x6d4   : > { %v3999_v21 = vsub.f32 %v19299_v22, %v19298_v43  ;;  %13427 = vpow2.f32 %v4199_v23 }
 0x6d5   : > { %v4213_v60 = vmul.f32 1.442695, %v4000_v55 }
 0x6d6   : > { %v17143_v63 = vpop.eup %13421  ;;  %v4211_v5 = vmul.f32 1.442695, %v3999_v21 }
 0x6d7   : > { %v4545_v62 = vsel %vm280_vm0, %v17143_v63, 0.0 }
 0x6d8   : > { %13429 = vpow2.f32 %v4211_v5 }
 0x6d9   : > { %13431 = vpow2.f32 %v4213_v60 }
 0x6dc   : > { %v17149_v27 = vpop.eup %13423 }
 0x6dd   : > { %v4536_v17 = vsel %vm280_vm0, %v17149_v27, 0.0  ;;  %v17155_v36 = vpop.eup %13425 }
 0x6de   : > { %v17163_v22 = vpop.eup %13427 }
 0x6df   : > { %v4533_v12 = vsel %vm280_vm0, %v17163_v22, 0.0 }
 0x6e0   : > { %13022 = vrot.lane.b32.xlu0 %v19295_v38, %s13840_s23 }
 0x6e2   : > { %v17173_v5 = vpop.eup %13429 }
 0x6e6   : > { %4540 = vadd.xlane.f32.xlu1 %v4539_v30  ;;  %v4548_v30 = vsel %vm280_vm0, %v17155_v36, 0.0 }
 0x6ea   : > { %4546 = vadd.xlane.f32.xlu1 %v4545_v62  ;;  %v19303_v62 = vld [vmem:[#allocation95_spill] sm:$0xff] }
 0x6eb   : > { %v4004_v48 = vsub.f32 %v19303_v62, %v19302_v4  ;;  %v4551_v62 = vsel %vm280_vm0, %v17173_v5, 0.0 }
 0x6ed   : > { %v4221_v43 = vmul.f32 1.442695, %v4004_v48  ;;  %v17185_v48 = vpop.eup %13431 }
 0x6ee   : > { %4537 = vadd.xlane.f32.xlu1 %v4536_v17 }
 0x6ef   : > { %13433 = vpow2.f32 %v4221_v43 }
 0x6f0   : > { %13435 = vrcp.f32 %v16835_v29  ;;  %v19308_v29 = vld [vmem:[#allocation26_spill] sm:$0xff] }
 0x6f1   : > { %13437 = vrcp.f32 %v16890_v31 }
 0x6f2   : > { %4549 = vadd.xlane.f32.xlu1 %v4548_v30  ;;  %13439 = vrcp.f32 %v16896_v16 }
 0x6f3   : > { %13441 = vrcp.f32 %v16964_v1 }
 0x6f4   : > { %13443 = vrcp.f32 %v16968_v49  ;;  %v19313_v49 = vld [vmem:[#allocation106_spill] sm:$0xff] }
 0x6f5   : > { %13445 = vrcp.f32 %v17001_v35  ;;  %v19314_v35 = vld [vmem:[#allocation23_spill] sm:$0xff] }
 0x6f6   : > { %13447 = vrcp.f32 %v17011_v58  ;;  %v19317_v58 = vld [vmem:[#allocation159_spill] sm:$0xff] }
 0x6f7   : > { %13449 = vrcp.f32 %v17117_v39 }
 0x6f8   : > { %13451 = vrcp.f32 %v17125_v45  ;;  %v19320_v45 = vld [vmem:[#allocation30_spill] sm:$0xff] }
 0x6f9   : > { %v17197_v34 = vpop.eup %13433 }
 0x6fa   : > { %v13436_v37 = vpop.eup %13435 }
 0x6fd   : > { %v17165_v17 = vpop.xlane.xlu1 %4486  ;;  %v17167_v21 = vpop.f32.mrb[80].mxu1 }
 0x6fe   : > { %19304 = vst [vmem:[#allocation86_spill] sm:$0xff] %v17167_v21  ;;  %v4499_v23 = vpop.xlane.xlu0 %4498  ;;  %v17169_v32 = vpop.f32.mrb[81].mxu1 }
 0x6ff   : > { %19305 = vst [vmem:[#allocation109_spill] sm:$0xff] %v17169_v32  ;;  %4534 = vadd.xlane.f32.xlu0 %v4533_v12  ;;  %v4554_v32 = vsel %vm280_vm0, %v17185_v48, 0.0  ;;  %13453 = vrcp.f32 %v4499_v23 }
 0x701   : > { %v17177_v55 = vpop.xlane.xlu1 %4489  ;;  %v17179_v30 = vpop.f32.mrb[82].mxu1 }
 0x702   : > { %19306 = vst [vmem:[#allocation83_spill] sm:$0xff] %v17179_v30  ;;  %v4502_v60 = vpop.xlane.xlu0 %4501  ;;  %v17181_v4 = vpop.f32.mrb[83].mxu1 }
 0x703   : > { %19307 = vst [vmem:[#allocation107_spill] sm:$0xff] %v17181_v4  ;;  %4552 = vadd.xlane.f32.xlu0 %v4551_v62  ;;  %13027 = vrot.lane.b32.xlu1 %v19308_v29, %s13840_s23  ;;  %13455 = vrcp.f32 %v4502_v60  ;;  %v19323_v60 = vld [vmem:[#allocation34_spill] sm:$0xff] }
 0x705   : > { %v13003_v31 = vpop.permute.xlu1 %13002  ;;  %v17191_v43 = vpop.f32.mrb[84].mxu1 }
 0x706   : > { %19309 = vst [vmem:[#allocation76_spill] sm:$0xff] %v17191_v43  ;;  %v13005_v12 = vunpack.i.h.bf16 %v13003_v31  ;;  %v13004_v30 = vunpack.i.l.bf16 %v13003_v31  ;;  %v13008_v21 = vpop.permute.xlu0 %13007  ;;  %v17193_v4 = vpop.f32.mrb[85].mxu1 }
 0x707   : > { %19310 = vst [vmem:[#allocation72_spill] sm:$0xff] %v17193_v4  ;;  %v13010_v16 = vunpack.i.h.bf16 %v13008_v21  ;;  %v13009_v62 = vunpack.i.l.bf16 %v13008_v21  ;;  %4555 = vadd.xlane.f32.xlu0 %v4554_v32  ;;  %v13438_v31 = vpop.eup %13437  ;;  %v4566_v4 = vsel %vm280_vm0, %v17197_v34, 0.0  ;;  %v4860_v21 = vmul.f32 %v13436_v37, %v19313_v49  ;;  %v19316_v37 = vld [vmem:[#allocation27_spill] sm:$0xff] }
 0x708   : > { %v12323_v1 = vpack.c.bf16 %v13005_v12, %v13004_v30  ;;  %v13440_v32 = vpop.eup %13439  ;;  %v19315_v30 = vld [vmem:[#allocation155_spill] sm:$0xff] }
 0x709   : > { %v12331_v43 = vpack.c.bf16 %v13010_v16, %v13009_v62  ;;  %v17201_v54 = vpop.f32.mrb[86].mxu1  ;;  %v4861_v12 = vmul.f32 %v13438_v31, %v19315_v30  ;;  %v13442_v16 = vpop.eup %13441  ;;  %v4862_v39 = vmul.f32 %v13440_v32, %v19317_v58  ;;  %v19318_v62 = vld [vmem:[#allocation37_spill] sm:$0xff]  ;;  %v19322_v30 = vld [vmem:[#allocation47_spill] sm:$0xff] }
 0x70a   : > { %19311 = vst [vmem:[#allocation78_spill] sm:$0xff] %v17201_v54  ;;  %v17203_v8 = vpop.f32.mrb[87].mxu1  ;;  %12324 = vmatprep.subr.bf16.mxu1 %v12323_v1  ;;  %v4863_v31 = vmul.f32 %v13442_v16, %v16804_v20  ;;  %v19321_v32 = vld [vmem:[#allocation81_spill] sm:$0xff] }
 0x70b   : > { %19312 = vst [vmem:[#allocation69_spill] sm:$0xff] %v17203_v8  ;;  %4567 = vadd.xlane.f32.xlu0 %v4566_v4  ;;  %12326 = vmatpush3.bf16.msra.mxu1 %v12323_v1  ;;  %v13444_v4 = vpop.eup %13443  ;;  %v19319_v1 = vld [vmem:[#allocation17_spill] sm:$0xff]  ;;  %v19365_v8 = vld [vmem:[#allocation67_spill] sm:$0xff] }
 0x70c   : > { %12332 = vmatprep.subr.bf16.mxu0 %v12331_v43  ;;  %12344 = vmatprep.subr.bf16.mxu1 %v19314_v35  ;;  %v13446_v49 = vpop.eup %13445  ;;  %v4864_v23 = vmul.f32 %v13444_v4, %v16814_v19  ;;  %v19324_v19 = vld [vmem:[#allocation146_spill] sm:$0xff] }
 0x70d   : > { %12334 = vmatpush3.bf16.msra.mxu0 %v12331_v43  ;;  %v4003_v43 = vsub.f32 %v19319_v1, %v19318_v62  ;;  %v4865_v58 = vmul.f32 %v13446_v49, %v16848_v53 }
 0x70e   : > { %11328 = vmatmul.mubr.msk.f32.vlgmr.msra.gmra.mrb[88].mxu1 %vm280_vm0, %v4860_v21  ;;  %v13448_v21 = vpop.eup %13447 }
 0x70f   : > { %11330 = vmatprep.mubr.msk.f32.mxu1 %vm280_vm0, %v4861_v12  ;;  %12346 = vmatpush3.bf16.msra.mxu1 %v19314_v35  ;;  %v4219_v35 = vmul.f32 1.442695, %v4003_v43  ;;  %v4005_v12 = vsub.f32 %v19322_v30, %v19321_v32  ;;  %v13450_v20 = vpop.eup %13449  ;;  %v4866_v16 = vmul.f32 %v13448_v21, %v16856_v9  ;;  %v19326_v9 = vld [vmem:[#allocation118_spill] sm:$0xff]  ;;  %v19328_v32 = vld [vmem:[#allocation31_spill] sm:$0xff] }
 0x710   : > { %12348 = vmatprep.subr.bf16.mxu1 %v19316_v37  ;;  %v4875_v1 = vmul.f32 %v13450_v20, %v16942_v46  ;;  %v19330_v20 = vld [vmem:[#allocation79_spill] sm:$0xff] }
 0x711   : > { %13457 = vpow2.f32 %v4219_v35  ;;  %v4223_v62 = vmul.f32 1.442695, %v4005_v12 }
 0x712   : > { %11331 = vmatmul.mubr.msk.f32.gmra.mrb[90].mxu1 %vm280_vm0, %v4862_v39  ;;  %v19325_v39 = vld [vmem:[#allocation114_spill] sm:$0xff] }
 0x713   : > { %11333 = vmatprep.mubr.msk.f32.mxu1 %vm280_vm0, %v4863_v31  ;;  %12350 = vmatpush3.bf16.msra.mxu1 %v19316_v37  ;;  %v13452_v37 = vpop.eup %13451  ;;  %v4002_v4 = vsub.f32 %v19325_v39, %v19324_v19  ;;  %13459 = vpow2.f32 %v4223_v62  ;;  %v19331_v39 = vld [vmem:[#allocation41_spill] sm:$0xff] }
 0x714   : > { %12352 = vmatprep.subr.bf16.mxu1 %v19320_v45  ;;  %v13454_v53 = vpop.eup %13453  ;;  %v4876_v43 = vmul.f32 %v13452_v37, %v16954_v33 }
 0x715   : > { %v13456_v31 = vpop.eup %13455  ;;  %v4217_v49 = vmul.f32 1.442695, %v4002_v4  ;;  %v4877_v21 = vmul.f32 %v13454_v53, %v16983_v15  ;;  %v19332_v4 = vld [vmem:[#allocation94_spill] sm:$0xff]  ;;  %v19333_v53 = vld [vmem:[#allocation43_spill] sm:$0xff] }
 0x716   : > { %11334 = vmatmul.mubr.msk.f32.gmra.mrb[92].mxu1 %vm280_vm0, %v4864_v23  ;;  %v4878_v46 = vmul.f32 %v13456_v31, %v16991_v51  ;;  %v4007_v62 = vsub.f32 %v19332_v4, %v19331_v39 }
 0x717   : > { %11336 = vmatprep.mubr.msk.f32.mxu1 %vm280_vm0, %v4865_v58  ;;  %12354 = vmatpush3.bf16.msra.mxu1 %v19320_v45  ;;  %v19327_v45 = vld [vmem:[#allocation105_spill] sm:$0xff]  ;;  %13461 = vpow2.f32 %v4217_v49  ;;  %v19329_v58 = vld [vmem:[#allocation128_spill] sm:$0xff] }
 0x718   : > { %12356 = vmatprep.subr.bf16.mxu1 %v19323_v60  ;;  %v4006_v23 = vsub.f32 %v19327_v45, %v19326_v9  ;;  %v4227_v49 = vmul.f32 1.442695, %v4007_v62  ;;  %v19335_v45 = vld [vmem:[#allocation148_spill] sm:$0xff] }
 0x71a   : > { %11337 = vmatmul.mubr.msk.f32.gmra.mrb[94].mxu1 %vm280_vm0, %v4866_v16  ;;  %v4225_v35 = vmul.f32 1.442695, %v4006_v23  ;;  %v19336_v23 = vld [vmem:[#allocation13_spill] sm:$0xff] }
 0x71b   : > { %12358 = vmatpush3.bf16.msra.mxu1 %v19323_v60  ;;  %11383 = vmatprep.mubr.msk.f32.mxu1 %vm280_vm0, %v4875_v1  ;;  %v17250_v33 = vpop.eup %13457  ;;  %v4001_v60 = vsub.f32 %v19330_v20, %v19329_v58 }
 0x71c   : > { %13463 = vpow2.f32 %v4225_v35  ;;  %v4563_v15 = vsel %vm280_vm0, %v17250_v33, 0.0 }
 0x71d   : > { %v17256_v30 = vpop.eup %13459  ;;  %v4215_v19 = vmul.f32 1.442695, %v4001_v60 }
 0x71e   : > { %11384 = vmatmul.mubr.msk.f32.vlgmr.msra.gmra.mrb[96].mxu1 %vm280_vm0, %v4876_v43  ;;  %v4569_v51 = vsel %vm280_vm0, %v17256_v30, 0.0  ;;  %v19334_v43 = vld [vmem:[#allocation19_spill] sm:$0xff] }
 0x71f   : > { %11386 = vmatprep.mubr.msk.f32.mxu1 %vm280_vm0, %v4877_v21  ;;  %v4008_v31 = vsub.f32 %v19334_v43, %v19333_v53  ;;  %13465 = vpow2.f32 %v4215_v19  ;;  %v4012_v21 = vsub.f32 %v19336_v23, %v19335_v45 }
 0x721   : > { %13032 = vrot.lane.b32.xlu0 %v19328_v32, %s13840_s23  ;;  %v17260_v12 = vpop.eup %13461  ;;  %v4229_v35 = vmul.f32 1.442695, %v4008_v31 }
 0x722   : > { %11387 = vmatmul.mubr.msk.f32.gmra.mrb[98].mxu1 %vm280_vm0, %v4878_v46  ;;  %v4560_v16 = vsel %vm280_vm0, %v17260_v12, 0.0 }
 0x725   : > { %13037 = vrot.lane.b32.xlu0 %v19295_v38, %s13842_s8 }
 0x726   : > { %v17266_v37 = vpop.eup %13463 }
 0x727   : > { %4564 = vadd.xlane.f32.xlu1 %v4563_v15  ;;  %v4572_v1 = vsel %vm280_vm0, %v17266_v37, 0.0 }
 0x729   : > { %v17280_v39 = vpop.eup %13465 }
 0x72a   : > { %v4557_v31 = vsel %vm280_vm0, %v17280_v39, 0.0 }
 0x72b   : > { %4570 = vadd.xlane.f32.xlu1 %v4569_v51  ;;  %v4237_v51 = vmul.f32 1.442695, %v4012_v21 }
 0x72f   : > { %4561 = vadd.xlane.f32.xlu1 %v4560_v16 }
 0x733   : > { %4573 = vadd.xlane.f32.xlu1 %v4572_v1 }
 0x736   : > { %v4505_v9 = vpop.xlane.xlu1 %4504 }
 0x737   : > { %13467 = vrcp.f32 %v4505_v9  ;;  %v4517_v46 = vpop.xlane.xlu0 %4516  ;;  %v19337_v9 = vld [vmem:[#allocation35_spill] sm:$0xff] }
 0x738   : > { %13469 = vpow2.f32 %v4227_v49 }
 0x73a   : > { %v4508_v15 = vpop.xlane.xlu1 %4507 }
 0x73b   : > { %13471 = vrcp.f32 %v4508_v15  ;;  %v17276_v58 = vpop.xlane.xlu0 %4519 }
 0x73c   : > { %13473 = vpow2.f32 %v4229_v35 }
 0x73d   : > { %13475 = vrcp.f32 %v16970_v28 }
 0x73e   : > { %13477 = vrcp.f32 %v17005_v59  ;;  %v13013_v20 = vpop.permute.xlu1 %13012 }
 0x73f   : > { %13479 = vpow2.f32 %v4237_v51  ;;  %v13015_v60 = vunpack.i.h.bf16 %v13013_v20  ;;  %v13014_v16 = vunpack.i.l.bf16 %v13013_v20  ;;  %v4511_v19 = vpop.xlane.xlu0 %4510 }
 0x740   : > { %13481 = vrcp.f32 %v4511_v19 }
 0x741   : > { %v13468_v4 = vpop.eup %13467  ;;  %13483 = vrcp.f32 %v17015_v52  ;;  %v12335_v62 = vpack.c.bf16 %v13015_v60, %v13014_v16 }
 0x742   : > { %13485 = vrcp.f32 %v17115_v61  ;;  %v13018_v1 = vpop.permute.xlu1 %13017  ;;  %v4879_v53 = vmul.f32 %v13468_v4, %v17060_v3  ;;  %v17289_v49 = vpop.eup %13469 }
 0x743   : > { %v13020_v28 = vunpack.i.h.bf16 %v13018_v1  ;;  %v13019_v43 = vunpack.i.l.bf16 %v13018_v1  ;;  %v17285_v59 = vpop.xlane.xlu0 %4522  ;;  %12336 = vmatprep.subr.bf16.mxu0 %v12335_v62  ;;  %13487 = vrcp.f32 %v17123_v13  ;;  %v4575_v35 = vsel %vm280_vm0, %v17289_v49, 0.0 }
 0x744   : > { %4558 = vadd.xlane.f32.xlu0 %v4557_v31  ;;  %13042 = vrot.lane.b32.xlu1 %v19337_v9, %s13840_s23  ;;  %13489 = vrcp.f32 %v17165_v17  ;;  %s13847_s23 = smov [#allocation8]  }
 0x745   : > { %v13472_v52 = vpop.eup %13471  ;;  %v12339_v61 = vpack.c.bf16 %v13020_v28, %v13019_v43  ;;  %12338 = vmatpush3.bf16.msra.mxu0 %v12335_v62  ;;  %11389 = vmatprep.mubr.msk.f32.mxu1 %vm280_vm0, %v4879_v53 }
 0x746   : > { %v17295_v3 = vpop.eup %13473  ;;  %v4880_v45 = vmul.f32 %v13472_v52, %v17072_v42 }
 0x747   : > { %v13476_v23 = vpop.eup %13475  ;;  %v4514_v21 = vpop.xlane.xlu0 %4513  ;;  %12340 = vmatprep.subr.bf16.mxu0 %v12339_v61  ;;  %v4578_v60 = vsel %vm280_vm0, %v17295_v3, 0.0 }
 0x748   : > { %v13478_v15 = vpop.eup %13477  ;;  %13491 = vrcp.f32 %v4514_v21  ;;  %4576 = vadd.xlane.f32.xlu0 %v4575_v35  ;;  %13047 = vrot.lane.b32.xlu1 %v19308_v29, %s13842_s8  ;;  %v4868_v17 = vmul.f32 %v13476_v23, %v16819_v0  ;;  %v19341_v35 = vld [vmem:[#allocation15_spill] sm:$0xff] }
 0x749   : > { %v17303_v13 = vpop.eup %13479  ;;  %13493 = vrcp.f32 %v17177_v55  ;;  %12342 = vmatpush3.bf16.msra.mxu0 %v12339_v61  ;;  %11390 = vmatmul.mubr.msk.f32.gmra.mrb[100].mxu1 %vm280_vm0, %v4880_v45  ;;  %v4869_v16 = vmul.f32 %v13478_v15, %v16850_v41  ;;  %v19339_v61 = vld [vmem:[#allocation84_spill] sm:$0xff] }
 0x74a   : > { %v13482_v42 = vpop.eup %13481  ;;  %13495 = vrcp.f32 %v4517_v46  ;;  %v4590_v62 = vsel %vm280_vm0, %v17303_v13, 0.0 }
 0x74b   : > { %v13484_v51 = vpop.eup %13483  ;;  %v17308_v20 = vpop.xlane.xlu0 %4525  ;;  %v4881_v19 = vmul.f32 %v13482_v42, %v17085_v44 }
 0x74c   : > { %v13486_v4 = vpop.eup %13485  ;;  %11356 = vmatmul.mubr.msk.f32.vlgmr.msra.gmra.mrb[120].mxu0 %vm280_vm0, %v4868_v17  ;;  %4579 = vadd.xlane.f32.xlu0 %v4578_v60  ;;  %v4870_v0 = vmul.f32 %v13484_v51, %v16862_v25 }
 0x74d   : > { %11358 = vmatprep.mubr.msk.f32.mxu0 %vm280_vm0, %v4869_v16  ;;  %11392 = vmatprep.mubr.msk.f32.mxu1 %vm280_vm0, %v4881_v19  ;;  %v13488_v55 = vpop.eup %13487  ;;  %v4871_v41 = vmul.f32 %v13486_v4, %v16937_v18  ;;  %v19338_v18 = vld [vmem:[#allocation115_spill] sm:$0xff]  ;;  %v19342_v16 = vld [vmem:[#allocation14_spill] sm:$0xff]  ;;  %v19343_v19 = vld [vmem:[#allocation100_spill] sm:$0xff] }
 0x74e   : > { %v13490_v1 = vpop.eup %13489  ;;  %v4872_v53 = vmul.f32 %v13488_v55, %v16949_v40  ;;  %v4011_v45 = vsub.f32 %v19339_v61, %v19338_v18  ;;  %v19348_v18 = vld [vmem:[#allocation42_spill] sm:$0xff]  ;;  %v19349_v61 = vld [vmem:[#allocation103_spill] sm:$0xff] }
 0x74f   : > { %v17318_v46 = vpop.xlane.xlu0 %4528  ;;  %v4873_v25 = vmul.f32 %v13490_v1, %v16981_v57 }
 0x750   : > { %11359 = vmatmul.mubr.msk.f32.gmra.mrb[122].mxu0 %vm280_vm0, %v4870_v0  ;;  %4591 = vadd.xlane.f32.xlu0 %v4590_v62  ;;  %v4235_v57 = vmul.f32 1.442695, %v4011_v45  ;;  %v19345_v0 = vld [vmem:[#allocation91_spill] sm:$0xff]  ;;  %v4009_v45 = vsub.f32 %v19349_v61, %v19348_v18  ;;  %v19360_v61 = vld [vmem:[#allocation40_spill] sm:$0xff] }
 0x751   : > { %11361 = vmatprep.mubr.msk.f32.mxu0 %vm280_vm0, %v4871_v41 }
 0x752   : > { %v13492_v44 = vpop.eup %13491  ;;  %13497 = vpow2.f32 %v4235_v57 }
 0x753   : > { %v13494_v28 = vpop.eup %13493  ;;  %v17326_v43 = vpop.xlane.xlu0 %4531  ;;  %v4882_v31 = vmul.f32 %v13492_v44, %v17097_v14  ;;  %v19340_v14 = vld [vmem:[#allocation116_spill] sm:$0xff] }
 0x754   : > { %v13496_v52 = vpop.eup %13495  ;;  %11362 = vmatmul.mubr.msk.f32.gmra.mrb[124].mxu0 %vm280_vm0, %v4872_v53  ;;  %v4874_v23 = vmul.f32 %v13494_v28, %v16987_v24  ;;  %v4013_v15 = vsub.f32 %v19341_v35, %v19340_v14  ;;  %v4010_v24 = vsub.f32 %v19343_v19, %v19342_v16 }
 0x755   : > { %11364 = vmatprep.mubr.msk.f32.mxu0 %vm280_vm0, %v4873_v25  ;;  %11393 = vmatmul.mubr.msk.f32.gmra.mrb[102].mxu1 %vm280_vm0, %v4882_v31  ;;  %v4883_v21 = vmul.f32 %v13496_v52, %v17063_v7  ;;  %v19344_v7 = vld [vmem:[#allocation149_spill] sm:$0xff] }
 0x756   : > { %v4239_v60 = vmul.f32 1.442695, %v4013_v15  ;;  %v4014_v55 = vsub.f32 %v19345_v0, %v19344_v7  ;;  %v4233_v62 = vmul.f32 1.442695, %v4010_v24  ;;  %v19352_v15 = vld [vmem:[#allocation18_spill] sm:$0xff] }
 0x757   : > { %v17336_v40 = vpop.xlane.xlu0 %4543  ;;  %v19357_v7 = vld [vmem:[#allocation102_spill] sm:$0xff] }
 0x758   : > { %11365 = vmatmul.mubr.msk.f32.gmra.mrb[126].mxu0 %vm280_vm0, %v4874_v23  ;;  %13499 = vpow2.f32 %v4239_v60  ;;  %v4241_v41 = vmul.f32 1.442695, %v4014_v55 }
 0x759   : > { %11411 = vmatprep.mubr.msk.f32.mxu0 %vm280_vm0, %v4883_v21  ;;  %13501 = vpow2.f32 %v4233_v62 }
 0x75a   : > { %13503 = vpow2.f32 %v4241_v41 }
 0x75b   : > { %v13023_v42 = vpop.permute.xlu0 %13022 }
 0x75c   : > { %v13025_v17 = vunpack.i.h.bf16 %v13023_v42  ;;  %v13024_v51 = vunpack.i.l.bf16 %v13023_v42  ;;  %v17349_v1 = vpop.eup %13497  ;;  %v19353_v42 = vld [vmem:[#allocation82_spill] sm:$0xff] }
 0x75d   : > { %v4587_v44 = vsel %vm280_vm0, %v17349_v1, 0.0 }
 0x75e   : > { %v12359_v4 = vpack.c.bf16 %v13025_v17, %v13024_v51  ;;  %v4015_v17 = vsub.f32 %v19353_v42, %v19352_v15  ;;  %v4231_v51 = vmul.f32 1.442695, %v4009_v45  ;;  %v19361_v45 = vld [vmem:[#allocation104_spill] sm:$0xff] }
 0x760   : > { %12360 = vmatprep.subr.bf16.mxu0 %v12359_v4  ;;  %v4243_v55 = vmul.f32 1.442695, %v4015_v17 }
 0x761   : > { %12362 = vmatpush3.bf16.msra.mxu0 %v12359_v4  ;;  %v19356_v4 = vld [vmem:[#allocation39_spill] sm:$0xff] }
 0x762   : > { %v17355_v53 = vpop.eup %13499  ;;  %v4016_v0 = vsub.f32 %v19357_v7, %v19356_v4 }
 0x763   : > { %v4593_v25 = vsel %vm280_vm0, %v17355_v53, 0.0  ;;  %v17361_v31 = vpop.eup %13501 }
 0x764   : > { %v4584_v57 = vsel %vm280_vm0, %v17361_v31, 0.0  ;;  %v17371_v14 = vpop.eup %13503  ;;  %v4245_v18 = vmul.f32 1.442695, %v4016_v0 }
 0x765   : > { %v4596_v19 = vsel %vm280_vm0, %v17371_v14, 0.0 }
 0x766   : > { %13052 = vrot.lane.b32.xlu0 %v19328_v32, %s13842_s8 }
 0x76a   : > { %13057 = vrot.lane.b32.xlu0 %v19295_v38, %s13843_s30 }
 0x76c   : > { %4588 = vadd.xlane.f32.xlu1 %v4587_v44 }
 0x76f   : > { %v17357_v28 = vpop.f32.mrb[112].mxu0 }
 0x770   : > { %19346 = vst [vmem:[#allocation75_spill] sm:$0xff] %v17357_v28  ;;  %4594 = vadd.xlane.f32.xlu1 %v4593_v25  ;;  %v17363_v52 = vpop.f32.mrb[113].mxu0  ;;  %v19367_v28 = vld [vmem:[#allocation25_spill] sm:$0xff] }
 0x771   : > { %19347 = vst [vmem:[#allocation97_spill] sm:$0xff] %v17363_v52 }
 0x773   : > { %v4541_v23 = vpop.xlane.xlu1 %4540  ;;  %v17367_v21 = vpop.f32.mrb[114].mxu0 }
 0x774   : > { %19350 = vst [vmem:[#allocation123_spill] sm:$0xff] %v17367_v21  ;;  %13505 = vrcp.f32 %v4541_v23  ;;  %4585 = vadd.xlane.f32.xlu1 %v4584_v57  ;;  %v17373_v35 = vpop.f32.mrb[115].mxu0  ;;  %v4020_v23 = vsub.f32 %v19361_v45, %v19360_v61 }
 0x775   : > { %19351 = vst [vmem:[#allocation152_spill] sm:$0xff] %v17373_v35  ;;  %13507 = vpow2.f32 %v4231_v51 }
 0x776   : > { %13509 = vpow2.f32 %v4243_v55  ;;  %v4253_v42 = vmul.f32 1.442695, %v4020_v23 }
 0x777   : > { %v17377_v60 = vpop.xlane.xlu1 %4546  ;;  %v17379_v16 = vpop.f32.mrb[116].mxu0  ;;  %13511 = vpow2.f32 %v4245_v18 }
 0x778   : > { %19354 = vst [vmem:[#allocation87_spill] sm:$0xff] %v17379_v16  ;;  %4597 = vadd.xlane.f32.xlu1 %v4596_v19  ;;  %v17383_v24 = vpop.f32.mrb[117].mxu0  ;;  %13513 = vpow2.f32 %v4253_v42 }
 0x779   : > { %19355 = vst [vmem:[#allocation110_spill] sm:$0xff] %v17383_v24 }
 0x77b   : > { %v17387_v62 = vpop.xlane.xlu1 %4537  ;;  %v17389_v41 = vpop.f32.mrb[118].mxu0 }
 0x77c   : > { %19358 = vst [vmem:[#allocation157_spill] sm:$0xff] %v17389_v41  ;;  %v17391_v44 = vpop.f32.mrb[119].mxu0 }
 0x77d   : > { %19359 = vst [vmem:[#allocation139_spill] sm:$0xff] %v17391_v44  ;;  %v19366_v44 = vld [vmem:[#allocation125_spill] sm:$0xff] }
 0x77e   : > { %v13506_v25 = vpop.eup %13505  ;;  %v4021_v16 = vsub.f32 %v19366_v44, %v19365_v8 }
 0x77f   : > { %v17395_v57 = vpop.xlane.xlu1 %4549  ;;  %v4891_v15 = vmul.f32 %v13506_v25, %v17139_v11  ;;  %v17399_v4 = vpop.eup %13507 }
 0x780   : > { %v4581_v0 = vsel %vm280_vm0, %v17399_v4, 0.0  ;;  %v17403_v55 = vpop.eup %13509  ;;  %v4255_v26 = vmul.f32 1.442695, %v4021_v16  ;;  %v19371_v16 = vld [vmem:[#allocation53_spill] sm:$0xff] }
 0x781   : > { %11439 = vmatprep.mubr.msk.f32.mxu1 %vm280_vm0, %v4891_v15  ;;  %v4599_v25 = vsel %vm280_vm0, %v17403_v55, 0.0  ;;  %v17411_v18 = vpop.eup %13511 }
 0x782   : > { %v4602_v45 = vsel %vm280_vm0, %v17411_v18, 0.0  ;;  %v17419_v23 = vpop.eup %13513 }
 0x783   : > { %v13028_v17 = vpop.permute.xlu1 %13027  ;;  %19362 = vst [vmem:[#allocation90_spill] sm:$0xff] %v17419_v23  ;;  %v4614_v42 = vsel %vm280_vm0, %v17419_v23, 0.0 }
 0x784   : > { %v13030_v51 = vunpack.i.h.bf16 %v13028_v17  ;;  %v13029_v19 = vunpack.i.l.bf16 %v13028_v17 }
 0x786   : > { %v12363_v7 = vpack.c.bf16 %v13030_v51, %v13029_v19  ;;  %v19363_v51 = vld [vmem:[#allocation126_spill] sm:$0xff]  ;;  %v19364_v19 = vld [vmem:[#allocation120_spill] sm:$0xff] }
 0x788   : > { %12364 = vmatprep.subr.bf16.mxu0 %v12363_v7 }
 0x789   : > { %4582 = vadd.xlane.f32.xlu0 %v4581_v0  ;;  %13062 = vrot.lane.b32.xlu1 %v19337_v9, %s13842_s8 }
 0x78a   : > { %12366 = vmatpush3.bf16.msra.mxu0 %v12363_v7  ;;  %v4019_v7 = vsub.f32 %v19364_v19, %v19363_v51  ;;  %v19369_v19 = vld [vmem:[#allocation133_spill] sm:$0xff] }
 0x78c   : > { %v17407_v11 = vpop.xlane.xlu0 %4534  ;;  %v4251_v41 = vmul.f32 1.442695, %v4019_v7  ;;  %v19370_v7 = vld [vmem:[#allocation122_spill] sm:$0xff] }
 0x78d   : > { %4600 = vadd.xlane.f32.xlu0 %v4599_v25  ;;  %13067 = vrot.lane.b32.xlu1 %v19308_v29, %s13843_s30 }
 0x78e   : > { %13515 = vpow2.f32 %v4251_v41 }
 0x78f   : > { %13517 = vpow2.f32 %v4255_v26 }
 0x790   : > { %v17415_v61 = vpop.xlane.xlu0 %4552 }
 0x791   : > { %4603 = vadd.xlane.f32.xlu0 %v4602_v45 }
 0x794   : > { %v17421_v15 = vpop.xlane.xlu0 %4555 }
 0x795   : > { %4615 = vadd.xlane.f32.xlu0 %v4614_v42  ;;  %v19368_v42 = vld [vmem:[#allocation89_spill] sm:$0xff] }
 0x796   : > { %v4018_v52 = vsub.f32 %v19368_v42, %v19367_v28  ;;  %v19374_v42 = vld [vmem:[#allocation33_spill] sm:$0xff] }
 0x798   : > { %v17425_v17 = vpop.xlane.xlu0 %4567  ;;  %v4249_v51 = vmul.f32 1.442695, %v4018_v52 }
 0x79a   : > { %13519 = vpow2.f32 %v4249_v51  ;;  %v19375_v51 = vld [vmem:[#allocation130_spill] sm:$0xff] }
 0x79c   : > { %v13033_v0 = vpop.permute.xlu0 %13032 }
 0x79d   : > { %v13035_v25 = vunpack.i.h.bf16 %v13033_v0  ;;  %v13034_v54 = vunpack.i.l.bf16 %v13033_v0  ;;  %v4022_v0 = vsub.f32 %v19370_v7, %v19369_v19  ;;  %v4023_v19 = vsub.f32 %v19375_v51, %v19374_v42 }
 0x79f   : > { %v12367_v24 = vpack.c.bf16 %v13035_v25, %v13034_v54  ;;  %v4257_v8 = vmul.f32 1.442695, %v4022_v0  ;;  %v17437_v54 = vpop.eup %13515 }
 0x7a0   : > { %v13038_v45 = vpop.permute.xlu0 %13037  ;;  %v4611_v28 = vsel %vm280_vm0, %v17437_v54, 0.0 }
 0x7a1   : > { %v13040_v21 = vunpack.i.h.bf16 %v13038_v45  ;;  %v13039_v35 = vunpack.i.l.bf16 %v13038_v45  ;;  %12368 = vmatprep.subr.bf16.mxu0 %v12367_v24  ;;  %13521 = vpow2.f32 %v4257_v8  ;;  %v4259_v8 = vmul.f32 1.442695, %v4023_v19 }
 0x7a2   : > { %12370 = vmatpush3.bf16.msra.mxu0 %v12367_v24  ;;  %v19372_v24 = vld [vmem:[#allocation117_spill] sm:$0xff]  ;;  %13523 = vrcp.f32 %v17276_v58 }
 0x7a3   : > { %v12375_v23 = vpack.c.bf16 %v13040_v21, %v13039_v35  ;;  %v17443_v21 = vpop.eup %13517  ;;  %v4017_v41 = vsub.f32 %v19372_v24, %v19371_v16 }
 0x7a4   : > { %v4617_v26 = vsel %vm280_vm0, %v17443_v21, 0.0  ;;  %v17447_v35 = vpop.eup %13519 }
 0x7a5   : > { %12376 = vmatprep.subr.bf16.mxu1 %v12375_v23  ;;  %v4247_v45 = vmul.f32 1.442695, %v4017_v41  ;;  %v19378_v41 = vld [vmem:[#allocation134_spill] sm:$0xff] }
 0x7a6   : > { %12378 = vmatpush3.bf16.msra.mxu1 %v12375_v23  ;;  %v4608_v23 = vsel %vm280_vm0, %v17447_v35, 0.0 }
 0x7a7   : > { %13525 = vpow2.f32 %v4247_v45 }
 0x7a8   : > { %13527 = vrcp.f32 %v17285_v59 }
 0x7a9   : > { %13529 = vrcp.f32 %v17308_v20 }
 0x7aa   : > { %13531 = vpow2.f32 %v4259_v8 }
 0x7ab   : > { %13072 = vrot.lane.b32.xlu0 %v19328_v32, %s13843_s30  ;;  %v17455_v25 = vpop.eup %13521  ;;  %13533 = vrcp.f32 %v17318_v46 }
 0x7ac   : > { %19373 = vst [vmem:[#allocation141_spill] sm:$0xff] %v17455_v25  ;;  %v4620_v0 = vsel %vm280_vm0, %v17455_v25, 0.0  ;;  %13535 = vrcp.f32 %v17326_v43  ;;  %v13524_v59 = vpop.eup %13523 }
 0x7ad   : > { %13537 = vrcp.f32 %v17407_v11  ;;  %v4884_v46 = vmul.f32 %v13524_v59, %v17077_v50 }
 0x7af   : > { %13077 = vrot.lane.b32.xlu0 %v19295_v38, %s13844_s6 }
 0x7b1   : > { %4612 = vadd.xlane.f32.xlu1 %v4611_v28  ;;  %v19376_v28 = vld [vmem:[#allocation58_spill] sm:$0xff]  ;;  %v17475_v20 = vpop.eup %13525 }
 0x7b4   : > { %v4565_v52 = vpop.xlane.xlu1 %4564 }
 0x7b5   : > { %4618 = vadd.xlane.f32.xlu1 %v4617_v26  ;;  %v19377_v26 = vld [vmem:[#allocation129_spill] sm:$0xff] }
 0x7b6   : > { %v4024_v16 = vsub.f32 %v19377_v26, %v19376_v28 }
 0x7b8   : > { %v17451_v44 = vpop.xlane.xlu1 %4570  ;;  %v4261_v51 = vmul.f32 1.442695, %v4024_v16  ;;  %v13528_v16 = vpop.eup %13527 }
 0x7b9   : > { %4609 = vadd.xlane.f32.xlu1 %v4608_v23  ;;  %v19379_v23 = vld [vmem:[#allocation52_spill] sm:$0xff] }
 0x7ba   : > { %v4028_v42 = vsub.f32 %v19379_v23, %v19378_v41  ;;  %13539 = vpow2.f32 %v4261_v51  ;;  %v13530_v41 = vpop.eup %13529  ;;  %v4605_v23 = vsel %vm280_vm0, %v17475_v20, 0.0 }
 0x7bb   : > { %13541 = vrcp.f32 %v17387_v62  ;;  %v17479_v11 = vpop.eup %13531  ;;  %v4886_v50 = vmul.f32 %v13530_v41, %v17101_v2  ;;  %v19381_v41 = vld [vmem:[#allocation60_spill] sm:$0xff] }
 0x7bc   : > { %v17459_v7 = vpop.xlane.xlu1 %4561  ;;  %v4269_v28 = vmul.f32 1.442695, %v4028_v42  ;;  %13543 = vrcp.f32 %v4565_v52  ;;  %v4885_v42 = vmul.f32 %v13528_v16, %v17091_v10  ;;  %v13534_v51 = vpop.eup %13533 }
 0x7bd   : > { %4621 = vadd.xlane.f32.xlu1 %v4620_v0  ;;  %v13536_v62 = vpop.eup %13535  ;;  %v4887_v10 = vmul.f32 %v13534_v51, %v17105_v56 }
 0x7be   : > { %13545 = vpow2.f32 %v4269_v28  ;;  %v13538_v52 = vpop.eup %13537  ;;  %v4888_v2 = vmul.f32 %v13536_v62, %v17111_v47 }
 0x7c0   : > { %v17467_v24 = vpop.xlane.xlu1 %4573 }
 0x7c4   : > { %v13043_v0 = vpop.permute.xlu1 %13042 }
 0x7c5   : > { %v13045_v58 = vunpack.i.h.bf16 %v13043_v0  ;;  %v13044_v45 = vunpack.i.l.bf16 %v13043_v0  ;;  %v4623_v0 = vsel %vm280_vm0, %v17479_v11, 0.0 }
 0x7c7   : > { %v12371_v19 = vpack.c.bf16 %v13045_v58, %v13044_v45  ;;  %v17495_v58 = vpop.eup %13539 }
 0x7c8   : > { %v13048_v26 = vpop.permute.xlu1 %13047  ;;  %v13542_v45 = vpop.eup %13541  ;;  %v4626_v56 = vsel %vm280_vm0, %v17495_v58, 0.0 }
 0x7c9   : > { %v13050_v8 = vunpack.i.h.bf16 %v13048_v26  ;;  %v13049_v25 = vunpack.i.l.bf16 %v13048_v26  ;;  %12372 = vmatprep.subr.bf16.mxu0 %v12371_v19  ;;  %v13544_v59 = vpop.eup %13543 }
 0x7ca   : > { %12374 = vmatpush3.bf16.msra.mxu0 %v12371_v19  ;;  %v4889_v19 = vmul.f32 %v13538_v52, %v17163_v22  ;;  %v17507_v26 = vpop.eup %13545  ;;  %v4899_v47 = vmul.f32 %v13544_v59, %v17250_v33  ;;  %v19383_v52 = vld [vmem:[#allocation150_spill] sm:$0xff] }
 0x7cb   : > { %v12379_v43 = vpack.c.bf16 %v13050_v8, %v13049_v25  ;;  %v4890_v8 = vmul.f32 %v13542_v45, %v17149_v27  ;;  %v4638_v22 = vsel %vm280_vm0, %v17507_v26, 0.0 }
 0x7cd   : > { %11412 = vmatmul.mubr.msk.f32.vlgmr.msra.gmra.mrb[128].mxu0 %vm280_vm0, %v4884_v46  ;;  %12380 = vmatprep.subr.bf16.mxu1 %v12379_v43 }
 0x7ce   : > { %4606 = vadd.xlane.f32.xlu0 %v4605_v23  ;;  %13082 = vrot.lane.b32.xlu1 %v19337_v9, %s13843_s30 }
 0x7cf   : > { %11414 = vmatprep.mubr.msk.f32.mxu0 %vm280_vm0, %v4885_v42  ;;  %12382 = vmatpush3.bf16.msra.mxu1 %v12379_v43  ;;  %v19380_v43 = vld [vmem:[#allocation70_spill] sm:$0xff] }
 0x7d0   : > { %v4027_v23 = vsub.f32 %v19381_v41, %v19380_v43  ;;  %v19388_v43 = vld [vmem:[#allocation131_spill] sm:$0xff] }
 0x7d1   : > { %v17489_v25 = vpop.xlane.xlu0 %4558  ;;  %11415 = vmatmul.mubr.msk.f32.gmra.mrb[130].mxu0 %vm280_vm0, %v4886_v50 }
 0x7d2   : > { %4624 = vadd.xlane.f32.xlu0 %v4623_v0  ;;  %13087 = vrot.lane.b32.xlu1 %v19308_v29, %s13844_s6  ;;  %v4267_v62 = vmul.f32 1.442695, %v4027_v23  ;;  %v19384_v0 = vld [vmem:[#allocation93_spill] sm:$0xff] }
 0x7d3   : > { %11417 = vmatprep.mubr.msk.f32.mxu0 %vm280_vm0, %v4887_v10  ;;  %v4029_v10 = vsub.f32 %v19384_v0, %v19383_v52 }
 0x7d4   : > { %13547 = vpow2.f32 %v4267_v62 }
 0x7d5   : > { %v17502_v28 = vpop.xlane.xlu0 %4576  ;;  %11418 = vmatmul.mubr.msk.f32.gmra.mrb[132].mxu0 %vm280_vm0, %v4888_v2 }
 0x7d6   : > { %4627 = vadd.xlane.f32.xlu0 %v4626_v56  ;;  %11420 = vmatprep.mubr.msk.f32.mxu0 %vm280_vm0, %v4889_v19 }
 0x7d9   : > { %v17512_v16 = vpop.xlane.xlu0 %4579  ;;  %11421 = vmatmul.mubr.msk.f32.gmra.mrb[134].mxu0 %vm280_vm0, %v4890_v8 }
 0x7da   : > { %4639 = vadd.xlane.f32.xlu0 %v4638_v22  ;;  %11467 = vmatprep.mubr.msk.f32.mxu0 %vm280_vm0, %v4899_v47  ;;  %v4271_v47 = vmul.f32 1.442695, %v4029_v10  ;;  %v19387_v22 = vld [vmem:[#allocation158_spill] sm:$0xff] }
 0x7db   : > { %v4026_v41 = vsub.f32 %v19388_v43, %v19387_v22 }
 0x7dc   : > { %13549 = vpow2.f32 %v4271_v47 }
 0x7dd   : > { %v17518_v46 = vpop.xlane.xlu0 %4591  ;;  %v4265_v0 = vmul.f32 1.442695, %v4026_v41 }
 0x7df   : > { %13551 = vpow2.f32 %v4265_v0  ;;  %v19400_v0 = vld [vmem:[#allocation132_spill] sm:$0xff] }
 0x7e1   : > { %v13053_v42 = vpop.permute.xlu0 %13052  ;;  %v17522_v51 = vpop.f32.mrb[88].mxu1 }
 0x7e2   : > { %19382 = vst [vmem:[#allocation111_spill] sm:$0xff] %v17522_v51  ;;  %v13055_v27 = vunpack.i.h.bf16 %v13053_v42  ;;  %v13054_v33 = vunpack.i.l.bf16 %v13053_v42  ;;  %v17524_v50 = vpop.f32.mrb[89].mxu1 }
 0x7e4   : > { %v12383_v2 = vpack.c.bf16 %v13055_v27, %v13054_v33  ;;  %v19391_v27 = vld [vmem:[#allocation16_spill] sm:$0xff]  ;;  %v19392_v33 = vld [vmem:[#allocation85_spill] sm:$0xff] }
 0x7e5   : > { %v13058_v45 = vpop.permute.xlu0 %13057  ;;  %v17528_v19 = vpop.f32.mrb[90].mxu1  ;;  %v4030_v52 = vsub.f32 %v19392_v33, %v19391_v27 }
 0x7e6   : > { %19385 = vst [vmem:[#allocation143_spill] sm:$0xff] %v17528_v19  ;;  %v13060_v59 = vunpack.i.h.bf16 %v13058_v45  ;;  %v13059_v56 = vunpack.i.l.bf16 %v13058_v45  ;;  %v17530_v8 = vpop.f32.mrb[91].mxu1  ;;  %12384 = vmatprep.subr.bf16.mxu1 %v12383_v2 }
 0x7e7   : > { %19386 = vst [vmem:[#allocation99_spill] sm:$0xff] %v17530_v8  ;;  %12386 = vmatpush3.bf16.msra.mxu1 %v12383_v2  ;;  %v4273_v62 = vmul.f32 1.442695, %v4030_v52  ;;  %v19399_v52 = vld [vmem:[#allocation160_spill] sm:$0xff] }
 0x7e8   : > { %v12391_v42 = vpack.c.bf16 %v13060_v59, %v13059_v56  ;;  %v17548_v59 = vpop.eup %13547 }
 0x7e9   : > { %v17534_v23 = vpop.f32.mrb[92].mxu1  ;;  %13553 = vpow2.f32 %v4273_v62  ;;  %v4635_v22 = vsel %vm280_vm0, %v17548_v59, 0.0  ;;  %v17558_v43 = vpop.eup %13549  ;;  %v4025_v62 = vsub.f32 %v19400_v0, %v19399_v52  ;;  %v19403_v0 = vld [vmem:[#allocation12_spill] sm:$0xff] }
 0x7ea   : > { %19389 = vst [vmem:[#allocation138_spill] sm:$0xff] %v17534_v23  ;;  %v17536_v51 = vpop.f32.mrb[93].mxu1  ;;  %12392 = vmatprep.subr.bf16.mxu0 %v12391_v42  ;;  %v4641_v27 = vsel %vm280_vm0, %v17558_v43, 0.0  ;;  %v17564_v33 = vpop.eup %13551  ;;  %13555 = vrcp.f32 %v17336_v40 }
 0x7eb   : > { %19390 = vst [vmem:[#allocation80_spill] sm:$0xff] %v17536_v51  ;;  %12394 = vmatpush3.bf16.msra.mxu0 %v12391_v42  ;;  %v19404_v51 = vld [vmem:[#allocation119_spill] sm:$0xff] }
 0x7ec   : > { %v4032_v19 = vsub.f32 %v19404_v51, %v19403_v0 }
 0x7ed   : > { %v17540_v45 = vpop.f32.mrb[94].mxu1 }
 0x7ee   : > { %19393 = vst [vmem:[#allocation20_spill] sm:$0xff] %v17540_v45  ;;  %v17542_v2 = vpop.f32.mrb[95].mxu1 }
 0x7ef   : > { %19394 = vst [vmem:[#allocation88_spill] sm:$0xff] %v17542_v2  ;;  %v4263_v2 = vmul.f32 1.442695, %v4025_v62  ;;  %v19405_v62 = vld [vmem:[#allocation164_spill] sm:$0xff] }
 0x7f0   : > { %13092 = vrot.lane.b32.xlu0 %v19328_v32, %s13844_s6 }
 0x7f1   : > { %v17546_v10 = vpop.f32.mrb[96].mxu1  ;;  %13557 = vpow2.f32 %v4263_v2 }
 0x7f2   : > { %19395 = vst [vmem:[#allocation21_spill] sm:$0xff] %v17546_v10  ;;  %v17550_v56 = vpop.f32.mrb[97].mxu1  ;;  %13559 = vrcp.f32 %v17377_v60 }
 0x7f3   : > { %19396 = vst [vmem:[#allocation98_spill] sm:$0xff] %v17550_v56  ;;  %v17572_v56 = vpop.eup %13553  ;;  %13561 = vrcp.f32 %v17395_v57 }
 0x7f4   : > { %13097 = vrot.lane.b32.xlu0 %v19295_v38, %s13845_s9  ;;  %v13556_v60 = vpop.eup %13555 }
 0x7f5   : > { %v17554_v47 = vpop.f32.mrb[98].mxu1 }
 0x7f6   : > { %19397 = vst [vmem:[#allocation145_spill] sm:$0xff] %v17554_v47  ;;  %4636 = vadd.xlane.f32.xlu1 %v4635_v22  ;;  %v17560_v41 = vpop.f32.mrb[99].mxu1  ;;  %v4632_v47 = vsel %vm280_vm0, %v17564_v33, 0.0  ;;  %v19401_v22 = vld [vmem:[#allocation154_spill] sm:$0xff] }
 0x7f7   : > { %19398 = vst [vmem:[#allocation112_spill] sm:$0xff] %v17560_v41  ;;  %v19402_v41 = vld [vmem:[#allocation121_spill] sm:$0xff] }
 0x7f8   : > { %v4031_v45 = vsub.f32 %v19402_v41, %v19401_v22  ;;  %v4277_v41 = vmul.f32 1.442695, %v4032_v19  ;;  %v19406_v22 = vld [vmem:[#allocation135_spill] sm:$0xff] }
 0x7f9   : > { %v4589_v42 = vpop.xlane.xlu1 %4588  ;;  %v4036_v8 = vsub.f32 %v19406_v22, %v19405_v62 }
 0x7fa   : > { %4642 = vadd.xlane.f32.xlu1 %v4641_v27  ;;  %v4644_v27 = vsel %vm280_vm0, %v17572_v56, 0.0  ;;  %v4275_v52 = vmul.f32 1.442695, %v4031_v45 }
 0x7fb   : > { %v4285_v2 = vmul.f32 1.442695, %v4036_v8  ;;  %v17592_v57 = vpop.eup %13557 }
 0x7fc   : > { %13563 = vpow2.f32 %v4275_v52  ;;  %v13560_v62 = vpop.eup %13559  ;;  %v4629_v8 = vsel %vm280_vm0, %v17592_v57, 0.0 }
 0x7fd   : > { %v17568_v10 = vpop.xlane.xlu1 %4594  ;;  %13565 = vrcp.f32 %v17415_v61  ;;  %v4892_v61 = vmul.f32 %v13556_v60, %v17121_v6  ;;  %v13562_v22 = vpop.eup %13561 }
 0x7fe   : > { %4633 = vadd.xlane.f32.xlu1 %v4632_v47  ;;  %13567 = vrcp.f32 %v17421_v15  ;;  %v4894_v6 = vmul.f32 %v13562_v22, %v17155_v36 }
 0x7ff   : > { %13569 = vrcp.f32 %v17489_v25 }
 0x800   : > { %13571 = vpow2.f32 %v4277_v41  ;;  %v4893_v41 = vmul.f32 %v13560_v62, %v17143_v63 }
 0x801   : > { %v17576_v23 = vpop.xlane.xlu1 %4585  ;;  %13573 = vrcp.f32 %v17459_v7 }
 0x802   : > { %4645 = vadd.xlane.f32.xlu1 %v4644_v27  ;;  %13575 = vrcp.f32 %v4589_v42 }
 0x803   : > { %13577 = vpow2.f32 %v4285_v2 }
 0x805   : > { %v17584_v47 = vpop.xlane.xlu1 %4597 }
 0x806   : > { %v17596_v25 = vpop.eup %13563 }
 0x809   : > { %v13063_v27 = vpop.permute.xlu1 %13062 }
 0x80a   : > { %v13065_v40 = vunpack.i.h.bf16 %v13063_v27  ;;  %v13064_v45 = vunpack.i.l.bf16 %v13063_v27  ;;  %v13566_v27 = vpop.eup %13565 }
 0x80b   : > { %v13568_v7 = vpop.eup %13567  ;;  %v4895_v63 = vmul.f32 %v13566_v27, %v17173_v5 }
 0x80c   : > { %v12387_v51 = vpack.c.bf16 %v13065_v40, %v13064_v45  ;;  %v13570_v42 = vpop.eup %13569  ;;  %v4647_v45 = vsel %vm280_vm0, %v17596_v25, 0.0  ;;  %v4896_v36 = vmul.f32 %v13568_v7, %v17185_v48  ;;  %v19413_v7 = vld [vmem:[#allocation136_spill] sm:$0xff] }
 0x80d   : > { %v13068_v0 = vpop.permute.xlu1 %13067  ;;  %v4897_v2 = vmul.f32 %v13570_v42, %v17280_v39 }
 0x80e   : > { %v13070_v19 = vunpack.i.h.bf16 %v13068_v0  ;;  %v13069_v52 = vunpack.i.l.bf16 %v13068_v0  ;;  %12388 = vmatprep.subr.bf16.mxu1 %v12387_v51 }
 0x80f   : > { %12390 = vmatpush3.bf16.msra.mxu1 %v12387_v51  ;;  %v17612_v51 = vpop.eup %13571 }
 0x810   : > { %v12395_v15 = vpack.c.bf16 %v13070_v19, %v13069_v52  ;;  %v13574_v60 = vpop.eup %13573  ;;  %v4650_v5 = vsel %vm280_vm0, %v17612_v51, 0.0 }
 0x811   : > { %v13576_v0 = vpop.eup %13575  ;;  %v4898_v48 = vmul.f32 %v13574_v60, %v17260_v12 }
 0x812   : > { %11440 = vmatmul.mubr.msk.f32.vlgmr.msra.gmra.mrb[104].mxu1 %vm280_vm0, %v4892_v61  ;;  %12396 = vmatprep.subr.bf16.mxu0 %v12395_v15  ;;  %v17624_v52 = vpop.eup %13577  ;;  %v4907_v39 = vmul.f32 %v13576_v0, %v17349_v1  ;;  %v19412_v1 = vld [vmem:[#allocation170_spill] sm:$0xff] }
 0x813   : > { %4630 = vadd.xlane.f32.xlu0 %v4629_v8  ;;  %13102 = vrot.lane.b32.xlu1 %v19337_v9, %s13844_s6  ;;  %v4662_v22 = vsel %vm280_vm0, %v17624_v52, 0.0  ;;  %v4035_v42 = vsub.f32 %v19413_v7, %v19412_v1 }
 0x814   : > { %11442 = vmatprep.mubr.msk.f32.mxu1 %vm280_vm0, %v4893_v41  ;;  %12398 = vmatpush3.bf16.msra.mxu0 %v12395_v15 }
 0x816   : > { %v17606_v40 = vpop.xlane.xlu0 %4582  ;;  %11443 = vmatmul.mubr.msk.f32.gmra.mrb[106].mxu1 %vm280_vm0, %v4894_v6 }
 0x817   : > { %4648 = vadd.xlane.f32.xlu0 %v4647_v45  ;;  %13107 = vrot.lane.b32.xlu1 %v19308_v29, %s13845_s9 }
 0x818   : > { %11445 = vmatprep.mubr.msk.f32.mxu1 %vm280_vm0, %v4895_v63 }
 0x81a   : > { %v17619_v19 = vpop.xlane.xlu0 %4600  ;;  %11446 = vmatmul.mubr.msk.f32.gmra.mrb[108].mxu1 %vm280_vm0, %v4896_v36 }
 0x81b   : > { %4651 = vadd.xlane.f32.xlu0 %v4650_v5  ;;  %11448 = vmatprep.mubr.msk.f32.mxu1 %vm280_vm0, %v4897_v2  ;;  %v4283_v5 = vmul.f32 1.442695, %v4035_v42 }
 0x81c   : > { %v17627_v62 = vpop.f32.mrb[100].mxu1 }
 0x81d   : > { %19407 = vst [vmem:[#allocation140_spill] sm:$0xff] %v17627_v62  ;;  %v17630_v61 = vpop.f32.mrb[101].mxu1  ;;  %13579 = vpow2.f32 %v4283_v5  ;;  %v19426_v5 = vld [vmem:[#allocation127_spill] sm:$0xff] }
 0x81e   : > { %19408 = vst [vmem:[#allocation92_spill] sm:$0xff] %v17630_v61  ;;  %v17633_v15 = vpop.xlane.xlu0 %4603  ;;  %11449 = vmatmul.mubr.msk.f32.gmra.mrb[110].mxu1 %vm280_vm0, %v4898_v48  ;;  %v19417_v48 = vld [vmem:[#allocation171_spill] sm:$0xff] }
 0x81f   : > { %v17638_v8 = vpop.f32.mrb[120].mxu0  ;;  %4663 = vadd.xlane.f32.xlu0 %v4662_v22  ;;  %11495 = vmatprep.mubr.msk.f32.mxu1 %vm280_vm0, %v4907_v39  ;;  %v19418_v39 = vld [vmem:[#allocation29_spill] sm:$0xff] }
 0x820   : > { %19409 = vst [vmem:[#allocation22_spill] sm:$0xff] %v17638_v8  ;;  %v17641_v41 = vpop.f32.mrb[121].mxu0  ;;  %v4037_v22 = vsub.f32 %v19418_v39, %v19417_v48  ;;  %v19424_v48 = vld [vmem:[#allocation38_spill] sm:$0xff] }
 0x822   : > { %v17643_v27 = vpop.xlane.xlu0 %4615  ;;  %v4287_v42 = vmul.f32 1.442695, %v4037_v22 }
 0x823   : > { %v17645_v12 = vpop.f32.mrb[122].mxu0 }
 0x824   : > { %19410 = vst [vmem:[#allocation144_spill] sm:$0xff] %v17645_v12  ;;  %v17647_v6 = vpop.f32.mrb[123].mxu0  ;;  %13581 = vpow2.f32 %v4287_v42 }
 0x825   : > { %19411 = vst [vmem:[#allocation77_spill] sm:$0xff] %v17647_v6 }
 0x826   : > { %v13073_v45 = vpop.permute.xlu0 %13072 }
 0x827   : > { %v13075_v63 = vunpack.i.h.bf16 %v13073_v45  ;;  %v13074_v36 = vunpack.i.l.bf16 %v13073_v45  ;;  %v17651_v60 = vpop.f32.mrb[124].mxu0  ;;  %v19421_v45 = vld [vmem:[#allocation156_spill] sm:$0xff] }
 0x828   : > { %19414 = vst [vmem:[#allocation142_spill] sm:$0xff] %v17651_v60  ;;  %v17653_v2 = vpop.f32.mrb[125].mxu0  ;;  %v17655_v0 = vpop.f32.mrb[102].mxu1  ;;  %v19422_v60 = vld [vmem:[#allocation124_spill] sm:$0xff] }
 0x829   : > { %19415 = vst [vmem:[#allocation113_spill] sm:$0xff] %v17653_v2  ;;  %19416 = vst [vmem:[#allocation49_spill] sm:$0xff] %v17655_v0  ;;  %v12399_v62 = vpack.c.bf16 %v13075_v63, %v13074_v36  ;;  %v17659_v61 = vpop.f32.mrb[103].mxu1  ;;  %v4034_v2 = vsub.f32 %v19422_v60, %v19421_v45  ;;  %v19423_v36 = vld [vmem:[#allocation167_spill] sm:$0xff] }
 0x82a   : > { %19419 = vst [vmem:[#allocation101_spill] sm:$0xff] %v17659_v61  ;;  %v13078_v12 = vpop.permute.xlu0 %13077  ;;  %v4038_v39 = vsub.f32 %v19424_v48, %v19423_v36  ;;  %v17671_v61 = vpop.eup %13579  ;;  %v19427_v48 = vld [vmem:[#allocation172_spill] sm:$0xff] }
 0x82b   : > { %v13080_v6 = vunpack.i.h.bf16 %v13078_v12  ;;  %v13079_v8 = vunpack.i.l.bf16 %v13078_v12  ;;  %v17661_v1 = vpop.f32.mrb[126].mxu0  ;;  %12400 = vmatprep.subr.bf16.mxu0 %v12399_v62  ;;  %v4281_v63 = vmul.f32 1.442695, %v4034_v2 }
 0x82c   : > { %19420 = vst [vmem:[#allocation147_spill] sm:$0xff] %v17661_v1  ;;  %v17663_v7 = vpop.f32.mrb[127].mxu0  ;;  %12402 = vmatpush3.bf16.msra.mxu0 %v12399_v62  ;;  %v4289_v12 = vmul.f32 1.442695, %v4038_v39  ;;  %v4659_v62 = vsel %vm280_vm0, %v17671_v61, 0.0  ;;  %v19428_v39 = vld [vmem:[#allocation65_spill] sm:$0xff] }
 0x82d   : > { %v12407_v0 = vpack.c.bf16 %v13080_v6, %v13079_v8  ;;  %13583 = vpow2.f32 %v4281_v63 }
 0x82e   : > { %13585 = vpow2.f32 %v4289_v12  ;;  %v17677_v8 = vpop.eup %13581  ;;  %v4039_v12 = vsub.f32 %v19428_v39, %v19427_v48 }
 0x82f   : > { %12408 = vmatprep.subr.bf16.mxu1 %v12407_v0  ;;  %v4665_v60 = vsel %vm280_vm0, %v17677_v8, 0.0  ;;  %13587 = vrcp.f32 %v17425_v17 }
 0x830   : > { %12410 = vmatpush3.bf16.msra.mxu1 %v12407_v0  ;;  %v19425_v0 = vld [vmem:[#allocation163_spill] sm:$0xff] }
 0x831   : > { %v4033_v22 = vsub.f32 %v19426_v5, %v19425_v0  ;;  %v4291_v0 = vmul.f32 1.442695, %v4039_v12 }
 0x833   : > { %v4279_v36 = vmul.f32 1.442695, %v4033_v22 }
 0x835   : > { %13112 = vrot.lane.b32.xlu0 %v19328_v32, %s13845_s9  ;;  %13589 = vpow2.f32 %v4279_v36 }
 0x836   : > { %13591 = vrcp.f32 %v17451_v44 }
 0x837   : > { %v17681_v2 = vpop.eup %13583  ;;  %13593 = vrcp.f32 %v17467_v24 }
 0x838   : > { %v4656_v42 = vsel %vm280_vm0, %v17681_v2, 0.0  ;;  %v17689_v63 = vpop.eup %13585  ;;  %13595 = vpow2.f32 %v4291_v0 }
 0x839   : > { %13117 = vrot.lane.b32.xlu0 %v19295_v38, %s13839_s21  ;;  %13597 = vrcp.f32 %v17502_v28  ;;  %v13588_v17 = vpop.eup %13587 }
 0x83a   : > { %13599 = vrcp.f32 %v17512_v16  ;;  %v4900_v24 = vmul.f32 %v13588_v17, %v17197_v34 }
 0x83b   : > { %4660 = vadd.xlane.f32.xlu1 %v4659_v62  ;;  %13601 = vrcp.f32 %v17606_v40 }
 0x83c   : > { %13603 = vrcp.f32 %v17576_v23 }
 0x83e   : > { %v4613_v6 = vpop.xlane.xlu1 %4612 }
 0x83f   : > { %4666 = vadd.xlane.f32.xlu1 %v4665_v60  ;;  %v4668_v60 = vsel %vm280_vm0, %v17689_v63, 0.0  ;;  %v17705_v12 = vpop.eup %13589  ;;  %13605 = vrcp.f32 %v4613_v6 }
 0x840   : > { %v13592_v1 = vpop.eup %13591  ;;  %v4653_v40 = vsel %vm280_vm0, %v17705_v12, 0.0 }
 0x841   : > { %v13594_v0 = vpop.eup %13593 }
 0x842   : > { %v17685_v45 = vpop.xlane.xlu1 %4618  ;;  %v17709_v16 = vpop.eup %13595  ;;  %v4902_v34 = vmul.f32 %v13594_v0, %v17266_v37 }
 0x843   : > { %4657 = vadd.xlane.f32.xlu1 %v4656_v42 }
 0x846   : > { %v17693_v62 = vpop.xlane.xlu1 %4609 }
 0x847   : > { %4669 = vadd.xlane.f32.xlu1 %v4668_v60 }
 0x84a   : > { %v17699_v5 = vpop.xlane.xlu1 %4621 }
 0x84e   : > { %v13083_v22 = vpop.permute.xlu1 %13082 }
 0x84f   : > { %v13085_v42 = vunpack.i.h.bf16 %v13083_v22  ;;  %v13084_v48 = vunpack.i.l.bf16 %v13083_v22  ;;  %v4901_v22 = vmul.f32 %v13592_v1, %v17256_v30 }
 0x851   : > { %v12403_v39 = vpack.c.bf16 %v13085_v42, %v13084_v48  ;;  %v13598_v42 = vpop.eup %13597 }
 0x852   : > { %v13088_v36 = vpop.permute.xlu1 %13087  ;;  %v13600_v23 = vpop.eup %13599  ;;  %v4903_v30 = vmul.f32 %v13598_v42, %v17289_v49 }
 0x853   : > { %v13090_v44 = vunpack.i.h.bf16 %v13088_v36  ;;  %v13089_v60 = vunpack.i.l.bf16 %v13088_v36  ;;  %12404 = vmatprep.subr.bf16.mxu0 %v12403_v39  ;;  %v13602_v6 = vpop.eup %13601  ;;  %v4904_v1 = vmul.f32 %v13600_v23, %v17295_v3  ;;  %v19431_v23 = vld [vmem:[#allocation175_spill] sm:$0xff] }
 0x854   : > { %12406 = vmatpush3.bf16.msra.mxu0 %v12403_v39  ;;  %v4671_v39 = vsel %vm280_vm0, %v17709_v16, 0.0  ;;  %v13604_v37 = vpop.eup %13603  ;;  %v4905_v17 = vmul.f32 %v13602_v6, %v17399_v4  ;;  %v19429_v4 = vld [vmem:[#allocation173_spill] sm:$0xff]  ;;  %v19432_v6 = vld [vmem:[#allocation66_spill] sm:$0xff] }
 0x855   : > { %v12411_v28 = vpack.c.bf16 %v13090_v44, %v13089_v60  ;;  %v13606_v36 = vpop.eup %13605  ;;  %v4906_v49 = vmul.f32 %v13604_v37, %v17361_v31  ;;  %v4042_v31 = vsub.f32 %v19432_v6, %v19431_v23 }
 0x856   : > { %v4915_v60 = vmul.f32 %v13606_v36, %v17437_v54 }
 0x857   : > { %11468 = vmatmul.mubr.msk.f32.vlgmr.msra.gmra.mrb[136].mxu0 %vm280_vm0, %v4900_v24  ;;  %12412 = vmatprep.subr.bf16.mxu1 %v12411_v28  ;;  %v4297_v37 = vmul.f32 1.442695, %v4042_v31 }
 0x858   : > { %4654 = vadd.xlane.f32.xlu0 %v4653_v40  ;;  %13122 = vrot.lane.b32.xlu1 %v19337_v9, %s13845_s9 }
 0x859   : > { %11470 = vmatprep.mubr.msk.f32.mxu0 %vm280_vm0, %v4901_v22  ;;  %12414 = vmatpush3.bf16.msra.mxu1 %v12411_v28  ;;  %v19430_v28 = vld [vmem:[#allocation50_spill] sm:$0xff] }
 0x85a   : > { %v4040_v0 = vsub.f32 %v19430_v28, %v19429_v4 }
 0x85b   : > { %v17719_v48 = vpop.xlane.xlu0 %4606  ;;  %11471 = vmatmul.mubr.msk.f32.gmra.mrb[138].mxu0 %vm280_vm0, %v4902_v34 }
 0x85c   : > { %4672 = vadd.xlane.f32.xlu0 %v4671_v39  ;;  %13127 = vrot.lane.b32.xlu1 %v19308_v29, %s13839_s21  ;;  %v4293_v34 = vmul.f32 1.442695, %v4040_v0 }
 0x85d   : > { %11473 = vmatprep.mubr.msk.f32.mxu0 %vm280_vm0, %v4903_v30 }
 0x85e   : > { %13607 = vpow2.f32 %v4293_v34 }
 0x85f   : > { %v17730_v44 = vpop.xlane.xlu0 %4624  ;;  %11474 = vmatmul.mubr.msk.f32.gmra.mrb[140].mxu0 %vm280_vm0, %v4904_v1  ;;  %13609 = vpow2.f32 %v4297_v37 }
 0x860   : > { %11476 = vmatprep.mubr.msk.f32.mxu0 %vm280_vm0, %v4905_v17 }
 0x863   : > { %v17736_v24 = vpop.xlane.xlu0 %4627  ;;  %11477 = vmatmul.mubr.msk.f32.gmra.mrb[142].mxu0 %vm280_vm0, %v4906_v49  ;;  %v19433_v49 = vld [vmem:[#allocation174_spill] sm:$0xff] }
 0x864   : > { %11523 = vmatprep.mubr.msk.f32.mxu0 %vm280_vm0, %v4915_v60  ;;  %v19434_v60 = vld [vmem:[#allocation62_spill] sm:$0xff] }
 0x865   : > { %v4041_v4 = vsub.f32 %v19434_v60, %v19433_v49 }
 0x867   : > { %v17740_v3 = vpop.xlane.xlu0 %4639 }
 0x868   : > { %v17750_v36 = vpop.eup %13607 }
 0x869   : > { %v4674_v28 = vsel %vm280_vm0, %v17750_v36, 0.0  ;;  %v17756_v0 = vpop.eup %13609 }
 0x86b   : > { %v13093_v40 = vpop.permute.xlu0 %13092 }
 0x86c   : > { %v13095_v22 = vunpack.i.h.bf16 %v13093_v40  ;;  %v13094_v42 = vunpack.i.l.bf16 %v13093_v40  ;;  %v4295_v40 = vmul.f32 1.442695, %v4041_v4 }
 0x86e   : > { %v12415_v39 = vpack.c.bf16 %v13095_v22, %v13094_v42  ;;  %v4680_v42 = vsel %vm280_vm0, %v17756_v0, 0.0  ;;  %13611 = vpow2.f32 %v4295_v40 }
 0x86f   : > { %v13098_v54 = vpop.permute.xlu0 %13097  ;;  %13613 = vrcp.f32 %v17518_v46 }
 0x870   : > { %v13100_v30 = vunpack.i.h.bf16 %v13098_v54  ;;  %v13099_v1 = vunpack.i.l.bf16 %v13098_v54  ;;  %12416 = vmatprep.subr.bf16.mxu1 %v12415_v39  ;;  %13615 = vrcp.f32 %v17568_v10 }
 0x871   : > { %12418 = vmatpush3.bf16.msra.mxu1 %v12415_v39  ;;  %13617 = vrcp.f32 %v17584_v47 }
 0x872   : > { %v12423_v17 = vpack.c.bf16 %v13100_v30, %v13099_v1  ;;  %13132 = vrot.lane.b32.xlu0 %v19328_v32, %s13839_s21  ;;  %13619 = vrcp.f32 %v17619_v19 }
 0x873   : > { %13621 = vrcp.f32 %v17633_v15 }
 0x874   : > { %12424 = vmatprep.subr.bf16.mxu0 %v12423_v17  ;;  %13623 = vrcp.f32 %v17719_v48 }
 0x875   : > { %12426 = vmatpush3.bf16.msra.mxu0 %v12423_v17  ;;  %13625 = vrcp.f32 %v17693_v62 }
 0x876   : > { %13137 = vrot.lane.b32.xlu0 %v19295_v38, %s13841_s7 }
 0x878   : > { %v17768_v6 = vpop.eup %13611 }
 0x879   : > { %v4677_v30 = vsel %vm280_vm0, %v17768_v6, 0.0  ;;  %v13614_v10 = vpop.eup %13613 }
 0x87a   : > { %v13616_v47 = vpop.eup %13615  ;;  %v4908_v15 = vmul.f32 %v13614_v10, %v17303_v13 }
 0x87b   : > { %v13618_v49 = vpop.eup %13617  ;;  %v4909_v48 = vmul.f32 %v13616_v47, %v17355_v53 }
 0x87c   : > { %v13620_v60 = vpop.eup %13619 }
 0x87d   : > { %v13622_v62 = vpop.eup %13621  ;;  %v4911_v13 = vmul.f32 %v13620_v60, %v17403_v55 }
 0x87e   : > { %v13624_v4 = vpop.eup %13623 }
 0x880   : > { %4675 = vadd.xlane.f32.xlu1 %v4674_v28 }
 0x883   : > { %v4637_v22 = vpop.xlane.xlu1 %4636 }
 0x884   : > { %4681 = vadd.xlane.f32.xlu1 %v4680_v42  ;;  %13627 = vrcp.f32 %v4637_v22  ;;  %v13626_v22 = vpop.eup %13625  ;;  %v4913_v42 = vmul.f32 %v13624_v4, %v17475_v20 }
 0x885   : > { %13629 = vrcp.f32 %v17643_v27 }
 0x886   : > { %13631 = vrcp.f32 %v17685_v45  ;;  %v19435_v45 = vld [vmem:[#allocation90_spill] sm:$0xff] }
 0x887   : > { %v17760_v34 = vpop.xlane.xlu1 %4642  ;;  %13633 = vrcp.f32 %v17699_v5 }
 0x888   : > { %13635 = vrcp.f32 %v17730_v44 }
 0x889   : > { %13637 = vrcp.f32 %v17736_v24  ;;  %v19436_v24 = vld [vmem:[#allocation141_spill] sm:$0xff] }
 0x88b   : > { %v17762_v38 = vpop.xlane.xlu1 %4633 }
 0x88f   : > { %v17766_v23 = vpop.xlane.xlu1 %4645 }
 0x893   : > { %v13103_v31 = vpop.permute.xlu1 %13102 }
 0x894   : > { %v13105_v39 = vunpack.i.h.bf16 %v13103_v31  ;;  %v13104_v54 = vunpack.i.l.bf16 %v13103_v31  ;;  %v13628_v31 = vpop.eup %13627 }
 0x895   : > { %4678 = vadd.xlane.f32.xlu0 %v4677_v30  ;;  %13142 = vrot.lane.b32.xlu1 %v19337_v9, %s13839_s21  ;;  %v4923_v30 = vmul.f32 %v13628_v31, %v17548_v59  ;;  %s13759_s21 = scalar_lea.vmem %s18334_s12, 2048 }
 0x896   : > { %v12419_v46 = vpack.c.bf16 %v13105_v39, %v13104_v54  ;;  %v4914_v54 = vmul.f32 %v13626_v22, %v17447_v35  ;;  %p13760_p11 = scmp.ne.s32.totalorder %s18334_s12, %s13759_s21 }
 0x897   : > { %v13108_v1 = vpop.permute.xlu1 %13107 }
 0x898   : > { %v13110_v37 = vunpack.i.h.bf16 %v13108_v1  ;;  %v13109_v19 = vunpack.i.l.bf16 %v13108_v1  ;;  %12420 = vmatprep.subr.bf16.mxu1 %v12419_v46  ;;  %p13761_p1 = pnand %p13760_p11, %p19506_p0 }
 0x899   : > { %13147 = vrot.lane.b32.xlu1 %v19308_v29, %s13841_s7  ;;  %12422 = vmatpush3.bf16.msra.mxu1 %v12419_v46  ;;  %v4910_v29 = vmul.f32 %v13618_v49, %v17371_v14 }
 0x89a   : > { %v12427_v17 = vpack.c.bf16 %v13110_v37, %v13109_v19  ;;  %p13762_p3 = pneg %p13761_p1 }
 0x89c   : > { %11496 = vmatmul.mubr.msk.f32.vlgmr.msra.gmra.mrb[112].mxu1 %vm280_vm0, %v4908_v15  ;;  %12428 = vmatprep.subr.bf16.mxu0 %v12427_v17 }
 0x89d   : > { %13157 = vrot.lane.b32.xlu1 %v19337_v9, %s13841_s7  ;;  %11498 = vmatprep.mubr.msk.f32.mxu1 %vm280_vm0, %v4909_v48  ;;  %v4912_v9 = vmul.f32 %v13622_v62, %v17411_v18 }
 0x89e   : > { %12430 = vmatpush3.bf16.msra.mxu0 %v12427_v17 }
 0x8a0   : > { %v4631_v28 = vpop.xlane.xlu0 %4630  ;;  %v17789_v40 = vpop.f32.mrb[128].mxu0  ;;  %11499 = vmatmul.mubr.msk.f32.gmra.mrb[114].mxu1 %vm280_vm0, %v4910_v29 }
 0x8a1   : > { %v17792_v53 = vpop.f32.mrb[129].mxu0  ;;  %11501 = vmatprep.mubr.msk.f32.mxu1 %vm280_vm0, %v4911_v13  ;;  %13639 = vrcp.f32 %v4631_v28 }
 0x8a2   : > { %13641 = vrcp.f32 %v17762_v38 }
 0x8a4   : > { %v17797_v14 = vpop.xlane.xlu0 %4648  ;;  %v17799_v39 = vpop.f32.mrb[130].mxu0  ;;  %11502 = vmatmul.mubr.msk.f32.gmra.mrb[116].mxu1 %vm280_vm0, %v4912_v9 }
 0x8a5   : > { %v17802_v55 = vpop.f32.mrb[131].mxu0  ;;  %11504 = vmatprep.mubr.msk.f32.mxu1 %vm280_vm0, %v4913_v42  ;;  %v13630_v42 = vpop.eup %13629 }
 0x8a6   : > { %v4916_v5 = vmul.f32 %v13630_v42, %v19435_v45 }
 0x8a8   : > { %v17807_v46 = vpop.xlane.xlu0 %4651  ;;  %v17809_v18 = vpop.f32.mrb[132].mxu0  ;;  %11505 = vmatmul.mubr.msk.f32.gmra.mrb[118].mxu1 %vm280_vm0, %v4914_v54 }
 0x8a9   : > { %v17812_v20 = vpop.f32.mrb[133].mxu0  ;;  %11551 = vmatprep.mubr.msk.f32.mxu1 %vm280_vm0, %v4923_v30  ;;  %v13632_v54 = vpop.eup %13631 }
 0x8ab   : > { %13152 = vrot.lane.b32.xlu0 %v19328_v32, %s13841_s7  ;;  %s13763_s7 = sshll.u32 %s13847_s23, 4  ;;  %s13764_s7 = int_to_ptr.vmem [resolvable:$false] %s13763_s7 }
 0x8ac   : > { %v17817_v10 = vpop.xlane.xlu0 %4663  ;;  %v17819_v1 = vpop.f32.mrb[134].mxu0  ;;  %s13765_s8 = scalar_lea.vmem %s13764_s7, 4096  ;;  %p13766_p5 = scmp.lt.s32.totalorder %s18334_s12, %s13764_s7 }
 0x8ad   : > { %v17821_v35 = vpop.f32.mrb[135].mxu0  ;;  %p13767_p9 = scmp.lt.s32.totalorder %s13765_s8, %s13759_s21 }
 0x8af   : > { %p13768_p12 = por %p13767_p9, %p13766_p5 }
 0x8b0   : > { %v13113_v59 = vpop.permute.xlu0 %13112 }
 0x8b1   : > { %v13115_v47 = vunpack.i.h.bf16 %v13113_v59  ;;  %v13114_v37 = vunpack.i.l.bf16 %v13113_v59  ;;  %v13634_v59 = vpop.eup %13633  ;;  %p13769_p2 = pnand %p13768_p12, %p13762_p3 }
 0x8b2   : > { %v4918_v28 = vmul.f32 %v13634_v59, %v19436_v24 }
 0x8b3   : > { %v12431_v19 = vpack.c.bf16 %v13115_v47, %v13114_v37  ;;  %v4917_v47 = vmul.f32 %v13632_v54, %v17443_v21  ;;  %v13636_v37 = vpop.eup %13635 }
 0x8b4   : > { %v13118_v15 = vpop.permute.xlu0 %13117  ;;  %v4919_v38 = vmul.f32 %v13636_v37, %v17479_v11 }
 0x8b5   : > { %v13120_v17 = vunpack.i.h.bf16 %v13118_v15  ;;  %v13119_v49 = vunpack.i.l.bf16 %v13118_v15  ;;  %12432 = vmatprep.subr.bf16.mxu0 %v12431_v19 }
 0x8b6   : > { %12434 = vmatpush3.bf16.msra.mxu0 %v12431_v19  ;;  %v13638_v19 = vpop.eup %13637 }
 0x8b7   : > { %v12439_v48 = vpack.c.bf16 %v13120_v17, %v13119_v49  ;;  %v13640_v15 = vpop.eup %13639  ;;  %v4920_v21 = vmul.f32 %v13638_v19, %v17495_v58 }
 0x8b9   : > { %12440 = vmatprep.subr.bf16.mxu1 %v12439_v48 }
 0x8ba   : > { %12442 = vmatpush3.bf16.msra.mxu1 %v12439_v48 }
 0x8c8   : > { %v4661_v60 = vpop.xlane.xlu1 %4660 }
 0x8c9   : > { %13643 = vrcp.f32 %v4661_v60  ;;  %v13642_v60 = vpop.eup %13641 }
 0x8ca   : > { %v4922_v42 = vmul.f32 %v13642_v60, %v17564_v33  ;;  %13645 = vrcp.f32 %v17740_v3 }
 0x8cb   : > { %13647 = vrcp.f32 %v17760_v34 }
 0x8cc   : > { %v17823_v32 = vpop.xlane.xlu1 %4666  ;;  %13649 = vrcp.f32 %v17766_v23 }
 0x8cd   : > { %13651 = vrcp.f32 %v17797_v14 }
 0x8ce   : > { %13653 = vrcp.f32 %v17807_v46 }
 0x8d0   : > { %v17825_v29 = vpop.xlane.xlu1 %4657 }
 0x8d4   : > { %v17829_v62 = vpop.xlane.xlu1 %4669 }
 0x8d8   : > { %v13123_v13 = vpop.permute.xlu1 %13122 }
 0x8d9   : > { %v13125_v4 = vunpack.i.h.bf16 %v13123_v13  ;;  %v13124_v9 = vunpack.i.l.bf16 %v13123_v13  ;;  %v4921_v13 = vmul.f32 %v13640_v15, %v17592_v57 }
 0x8db   : > { %v12435_v22 = vpack.c.bf16 %v13125_v4, %v13124_v9  ;;  %v13644_v4 = vpop.eup %13643 }
 0x8dc   : > { %v13128_v31 = vpop.permute.xlu1 %13127 }
 0x8dd   : > { %v13130_v30 = vunpack.i.h.bf16 %v13128_v31  ;;  %v13129_v27 = vunpack.i.l.bf16 %v13128_v31  ;;  %12436 = vmatprep.subr.bf16.mxu0 %v12435_v22  ;;  %v4931_v31 = vmul.f32 %v13644_v4, %v17671_v61 }
 0x8de   : > { %12438 = vmatpush3.bf16.msra.mxu0 %v12435_v22 }
 0x8df   : > { %v12443_v44 = vpack.c.bf16 %v13130_v30, %v13129_v27 }
 0x8e1   : > { %11524 = vmatmul.mubr.msk.f32.vlgmr.msra.gmra.mrb[144].mxu0 %vm280_vm0, %v4916_v5  ;;  %12444 = vmatprep.subr.bf16.mxu1 %v12443_v44 }
 0x8e2   : > { %11526 = vmatprep.mubr.msk.f32.mxu0 %vm280_vm0, %v4917_v47  ;;  %12446 = vmatpush3.bf16.msra.mxu1 %v12443_v44 }
 0x8e5   : > { %v4655_v17 = vpop.xlane.xlu0 %4654  ;;  %v17841_v49 = vpop.f32.mrb[104].mxu1  ;;  %11527 = vmatmul.mubr.msk.f32.gmra.mrb[146].mxu0 %vm280_vm0, %v4918_v28 }
 0x8e6   : > { %v17844_v48 = vpop.f32.mrb[105].mxu1  ;;  %11529 = vmatprep.mubr.msk.f32.mxu0 %vm280_vm0, %v4919_v38  ;;  %13655 = vrcp.f32 %v4655_v17 }
 0x8e7   : > { %13657 = vrcp.f32 %v17825_v29 }
 0x8e9   : > { %v4673_v9 = vpop.xlane.xlu0 %4672  ;;  %v17849_v22 = vpop.f32.mrb[106].mxu1  ;;  %11530 = vmatmul.mubr.msk.f32.gmra.mrb[148].mxu0 %vm280_vm0, %v4920_v21 }
 0x8ea   : > { %v17852_v11 = vpop.f32.mrb[107].mxu1  ;;  %11532 = vmatprep.mubr.msk.f32.mxu0 %vm280_vm0, %v4921_v13  ;;  %v13646_v21 = vpop.eup %13645  ;;  %13659 = vrcp.f32 %v4673_v9 }
 0x8eb   : > { %v13648_v13 = vpop.eup %13647  ;;  %v4924_v3 = vmul.f32 %v13646_v21, %v17507_v26  ;;  %13661 = vrcp.f32 %v17817_v10 }
 0x8ec   : > { %v13650_v23 = vpop.eup %13649  ;;  %v4925_v14 = vmul.f32 %v13648_v13, %v17558_v43  ;;  %13663 = vrcp.f32 %v17823_v32 }
 0x8ed   : > { %v13133_v54 = vpop.permute.xlu0 %13132  ;;  %v17857_v30 = vpop.f32.mrb[108].mxu1  ;;  %11533 = vmatmul.mubr.msk.f32.gmra.mrb[150].mxu0 %vm280_vm0, %v4922_v42  ;;  %v4926_v29 = vmul.f32 %v13650_v23, %v17572_v56 }
 0x8ee   : > { %v13135_v58 = vunpack.i.h.bf16 %v13133_v54  ;;  %v13134_v57 = vunpack.i.l.bf16 %v13133_v54  ;;  %v17860_v27 = vpop.f32.mrb[109].mxu1  ;;  %11579 = vmatprep.mubr.msk.f32.mxu0 %vm280_vm0, %v4931_v31  ;;  %v13652_v46 = vpop.eup %13651 }
 0x8ef   : > { %v13654_v17 = vpop.eup %13653  ;;  %v4927_v26 = vmul.f32 %v13652_v46, %v17596_v25 }
 0x8f0   : > { %v12447_v45 = vpack.c.bf16 %v13135_v58, %v13134_v57  ;;  %v13656_v31 = vpop.eup %13655  ;;  %v4928_v9 = vmul.f32 %v13654_v17, %v17612_v51  ;;  %v19438_v17 = vld [vmem:[#allocation153_spill] sm:$0xff] }
 0x8f1   : > { %v13138_v5 = vpop.permute.xlu0 %13137  ;;  %v17863_v44 = vpop.f32.mrb[110].mxu1  ;;  %v4929_v56 = vmul.f32 %v13656_v31, %v17705_v12  ;;  %v19441_v31 = vld [vmem:[#allocation63_spill] sm:$0xff] }
 0x8f2   : > { %v13140_v59 = vunpack.i.h.bf16 %v13138_v5  ;;  %v13139_v47 = vunpack.i.l.bf16 %v13138_v5  ;;  %v17865_v33 = vpop.f32.mrb[111].mxu1  ;;  %12448 = vmatprep.subr.bf16.mxu1 %v12447_v45  ;;  %v13658_v58 = vpop.eup %13657 }
 0x8f3   : > { %12450 = vmatpush3.bf16.msra.mxu1 %v12447_v45  ;;  %v4930_v32 = vmul.f32 %v13658_v58, %v17681_v2  ;;  %v19444_v58 = vld [vmem:[#allocation161_spill] sm:$0xff] }
 0x8f4   : > { %v12455_v61 = vpack.c.bf16 %v13140_v59, %v13139_v47  ;;  %v13660_v57 = vpop.eup %13659 }
 0x8f5   : > { %v4935_v12 = vmul.f32 %v13660_v57, %v17709_v16  ;;  %v7003_v16 = vld [vmem:[#allocation7] sm:$0xff] }
 0x8f6   : > { %12456 = vmatprep.subr.bf16.mxu0 %v12455_v61  ;;  %v19447_v57 = vld [vmem:[#allocation24_spill] sm:$0xff] }
 0x8f7   : > { %12458 = vmatpush3.bf16.msra.mxu0 %v12455_v61 }
 0x90d   : > { %v4676_v37 = vpop.xlane.xlu1 %4675 }
 0x90e   : > { %13665 = vrcp.f32 %v4676_v37 }
 0x911   : > { %v4682_v24 = vpop.xlane.xlu1 %4681 }
 0x915   : > { %v13143_v28 = vpop.permute.xlu1 %13142 }
 0x916   : > { %v13145_v19 = vunpack.i.h.bf16 %v13143_v28  ;;  %v13144_v38 = vunpack.i.l.bf16 %v13143_v28  ;;  %v13662_v28 = vpop.eup %13661 }
 0x917   : > { %v13664_v2 = vpop.eup %13663  ;;  %v4932_v21 = vmul.f32 %v13662_v28, %v17624_v52  ;;  %v7006_v52 = vld [vmem:[#allocation7 + $0x18] sm:$0xff]  ;;  %v7009_v28 = vld [vmem:[#allocation7 + $0x30] sm:$0xff] }
 0x918   : > { %v12451_v15 = vpack.c.bf16 %v13145_v19, %v13144_v38  ;;  %v13666_v19 = vpop.eup %13665 }
 0x919   : > { %v13148_v60 = vpop.permute.xlu1 %13147  ;;  %v4936_v13 = vmul.f32 %v13666_v19, %v17750_v36  ;;  %v7010_v19 = vld [vmem:[#allocation7 + $0x38] sm:$0xff] }
 0x91a   : > { %v13150_v4 = vunpack.i.h.bf16 %v13148_v60  ;;  %v13149_v42 = vunpack.i.l.bf16 %v13148_v60  ;;  %12452 = vmatprep.subr.bf16.mxu1 %v12451_v15 }
 0x91b   : > { %12454 = vmatpush3.bf16.msra.mxu1 %v12451_v15 }
 0x91c   : > { %v12459_v34 = vpack.c.bf16 %v13150_v4, %v13149_v42  ;;  %12471 = vmatprep.subr.bf16.mxu1 %v12455_v61  ;;  %v4933_v42 = vmul.f32 %v13664_v2, %v17677_v8  ;;  %v19456_v2 = vld [vmem:[#allocation137_spill] sm:$0xff] }
 0x91d   : > { %v13158_v43 = vpop.permute.xlu1 %13157 }
 0x91e   : > { %11552 = vmatmul.mubr.msk.f32.vlgmr.msra.gmra.mrb[120].mxu1 %vm280_vm0, %v4924_v3  ;;  %12460 = vmatprep.subr.bf16.mxu0 %v12459_v34  ;;  %v13160_v45 = vunpack.i.h.bf16 %v13158_v43  ;;  %v13159_v5 = vunpack.i.l.bf16 %v13158_v43  ;;  %v19442_v43 = vld [vmem:[#allocation162_spill] sm:$0xff] }
 0x91f   : > { %11554 = vmatprep.mubr.msk.f32.mxu1 %vm280_vm0, %v4925_v14  ;;  %12475 = vmatpush3.bf16.msra.mxu1 %v12455_v61  ;;  %v7005_v14 = vld [vmem:[#allocation7 + $0x10] sm:$0xff] }
 0x920   : > { %12462 = vmatpush3.bf16.msra.mxu0 %v12459_v34  ;;  %12472 = vmatprep.subr.bf16.mxu1 %v12459_v34  ;;  %v12467_v61 = vpack.c.bf16 %v13160_v45, %v13159_v5  ;;  %v19448_v45 = vld [vmem:[#allocation165_spill] sm:$0xff]  ;;  %v19449_v5 = vld [vmem:[#allocation64_spill] sm:$0xff] }
 0x922   : > { %v4679_v54 = vpop.xlane.xlu0 %4678  ;;  %11555 = vmatmul.mubr.msk.f32.gmra.mrb[122].mxu1 %vm280_vm0, %v4926_v29 }
 0x923   : > { %11557 = vmatprep.mubr.msk.f32.mxu1 %vm280_vm0, %v4927_v26  ;;  %12476 = vmatpush3.bf16.msra.mxu1 %v12459_v34  ;;  %13667 = vrcp.f32 %v4679_v54  ;;  %v7007_v26 = vld [vmem:[#allocation7 + $0x20] sm:$0xff]  ;;  %v7008_v54 = vld [vmem:[#allocation7 + $0x28] sm:$0xff] }
 0x924   : > { %13669 = vrcp.f32 %v17829_v62 }
 0x925   : > { %13671 = vrcp.f32 %v4682_v24  ;;  %v7004_v24 = vld [vmem:[#allocation7 + $0x8] sm:$0xff] }
 0x926   : > { %v13153_v25 = vpop.permute.xlu0 %13152  ;;  %11558 = vmatmul.mubr.msk.f32.gmra.mrb[124].mxu1 %vm280_vm0, %v4928_v9  ;;  %v19443_v9 = vld [vmem:[#allocation59_spill] sm:$0xff] }
 0x927   : > { %v13155_v10 = vunpack.i.h.bf16 %v13153_v25  ;;  %v13154_v59 = vunpack.i.l.bf16 %v13153_v25  ;;  %11560 = vmatprep.mubr.msk.f32.mxu1 %vm280_vm0, %v4929_v56  ;;  %v19445_v56 = vld [vmem:[#allocation68_spill] sm:$0xff]  ;;  %v19446_v25 = vld [vmem:[#allocation166_spill] sm:$0xff] }
 0x929   : > { %v12463_v51 = vpack.c.bf16 %v13155_v10, %v13154_v59  ;;  %v19450_v10 = vld [vmem:[#allocation169_spill] sm:$0xff]  ;;  %v19451_v59 = vld [vmem:[#allocation46_spill] sm:$0xff] }
 0x92a   : > { %v17889_v47 = vpop.f32.mrb[136].mxu0  ;;  %11561 = vmatmul.mubr.msk.f32.gmra.mrb[126].mxu1 %vm280_vm0, %v4930_v32  ;;  %v19452_v32 = vld [vmem:[#allocation168_spill] sm:$0xff] }
 0x92b   : > { %v17893_v37 = vpop.f32.mrb[137].mxu0  ;;  %12464 = vmatprep.subr.bf16.mxu0 %v12463_v51  ;;  %12473 = vmatprep.subr.bf16.mxu1 %v12463_v51 }
 0x92c   : > { %11585 = vmatprep.mubr.msk.f32.mxu1 %vm280_vm0, %v4935_v12  ;;  %12466 = vmatpush3.bf16.msra.mxu0 %v12463_v51  ;;  %v19454_v12 = vld [vmem:[#allocation56_spill] sm:$0xff] }
 0x92d   : > { %12477 = vmatpush3.bf16.msra.mxu1 %v12463_v51  ;;  %12468 = vmatprep.subr.bf16.mxu0 %v12467_v61  ;;  %v13668_v15 = vpop.eup %13667  ;;  %v19453_v51 = vld [vmem:[#allocation44_spill] sm:$0xff] }
 0x92e   : > { %12474 = vmatprep.subr.bf16.mxu1 %v12467_v61  ;;  %v17896_v62 = vpop.f32.mrb[138].mxu0  ;;  %v13670_v60 = vpop.eup %13669  ;;  %v4937_v23 = vmul.f32 %v13668_v15, %v17768_v6  ;;  %v19437_v6 = vld [vmem:[#allocation45_spill] sm:$0xff]  ;;  %v19459_v15 = vld [vmem:[#allocation48_spill] sm:$0xff] }
 0x92f   : > { %v17898_v38 = vpop.f32.mrb[139].mxu0  ;;  %v13672_v3 = vpop.eup %13671  ;;  %v4934_v36 = vmul.f32 %v13670_v60, %v17689_v63  ;;  %v19439_v63 = vld [vmem:[#allocation57_spill] sm:$0xff]  ;;  %v19461_v60 = vld [vmem:[#allocation71_spill] sm:$0xff] }
 0x930   : > { %12470 = vmatpush3.bf16.msra.mxu0 %v12467_v61  ;;  %v4938_v46 = vmul.f32 %v13672_v3, %v17756_v0  ;;  %v19440_v0 = vld [vmem:[#allocation151_spill] sm:$0xff]  ;;  %v19464_v3 = vld [vmem:[#allocation61_spill] sm:$0xff] }
 0x931   : > { %12478 = vmatpush3.bf16.msra.mxu1 %v12467_v61  ;;  %11605 = vmatprep.subr.mxu0 %v7004_v24  ;;  %v19455_v61 = vld [vmem:[#allocation55_spill] sm:$0xff] }
 0x932   : > { %v17902_v4 = vpop.f32.mrb[140].mxu0  ;;  %11591 = vmatprep.subr.mxu1 %v7003_v16 }
 0x933   : > { %v17905_v34 = vpop.f32.mrb[141].mxu0  ;;  %11580 = vmatmul.mubr.msk.f32.vlgmr.msra.gmra.mrb[152].mxu0 %vm280_vm0, %v4932_v21  ;;  %v19460_v21 = vld [vmem:[#allocation36_spill] sm:$0xff] }
 0x934   : > { %11586 = vmatmul.mubr.msk.f32.vlgmr.msra.gmra.mrb[128].mxu1 %vm280_vm0, %v4936_v13  ;;  %11582 = vmatprep.mubr.msk.f32.mxu0 %vm280_vm0, %v4933_v42  ;;  %v19462_v13 = vld [vmem:[#allocation51_spill] sm:$0xff]  ;;  %v19463_v42 = vld [vmem:[#allocation73_spill] sm:$0xff] }
 0x935   : > { %11588 = vmatprep.mubr.msk.f32.mxu1 %vm280_vm0, %v4937_v23  ;;  %11592 = vmatpush3.msra.mxu1 %v7003_v16  ;;  %v19458_v16 = vld [vmem:[#allocation28_spill] sm:$0xff] }
 0x936   : > { %v17913_v8 = vpop.f32.mrb[142].mxu0  ;;  %11606 = vmatpush3.msra.mxu0 %v7004_v24  ;;  %11619 = vmatprep.subr.mxu1 %v7005_v14  ;;  %v19457_v24 = vld [vmem:[#allocation74_spill] sm:$0xff]  ;;  %v19465_v23 = vld [vmem:[#allocation96_spill] sm:$0xff] }
 0x937   : > { %v17916_v29 = vpop.f32.mrb[143].mxu0  ;;  %11583 = vmatmul.mubr.msk.f32.gmra.mrb[154].mxu0 %vm280_vm0, %v4934_v36  ;;  %11633 = vmatprep.subr.mxu0 %v7006_v52  ;;  %v19468_v36 = vld [vmem:[#allocation54_spill] sm:$0xff] }
 0x938   : > { %11589 = vmatmul.mubr.msk.f32.gmra.mrb[130].mxu1 %vm280_vm0, %v4938_v46  ;;  %11607 = vmatprep.mubr.msk.f32.mxu0 %vm1098_vm1, %v19437_v6  ;;  %v19469_v46 = vld [vmem:[#allocation97_spill] sm:$0xff] }
 0x939   : > { %11593 = vmatprep.mubr.msk.f32.mxu1 %vm1098_vm1, %v19438_v17  ;;  %v19470_v6 = vld [vmem:[#allocation109_spill] sm:$0xff]  ;;  %v19471_v17 = vld [vmem:[#allocation75_spill] sm:$0xff] }
 0x93b   : > { %11608 = vmatmul.mubr.msk.f32.vlgmr.msra.gmra.mrb[156].mxu0 %vm1098_vm1, %v19439_v63  ;;  %v7011_v63 = vld [vmem:[#allocation7 + $0x40] sm:$0xff] }
 0x93c   : > { %11594 = vmatmul.mubr.msk.f32.vlgmr.msra.gmra.mrb[132].mxu1 %vm1098_vm1, %v19440_v0  ;;  %11610 = vmatprep.mubr.msk.f32.mxu0 %vm1098_vm1, %v19441_v31  ;;  %v19473_v0 = vld [vmem:[#allocation152_spill] sm:$0xff]  ;;  %v7012_v31 = vld [vmem:[#allocation7 + $0x48] sm:$0xff] }
 0x93d   : > { %11596 = vmatprep.mubr.msk.f32.mxu1 %vm1098_vm1, %v19442_v43  ;;  %11620 = vmatpush3.msra.mxu1 %v7005_v14  ;;  %v19466_v14 = vld [vmem:[#allocation32_spill] sm:$0xff]  ;;  %v19475_v43 = vld [vmem:[#allocation123_spill] sm:$0xff] }
 0x93e   : > { %11634 = vmatpush3.msra.mxu0 %v7006_v52  ;;  %11647 = vmatprep.subr.mxu1 %v7007_v26  ;;  %v19467_v52 = vld [vmem:[#allocation108_spill] sm:$0xff] }
 0x93f   : > { %11611 = vmatmul.mubr.msk.f32.gmra.mrb[158].mxu0 %vm1098_vm1, %v19443_v9  ;;  %11661 = vmatprep.subr.mxu0 %v7008_v54  ;;  %v19476_v9 = vld [vmem:[#allocation83_spill] sm:$0xff] }
 0x940   : > { %11597 = vmatmul.mubr.msk.f32.gmra.mrb[134].mxu1 %vm1098_vm1, %v19444_v58  ;;  %11613 = vmatprep.mubr.msk.f32.mxu0 %vm1098_vm1, %v19445_v56  ;;  %v19477_v58 = vld [vmem:[#allocation110_spill] sm:$0xff]  ;;  %v19478_v56 = vld [vmem:[#allocation72_spill] sm:$0xff] }
 0x941   : > { %11599 = vmatprep.mubr.msk.f32.mxu1 %vm1098_vm1, %v19446_v25  ;;  %v19479_v25 = vld [vmem:[#allocation87_spill] sm:$0xff] }
 0x943   : > { %11614 = vmatmul.mubr.msk.f32.gmra.mrb[160].mxu0 %vm1098_vm1, %v19447_v57  ;;  %v19480_v57 = vld [vmem:[#allocation76_spill] sm:$0xff] }
 0x944   : > { %11600 = vmatmul.mubr.msk.f32.gmra.mrb[136].mxu1 %vm1098_vm1, %v19448_v45  ;;  %11616 = vmatprep.mubr.msk.f32.mxu0 %vm1098_vm1, %v19449_v5  ;;  %v19481_v45 = vld [vmem:[#allocation139_spill] sm:$0xff]  ;;  %v19482_v5 = vld [vmem:[#allocation69_spill] sm:$0xff] }
 0x945   : > { %11602 = vmatprep.mubr.msk.f32.mxu1 %vm1098_vm1, %v19450_v10  ;;  %v19483_v10 = vld [vmem:[#allocation157_spill] sm:$0xff] }
 0x947   : > { %11617 = vmatmul.mubr.msk.f32.gmra.mrb[162].mxu0 %vm1098_vm1, %v19451_v59  ;;  %v19484_v59 = vld [vmem:[#allocation78_spill] sm:$0xff] }
 0x948   : > { %11603 = vmatmul.mubr.msk.f32.gmra.mrb[138].mxu1 %vm1098_vm1, %v19452_v32  ;;  %11635 = vmatprep.mubr.msk.f32.mxu0 %vm1098_vm1, %v19453_v51  ;;  %v19485_v32 = vld [vmem:[#allocation22_spill] sm:$0xff] }
 0x949   : > { %11621 = vmatprep.mubr.msk.f32.mxu1 %vm1098_vm1, %v19454_v12  ;;  %v7013_v51 = vld [vmem:[#allocation7 + $0x50] sm:$0xff]  ;;  %v19486_v12 = vld [vmem:[#allocation111_spill] sm:$0xff] }
 0x94b   : > { %11636 = vmatmul.mubr.msk.f32.vlgmr.msra.gmra.mrb[164].mxu0 %vm1098_vm1, %v19455_v61  ;;  %v19487_v61 = vld [vmem:[#allocation77_spill] sm:$0xff] }
 0x94c   : > { %11622 = vmatmul.mubr.msk.f32.vlgmr.msra.gmra.mrb[140].mxu1 %vm1098_vm1, %v19456_v2  ;;  %11638 = vmatprep.mubr.msk.f32.mxu0 %vm1098_vm1, %v19457_v24  ;;  %v19488_v2 = vld [vmem:[#allocation99_spill] sm:$0xff] }
 0x94d   : > { %11624 = vmatprep.mubr.msk.f32.mxu1 %vm1098_vm1, %v19458_v16  ;;  %11648 = vmatpush3.msra.mxu1 %v7007_v26  ;;  %v19472_v26 = vld [vmem:[#allocation86_spill] sm:$0xff]  ;;  %v19490_v24 = vld [vmem:[#allocation143_spill] sm:$0xff]  ;;  %v19491_v16 = vld [vmem:[#allocation113_spill] sm:$0xff] }
 0x94e   : > { %11662 = vmatpush3.msra.mxu0 %v7008_v54  ;;  %11675 = vmatprep.subr.mxu1 %v7009_v28  ;;  %v19474_v54 = vld [vmem:[#allocation107_spill] sm:$0xff] }
 0x94f   : > { %11639 = vmatmul.mubr.msk.f32.gmra.mrb[166].mxu0 %vm1098_vm1, %v19459_v15  ;;  %11689 = vmatprep.subr.mxu0 %v7010_v19  ;;  %v19492_v15 = vld [vmem:[#allocation80_spill] sm:$0xff] }
 0x950   : > { %11625 = vmatmul.mubr.msk.f32.gmra.mrb[142].mxu1 %vm1098_vm1, %v19460_v21  ;;  %11641 = vmatprep.mubr.msk.f32.mxu0 %vm1098_vm1, %v19461_v60  ;;  %v19493_v60 = vld [vmem:[#allocation142_spill] sm:$0xff] }
 0x951   : > { %11627 = vmatprep.mubr.msk.f32.mxu1 %vm1098_vm1, %v19462_v13  ;;  %v19494_v13 = vld [vmem:[#allocation138_spill] sm:$0xff] }
 0x953   : > { %11642 = vmatmul.mubr.msk.f32.gmra.mrb[168].mxu0 %vm1098_vm1, %v19463_v42 }
 0x954   : > { %11628 = vmatmul.mubr.msk.f32.gmra.mrb[144].mxu1 %vm1098_vm1, %v19464_v3  ;;  %11644 = vmatprep.mubr.msk.f32.mxu0 %vm1098_vm1, %v19465_v23  ;;  %v19495_v3 = vld [vmem:[#allocation88_spill] sm:$0xff] }
 0x955   : > { %11630 = vmatprep.mubr.msk.f32.mxu1 %vm1098_vm1, %v19466_v14  ;;  %v19496_v14 = vld [vmem:[#allocation147_spill] sm:$0xff] }
 0x957   : > { %11645 = vmatmul.mubr.msk.f32.gmra.mrb[170].mxu0 %vm1098_vm1, %v19467_v52  ;;  %v19497_v52 = vld [vmem:[#allocation20_spill] sm:$0xff] }
 0x958   : > { %11631 = vmatmul.mubr.msk.f32.gmra.mrb[146].mxu1 %vm1098_vm1, %v19468_v36  ;;  %11663 = vmatprep.mubr.msk.f32.mxu0 %vm1098_vm1, %v19469_v46  ;;  %v19498_v46 = vld [vmem:[#allocation98_spill] sm:$0xff] }
 0x959   : > { %11649 = vmatprep.mubr.msk.f32.mxu1 %vm1098_vm1, %v19470_v6 }
 0x95b   : > { %11664 = vmatmul.mubr.msk.f32.vlgmr.msra.gmra.mrb[172].mxu0 %vm1098_vm1, %v19471_v17  ;;  %v19499_v17 = vld [vmem:[#allocation21_spill] sm:$0xff] }
 0x95c   : > { %11650 = vmatmul.mubr.msk.f32.vlgmr.msra.gmra.mrb[148].mxu1 %vm1098_vm1, %v19472_v26  ;;  %11666 = vmatprep.mubr.msk.f32.mxu0 %vm1098_vm1, %v19473_v0  ;;  %v7016_v26 = vld [vmem:[#allocation7 + $0x68] sm:$0xff]  ;;  %v19500_v0 = vld [vmem:[#allocation112_spill] sm:$0xff] }
 0x95d   : > { %11652 = vmatprep.mubr.msk.f32.mxu1 %vm1098_vm1, %v19474_v54  ;;  %11676 = vmatpush3.msra.mxu1 %v7009_v28  ;;  %v7014_v28 = vld [vmem:[#allocation7 + $0x58] sm:$0xff] }
 0x95e   : > { %11690 = vmatpush3.msra.mxu0 %v7010_v19  ;;  %11703 = vmatprep.subr.mxu1 %v7011_v63 }
 0x95f   : > { %11667 = vmatmul.mubr.msk.f32.gmra.mrb[174].mxu0 %vm1098_vm1, %v19475_v43  ;;  %11717 = vmatprep.subr.mxu0 %v7012_v31 }
 0x960   : > { %11653 = vmatmul.mubr.msk.f32.gmra.mrb[150].mxu1 %vm1098_vm1, %v19476_v9  ;;  %11669 = vmatprep.mubr.msk.f32.mxu0 %vm1098_vm1, %v19477_v58 }
 0x961   : > { %11655 = vmatprep.mubr.msk.f32.mxu1 %vm1098_vm1, %v19478_v56 }
 0x963   : > { %11670 = vmatmul.mubr.msk.f32.gmra.mrb[176].mxu0 %vm1098_vm1, %v19479_v25 }
 0x964   : > { %11656 = vmatmul.mubr.msk.f32.gmra.mrb[152].mxu1 %vm1098_vm1, %v19480_v57  ;;  %11672 = vmatprep.mubr.msk.f32.mxu0 %vm1098_vm1, %v19481_v45 }
 0x965   : > { %11658 = vmatprep.mubr.msk.f32.mxu1 %vm1098_vm1, %v19482_v5 }
 0x967   : > { %11673 = vmatmul.mubr.msk.f32.gmra.mrb[178].mxu0 %vm1098_vm1, %v19483_v10 }
 0x968   : > { %11659 = vmatmul.mubr.msk.f32.gmra.mrb[154].mxu1 %vm1098_vm1, %v19484_v59  ;;  %11691 = vmatprep.mubr.msk.f32.mxu0 %vm1098_vm1, %v17641_v41 }
 0x969   : > { %11677 = vmatprep.mubr.msk.f32.mxu1 %vm1098_vm1, %v17524_v50  ;;  %v19489_v50 = vld [vmem:[#allocation144_spill] sm:$0xff] }
 0x96b   : > { %11692 = vmatmul.mubr.msk.f32.vlgmr.msra.gmra.mrb[180].mxu0 %vm1098_vm1, %v19485_v32 }
 0x96c   : > { %11678 = vmatmul.mubr.msk.f32.vlgmr.msra.gmra.mrb[156].mxu1 %vm1098_vm1, %v19486_v12  ;;  %11694 = vmatprep.mubr.msk.f32.mxu0 %vm1098_vm1, %v19487_v61 }
 0x96d   : > { %11680 = vmatprep.mubr.msk.f32.mxu1 %vm1098_vm1, %v19488_v2  ;;  %11704 = vmatpush3.msra.mxu1 %v7011_v63 }
 0x96e   : > { %11718 = vmatpush3.msra.mxu0 %v7012_v31  ;;  %11731 = vmatprep.subr.mxu1 %v7013_v51  ;;  %v19505_v31 = vld [vmem:[#allocation49_spill] sm:$0xff] }
 0x96f   : > { %v18028_v41 = vpop.f32.mrb[112].mxu1  ;;  %11695 = vmatmul.mubr.msk.f32.gmra.mrb[182].mxu0 %vm1098_vm1, %v19489_v50  ;;  %11745 = vmatprep.subr.mxu0 %v7014_v28 }
 0x970   : > { %11681 = vmatmul.mubr.msk.f32.gmra.mrb[158].mxu1 %vm1098_vm1, %v19490_v24  ;;  %v6577_v19 = vpop.f32.mrb[113].mxu1  ;;  %11697 = vmatprep.mubr.msk.f32.mxu0 %vm1098_vm1, %v19491_v16 }
 0x971   : > { %11683 = vmatprep.mubr.msk.f32.mxu1 %vm1098_vm1, %v19492_v15 }
 0x973   : > { %v11500_v21 = vpop.f32.mrb[114].mxu1  ;;  %11698 = vmatmul.mubr.msk.f32.gmra.mrb[184].mxu0 %vm1098_vm1, %v19493_v60 }
 0x974   : > { %11684 = vmatmul.mubr.msk.f32.gmra.mrb[160].mxu1 %vm1098_vm1, %v19494_v13  ;;  %v6587_v42 = vpop.f32.mrb[115].mxu1  ;;  %11700 = vmatprep.mubr.msk.f32.mxu0 %vm1098_vm1, %v17663_v7  ;;  %v7015_v7 = vld [vmem:[#allocation7 + $0x60] sm:$0xff] }
 0x975   : > { %11686 = vmatprep.mubr.msk.f32.mxu1 %vm1098_vm1, %v19495_v3 }
 0x977   : > { %v11503_v23 = vpop.f32.mrb[116].mxu1  ;;  %11701 = vmatmul.mubr.msk.f32.gmra.mrb[186].mxu0 %vm1098_vm1, %v19496_v14 }
 0x978   : > { %11687 = vmatmul.mubr.msk.f32.gmra.mrb[162].mxu1 %vm1098_vm1, %v19497_v52  ;;  %v6597_v36 = vpop.f32.mrb[117].mxu1  ;;  %11719 = vmatprep.mubr.msk.f32.mxu0 %vm1098_vm1, %v17792_v53  ;;  %v19502_v53 = vld [vmem:[#allocation92_spill] sm:$0xff] }
 0x979   : > { %11705 = vmatprep.mubr.msk.f32.mxu1 %vm1098_vm1, %v19498_v46 }
 0x97b   : > { %v11506_v6 = vpop.f32.mrb[118].mxu1  ;;  %11720 = vmatmul.mubr.msk.f32.vlgmr.msra.gmra.mrb[188].mxu0 %vm1098_vm1, %v17789_v40  ;;  %v19501_v40 = vld [vmem:[#allocation145_spill] sm:$0xff] }
 0x97c   : > { %11706 = vmatmul.mubr.msk.f32.vlgmr.msra.gmra.mrb[164].mxu1 %vm1098_vm1, %v19499_v17  ;;  %v6607_v63 = vpop.f32.mrb[119].mxu1  ;;  %11722 = vmatprep.mubr.msk.f32.mxu0 %vm1098_vm1, %v17802_v55  ;;  %v19503_v55 = vld [vmem:[#allocation140_spill] sm:$0xff] }
 0x97d   : > { %11708 = vmatprep.mubr.msk.f32.mxu1 %vm1098_vm1, %v19500_v0  ;;  %11732 = vmatpush3.msra.mxu1 %v7013_v51 }
 0x97e   : > { %11746 = vmatpush3.msra.mxu0 %v7014_v28  ;;  %11759 = vmatprep.subr.mxu1 %v7015_v7 }
 0x97f   : > { %11723 = vmatmul.mubr.msk.f32.gmra.mrb[190].mxu0 %vm1098_vm1, %v17799_v39  ;;  %11773 = vmatprep.subr.mxu0 %v7016_v26  ;;  %v19504_v39 = vld [vmem:[#allocation101_spill] sm:$0xff] }
 0x980   : > { %11709 = vmatmul.mubr.msk.f32.gmra.mrb[166].mxu1 %vm1098_vm1, %v19501_v40  ;;  %11725 = vmatprep.mubr.msk.f32.mxu0 %vm1098_vm1, %v17812_v20  ;;  %v7018_v20 = vld [vmem:[#allocation7 + $0x78] sm:$0xff] }
 0x981   : > { %11711 = vmatprep.mubr.msk.f32.mxu1 %vm1098_vm1, %v19502_v53 }
 0x983   : > { %11726 = vmatmul.mubr.msk.f32.gmra.mrb[192].mxu0 %vm1098_vm1, %v17809_v18  ;;  %v7017_v18 = vld [vmem:[#allocation7 + $0x70] sm:$0xff] }
 0x984   : > { %11712 = vmatmul.mubr.msk.f32.gmra.mrb[168].mxu1 %vm1098_vm1, %v19503_v55  ;;  %11728 = vmatprep.mubr.msk.f32.mxu0 %vm1098_vm1, %v17821_v35 }
 0x985   : > { %11714 = vmatprep.mubr.msk.f32.mxu1 %vm1098_vm1, %v19504_v39 }
 0x987   : > { %11729 = vmatmul.mubr.msk.f32.gmra.mrb[194].mxu0 %vm1098_vm1, %v17819_v1 }
 0x988   : > { %11715 = vmatmul.mubr.msk.f32.gmra.mrb[170].mxu1 %vm1098_vm1, %v19505_v31  ;;  %11747 = vmatprep.mubr.msk.f32.mxu0 %vm1098_vm1, %v17893_v37 }
 0x989   : > { %11733 = vmatprep.mubr.msk.f32.mxu1 %vm1098_vm1, %v17844_v48 }
 0x98b   : > { %11748 = vmatmul.mubr.msk.f32.vlgmr.msra.gmra.mrb[196].mxu0 %vm1098_vm1, %v17889_v47 }
 0x98c   : > { %11734 = vmatmul.mubr.msk.f32.vlgmr.msra.gmra.mrb[172].mxu1 %vm1098_vm1, %v17841_v49  ;;  %11750 = vmatprep.mubr.msk.f32.mxu0 %vm1098_vm1, %v17898_v38 }
 0x98d   : > { %11736 = vmatprep.mubr.msk.f32.mxu1 %vm1098_vm1, %v17852_v11  ;;  %11760 = vmatpush3.msra.mxu1 %v7015_v7 }
 0x98e   : > { %11774 = vmatpush3.msra.mxu0 %v7016_v26  ;;  %11787 = vmatprep.subr.mxu1 %v7017_v18 }
 0x98f   : > { %11751 = vmatmul.mubr.msk.f32.gmra.mrb[198].mxu0 %vm1098_vm1, %v17896_v62  ;;  %11801 = vmatprep.subr.mxu0 %v7018_v20 }
 0x990   : > { %11737 = vmatmul.mubr.msk.f32.gmra.mrb[174].mxu1 %vm1098_vm1, %v17849_v22  ;;  %11753 = vmatprep.mubr.msk.f32.mxu0 %vm1098_vm1, %v17905_v34 }
 0x991   : > { %11739 = vmatprep.mubr.msk.f32.mxu1 %vm1098_vm1, %v17860_v27 }
 0x993   : > { %11754 = vmatmul.mubr.msk.f32.gmra.mrb[200].mxu0 %vm1098_vm1, %v17902_v4 }
 0x994   : > { %11740 = vmatmul.mubr.msk.f32.gmra.mrb[176].mxu1 %vm1098_vm1, %v17857_v30  ;;  %11756 = vmatprep.mubr.msk.f32.mxu0 %vm1098_vm1, %v17916_v29 }
 0x995   : > { %11742 = vmatprep.mubr.msk.f32.mxu1 %vm1098_vm1, %v17865_v33 }
 0x997   : > { %11757 = vmatmul.mubr.msk.f32.gmra.mrb[202].mxu0 %vm1098_vm1, %v17913_v8 }
 0x998   : > { %11743 = vmatmul.mubr.msk.f32.gmra.mrb[178].mxu1 %vm1098_vm1, %v17863_v44 }
 0x999   : > { %11761 = vmatprep.mubr.msk.f32.mxu1 %vm1098_vm1, %v6577_v19 }
 0x99c   : > { %11762 = vmatmul.mubr.msk.f32.vlgmr.msra.gmra.mrb[180].mxu1 %vm1098_vm1, %v18028_v41 }
 0x99d   : > { %11764 = vmatprep.mubr.msk.f32.mxu1 %vm1098_vm1, %v6587_v42  ;;  %11788 = vmatpush3.msra.mxu1 %v7017_v18 }
 0x9a0   : > { %11765 = vmatmul.mubr.msk.f32.gmra.mrb[182].mxu1 %vm1098_vm1, %v11500_v21 }
 0x9a1   : > { %11767 = vmatprep.mubr.msk.f32.mxu1 %vm1098_vm1, %v6597_v36 }
 0x9a4   : > { %11768 = vmatmul.mubr.msk.f32.gmra.mrb[184].mxu1 %vm1098_vm1, %v11503_v23 }
 0x9a5   : > { %11770 = vmatprep.mubr.msk.f32.mxu1 %vm1098_vm1, %v6607_v63 }
 0x9a8   : > { %11771 = vmatmul.mubr.msk.f32.gmra.mrb[186].mxu1 %vm1098_vm1, %v11506_v6 }
 0x9b4   : > { %v11525_v1 = vpop.f32.mrb[144].mxu0 }
 0x9b5   : > { %v6706_v35 = vpop.f32.mrb[145].mxu0 }
 0x9b6   : > { %11775 = vmatprep.mubr.msk.f32.mxu0 %vm1098_vm1, %v6706_v35 }
 0x9b7   : > { %11776 = vmatmul.mubr.msk.f32.vlgmr.msra.gmra.mrb[204].mxu0 %vm1098_vm1, %v11525_v1 }
 0x9b8   : > { %v11528_v49 = vpop.f32.mrb[146].mxu0  ;;  %11802 = vmatpush3.msra.mxu0 %v7018_v20 }
 0x9b9   : > { %v6716_v48 = vpop.f32.mrb[147].mxu0 }
 0x9ba   : > { %11778 = vmatprep.mubr.msk.f32.mxu0 %vm1098_vm1, %v6716_v48 }
 0x9bb   : > { %11779 = vmatmul.mubr.msk.f32.gmra.mrb[206].mxu0 %vm1098_vm1, %v11528_v49 }
 0x9bc   : > { %v11531_v22 = vpop.f32.mrb[148].mxu0 }
 0x9bd   : > { %v6726_v11 = vpop.f32.mrb[149].mxu0 }
 0x9be   : > { %11781 = vmatprep.mubr.msk.f32.mxu0 %vm1098_vm1, %v6726_v11 }
 0x9bf   : > { %11782 = vmatmul.mubr.msk.f32.gmra.mrb[208].mxu0 %vm1098_vm1, %v11531_v22 }
 0x9c0   : > { %v11534_v30 = vpop.f32.mrb[150].mxu0 }
 0x9c1   : > { %v6736_v27 = vpop.f32.mrb[151].mxu0 }
 0x9c2   : > { %11784 = vmatprep.mubr.msk.f32.mxu0 %vm1098_vm1, %v6736_v27 }
 0x9c3   : > { %11785 = vmatmul.mubr.msk.f32.gmra.mrb[210].mxu0 %vm1098_vm1, %v11534_v30 }
 0x9f1   : > { %v11553_v44 = vpop.f32.mrb[120].mxu1 }
 0x9f2   : > { %v6835_v33 = vpop.f32.mrb[121].mxu1 }
 0x9f3   : > { %11789 = vmatprep.mubr.msk.f32.mxu1 %vm1098_vm1, %v6835_v33 }
 0x9f4   : > { %11790 = vmatmul.mubr.msk.f32.vlgmr.msra.gmra.mrb[188].mxu1 %vm1098_vm1, %v11553_v44 }
 0x9f5   : > { %v11556_v47 = vpop.f32.mrb[122].mxu1 }
 0x9f6   : > { %v6845_v37 = vpop.f32.mrb[123].mxu1 }
 0x9f7   : > { %11792 = vmatprep.mubr.msk.f32.mxu1 %vm1098_vm1, %v6845_v37 }
 0x9f8   : > { %11793 = vmatmul.mubr.msk.f32.gmra.mrb[190].mxu1 %vm1098_vm1, %v11556_v47 }
 0x9f9   : > { %v11559_v62 = vpop.f32.mrb[124].mxu1 }
 0x9fa   : > { %v6855_v38 = vpop.f32.mrb[125].mxu1 }
 0x9fb   : > { %11795 = vmatprep.mubr.msk.f32.mxu1 %vm1098_vm1, %v6855_v38 }
 0x9fc   : > { %11796 = vmatmul.mubr.msk.f32.gmra.mrb[192].mxu1 %vm1098_vm1, %v11559_v62 }
 0x9fd   : > { %v11562_v4 = vpop.f32.mrb[126].mxu1 }
 0x9fe   : > { %v6865_v34 = vpop.f32.mrb[127].mxu1 }
 0x9ff   : > { %11798 = vmatprep.mubr.msk.f32.mxu1 %vm1098_vm1, %v6865_v34 }
 0xa00   : > { %11799 = vmatmul.mubr.msk.f32.gmra.mrb[194].mxu1 %vm1098_vm1, %v11562_v4 }
 0xa06   : > { %v11581_v8 = vpop.f32.mrb[152].mxu0 }
 0xa07   : > { %v11587_v29 = vpop.f32.mrb[128].mxu1  ;;  %v6964_v54 = vpop.f32.mrb[153].mxu0 }
 0xa08   : > { %v6984_v43 = vpop.f32.mrb[129].mxu1  ;;  %11803 = vmatprep.mubr.msk.f32.mxu0 %vm1098_vm1, %v6964_v54 }
 0xa09   : > { %11804 = vmatmul.mubr.msk.f32.vlgmr.msra.gmra.mrb[212].mxu0 %vm1098_vm1, %v11581_v8 }
 0xa0a   : > { %v11584_v9 = vpop.f32.mrb[154].mxu0 }
 0xa0b   : > { %v11590_v58 = vpop.f32.mrb[130].mxu1  ;;  %v6974_v56 = vpop.f32.mrb[155].mxu0 }
 0xa0c   : > { %v6994_v25 = vpop.f32.mrb[131].mxu1  ;;  %11806 = vmatprep.mubr.msk.f32.mxu0 %vm1098_vm1, %v6974_v56 }
 0xa0d   : > { %11807 = vmatmul.mubr.msk.f32.gmra.mrb[214].mxu0 %vm1098_vm1, %v11584_v9 }
 0xa0e   : > { %v11609_v57 = vpop.f32.mrb[156].mxu0  ;;  %11809 = vmatprep.mubr.msk.f32.mxu0 %vm1098_vm1, %v6984_v43 }
 0xa0f   : > { %v11595_v45 = vpop.f32.mrb[132].mxu1  ;;  %v9099_v5 = vsel %vm280_vm0, %v11609_v57, 0.0  ;;  %v7238_v10 = vpop.f32.mrb[157].mxu0 }
 0xa10   : > { %v9098_v59 = vsel %vm280_vm0, %v11595_v45, 0.0  ;;  %v7109_v32 = vpop.f32.mrb[133].mxu1  ;;  %v9084_v51 = vsel %vm280_vm0, %v7238_v10, 0.0 }
 0xa11   : > { %v9100_v12 = vadd.f32 %v9099_v5, %v9098_v59  ;;  %v9083_v61 = vsel %vm280_vm0, %v7109_v32, 0.0  ;;  %11810 = vmatmul.mubr.msk.f32.gmra.mrb[216].mxu0 %vm1098_vm1, %v11587_v29 }
 0xa12   : > { %v9085_v28 = vadd.f32 %v9084_v51, %v9083_v61  ;;  %v11612_v2 = vpop.f32.mrb[158].mxu0  ;;  %11812 = vmatprep.mubr.msk.f32.mxu0 %vm1098_vm1, %v6994_v25 }
 0xa13   : > { %v11598_v41 = vpop.f32.mrb[134].mxu1  ;;  %v9129_v50 = vsel %vm280_vm0, %v11612_v2, 0.0  ;;  %v7248_v24 = vpop.f32.mrb[159].mxu0 }
 0xa14   : > { %v9128_v19 = vsel %vm280_vm0, %v11598_v41, 0.0  ;;  %v7119_v16 = vpop.f32.mrb[135].mxu1  ;;  %v9114_v15 = vsel %vm280_vm0, %v7248_v24, 0.0 }
 0xa15   : > { %v9130_v21 = vadd.f32 %v9129_v50, %v9128_v19  ;;  %v9113_v60 = vsel %vm280_vm0, %v7119_v16, 0.0  ;;  %11813 = vmatmul.mubr.msk.f32.gmra.mrb[218].mxu0 %vm1098_vm1, %v11590_v58 }
 0xa16   : > { %v9115_v13 = vadd.f32 %v9114_v15, %v9113_v60  ;;  %v11615_v42 = vpop.f32.mrb[160].mxu0 }
 0xa17   : > { %v11601_v3 = vpop.f32.mrb[136].mxu1  ;;  %v9159_v23 = vsel %vm280_vm0, %v11615_v42, 0.0  ;;  %v7258_v14 = vpop.f32.mrb[161].mxu0 }
 0xa18   : > { %v9158_v52 = vsel %vm280_vm0, %v11601_v3, 0.0  ;;  %v7129_v36 = vpop.f32.mrb[137].mxu1  ;;  %v9144_v46 = vsel %vm280_vm0, %v7258_v14, 0.0 }
 0xa19   : > { %v9160_v6 = vadd.f32 %v9159_v23, %v9158_v52  ;;  %v9143_v7 = vsel %vm280_vm0, %v7129_v36, 0.0 }
 0xa1a   : > { %v9145_v17 = vadd.f32 %v9144_v46, %v9143_v7  ;;  %v11618_v63 = vpop.f32.mrb[162].mxu0 }
 0xa1b   : > { %v11604_v26 = vpop.f32.mrb[138].mxu1  ;;  %v9189_v0 = vsel %vm280_vm0, %v11618_v63, 0.0  ;;  %v7268_v40 = vpop.f32.mrb[163].mxu0 }
 0xa1c   : > { %v9188_v53 = vsel %vm280_vm0, %v11604_v26, 0.0  ;;  %v7139_v55 = vpop.f32.mrb[139].mxu1  ;;  %v9174_v39 = vsel %vm280_vm0, %v7268_v40, 0.0 }
 0xa1d   : > { %v9190_v31 = vadd.f32 %v9189_v0, %v9188_v53  ;;  %v9173_v18 = vsel %vm280_vm0, %v7139_v55, 0.0 }
 0xa1e   : > { %v9175_v20 = vadd.f32 %v9174_v39, %v9173_v18  ;;  %v11637_v1 = vpop.f32.mrb[164].mxu0 }
 0xa1f   : > { %v11623_v35 = vpop.f32.mrb[140].mxu1  ;;  %v7496_v49 = vpop.f32.mrb[165].mxu0  ;;  %v9103_v27 = vsel %vm280_vm0, %v11637_v1, 0.0 }
 0xa20   : > { %v9101_v48 = vsel %vm280_vm0, %v11623_v35, 0.0  ;;  %v7367_v22 = vpop.f32.mrb[141].mxu1  ;;  %v9088_v37 = vsel %vm280_vm0, %v7496_v49, 0.0 }
 0xa21   : > { %v9102_v11 = vadd.f32 %v9101_v48, %v9100_v12  ;;  %v9086_v30 = vsel %vm280_vm0, %v7367_v22, 0.0 }
 0xa22   : > { %v9087_v44 = vadd.f32 %v9086_v30, %v9085_v28  ;;  %v11640_v33 = vpop.f32.mrb[166].mxu0 }
 0xa23   : > { %v9104_v47 = vadd.f32 %v9103_v27, %v9102_v11  ;;  %v11626_v62 = vpop.f32.mrb[142].mxu1  ;;  %v7506_v38 = vpop.f32.mrb[167].mxu0  ;;  %v9133_v43 = vsel %vm280_vm0, %v11640_v33, 0.0 }
 0xa24   : > { %v9089_v4 = vadd.f32 %v9088_v37, %v9087_v44  ;;  %v9131_v34 = vsel %vm280_vm0, %v11626_v62, 0.0  ;;  %v7377_v8 = vpop.f32.mrb[143].mxu1  ;;  %v9118_v25 = vsel %vm280_vm0, %v7506_v38, 0.0 }
 0xa25   : > { %v9132_v29 = vadd.f32 %v9131_v34, %v9130_v21  ;;  %v9116_v54 = vsel %vm280_vm0, %v7377_v8, 0.0 }
 0xa26   : > { %v9117_v9 = vadd.f32 %v9116_v54, %v9115_v13  ;;  %v11643_v58 = vpop.f32.mrb[168].mxu0 }
 0xa27   : > { %v9134_v56 = vadd.f32 %v9133_v43, %v9132_v29  ;;  %v11629_v57 = vpop.f32.mrb[144].mxu1  ;;  %v7516_v45 = vpop.f32.mrb[169].mxu0  ;;  %v9163_v12 = vsel %vm280_vm0, %v11643_v58, 0.0 }
 0xa28   : > { %v9119_v5 = vadd.f32 %v9118_v25, %v9117_v9  ;;  %v9161_v10 = vsel %vm280_vm0, %v11629_v57, 0.0  ;;  %v7387_v59 = vpop.f32.mrb[145].mxu1  ;;  %v9148_v41 = vsel %vm280_vm0, %v7516_v45, 0.0 }
 0xa29   : > { %v9162_v32 = vadd.f32 %v9161_v10, %v9160_v6  ;;  %v9146_v51 = vsel %vm280_vm0, %v7387_v59, 0.0 }
 0xa2a   : > { %v9147_v61 = vadd.f32 %v9146_v51, %v9145_v17  ;;  %v11646_v28 = vpop.f32.mrb[170].mxu0 }
 0xa2b   : > { %v9164_v2 = vadd.f32 %v9163_v12, %v9162_v32  ;;  %v11632_v50 = vpop.f32.mrb[146].mxu1  ;;  %v7526_v24 = vpop.f32.mrb[171].mxu0  ;;  %v9193_v13 = vsel %vm280_vm0, %v11646_v28, 0.0 }
 0xa2c   : > { %v9149_v19 = vadd.f32 %v9148_v41, %v9147_v61  ;;  %v9191_v16 = vsel %vm280_vm0, %v11632_v50, 0.0  ;;  %v7397_v15 = vpop.f32.mrb[147].mxu1  ;;  %v9178_v14 = vsel %vm280_vm0, %v7526_v24, 0.0 }
 0xa2d   : > { %v9192_v21 = vadd.f32 %v9191_v16, %v9190_v31  ;;  %v9176_v60 = vsel %vm280_vm0, %v7397_v15, 0.0  ;;  %v18201_v15 = vld [vmem:[%s18386_s3] ss:$0 sm:$0xff] }
 0xa2e   : > { %v9177_v42 = vadd.f32 %v9176_v60, %v9175_v20  ;;  %v11665_v3 = vpop.f32.mrb[172].mxu0 }
 0xa2f   : > { %v9194_v23 = vadd.f32 %v9193_v13, %v9192_v21  ;;  %v11651_v52 = vpop.f32.mrb[148].mxu1  ;;  %v7754_v36 = vpop.f32.mrb[173].mxu0  ;;  %v9107_v26 = vsel %vm280_vm0, %v11665_v3, 0.0 }
 0xa30   : > { %v9179_v46 = vadd.f32 %v9178_v14, %v9177_v42  ;;  %v9105_v6 = vsel %vm280_vm0, %v11651_v52, 0.0  ;;  %v7625_v7 = vpop.f32.mrb[149].mxu1  ;;  %v9092_v55 = vsel %vm280_vm0, %v7754_v36, 0.0 }
 0xa31   : > { %v9106_v17 = vadd.f32 %v9105_v6, %v9104_v47  ;;  %v9090_v63 = vsel %vm280_vm0, %v7625_v7, 0.0 }
 0xa32   : > { %v9091_v0 = vadd.f32 %v9090_v63, %v9089_v4  ;;  %v11668_v40 = vpop.f32.mrb[174].mxu0 }
 0xa33   : > { %v9108_v53 = vadd.f32 %v9107_v26, %v9106_v17  ;;  %v11654_v39 = vpop.f32.mrb[150].mxu1  ;;  %v7764_v31 = vpop.f32.mrb[175].mxu0  ;;  %v9137_v48 = vsel %vm280_vm0, %v11668_v40, 0.0 }
 0xa34   : > { %v9093_v18 = vadd.f32 %v9092_v55, %v9091_v0  ;;  %v9135_v20 = vsel %vm280_vm0, %v11654_v39, 0.0  ;;  %v7635_v1 = vpop.f32.mrb[151].mxu1  ;;  %v9122_v27 = vsel %vm280_vm0, %v7764_v31, 0.0 }
 0xa35   : > { %v9136_v35 = vadd.f32 %v9135_v20, %v9134_v56  ;;  %v9120_v49 = vsel %vm280_vm0, %v7635_v1, 0.0 }
 0xa36   : > { %v9121_v22 = vadd.f32 %v9120_v49, %v9119_v5  ;;  %v11671_v11 = vpop.f32.mrb[176].mxu0 }
 0xa37   : > { %v9138_v30 = vadd.f32 %v9137_v48, %v9136_v35  ;;  %v11657_v44 = vpop.f32.mrb[152].mxu1  ;;  %v7774_v33 = vpop.f32.mrb[177].mxu0  ;;  %v9167_v34 = vsel %vm280_vm0, %v11671_v11, 0.0 }
 0xa38   : > { %v9123_v47 = vadd.f32 %v9122_v27, %v9121_v22  ;;  %v9165_v37 = vsel %vm280_vm0, %v11657_v44, 0.0  ;;  %v7645_v62 = vpop.f32.mrb[153].mxu1  ;;  %v9152_v43 = vsel %vm280_vm0, %v7774_v33, 0.0 }
 0xa39   : > { %v9166_v38 = vadd.f32 %v9165_v37, %v9164_v2  ;;  %v9150_v4 = vsel %vm280_vm0, %v7645_v62, 0.0 }
 0xa3a   : > { %v9151_v8 = vadd.f32 %v9150_v4, %v9149_v19  ;;  %v11674_v29 = vpop.f32.mrb[178].mxu0 }
 0xa3b   : > { %v9168_v54 = vadd.f32 %v9167_v34, %v9166_v38  ;;  %v11660_v9 = vpop.f32.mrb[154].mxu1  ;;  %v7784_v58 = vpop.f32.mrb[179].mxu0  ;;  %v9197_v10 = vsel %vm280_vm0, %v11674_v29, 0.0 }
 0xa3c   : > { %v9153_v56 = vadd.f32 %v9152_v43, %v9151_v8  ;;  %v9195_v25 = vsel %vm280_vm0, %v11660_v9, 0.0  ;;  %v7655_v57 = vpop.f32.mrb[155].mxu1  ;;  %v9182_v12 = vsel %vm280_vm0, %v7784_v58, 0.0 }
 0xa3d   : > { %v9196_v45 = vadd.f32 %v9195_v25, %v9194_v23  ;;  %v9180_v5 = vsel %vm280_vm0, %v7655_v57, 0.0 }
 0xa3e   : > { %v9181_v59 = vadd.f32 %v9180_v5, %v9179_v46  ;;  %v11693_v32 = vpop.f32.mrb[180].mxu0 }
 0xa3f   : > { %v9198_v51 = vadd.f32 %v9197_v10, %v9196_v45  ;;  %v11679_v61 = vpop.f32.mrb[156].mxu1  ;;  %v8012_v28 = vpop.f32.mrb[181].mxu0  ;;  %v9111_v16 = vsel %vm280_vm0, %v11693_v32, 0.0 }
 0xa40   : > { %v9183_v2 = vadd.f32 %v9182_v12, %v9181_v59  ;;  %v9109_v41 = vsel %vm280_vm0, %v11679_v61, 0.0  ;;  %v7883_v50 = vpop.f32.mrb[157].mxu1  ;;  %v9096_v42 = vsel %vm280_vm0, %v8012_v28, 0.0 }
 0xa41   : > { %v9110_v24 = vadd.f32 %v9109_v41, %v9108_v53  ;;  %v9094_v19 = vsel %vm280_vm0, %v7883_v50, 0.0 }
 0xa42   : > { %v9095_v21 = vadd.f32 %v9094_v19, %v9093_v18  ;;  %v11696_v60 = vpop.f32.mrb[182].mxu0 }
 0xa43   : > { %v9112_v13 = vadd.f32 %v9111_v16, %v9110_v24  ;;  %v11682_v3 = vpop.f32.mrb[158].mxu1  ;;  %v8022_v23 = vpop.f32.mrb[183].mxu0  ;;  %v9141_v63 = vsel %vm280_vm0, %v11696_v60, 0.0 }
 0xa44   : > { %v9097_v14 = vadd.f32 %v9096_v42, %v9095_v21  ;;  %v9139_v52 = vsel %vm280_vm0, %v11682_v3, 0.0  ;;  %v7893_v36 = vpop.f32.mrb[159].mxu1  ;;  %v9126_v53 = vsel %vm280_vm0, %v8022_v23, 0.0 }
 0xa45   : > { %v9211_v46 = vadd.f32 %v18201_v15, %v9112_v13  ;;  %v9140_v6 = vadd.f32 %v9139_v52, %v9138_v30  ;;  %v9124_v7 = vsel %vm280_vm0, %v7893_v36, 0.0 }
 0xa46   : > { %v9210_v17 = vadd.f32 %v18201_v15, %v9097_v14  ;;  %v9125_v26 = vadd.f32 %v9124_v7, %v9123_v47  ;;  %v11699_v0 = vpop.f32.mrb[184].mxu0 }
 0xa47   : > { %9219 = vst.msk [vmem:[%s18211_s29 + $0x8] sm:$0xff] %vm280_vm0, %v9211_v46  ;;  %v9142_v40 = vadd.f32 %v9141_v63, %v9140_v6  ;;  %v11685_v55 = vpop.f32.mrb[160].mxu1  ;;  %v8032_v39 = vpop.f32.mrb[185].mxu0  ;;  %v9171_v22 = vsel %vm280_vm0, %v11699_v0, 0.0 }
 0xa48   : > { %9218 = vst.msk [vmem:[%s18211_s29] sm:$0xff] %vm280_vm0, %v9210_v17  ;;  %v9127_v31 = vadd.f32 %v9126_v53, %v9125_v26  ;;  %v9169_v18 = vsel %vm280_vm0, %v11685_v55, 0.0  ;;  %v7903_v20 = vpop.f32.mrb[161].mxu1  ;;  %v9156_v44 = vsel %vm280_vm0, %v8032_v39, 0.0 }
 0xa49   : > { %v9213_v1 = vadd.f32 %v18201_v15, %v9142_v40  ;;  %v9170_v35 = vadd.f32 %v9169_v18, %v9168_v54  ;;  %v9154_v49 = vsel %vm280_vm0, %v7903_v20, 0.0 }
 0xa4a   : > { %v9212_v48 = vadd.f32 %v18201_v15, %v9127_v31  ;;  %v9155_v11 = vadd.f32 %v9154_v49, %v9153_v56  ;;  %v11702_v30 = vpop.f32.mrb[186].mxu0 }
 0xa4b   : > { %9221 = vst.msk [vmem:[%s18211_s29 + $0x18] sm:$0xff] %vm280_vm0, %v9213_v1  ;;  %v9172_v27 = vadd.f32 %v9171_v22, %v9170_v35  ;;  %v11688_v33 = vpop.f32.mrb[162].mxu1  ;;  %v8042_v47 = vpop.f32.mrb[187].mxu0  ;;  %v9201_v54 = vsel %vm280_vm0, %v11702_v30, 0.0 }
 0xa4c   : > { %9220 = vst.msk [vmem:[%s18211_s29 + $0x10] sm:$0xff] %vm280_vm0, %v9212_v48  ;;  %v9157_v37 = vadd.f32 %v9156_v44, %v9155_v11  ;;  %v9199_v62 = vsel %vm280_vm0, %v11688_v33, 0.0  ;;  %v7913_v38 = vpop.f32.mrb[163].mxu1  ;;  %v9186_v56 = vsel %vm280_vm0, %v8042_v47, 0.0 }
 0xa4d   : > { %v9215_v4 = vadd.f32 %v18201_v15, %v9172_v27  ;;  %v9200_v34 = vadd.f32 %v9199_v62, %v9198_v51  ;;  %v9184_v8 = vsel %vm280_vm0, %v7913_v38, 0.0 }
 0xa4e   : > { %v9214_v29 = vadd.f32 %v18201_v15, %v9157_v37  ;;  %v9185_v43 = vadd.f32 %v9184_v8, %v9183_v2  ;;  %v11721_v9 = vpop.f32.mrb[188].mxu0 }
 0xa4f   : > { %9223 = vst.msk [vmem:[%s18211_s29 + $0x28] sm:$0xff] %vm280_vm0, %v9215_v4  ;;  %v9202_v58 = vadd.f32 %v9201_v54, %v9200_v34  ;;  %v11707_v25 = vpop.f32.mrb[164].mxu1  ;;  %v9242_v57 = vsel %vm280_vm0, %v11721_v9, 0.0  ;;  %v8270_v45 = vpop.f32.mrb[189].mxu0 }
 0xa50   : > { %9222 = vst.msk [vmem:[%s18211_s29 + $0x20] sm:$0xff] %vm280_vm0, %v9214_v29  ;;  %v9187_v5 = vadd.f32 %v9186_v56, %v9185_v43  ;;  %v9241_v10 = vsel %vm280_vm0, %v11707_v25, 0.0  ;;  %v8141_v59 = vpop.f32.mrb[165].mxu1  ;;  %v9227_v32 = vsel %vm280_vm0, %v8270_v45, 0.0 }
 0xa51   : > { %v9217_v51 = vadd.f32 %v18201_v15, %v9202_v58  ;;  %v9243_v12 = vadd.f32 %v9242_v57, %v9241_v10  ;;  %v9226_v61 = vsel %vm280_vm0, %v8141_v59, 0.0 }
 0xa52   : > { %v9216_v28 = vadd.f32 %v18201_v15, %v9187_v5  ;;  %v9228_v2 = vadd.f32 %v9227_v32, %v9226_v61  ;;  %v11724_v41 = vpop.f32.mrb[190].mxu0 }
 0xa53   : > { %9225 = vst.msk [vmem:[%s18211_s29 + $0x38] sm:$0xff] %vm280_vm0, %v9217_v51  ;;  %v11710_v50 = vpop.f32.mrb[166].mxu1  ;;  %v9272_v24 = vsel %vm280_vm0, %v11724_v41, 0.0  ;;  %v8280_v19 = vpop.f32.mrb[191].mxu0 }
 0xa54   : > { %9224 = vst.msk [vmem:[%s18211_s29 + $0x30] sm:$0xff] %vm280_vm0, %v9216_v28  ;;  %v9271_v16 = vsel %vm280_vm0, %v11710_v50, 0.0  ;;  %v8151_v21 = vpop.f32.mrb[167].mxu1  ;;  %v9257_v60 = vsel %vm280_vm0, %v8280_v19, 0.0 }
 0xa55   : > { %v9273_v13 = vadd.f32 %v9272_v24, %v9271_v16  ;;  %v9256_v42 = vsel %vm280_vm0, %v8151_v21, 0.0 }
 0xa56   : > { %v9258_v3 = vadd.f32 %v9257_v60, %v9256_v42  ;;  %v11727_v23 = vpop.f32.mrb[192].mxu0 }
 0xa57   : > { %v11713_v14 = vpop.f32.mrb[168].mxu1  ;;  %v9302_v52 = vsel %vm280_vm0, %v11727_v23, 0.0  ;;  %v8290_v36 = vpop.f32.mrb[193].mxu0 }
 0xa58   : > { %v9301_v46 = vsel %vm280_vm0, %v11713_v14, 0.0  ;;  %v8161_v6 = vpop.f32.mrb[169].mxu1  ;;  %v9287_v7 = vsel %vm280_vm0, %v8290_v36, 0.0 }
 0xa59   : > { %v9303_v17 = vadd.f32 %v9302_v52, %v9301_v46  ;;  %v9286_v63 = vsel %vm280_vm0, %v8161_v6, 0.0 }
 0xa5a   : > { %v9288_v26 = vadd.f32 %v9287_v7, %v9286_v63  ;;  %v11730_v0 = vpop.f32.mrb[194].mxu0 }
 0xa5b   : > { %v11716_v40 = vpop.f32.mrb[170].mxu1  ;;  %v9332_v53 = vsel %vm280_vm0, %v11730_v0, 0.0  ;;  %v8300_v55 = vpop.f32.mrb[195].mxu0 }
 0xa5c   : > { %v9331_v39 = vsel %vm280_vm0, %v11716_v40, 0.0  ;;  %v8171_v31 = vpop.f32.mrb[171].mxu1  ;;  %v9317_v18 = vsel %vm280_vm0, %v8300_v55, 0.0 }
 0xa5d   : > { %v9333_v20 = vadd.f32 %v9332_v53, %v9331_v39  ;;  %v9316_v1 = vsel %vm280_vm0, %v8171_v31, 0.0 }
 0xa5e   : > { %v9318_v35 = vadd.f32 %v9317_v18, %v9316_v1  ;;  %v11749_v49 = vpop.f32.mrb[196].mxu0 }
 0xa5f   : > { %v11735_v48 = vpop.f32.mrb[172].mxu1  ;;  %v8528_v22 = vpop.f32.mrb[197].mxu0  ;;  %v9246_v33 = vsel %vm280_vm0, %v11749_v49, 0.0 }
 0xa60   : > { %v9244_v11 = vsel %vm280_vm0, %v11735_v48, 0.0  ;;  %v8399_v30 = vpop.f32.mrb[173].mxu1  ;;  %v9231_v38 = vsel %vm280_vm0, %v8528_v22, 0.0 }
 0xa61   : > { %v9245_v27 = vadd.f32 %v9244_v11, %v9243_v12  ;;  %v9229_v44 = vsel %vm280_vm0, %v8399_v30, 0.0 }
 0xa62   : > { %v9230_v47 = vadd.f32 %v9229_v44, %v9228_v2  ;;  %v11752_v37 = vpop.f32.mrb[198].mxu0 }
 0xa63   : > { %v9247_v62 = vadd.f32 %v9246_v33, %v9245_v27  ;;  %v11738_v4 = vpop.f32.mrb[174].mxu1  ;;  %v8538_v34 = vpop.f32.mrb[199].mxu0  ;;  %v9276_v58 = vsel %vm280_vm0, %v11752_v37, 0.0 }
 0xa64   : > { %v9232_v8 = vadd.f32 %v9231_v38, %v9230_v47  ;;  %v9274_v29 = vsel %vm280_vm0, %v11738_v4, 0.0  ;;  %v8409_v54 = vpop.f32.mrb[175].mxu1  ;;  %v9261_v45 = vsel %vm280_vm0, %v8538_v34, 0.0 }
 0xa65   : > { %v9275_v43 = vadd.f32 %v9274_v29, %v9273_v13  ;;  %v9259_v9 = vsel %vm280_vm0, %v8409_v54, 0.0 }
 0xa66   : > { %v9260_v56 = vadd.f32 %v9259_v9, %v9258_v3  ;;  %v11755_v25 = vpop.f32.mrb[200].mxu0 }
 0xa67   : > { %v9277_v57 = vadd.f32 %v9276_v58, %v9275_v43  ;;  %v11741_v5 = vpop.f32.mrb[176].mxu1  ;;  %v8548_v10 = vpop.f32.mrb[201].mxu0  ;;  %v9306_v28 = vsel %vm280_vm0, %v11755_v25, 0.0 }
 0xa68   : > { %v9262_v59 = vadd.f32 %v9261_v45, %v9260_v56  ;;  %v9304_v32 = vsel %vm280_vm0, %v11741_v5, 0.0  ;;  %v8419_v51 = vpop.f32.mrb[177].mxu1  ;;  %v9291_v24 = vsel %vm280_vm0, %v8548_v10, 0.0 }
 0xa69   : > { %v9305_v12 = vadd.f32 %v9304_v32, %v9303_v17  ;;  %v9289_v61 = vsel %vm280_vm0, %v8419_v51, 0.0 }
 0xa6a   : > { %v9290_v2 = vadd.f32 %v9289_v61, %v9288_v26  ;;  %v11758_v41 = vpop.f32.mrb[202].mxu0 }
 0xa6b   : > { %v9307_v50 = vadd.f32 %v9306_v28, %v9305_v12  ;;  %v11744_v19 = vpop.f32.mrb[178].mxu1  ;;  %v8558_v16 = vpop.f32.mrb[203].mxu0  ;;  %v9336_v23 = vsel %vm280_vm0, %v11758_v41, 0.0 }
 0xa6c   : > { %v9292_v21 = vadd.f32 %v9291_v24, %v9290_v2  ;;  %v9334_v60 = vsel %vm280_vm0, %v11744_v19, 0.0  ;;  %v8429_v13 = vpop.f32.mrb[179].mxu1  ;;  %v9321_v36 = vsel %vm280_vm0, %v8558_v16, 0.0 }
 0xa6d   : > { %v9335_v42 = vadd.f32 %v9334_v60, %v9333_v20  ;;  %v9319_v3 = vsel %vm280_vm0, %v8429_v13, 0.0 }
 0xa6e   : > { %v9320_v14 = vadd.f32 %v9319_v3, %v9318_v35 }
 0xa6f   : > { %v9337_v52 = vadd.f32 %v9336_v23, %v9335_v42  ;;  %v11763_v46 = vpop.f32.mrb[180].mxu1 }
 0xa70   : > { %v9322_v6 = vadd.f32 %v9321_v36, %v9320_v14  ;;  %v9248_v7 = vsel %vm280_vm0, %v11763_v46, 0.0  ;;  %v8657_v17 = vpop.f32.mrb[181].mxu1 }
 0xa71   : > { %v9249_v63 = vadd.f32 %v9248_v7, %v9247_v62  ;;  %v9233_v26 = vsel %vm280_vm0, %v8657_v17, 0.0 }
 0xa72   : > { %v9234_v0 = vadd.f32 %v9233_v26, %v9232_v8 }
 0xa73   : > { %v11766_v40 = vpop.f32.mrb[182].mxu1 }
 0xa74   : > { %v9278_v53 = vsel %vm280_vm0, %v11766_v40, 0.0  ;;  %v8667_v55 = vpop.f32.mrb[183].mxu1 }
 0xa75   : > { %v9279_v39 = vadd.f32 %v9278_v53, %v9277_v57  ;;  %v9263_v31 = vsel %vm280_vm0, %v8667_v55, 0.0 }
 0xa76   : > { %v9264_v18 = vadd.f32 %v9263_v31, %v9262_v59 }
 0xa77   : > { %v11769_v20 = vpop.f32.mrb[184].mxu1 }
 0xa78   : > { %v9308_v1 = vsel %vm280_vm0, %v11769_v20, 0.0  ;;  %v8677_v35 = vpop.f32.mrb[185].mxu1 }
 0xa79   : > { %v9309_v49 = vadd.f32 %v9308_v1, %v9307_v50  ;;  %v9293_v48 = vsel %vm280_vm0, %v8677_v35, 0.0 }
 0xa7a   : > { %v9294_v22 = vadd.f32 %v9293_v48, %v9292_v21 }
 0xa7b   : > { %v11772_v11 = vpop.f32.mrb[186].mxu1 }
 0xa7c   : > { %v9338_v30 = vsel %vm280_vm0, %v11772_v11, 0.0  ;;  %v8687_v27 = vpop.f32.mrb[187].mxu1 }
 0xa7d   : > { %v9339_v44 = vadd.f32 %v9338_v30, %v9337_v52  ;;  %v9323_v33 = vsel %vm280_vm0, %v8687_v27, 0.0 }
 0xa7e   : > { %v9324_v47 = vadd.f32 %v9323_v33, %v9322_v6 }
 0xa8a   : > { %v11777_v37 = vpop.f32.mrb[204].mxu0 }
 0xa8b   : > { %v9250_v62 = vsel %vm280_vm0, %v11777_v37, 0.0  ;;  %v8786_v38 = vpop.f32.mrb[205].mxu0 }
 0xa8c   : > { %v9251_v4 = vadd.f32 %v9250_v62, %v9249_v63  ;;  %v9235_v34 = vsel %vm280_vm0, %v8786_v38, 0.0 }
 0xa8d   : > { %v9236_v8 = vadd.f32 %v9235_v34, %v9234_v0 }
 0xa8e   : > { %v11780_v29 = vpop.f32.mrb[206].mxu0 }
 0xa8f   : > { %v9280_v54 = vsel %vm280_vm0, %v11780_v29, 0.0  ;;  %v8796_v43 = vpop.f32.mrb[207].mxu0 }
 0xa90   : > { %v9281_v9 = vadd.f32 %v9280_v54, %v9279_v39  ;;  %v9265_v58 = vsel %vm280_vm0, %v8796_v43, 0.0 }
 0xa91   : > { %v9266_v56 = vadd.f32 %v9265_v58, %v9264_v18 }
 0xa92   : > { %v11783_v25 = vpop.f32.mrb[208].mxu0 }
 0xa93   : > { %v9310_v57 = vsel %vm280_vm0, %v11783_v25, 0.0  ;;  %v8806_v45 = vpop.f32.mrb[209].mxu0 }
 0xa94   : > { %v9311_v5 = vadd.f32 %v9310_v57, %v9309_v49  ;;  %v9295_v10 = vsel %vm280_vm0, %v8806_v45, 0.0 }
 0xa95   : > { %v9296_v59 = vadd.f32 %v9295_v10, %v9294_v22 }
 0xa96   : > { %v11786_v32 = vpop.f32.mrb[210].mxu0 }
 0xa97   : > { %v9340_v51 = vsel %vm280_vm0, %v11786_v32, 0.0  ;;  %v8816_v12 = vpop.f32.mrb[211].mxu0 }
 0xa98   : > { %v9341_v61 = vadd.f32 %v9340_v51, %v9339_v44  ;;  %v9325_v28 = vsel %vm280_vm0, %v8816_v12, 0.0 }
 0xa99   : > { %v9326_v2 = vadd.f32 %v9325_v28, %v9324_v47 }
 0xac7   : > { %v11791_v41 = vpop.f32.mrb[188].mxu1 }
 0xac8   : > { %v9252_v50 = vsel %vm280_vm0, %v11791_v41, 0.0  ;;  %v8915_v24 = vpop.f32.mrb[189].mxu1 }
 0xac9   : > { %v9253_v19 = vadd.f32 %v9252_v50, %v9251_v4  ;;  %v9237_v16 = vsel %vm280_vm0, %v8915_v24, 0.0 }
 0xaca   : > { %v9238_v21 = vadd.f32 %v9237_v16, %v9236_v8 }
 0xacb   : > { %v11794_v60 = vpop.f32.mrb[190].mxu1 }
 0xacc   : > { %v9282_v13 = vsel %vm280_vm0, %v11794_v60, 0.0  ;;  %v8925_v42 = vpop.f32.mrb[191].mxu1 }
 0xacd   : > { %v9283_v3 = vadd.f32 %v9282_v13, %v9281_v9  ;;  %v9267_v23 = vsel %vm280_vm0, %v8925_v42, 0.0 }
 0xace   : > { %v9268_v14 = vadd.f32 %v9267_v23, %v9266_v56 }
 0xacf   : > { %v11797_v52 = vpop.f32.mrb[192].mxu1 }
 0xad0   : > { %v9312_v36 = vsel %vm280_vm0, %v11797_v52, 0.0  ;;  %v8935_v46 = vpop.f32.mrb[193].mxu1 }
 0xad1   : > { %v9313_v6 = vadd.f32 %v9312_v36, %v9311_v5  ;;  %v9297_v7 = vsel %vm280_vm0, %v8935_v46, 0.0 }
 0xad2   : > { %v9298_v17 = vadd.f32 %v9297_v7, %v9296_v59 }
 0xad3   : > { %v11800_v63 = vpop.f32.mrb[194].mxu1 }
 0xad4   : > { %v9342_v26 = vsel %vm280_vm0, %v11800_v63, 0.0  ;;  %v8945_v0 = vpop.f32.mrb[195].mxu1 }
 0xad5   : > { %v9343_v40 = vadd.f32 %v9342_v26, %v9341_v61  ;;  %v9327_v53 = vsel %vm280_vm0, %v8945_v0, 0.0 }
 0xad6   : > { %v9328_v55 = vadd.f32 %v9327_v53, %v9326_v2 }
 0xadc   : > { %v11805_v39 = vpop.f32.mrb[212].mxu0 }
 0xadd   : > { %v9254_v31 = vsel %vm280_vm0, %v11805_v39, 0.0  ;;  %v9044_v18 = vpop.f32.mrb[213].mxu0 }
 0xade   : > { %v9255_v20 = vadd.f32 %v9254_v31, %v9253_v19  ;;  %v9239_v1 = vsel %vm280_vm0, %v9044_v18, 0.0 }
 0xadf   : > { %v9240_v35 = vadd.f32 %v9239_v1, %v9238_v21 }
 0xae0   : > { %v9354_v49 = vadd.f32 %v18201_v15, %v9255_v20  ;;  %v11808_v48 = vpop.f32.mrb[214].mxu0 }
 0xae1   : > { %v9353_v22 = vadd.f32 %v18201_v15, %v9240_v35  ;;  %v9284_v11 = vsel %vm280_vm0, %v11808_v48, 0.0  ;;  %v9054_v30 = vpop.f32.mrb[215].mxu0 }
 0xae2   : > { %10022 = vst.msk [vmem:[%s18211_s29 + $0x48] sm:$0xff] %vm280_vm0, %v9354_v49  ;;  %v9285_v27 = vadd.f32 %v9284_v11, %v9283_v3  ;;  %v9269_v44 = vsel %vm280_vm0, %v9054_v30, 0.0 }
 0xae3   : > { %10021 = vst.msk [vmem:[%s18211_s29 + $0x40] sm:$0xff] %vm280_vm0, %v9353_v22  ;;  %v9270_v33 = vadd.f32 %v9269_v44, %v9268_v14 }
 0xae4   : > { %v9356_v47 = vadd.f32 %v18201_v15, %v9285_v27  ;;  %v11811_v37 = vpop.f32.mrb[216].mxu0 }
 0xae5   : > { %v9355_v62 = vadd.f32 %v18201_v15, %v9270_v33  ;;  %v9314_v38 = vsel %vm280_vm0, %v11811_v37, 0.0  ;;  %v9064_v4 = vpop.f32.mrb[217].mxu0 }
 0xae6   : > { %10024 = vst.msk [vmem:[%s18211_s29 + $0x58] sm:$0xff] %vm280_vm0, %v9356_v47  ;;  %v9315_v34 = vadd.f32 %v9314_v38, %v9313_v6  ;;  %v9299_v8 = vsel %vm280_vm0, %v9064_v4, 0.0 }
 0xae7   : > { %10023 = vst.msk [vmem:[%s18211_s29 + $0x50] sm:$0xff] %vm280_vm0, %v9355_v62  ;;  %v9300_v29 = vadd.f32 %v9299_v8, %v9298_v17 }
 0xae8   : > { %v9358_v54 = vadd.f32 %v18201_v15, %v9315_v34  ;;  %v11814_v43 = vpop.f32.mrb[218].mxu0 }
 0xae9   : > { %v9357_v9 = vadd.f32 %v18201_v15, %v9300_v29  ;;  %v9344_v58 = vsel %vm280_vm0, %v11814_v43, 0.0  ;;  %v9074_v56 = vpop.f32.mrb[219].mxu0 }
 0xaea   : > { %10026 = vst.msk [vmem:[%s18211_s29 + $0x68] sm:$0xff] %vm280_vm0, %v9358_v54  ;;  %v9345_v25 = vadd.f32 %v9344_v58, %v9343_v40  ;;  %v9329_v57 = vsel %vm280_vm0, %v9074_v56, 0.0 }
 0xaeb   : > { %10025 = vst.msk [vmem:[%s18211_s29 + $0x60] sm:$0xff] %vm280_vm0, %v9357_v9  ;;  %v9330_v45 = vadd.f32 %v9329_v57, %v9328_v55 }
 0xaec   : > { %v9360_v5 = vadd.f32 %v18201_v15, %v9345_v25 }
 0xaed   : > { %v9359_v10 = vadd.f32 %v18201_v15, %v9330_v45 }
 0xaee   : > { %10028 = vst.msk [vmem:[%s18211_s29 + $0x78] sm:$0xff] %vm280_vm0, %v9360_v5 }
 0xaef   : > { %10027 = vst.msk [vmem:[%s18211_s29 + $0x70] sm:$0xff] %vm280_vm0, %v9359_v10 }
 0xaf0   : > { %13772 = shalt.err (!%p13769_p2)
}
 0xaf1   : > { %s13773_s30 = scalar_lea.hbm %s18332_s25, 2048  ;;  %s13777_s28 = scalar_lea.hbm %s18387_s4, 4096 }
 0xaf2   : > { %p13774_p13 = scmp.ne.s32.totalorder %s18332_s25, %s13773_s30  ;;  %p13778_p4 = scmp.lt.u32.totalorder %s18332_s25, %s18387_s4 }
 0xaf3   : > { %p13779_p7 = scmp.lt.u32.totalorder %s13777_s28, %s13773_s30  ;;  %p13781_p11 = scmp.lt.u32.totalorder %s13773_s30, %s18332_s25 }
 0xaf4   : > { %p13775_p6 = pnand %p13774_p13, %p19506_p0 }
 0xaf5   : > { %p13780_p8 = por %p13779_p7, %p13778_p4 }
 0xaf6   : > { %p13776_p10 = pneg %p13775_p6 }
 0xaf7   : > { %p13782_p1 = por %p13781_p11, %p13780_p8 }
 0xaf9   : > { %p13783_p3 = pnand %p13782_p1, %p13776_p10 }
 0xafb   : > { %13786 = shalt.err (!%p13783_p3)
}
 0xafc   : > { %s13848_s29 = smov 128   ;;  %s13849_s5 = smov 8  }
 0xafd   : > { %12489 = dma.vmem_to_hbm [thread:$0]  (%p19506_p0), %s18334_s12, 2048, %s18332_s25, %s9371_s19, %s13848_s29, %s13848_s29, %s13849_s5  }
 0xafe PF: > { %s9400_s13 = sand.u32 1, %s13817_s15   ;;  %p19507_p5 = scmp.ne.s32.totalorder %s18675_s22, 0 }
 0xaff   : > { %p19508_p9 = scmp.ge.s32.totalorder %s13829_s18, 2  ;;  %s9401_s24 = scalar_lea.sflag [#allocation4], %s9400_s13 }
 0xb01   : > { %p12503_p12 = pnand %p19508_p9, %p19507_p5 }
 0xb03   : > { %13812 = dma.done.wait (!%p12503_p12), %s9401_s24, 2048  }
 0xb04   : > { %13814 = vsyncadd (!%p12503_p12), %s9401_s24, 4294965248  ;;  %p18_p2 = scmp.ge.s32.totalorder %s13988_s11, 4   ;;  %s19509_s15 = smov %s13821_s16 }
 0xb05   : > { %s19510_s16 = smov %s13825_s17  ;;  %s19511_s17 = smov %s13997_s14 }
 0xb06   : > { %s19512_s18 = smov %s13988_s11  ;;  %20 = sbr.rel (!%p18_p2) target bundleno = 6 (0x6), region = 90 }
 0xb0d   :  { %9406 = vsyncpa [#allocation3], 1 }
 0xb0e   :  { %9408 = vsyncpa [#allocation3 + $0x1], 1 }
 0xb0f   :  { %9409 = vsyncpa [#allocation6], 1 }
 0xb10   :  { %9410 = vsyncpa [#allocation4], 1 }
 0xb11   :  { %9412 = vsyncpa [#allocation4 + $0x1], 1 }

</bundles_post_ra>
